<compile_context>
chip_gen: v6e
topology: v6e:2x2x1
jax: 0.10.0
libtpu: 0.0.40
codegen_flags: <defaults>
</compile_context>

<pallas_src>
import jax
import jax.numpy as jnp
from jax.experimental import pallas as pl
from jax.experimental.pallas import tpu as pltpu

MODULE_KERNEL_SIZE = 3
NUM_MODULES = 2
MODULE_DEPTH = 1
MODULE_FILTERS = 8
FILTER_FACTOR = 1
HIDDEN_SIZE = 32

IN_CHANNELS = 4      # dims[0] from gmaker.grid_dimensions(4)
GRID_DIM = 16        # dims[1] (small stand-in for the molgrid spatial size)
BATCH = 2

K = MODULE_KERNEL_SIZE          # 3
D0 = GRID_DIM                   # 16  spatial size, module 0
D1 = GRID_DIM // 2              # 8   spatial size, module 1 (after MaxPool3d(2))
C0 = IN_CHANNELS                # 4
F0 = MODULE_FILTERS             # 8
LAST_SIZE = D1 ** 3 * F0        # 4096

_VMEM = pl.BlockSpec(memory_space=pltpu.MemorySpace.VMEM)


def _elu(x):
    # F.elu (alpha=1).  Clamp before exp so large positives never hit the EUP
    # (reviewer note); exp(min(x,0))-1 keeps the lowering on guaranteed ops.
    return jnp.where(x > 0, x, jnp.exp(jnp.minimum(x, 0.0)) - 1.0)


# ----------------------------------------------------------------------------
# Kernel A: fused conv0 -> ELU -> MaxPool3d(2) -> conv1 -> ELU, one batch
# element per grid step.  All data is kept as (rows=(d,h), lanes=(w,c)) 2-D
# matrices so every operation is either an MXU matmul or a VPU elementwise op.
# ----------------------------------------------------------------------------
def _features_kernel(x_ref, l0_ref, t0_ref, b0_ref, sw_ref, sr_ref,
                     l1_ref, t1_ref, b1_ref, o_ref):
    x = x_ref[0]                                              # (256, 64)

    # conv0: sum over the 9 (kd,kh) taps of  row_shift @ x @ w_toeplitz
    acc0 = jnp.zeros((D0 * D0, D0 * F0), jnp.float32)         # (256, 128)
    for k in range(K * K):
        shifted = jnp.dot(l0_ref[k], x,
                          preferred_element_type=jnp.float32)  # (256, 64)
        acc0 = acc0 + jnp.dot(shifted, t0_ref[k],
                              preferred_element_type=jnp.float32)
    a0 = _elu(acc0 + b0_ref[...])                             # (256, 128)

    # MaxPool3d(2): w-pairs via lane-selection matmuls, then (d,h) pairs via
    # row-selection matmuls; elementwise maximum in between / after.
    mw = jnp.maximum(
        jnp.dot(a0, sw_ref[0], preferred_element_type=jnp.float32),
        jnp.dot(a0, sw_ref[1], preferred_element_type=jnp.float32))   # (256, 64)
    pooled = jnp.dot(sr_ref[0], mw, preferred_element_type=jnp.float32)
    for q in range(1, 4):
        pooled = jnp.maximum(
            pooled, jnp.dot(sr_ref[q], mw, preferred_element_type=jnp.float32))
    # pooled: (64, 64) = (d*8+h, w*8+c) on the 8^3 grid

    # conv1: same structure as conv0
    acc1 = jnp.zeros((D1 * D1, D1 * F0), jnp.float32)          # (64, 64)
    for k in range(K * K):
        shifted = jnp.dot(l1_ref[k], pooled,
                          preferred_element_type=jnp.float32)
        acc1 = acc1 + jnp.dot(shifted, t1_ref[k],
                              preferred_element_type=jnp.float32)
    a1 = _elu(acc1 + b1_ref[...])                              # (64, 64)
    o_ref[...] = a1.reshape(1, D1 * D1, D1 * F0)


def features_forward(x2d, kp):
    n = x2d.shape[0]
    return pl.pallas_call(
        _features_kernel,
        out_shape=jax.ShapeDtypeStruct((n, D1 * D1, D1 * F0), jnp.float32),
        grid=(n,),
        in_specs=[pl.BlockSpec((1, D0 * D0, D0 * C0), lambda i: (i, 0, 0)),
                  _VMEM, _VMEM, _VMEM, _VMEM, _VMEM, _VMEM, _VMEM, _VMEM],
        out_specs=pl.BlockSpec((1, D1 * D1, D1 * F0), lambda i: (i, 0, 0)),
        compiler_params=pltpu.CompilerParams(
            dimension_semantics=("parallel",)),
    )(x2d, kp["l0"], kp["t0"], kp["b0t"], kp["sw"], kp["sr"],
      kp["l1"], kp["t1"], kp["b1t"])


# ----------------------------------------------------------------------------
# Kernel B: View -> Linear(4096,32) -> ELU -> Linear(32,1)  (Flatten is a no-op
# on an (N,1) result).  The flatten-order permutation is already folded into
# the hidden weight, so the input here is the free row-major reshape of the
# feature kernel's output.
# ----------------------------------------------------------------------------
def _head_kernel(x_ref, wh_ref, bh_ref, wf_ref, bf_ref, o_ref):
    h = jnp.dot(x_ref[...], wh_ref[...], preferred_element_type=jnp.float32)
    h = _elu(h + bh_ref[...])
    o_ref[...] = (jnp.dot(h, wf_ref[...], preferred_element_type=jnp.float32)
                  + bf_ref[...]).astype(o_ref.dtype)


def head_forward(x_flat, kp):
    n = x_flat.shape[0]
    return pl.pallas_call(
        _head_kernel,
        out_shape=jax.ShapeDtypeStruct((n, 1), jnp.float32),
        in_specs=[_VMEM] * 5,
        out_specs=_VMEM,
    )(x_flat, kp["whp"], kp["bht"], kp["wft"], kp["bft"])


# ----------------------------------------------------------------------------
# One-time construction of the kernel-ready constants.
# ----------------------------------------------------------------------------
def _shift_matrices(s):
    # (9, s*s, s*s): [kd*3+kh][d*s+h, d2*s+h2] = 1 iff d2=d+kd-1, h2=h+kh-1 in
    # range (out-of-range rows become all-zero => implicit zero padding).
    r = jnp.arange(s * s)
    d, h = r // s, r % s
    cols = jnp.arange(s * s)[None, :]
    mats = []
    for kd in range(K):
        for kh in range(K):
            d2, h2 = d + kd - 1, h + kh - 1
            valid = (d2 >= 0) & (d2 < s) & (h2 >= 0) & (h2 < s)
            col = jnp.where(valid, d2 * s + h2, 0)
            mats.append(((cols == col[:, None]) &
                         valid[:, None]).astype(jnp.float32))
    return jnp.stack(mats)


def _w_toeplitz(w_torch, width):
    # PyTorch (Cout, Cin, kD, kH, kW)  ->  (K*K, width*Cin, width*Cout) band
    # matrices handling the kw taps and the w-direction zero padding.
    cin, cout = w_torch.shape[1], w_torch.shape[0]
    wt = jnp.transpose(w_torch, (2, 3, 4, 1, 0))          # (kd, kh, kw, Cin, Cout)
    w_in = jnp.arange(width)[:, None]
    w_out = jnp.arange(width)[None, :]
    kw = w_in - w_out + K // 2
    valid = (kw >= 0) & (kw < K)
    kw_c = jnp.clip(kw, 0, K - 1)
    full = wt[:, :, kw_c, :, :]                            # (K, K, W, W, Cin, Cout)
    full = full * valid[None, None, :, :, None, None].astype(wt.dtype)
    full = jnp.transpose(full, (0, 1, 2, 4, 3, 5))         # (K, K, W, Cin, W, Cout)
    return full.reshape(K * K, width * cin, width * cout)


def _pool_lane_select():
    # (2, 128, 64): picks lane (2*wo+p)*8+c -> wo*8+c
    r = jnp.arange(D0 * F0)
    rw, rc = r // F0, r % F0
    l = jnp.arange(D1 * F0)
    lw, lc = l // F0, l % F0
    return jnp.stack([((rw[:, None] == 2 * lw[None, :] + p) &
                       (rc[:, None] == lc[None, :])).astype(jnp.float32)
                      for p in range(2)])


def _pool_row_select():
    # (4, 64, 256): picks row (2*do+dd)*16 + (2*ho+hh) -> do*8+ho
    r = jnp.arange(D1 * D1)
    rd, rh = r // D1, r % D1
    c = jnp.arange(D0 * D0)
    cd, ch = c // D0, c % D0
    mats = []
    for dd in range(2):
        for hh in range(2):
            mats.append(((cd[None, :] == 2 * rd[:, None] + dd) &
                         (ch[None, :] == 2 * rh[:, None] + hh)).astype(jnp.float32))
    return jnp.stack(mats)


def init_params(key):
    # PyTorch-layout weights, uniform fan-in init like nn.Conv3d / nn.Linear.
    ks = jax.random.split(key, 8)

    def u(k, shape, fan_in):
        b = 1.0 / (fan_in ** 0.5)
        return jax.random.uniform(k, shape, jnp.float32, -b, b)

    fan0 = C0 * K ** 3
    fan1 = F0 * K ** 3
    return dict(
        w_conv0=u(ks[0], (F0, C0, K, K, K), fan0),
        b_conv0=u(ks[1], (F0,), fan0),
        w_conv1=u(ks[2], (F0, F0, K, K, K), fan1),
        b_conv1=u(ks[3], (F0,), fan1),
        w_hidden=u(ks[4], (HIDDEN_SIZE, LAST_SIZE), LAST_SIZE),
        b_hidden=u(ks[5], (HIDDEN_SIZE,), LAST_SIZE),
        w_fc=u(ks[6], (1, HIDDEN_SIZE), HIDDEN_SIZE),
        b_fc=u(ks[7], (1,), HIDDEN_SIZE),
    )


def prepare_params(p):
    """One-time transform of PyTorch-layout weights into kernel-ready tensors."""
    # Fold the NCDHW flatten order into w_hidden: our flatten index is
    # f = ((d*8+h)*8 + w)*8 + c, PyTorch's is fp = ((c*8+d)*8 + h)*8 + w.
    f = jnp.arange(LAST_SIZE)
    c = f % F0
    w = (f // F0) % D1
    h = (f // (F0 * D1)) % D1
    d = f // (F0 * D1 * D1)
    fp = ((c * D1 + d) * D1 + h) * D1 + w
    whp = jnp.transpose(p["w_hidden"])[fp, :]              # (4096, 32)

    return dict(
        l0=_shift_matrices(D0),                            # (9, 256, 256)
        t0=_w_toeplitz(p["w_conv0"], D0),                  # (9, 64, 128)
        b0t=jnp.tile(p["b_conv0"], D0).reshape(1, D0 * F0),
        sw=_pool_lane_select(),                            # (2, 128, 64)
        sr=_pool_row_select(),                             # (4, 64, 256)
        l1=_shift_matrices(D1),                            # (9, 64, 64)
        t1=_w_toeplitz(p["w_conv1"], D1),                  # (9, 64, 64)
        b1t=jnp.tile(p["b_conv1"], D1).reshape(1, D1 * F0),
        whp=whp,
        bht=p["b_hidden"].reshape(1, HIDDEN_SIZE),
        wft=jnp.transpose(p["w_fc"]),                      # (32, 1)
        bft=p["b_fc"].reshape(1, 1),
    )


@jax.jit
def net_forward(x_ncdhw, kp):
    n = x_ncdhw.shape[0]
    # One-time input format conversion NCDHW -> rows=(d,h), lanes=(w,c).
    x2d = jnp.transpose(x_ncdhw, (0, 2, 3, 4, 1)).reshape(n, D0 * D0, D0 * C0)
    feats = features_forward(x2d, kp)                      # (n, 64, 64)
    x_flat = feats.reshape(n, LAST_SIZE)                   # free row-major reshape
    return head_forward(x_flat, kp)                        # (n, 1)


if __name__ == "__main__":
    key = jax.random.PRNGKey(0)
    k_in, k_par = jax.random.split(key)
    params = init_params(k_par)
    kparams = prepare_params(params)

    # PyTorch-convention input (N, C, D, H, W).
    x = jax.random.normal(
        k_in, (BATCH, IN_CHANNELS, GRID_DIM, GRID_DIM, GRID_DIM), jnp.float32)

    out = jax.block_until_ready(net_forward(x, kparams))

    assert out.shape == (BATCH, 1), out.shape
    assert bool(jnp.all(jnp.isfinite(out)))
    print("KERNEL_OK")
</pallas_src>

<mosaic_0001>
module attributes {stable_mosaic.version = 11 : i64} {
  func.func @_features_kernel(%arg0: i32, %arg1: memref<1x256x64xf32, #tpu.memory_space<vmem>>, %arg2: memref<9x256x256xf32, #tpu.memory_space<vmem>>, %arg3: memref<9x64x128xf32, #tpu.memory_space<vmem>>, %arg4: memref<1x128xf32, #tpu.memory_space<vmem>>, %arg5: memref<2x128x64xf32, #tpu.memory_space<vmem>>, %arg6: memref<4x64x256xf32, #tpu.memory_space<vmem>>, %arg7: memref<9x64x64xf32, #tpu.memory_space<vmem>>, %arg8: memref<9x64x64xf32, #tpu.memory_space<vmem>>, %arg9: memref<1x64xf32, #tpu.memory_space<vmem>>, %arg10: memref<1x64x64xf32, #tpu.memory_space<vmem>>) attributes {dimension_semantics = [#tpu.dimension_semantics<parallel>], iteration_bounds = array<i64: 2>, scalar_prefetch = 0 : i64, scratch_operands = 0 : i64, tpu.core_type = #tpu.core_type<tc>, window_params = [{transform_indices = @transform_0, window_bounds = array<i64: 1, 256, 64>}, {pipeline_mode = #tpu.pipeline_mode<synchronous>, transform_indices = @transform_1, window_bounds = array<i64: 9, 256, 256>}, {pipeline_mode = #tpu.pipeline_mode<synchronous>, transform_indices = @transform_2, window_bounds = array<i64: 9, 64, 128>}, {pipeline_mode = #tpu.pipeline_mode<synchronous>, transform_indices = @transform_3, window_bounds = array<i64: 1, 128>}, {pipeline_mode = #tpu.pipeline_mode<synchronous>, transform_indices = @transform_4, window_bounds = array<i64: 2, 128, 64>}, {pipeline_mode = #tpu.pipeline_mode<synchronous>, transform_indices = @transform_5, window_bounds = array<i64: 4, 64, 256>}, {pipeline_mode = #tpu.pipeline_mode<synchronous>, transform_indices = @transform_6, window_bounds = array<i64: 9, 64, 64>}, {pipeline_mode = #tpu.pipeline_mode<synchronous>, transform_indices = @transform_7, window_bounds = array<i64: 9, 64, 64>}, {pipeline_mode = #tpu.pipeline_mode<synchronous>, transform_indices = @transform_8, window_bounds = array<i64: 1, 64>}, {transform_indices = @transform_9, window_bounds = array<i64: 1, 64, 64>}]} {
    %c0 = arith.constant 0 : index
    %c0_0 = arith.constant 0 : index
    %c0_1 = arith.constant 0 : index
    %0 = vector.load %arg1[%c0, %c0_0, %c0_1] : memref<1x256x64xf32, #tpu.memory_space<vmem>>, vector<1x256x64xf32>
    %1 = vector.shape_cast %0 : vector<1x256x64xf32> to vector<256x64xf32>
    %cst = arith.constant 0.000000e+00 : f32
    %2 = vector.broadcast %cst : f32 to vector<256x128xf32>
    %c0_2 = arith.constant 0 : index
    %c0_3 = arith.constant 0 : index
    %c0_4 = arith.constant 0 : index
    %3 = vector.load %arg2[%c0_2, %c0_3, %c0_4] : memref<9x256x256xf32, #tpu.memory_space<vmem>>, vector<1x256x256xf32>
    %4 = vector.shape_cast %3 : vector<1x256x256xf32> to vector<256x256xf32>
    %cst_5 = arith.constant dense<0.000000e+00> : vector<256x64xf32>
    %5 = tpu.matmul %4, %1, %cst_5 {dimension_numbers = #tpu.dot_dimension_numbers<[1], [0], [0], [1], [0, 0, 1, 1], [], []>} : vector<256x256xf32>, vector<256x64xf32>, vector<256x64xf32> -> vector<256x64xf32>
    %c0_6 = arith.constant 0 : index
    %c0_7 = arith.constant 0 : index
    %c0_8 = arith.constant 0 : index
    %6 = vector.load %arg3[%c0_6, %c0_7, %c0_8] : memref<9x64x128xf32, #tpu.memory_space<vmem>>, vector<1x64x128xf32>
    %7 = vector.shape_cast %6 : vector<1x64x128xf32> to vector<64x128xf32>
    %cst_9 = arith.constant dense<0.000000e+00> : vector<256x128xf32>
    %8 = tpu.matmul %5, %7, %cst_9 {dimension_numbers = #tpu.dot_dimension_numbers<[1], [0], [0], [1], [0, 0, 1, 1], [], []>} : vector<256x64xf32>, vector<64x128xf32>, vector<256x128xf32> -> vector<256x128xf32>
    %9 = arith.addf %2, %8 : vector<256x128xf32>
    %c1 = arith.constant 1 : index
    %c0_10 = arith.constant 0 : index
    %c0_11 = arith.constant 0 : index
    %10 = vector.load %arg2[%c1, %c0_10, %c0_11] : memref<9x256x256xf32, #tpu.memory_space<vmem>>, vector<1x256x256xf32>
    %11 = vector.shape_cast %10 : vector<1x256x256xf32> to vector<256x256xf32>
    %cst_12 = arith.constant dense<0.000000e+00> : vector<256x64xf32>
    %12 = tpu.matmul %11, %1, %cst_12 {dimension_numbers = #tpu.dot_dimension_numbers<[1], [0], [0], [1], [0, 0, 1, 1], [], []>} : vector<256x256xf32>, vector<256x64xf32>, vector<256x64xf32> -> vector<256x64xf32>
    %c1_13 = arith.constant 1 : index
    %c0_14 = arith.constant 0 : index
    %c0_15 = arith.constant 0 : index
    %13 = vector.load %arg3[%c1_13, %c0_14, %c0_15] : memref<9x64x128xf32, #tpu.memory_space<vmem>>, vector<1x64x128xf32>
    %14 = vector.shape_cast %13 : vector<1x64x128xf32> to vector<64x128xf32>
    %cst_16 = arith.constant dense<0.000000e+00> : vector<256x128xf32>
    %15 = tpu.matmul %12, %14, %cst_16 {dimension_numbers = #tpu.dot_dimension_numbers<[1], [0], [0], [1], [0, 0, 1, 1], [], []>} : vector<256x64xf32>, vector<64x128xf32>, vector<256x128xf32> -> vector<256x128xf32>
    %16 = arith.addf %9, %15 : vector<256x128xf32>
    %c2 = arith.constant 2 : index
    %c0_17 = arith.constant 0 : index
    %c0_18 = arith.constant 0 : index
    %17 = vector.load %arg2[%c2, %c0_17, %c0_18] : memref<9x256x256xf32, #tpu.memory_space<vmem>>, vector<1x256x256xf32>
    %18 = vector.shape_cast %17 : vector<1x256x256xf32> to vector<256x256xf32>
    %cst_19 = arith.constant dense<0.000000e+00> : vector<256x64xf32>
    %19 = tpu.matmul %18, %1, %cst_19 {dimension_numbers = #tpu.dot_dimension_numbers<[1], [0], [0], [1], [0, 0, 1, 1], [], []>} : vector<256x256xf32>, vector<256x64xf32>, vector<256x64xf32> -> vector<256x64xf32>
    %c2_20 = arith.constant 2 : index
    %c0_21 = arith.constant 0 : index
    %c0_22 = arith.constant 0 : index
    %20 = vector.load %arg3[%c2_20, %c0_21, %c0_22] : memref<9x64x128xf32, #tpu.memory_space<vmem>>, vector<1x64x128xf32>
    %21 = vector.shape_cast %20 : vector<1x64x128xf32> to vector<64x128xf32>
    %cst_23 = arith.constant dense<0.000000e+00> : vector<256x128xf32>
    %22 = tpu.matmul %19, %21, %cst_23 {dimension_numbers = #tpu.dot_dimension_numbers<[1], [0], [0], [1], [0, 0, 1, 1], [], []>} : vector<256x64xf32>, vector<64x128xf32>, vector<256x128xf32> -> vector<256x128xf32>
    %23 = arith.addf %16, %22 : vector<256x128xf32>
    %c3 = arith.constant 3 : index
    %c0_24 = arith.constant 0 : index
    %c0_25 = arith.constant 0 : index
    %24 = vector.load %arg2[%c3, %c0_24, %c0_25] : memref<9x256x256xf32, #tpu.memory_space<vmem>>, vector<1x256x256xf32>
    %25 = vector.shape_cast %24 : vector<1x256x256xf32> to vector<256x256xf32>
    %cst_26 = arith.constant dense<0.000000e+00> : vector<256x64xf32>
    %26 = tpu.matmul %25, %1, %cst_26 {dimension_numbers = #tpu.dot_dimension_numbers<[1], [0], [0], [1], [0, 0, 1, 1], [], []>} : vector<256x256xf32>, vector<256x64xf32>, vector<256x64xf32> -> vector<256x64xf32>
    %c3_27 = arith.constant 3 : index
    %c0_28 = arith.constant 0 : index
    %c0_29 = arith.constant 0 : index
    %27 = vector.load %arg3[%c3_27, %c0_28, %c0_29] : memref<9x64x128xf32, #tpu.memory_space<vmem>>, vector<1x64x128xf32>
    %28 = vector.shape_cast %27 : vector<1x64x128xf32> to vector<64x128xf32>
    %cst_30 = arith.constant dense<0.000000e+00> : vector<256x128xf32>
    %29 = tpu.matmul %26, %28, %cst_30 {dimension_numbers = #tpu.dot_dimension_numbers<[1], [0], [0], [1], [0, 0, 1, 1], [], []>} : vector<256x64xf32>, vector<64x128xf32>, vector<256x128xf32> -> vector<256x128xf32>
    %30 = arith.addf %23, %29 : vector<256x128xf32>
    %c4 = arith.constant 4 : index
    %c0_31 = arith.constant 0 : index
    %c0_32 = arith.constant 0 : index
    %31 = vector.load %arg2[%c4, %c0_31, %c0_32] : memref<9x256x256xf32, #tpu.memory_space<vmem>>, vector<1x256x256xf32>
    %32 = vector.shape_cast %31 : vector<1x256x256xf32> to vector<256x256xf32>
    %cst_33 = arith.constant dense<0.000000e+00> : vector<256x64xf32>
    %33 = tpu.matmul %32, %1, %cst_33 {dimension_numbers = #tpu.dot_dimension_numbers<[1], [0], [0], [1], [0, 0, 1, 1], [], []>} : vector<256x256xf32>, vector<256x64xf32>, vector<256x64xf32> -> vector<256x64xf32>
    %c4_34 = arith.constant 4 : index
    %c0_35 = arith.constant 0 : index
    %c0_36 = arith.constant 0 : index
    %34 = vector.load %arg3[%c4_34, %c0_35, %c0_36] : memref<9x64x128xf32, #tpu.memory_space<vmem>>, vector<1x64x128xf32>
    %35 = vector.shape_cast %34 : vector<1x64x128xf32> to vector<64x128xf32>
    %cst_37 = arith.constant dense<0.000000e+00> : vector<256x128xf32>
    %36 = tpu.matmul %33, %35, %cst_37 {dimension_numbers = #tpu.dot_dimension_numbers<[1], [0], [0], [1], [0, 0, 1, 1], [], []>} : vector<256x64xf32>, vector<64x128xf32>, vector<256x128xf32> -> vector<256x128xf32>
    %37 = arith.addf %30, %36 : vector<256x128xf32>
    %c5 = arith.constant 5 : index
    %c0_38 = arith.constant 0 : index
    %c0_39 = arith.constant 0 : index
    %38 = vector.load %arg2[%c5, %c0_38, %c0_39] : memref<9x256x256xf32, #tpu.memory_space<vmem>>, vector<1x256x256xf32>
    %39 = vector.shape_cast %38 : vector<1x256x256xf32> to vector<256x256xf32>
    %cst_40 = arith.constant dense<0.000000e+00> : vector<256x64xf32>
    %40 = tpu.matmul %39, %1, %cst_40 {dimension_numbers = #tpu.dot_dimension_numbers<[1], [0], [0], [1], [0, 0, 1, 1], [], []>} : vector<256x256xf32>, vector<256x64xf32>, vector<256x64xf32> -> vector<256x64xf32>
    %c5_41 = arith.constant 5 : index
    %c0_42 = arith.constant 0 : index
    %c0_43 = arith.constant 0 : index
    %41 = vector.load %arg3[%c5_41, %c0_42, %c0_43] : memref<9x64x128xf32, #tpu.memory_space<vmem>>, vector<1x64x128xf32>
    %42 = vector.shape_cast %41 : vector<1x64x128xf32> to vector<64x128xf32>
    %cst_44 = arith.constant dense<0.000000e+00> : vector<256x128xf32>
    %43 = tpu.matmul %40, %42, %cst_44 {dimension_numbers = #tpu.dot_dimension_numbers<[1], [0], [0], [1], [0, 0, 1, 1], [], []>} : vector<256x64xf32>, vector<64x128xf32>, vector<256x128xf32> -> vector<256x128xf32>
    %44 = arith.addf %37, %43 : vector<256x128xf32>
    %c6 = arith.constant 6 : index
    %c0_45 = arith.constant 0 : index
    %c0_46 = arith.constant 0 : index
    %45 = vector.load %arg2[%c6, %c0_45, %c0_46] : memref<9x256x256xf32, #tpu.memory_space<vmem>>, vector<1x256x256xf32>
    %46 = vector.shape_cast %45 : vector<1x256x256xf32> to vector<256x256xf32>
    %cst_47 = arith.constant dense<0.000000e+00> : vector<256x64xf32>
    %47 = tpu.matmul %46, %1, %cst_47 {dimension_numbers = #tpu.dot_dimension_numbers<[1], [0], [0], [1], [0, 0, 1, 1], [], []>} : vector<256x256xf32>, vector<256x64xf32>, vector<256x64xf32> -> vector<256x64xf32>
    %c6_48 = arith.constant 6 : index
    %c0_49 = arith.constant 0 : index
    %c0_50 = arith.constant 0 : index
    %48 = vector.load %arg3[%c6_48, %c0_49, %c0_50] : memref<9x64x128xf32, #tpu.memory_space<vmem>>, vector<1x64x128xf32>
    %49 = vector.shape_cast %48 : vector<1x64x128xf32> to vector<64x128xf32>
    %cst_51 = arith.constant dense<0.000000e+00> : vector<256x128xf32>
    %50 = tpu.matmul %47, %49, %cst_51 {dimension_numbers = #tpu.dot_dimension_numbers<[1], [0], [0], [1], [0, 0, 1, 1], [], []>} : vector<256x64xf32>, vector<64x128xf32>, vector<256x128xf32> -> vector<256x128xf32>
    %51 = arith.addf %44, %50 : vector<256x128xf32>
    %c7 = arith.constant 7 : index
    %c0_52 = arith.constant 0 : index
    %c0_53 = arith.constant 0 : index
    %52 = vector.load %arg2[%c7, %c0_52, %c0_53] : memref<9x256x256xf32, #tpu.memory_space<vmem>>, vector<1x256x256xf32>
    %53 = vector.shape_cast %52 : vector<1x256x256xf32> to vector<256x256xf32>
    %cst_54 = arith.constant dense<0.000000e+00> : vector<256x64xf32>
    %54 = tpu.matmul %53, %1, %cst_54 {dimension_numbers = #tpu.dot_dimension_numbers<[1], [0], [0], [1], [0, 0, 1, 1], [], []>} : vector<256x256xf32>, vector<256x64xf32>, vector<256x64xf32> -> vector<256x64xf32>
    %c7_55 = arith.constant 7 : index
    %c0_56 = arith.constant 0 : index
    %c0_57 = arith.constant 0 : index
    %55 = vector.load %arg3[%c7_55, %c0_56, %c0_57] : memref<9x64x128xf32, #tpu.memory_space<vmem>>, vector<1x64x128xf32>
    %56 = vector.shape_cast %55 : vector<1x64x128xf32> to vector<64x128xf32>
    %cst_58 = arith.constant dense<0.000000e+00> : vector<256x128xf32>
    %57 = tpu.matmul %54, %56, %cst_58 {dimension_numbers = #tpu.dot_dimension_numbers<[1], [0], [0], [1], [0, 0, 1, 1], [], []>} : vector<256x64xf32>, vector<64x128xf32>, vector<256x128xf32> -> vector<256x128xf32>
    %58 = arith.addf %51, %57 : vector<256x128xf32>
    %c8 = arith.constant 8 : index
    %c0_59 = arith.constant 0 : index
    %c0_60 = arith.constant 0 : index
    %59 = vector.load %arg2[%c8, %c0_59, %c0_60] : memref<9x256x256xf32, #tpu.memory_space<vmem>>, vector<1x256x256xf32>
    %60 = vector.shape_cast %59 : vector<1x256x256xf32> to vector<256x256xf32>
    %cst_61 = arith.constant dense<0.000000e+00> : vector<256x64xf32>
    %61 = tpu.matmul %60, %1, %cst_61 {dimension_numbers = #tpu.dot_dimension_numbers<[1], [0], [0], [1], [0, 0, 1, 1], [], []>} : vector<256x256xf32>, vector<256x64xf32>, vector<256x64xf32> -> vector<256x64xf32>
    %c8_62 = arith.constant 8 : index
    %c0_63 = arith.constant 0 : index
    %c0_64 = arith.constant 0 : index
    %62 = vector.load %arg3[%c8_62, %c0_63, %c0_64] : memref<9x64x128xf32, #tpu.memory_space<vmem>>, vector<1x64x128xf32>
    %63 = vector.shape_cast %62 : vector<1x64x128xf32> to vector<64x128xf32>
    %cst_65 = arith.constant dense<0.000000e+00> : vector<256x128xf32>
    %64 = tpu.matmul %61, %63, %cst_65 {dimension_numbers = #tpu.dot_dimension_numbers<[1], [0], [0], [1], [0, 0, 1, 1], [], []>} : vector<256x64xf32>, vector<64x128xf32>, vector<256x128xf32> -> vector<256x128xf32>
    %65 = arith.addf %58, %64 : vector<256x128xf32>
    %c0_66 = arith.constant 0 : index
    %c0_67 = arith.constant 0 : index
    %66 = vector.load %arg4[%c0_66, %c0_67] : memref<1x128xf32, #tpu.memory_space<vmem>>, vector<1x128xf32>
    %67 = vector.broadcast %66 : vector<1x128xf32> to vector<256x128xf32>
    %68 = arith.addf %65, %67 : vector<256x128xf32>
    %cst_68 = arith.constant 0.000000e+00 : f32
    %69 = vector.broadcast %cst_68 : f32 to vector<256x128xf32>
    %70 = arith.cmpf ogt, %68, %69 : vector<256x128xf32>
    %cst_69 = arith.constant 0.000000e+00 : f32
    %71 = vector.broadcast %cst_69 : f32 to vector<256x128xf32>
    %72 = arith.minimumf %68, %71 : vector<256x128xf32>
    %73 = math.exp %72 : vector<256x128xf32>
    %cst_70 = arith.constant 1.000000e+00 : f32
    %74 = vector.broadcast %cst_70 : f32 to vector<256x128xf32>
    %75 = arith.subf %73, %74 : vector<256x128xf32>
    %76 = arith.select %70, %68, %75 : vector<256x128xi1>, vector<256x128xf32>
    %c0_71 = arith.constant 0 : index
    %c0_72 = arith.constant 0 : index
    %c0_73 = arith.constant 0 : index
    %77 = vector.load %arg5[%c0_71, %c0_72, %c0_73] : memref<2x128x64xf32, #tpu.memory_space<vmem>>, vector<1x128x64xf32>
    %78 = vector.shape_cast %77 : vector<1x128x64xf32> to vector<128x64xf32>
    %cst_74 = arith.constant dense<0.000000e+00> : vector<256x64xf32>
    %79 = tpu.matmul %76, %78, %cst_74 {dimension_numbers = #tpu.dot_dimension_numbers<[1], [0], [0], [1], [0, 0, 1, 1], [], []>} : vector<256x128xf32>, vector<128x64xf32>, vector<256x64xf32> -> vector<256x64xf32>
    %c1_75 = arith.constant 1 : index
    %c0_76 = arith.constant 0 : index
    %c0_77 = arith.constant 0 : index
    %80 = vector.load %arg5[%c1_75, %c0_76, %c0_77] : memref<2x128x64xf32, #tpu.memory_space<vmem>>, vector<1x128x64xf32>
    %81 = vector.shape_cast %80 : vector<1x128x64xf32> to vector<128x64xf32>
    %cst_78 = arith.constant dense<0.000000e+00> : vector<256x64xf32>
    %82 = tpu.matmul %76, %81, %cst_78 {dimension_numbers = #tpu.dot_dimension_numbers<[1], [0], [0], [1], [0, 0, 1, 1], [], []>} : vector<256x128xf32>, vector<128x64xf32>, vector<256x64xf32> -> vector<256x64xf32>
    %83 = arith.maximumf %79, %82 : vector<256x64xf32>
    %c0_79 = arith.constant 0 : index
    %c0_80 = arith.constant 0 : index
    %c0_81 = arith.constant 0 : index
    %84 = vector.load %arg6[%c0_79, %c0_80, %c0_81] : memref<4x64x256xf32, #tpu.memory_space<vmem>>, vector<1x64x256xf32>
    %85 = vector.shape_cast %84 : vector<1x64x256xf32> to vector<64x256xf32>
    %cst_82 = arith.constant dense<0.000000e+00> : vector<64x64xf32>
    %86 = tpu.matmul %85, %83, %cst_82 {dimension_numbers = #tpu.dot_dimension_numbers<[1], [0], [0], [1], [0, 0, 1, 1], [], []>} : vector<64x256xf32>, vector<256x64xf32>, vector<64x64xf32> -> vector<64x64xf32>
    %c1_83 = arith.constant 1 : index
    %c0_84 = arith.constant 0 : index
    %c0_85 = arith.constant 0 : index
    %87 = vector.load %arg6[%c1_83, %c0_84, %c0_85] : memref<4x64x256xf32, #tpu.memory_space<vmem>>, vector<1x64x256xf32>
    %88 = vector.shape_cast %87 : vector<1x64x256xf32> to vector<64x256xf32>
    %cst_86 = arith.constant dense<0.000000e+00> : vector<64x64xf32>
    %89 = tpu.matmul %88, %83, %cst_86 {dimension_numbers = #tpu.dot_dimension_numbers<[1], [0], [0], [1], [0, 0, 1, 1], [], []>} : vector<64x256xf32>, vector<256x64xf32>, vector<64x64xf32> -> vector<64x64xf32>
    %90 = arith.maximumf %86, %89 : vector<64x64xf32>
    %c2_87 = arith.constant 2 : index
    %c0_88 = arith.constant 0 : index
    %c0_89 = arith.constant 0 : index
    %91 = vector.load %arg6[%c2_87, %c0_88, %c0_89] : memref<4x64x256xf32, #tpu.memory_space<vmem>>, vector<1x64x256xf32>
    %92 = vector.shape_cast %91 : vector<1x64x256xf32> to vector<64x256xf32>
    %cst_90 = arith.constant dense<0.000000e+00> : vector<64x64xf32>
    %93 = tpu.matmul %92, %83, %cst_90 {dimension_numbers = #tpu.dot_dimension_numbers<[1], [0], [0], [1], [0, 0, 1, 1], [], []>} : vector<64x256xf32>, vector<256x64xf32>, vector<64x64xf32> -> vector<64x64xf32>
    %94 = arith.maximumf %90, %93 : vector<64x64xf32>
    %c3_91 = arith.constant 3 : index
    %c0_92 = arith.constant 0 : index
    %c0_93 = arith.constant 0 : index
    %95 = vector.load %arg6[%c3_91, %c0_92, %c0_93] : memref<4x64x256xf32, #tpu.memory_space<vmem>>, vector<1x64x256xf32>
    %96 = vector.shape_cast %95 : vector<1x64x256xf32> to vector<64x256xf32>
    %cst_94 = arith.constant dense<0.000000e+00> : vector<64x64xf32>
    %97 = tpu.matmul %96, %83, %cst_94 {dimension_numbers = #tpu.dot_dimension_numbers<[1], [0], [0], [1], [0, 0, 1, 1], [], []>} : vector<64x256xf32>, vector<256x64xf32>, vector<64x64xf32> -> vector<64x64xf32>
    %98 = arith.maximumf %94, %97 : vector<64x64xf32>
    %cst_95 = arith.constant 0.000000e+00 : f32
    %99 = vector.broadcast %cst_95 : f32 to vector<64x64xf32>
    %c0_96 = arith.constant 0 : index
    %c0_97 = arith.constant 0 : index
    %c0_98 = arith.constant 0 : index
    %100 = vector.load %arg7[%c0_96, %c0_97, %c0_98] : memref<9x64x64xf32, #tpu.memory_space<vmem>>, vector<1x64x64xf32>
    %101 = vector.shape_cast %100 : vector<1x64x64xf32> to vector<64x64xf32>
    %cst_99 = arith.constant dense<0.000000e+00> : vector<64x64xf32>
    %102 = tpu.matmul %101, %98, %cst_99 {dimension_numbers = #tpu.dot_dimension_numbers<[1], [0], [0], [1], [0, 0, 1, 1], [], []>} : vector<64x64xf32>, vector<64x64xf32>, vector<64x64xf32> -> vector<64x64xf32>
    %c0_100 = arith.constant 0 : index
    %c0_101 = arith.constant 0 : index
    %c0_102 = arith.constant 0 : index
    %103 = vector.load %arg8[%c0_100, %c0_101, %c0_102] : memref<9x64x64xf32, #tpu.memory_space<vmem>>, vector<1x64x64xf32>
    %104 = vector.shape_cast %103 : vector<1x64x64xf32> to vector<64x64xf32>
    %cst_103 = arith.constant dense<0.000000e+00> : vector<64x64xf32>
    %105 = tpu.matmul %102, %104, %cst_103 {dimension_numbers = #tpu.dot_dimension_numbers<[1], [0], [0], [1], [0, 0, 1, 1], [], []>} : vector<64x64xf32>, vector<64x64xf32>, vector<64x64xf32> -> vector<64x64xf32>
    %106 = arith.addf %99, %105 : vector<64x64xf32>
    %c1_104 = arith.constant 1 : index
    %c0_105 = arith.constant 0 : index
    %c0_106 = arith.constant 0 : index
    %107 = vector.load %arg7[%c1_104, %c0_105, %c0_106] : memref<9x64x64xf32, #tpu.memory_space<vmem>>, vector<1x64x64xf32>
    %108 = vector.shape_cast %107 : vector<1x64x64xf32> to vector<64x64xf32>
    %cst_107 = arith.constant dense<0.000000e+00> : vector<64x64xf32>
    %109 = tpu.matmul %108, %98, %cst_107 {dimension_numbers = #tpu.dot_dimension_numbers<[1], [0], [0], [1], [0, 0, 1, 1], [], []>} : vector<64x64xf32>, vector<64x64xf32>, vector<64x64xf32> -> vector<64x64xf32>
    %c1_108 = arith.constant 1 : index
    %c0_109 = arith.constant 0 : index
    %c0_110 = arith.constant 0 : index
    %110 = vector.load %arg8[%c1_108, %c0_109, %c0_110] : memref<9x64x64xf32, #tpu.memory_space<vmem>>, vector<1x64x64xf32>
    %111 = vector.shape_cast %110 : vector<1x64x64xf32> to vector<64x64xf32>
    %cst_111 = arith.constant dense<0.000000e+00> : vector<64x64xf32>
    %112 = tpu.matmul %109, %111, %cst_111 {dimension_numbers = #tpu.dot_dimension_numbers<[1], [0], [0], [1], [0, 0, 1, 1], [], []>} : vector<64x64xf32>, vector<64x64xf32>, vector<64x64xf32> -> vector<64x64xf32>
    %113 = arith.addf %106, %112 : vector<64x64xf32>
    %c2_112 = arith.constant 2 : index
    %c0_113 = arith.constant 0 : index
    %c0_114 = arith.constant 0 : index
    %114 = vector.load %arg7[%c2_112, %c0_113, %c0_114] : memref<9x64x64xf32, #tpu.memory_space<vmem>>, vector<1x64x64xf32>
    %115 = vector.shape_cast %114 : vector<1x64x64xf32> to vector<64x64xf32>
    %cst_115 = arith.constant dense<0.000000e+00> : vector<64x64xf32>
    %116 = tpu.matmul %115, %98, %cst_115 {dimension_numbers = #tpu.dot_dimension_numbers<[1], [0], [0], [1], [0, 0, 1, 1], [], []>} : vector<64x64xf32>, vector<64x64xf32>, vector<64x64xf32> -> vector<64x64xf32>
    %c2_116 = arith.constant 2 : index
    %c0_117 = arith.constant 0 : index
    %c0_118 = arith.constant 0 : index
    %117 = vector.load %arg8[%c2_116, %c0_117, %c0_118] : memref<9x64x64xf32, #tpu.memory_space<vmem>>, vector<1x64x64xf32>
    %118 = vector.shape_cast %117 : vector<1x64x64xf32> to vector<64x64xf32>
    %cst_119 = arith.constant dense<0.000000e+00> : vector<64x64xf32>
    %119 = tpu.matmul %116, %118, %cst_119 {dimension_numbers = #tpu.dot_dimension_numbers<[1], [0], [0], [1], [0, 0, 1, 1], [], []>} : vector<64x64xf32>, vector<64x64xf32>, vector<64x64xf32> -> vector<64x64xf32>
    %120 = arith.addf %113, %119 : vector<64x64xf32>
    %c3_120 = arith.constant 3 : index
    %c0_121 = arith.constant 0 : index
    %c0_122 = arith.constant 0 : index
    %121 = vector.load %arg7[%c3_120, %c0_121, %c0_122] : memref<9x64x64xf32, #tpu.memory_space<vmem>>, vector<1x64x64xf32>
    %122 = vector.shape_cast %121 : vector<1x64x64xf32> to vector<64x64xf32>
    %cst_123 = arith.constant dense<0.000000e+00> : vector<64x64xf32>
    %123 = tpu.matmul %122, %98, %cst_123 {dimension_numbers = #tpu.dot_dimension_numbers<[1], [0], [0], [1], [0, 0, 1, 1], [], []>} : vector<64x64xf32>, vector<64x64xf32>, vector<64x64xf32> -> vector<64x64xf32>
    %c3_124 = arith.constant 3 : index
    %c0_125 = arith.constant 0 : index
    %c0_126 = arith.constant 0 : index
    %124 = vector.load %arg8[%c3_124, %c0_125, %c0_126] : memref<9x64x64xf32, #tpu.memory_space<vmem>>, vector<1x64x64xf32>
    %125 = vector.shape_cast %124 : vector<1x64x64xf32> to vector<64x64xf32>
    %cst_127 = arith.constant dense<0.000000e+00> : vector<64x64xf32>
    %126 = tpu.matmul %123, %125, %cst_127 {dimension_numbers = #tpu.dot_dimension_numbers<[1], [0], [0], [1], [0, 0, 1, 1], [], []>} : vector<64x64xf32>, vector<64x64xf32>, vector<64x64xf32> -> vector<64x64xf32>
    %127 = arith.addf %120, %126 : vector<64x64xf32>
    %c4_128 = arith.constant 4 : index
    %c0_129 = arith.constant 0 : index
    %c0_130 = arith.constant 0 : index
    %128 = vector.load %arg7[%c4_128, %c0_129, %c0_130] : memref<9x64x64xf32, #tpu.memory_space<vmem>>, vector<1x64x64xf32>
    %129 = vector.shape_cast %128 : vector<1x64x64xf32> to vector<64x64xf32>
    %cst_131 = arith.constant dense<0.000000e+00> : vector<64x64xf32>
    %130 = tpu.matmul %129, %98, %cst_131 {dimension_numbers = #tpu.dot_dimension_numbers<[1], [0], [0], [1], [0, 0, 1, 1], [], []>} : vector<64x64xf32>, vector<64x64xf32>, vector<64x64xf32> -> vector<64x64xf32>
    %c4_132 = arith.constant 4 : index
    %c0_133 = arith.constant 0 : index
    %c0_134 = arith.constant 0 : index
    %131 = vector.load %arg8[%c4_132, %c0_133, %c0_134] : memref<9x64x64xf32, #tpu.memory_space<vmem>>, vector<1x64x64xf32>
    %132 = vector.shape_cast %131 : vector<1x64x64xf32> to vector<64x64xf32>
    %cst_135 = arith.constant dense<0.000000e+00> : vector<64x64xf32>
    %133 = tpu.matmul %130, %132, %cst_135 {dimension_numbers = #tpu.dot_dimension_numbers<[1], [0], [0], [1], [0, 0, 1, 1], [], []>} : vector<64x64xf32>, vector<64x64xf32>, vector<64x64xf32> -> vector<64x64xf32>
    %134 = arith.addf %127, %133 : vector<64x64xf32>
    %c5_136 = arith.constant 5 : index
    %c0_137 = arith.constant 0 : index
    %c0_138 = arith.constant 0 : index
    %135 = vector.load %arg7[%c5_136, %c0_137, %c0_138] : memref<9x64x64xf32, #tpu.memory_space<vmem>>, vector<1x64x64xf32>
    %136 = vector.shape_cast %135 : vector<1x64x64xf32> to vector<64x64xf32>
    %cst_139 = arith.constant dense<0.000000e+00> : vector<64x64xf32>
    %137 = tpu.matmul %136, %98, %cst_139 {dimension_numbers = #tpu.dot_dimension_numbers<[1], [0], [0], [1], [0, 0, 1, 1], [], []>} : vector<64x64xf32>, vector<64x64xf32>, vector<64x64xf32> -> vector<64x64xf32>
    %c5_140 = arith.constant 5 : index
    %c0_141 = arith.constant 0 : index
    %c0_142 = arith.constant 0 : index
    %138 = vector.load %arg8[%c5_140, %c0_141, %c0_142] : memref<9x64x64xf32, #tpu.memory_space<vmem>>, vector<1x64x64xf32>
    %139 = vector.shape_cast %138 : vector<1x64x64xf32> to vector<64x64xf32>
    %cst_143 = arith.constant dense<0.000000e+00> : vector<64x64xf32>
    %140 = tpu.matmul %137, %139, %cst_143 {dimension_numbers = #tpu.dot_dimension_numbers<[1], [0], [0], [1], [0, 0, 1, 1], [], []>} : vector<64x64xf32>, vector<64x64xf32>, vector<64x64xf32> -> vector<64x64xf32>
    %141 = arith.addf %134, %140 : vector<64x64xf32>
    %c6_144 = arith.constant 6 : index
    %c0_145 = arith.constant 0 : index
    %c0_146 = arith.constant 0 : index
    %142 = vector.load %arg7[%c6_144, %c0_145, %c0_146] : memref<9x64x64xf32, #tpu.memory_space<vmem>>, vector<1x64x64xf32>
    %143 = vector.shape_cast %142 : vector<1x64x64xf32> to vector<64x64xf32>
    %cst_147 = arith.constant dense<0.000000e+00> : vector<64x64xf32>
    %144 = tpu.matmul %143, %98, %cst_147 {dimension_numbers = #tpu.dot_dimension_numbers<[1], [0], [0], [1], [0, 0, 1, 1], [], []>} : vector<64x64xf32>, vector<64x64xf32>, vector<64x64xf32> -> vector<64x64xf32>
    %c6_148 = arith.constant 6 : index
    %c0_149 = arith.constant 0 : index
    %c0_150 = arith.constant 0 : index
    %145 = vector.load %arg8[%c6_148, %c0_149, %c0_150] : memref<9x64x64xf32, #tpu.memory_space<vmem>>, vector<1x64x64xf32>
    %146 = vector.shape_cast %145 : vector<1x64x64xf32> to vector<64x64xf32>
    %cst_151 = arith.constant dense<0.000000e+00> : vector<64x64xf32>
    %147 = tpu.matmul %144, %146, %cst_151 {dimension_numbers = #tpu.dot_dimension_numbers<[1], [0], [0], [1], [0, 0, 1, 1], [], []>} : vector<64x64xf32>, vector<64x64xf32>, vector<64x64xf32> -> vector<64x64xf32>
    %148 = arith.addf %141, %147 : vector<64x64xf32>
    %c7_152 = arith.constant 7 : index
    %c0_153 = arith.constant 0 : index
    %c0_154 = arith.constant 0 : index
    %149 = vector.load %arg7[%c7_152, %c0_153, %c0_154] : memref<9x64x64xf32, #tpu.memory_space<vmem>>, vector<1x64x64xf32>
    %150 = vector.shape_cast %149 : vector<1x64x64xf32> to vector<64x64xf32>
    %cst_155 = arith.constant dense<0.000000e+00> : vector<64x64xf32>
    %151 = tpu.matmul %150, %98, %cst_155 {dimension_numbers = #tpu.dot_dimension_numbers<[1], [0], [0], [1], [0, 0, 1, 1], [], []>} : vector<64x64xf32>, vector<64x64xf32>, vector<64x64xf32> -> vector<64x64xf32>
    %c7_156 = arith.constant 7 : index
    %c0_157 = arith.constant 0 : index
    %c0_158 = arith.constant 0 : index
    %152 = vector.load %arg8[%c7_156, %c0_157, %c0_158] : memref<9x64x64xf32, #tpu.memory_space<vmem>>, vector<1x64x64xf32>
    %153 = vector.shape_cast %152 : vector<1x64x64xf32> to vector<64x64xf32>
    %cst_159 = arith.constant dense<0.000000e+00> : vector<64x64xf32>
    %154 = tpu.matmul %151, %153, %cst_159 {dimension_numbers = #tpu.dot_dimension_numbers<[1], [0], [0], [1], [0, 0, 1, 1], [], []>} : vector<64x64xf32>, vector<64x64xf32>, vector<64x64xf32> -> vector<64x64xf32>
    %155 = arith.addf %148, %154 : vector<64x64xf32>
    %c8_160 = arith.constant 8 : index
    %c0_161 = arith.constant 0 : index
    %c0_162 = arith.constant 0 : index
    %156 = vector.load %arg7[%c8_160, %c0_161, %c0_162] : memref<9x64x64xf32, #tpu.memory_space<vmem>>, vector<1x64x64xf32>
    %157 = vector.shape_cast %156 : vector<1x64x64xf32> to vector<64x64xf32>
    %cst_163 = arith.constant dense<0.000000e+00> : vector<64x64xf32>
    %158 = tpu.matmul %157, %98, %cst_163 {dimension_numbers = #tpu.dot_dimension_numbers<[1], [0], [0], [1], [0, 0, 1, 1], [], []>} : vector<64x64xf32>, vector<64x64xf32>, vector<64x64xf32> -> vector<64x64xf32>
    %c8_164 = arith.constant 8 : index
    %c0_165 = arith.constant 0 : index
    %c0_166 = arith.constant 0 : index
    %159 = vector.load %arg8[%c8_164, %c0_165, %c0_166] : memref<9x64x64xf32, #tpu.memory_space<vmem>>, vector<1x64x64xf32>
    %160 = vector.shape_cast %159 : vector<1x64x64xf32> to vector<64x64xf32>
    %cst_167 = arith.constant dense<0.000000e+00> : vector<64x64xf32>
    %161 = tpu.matmul %158, %160, %cst_167 {dimension_numbers = #tpu.dot_dimension_numbers<[1], [0], [0], [1], [0, 0, 1, 1], [], []>} : vector<64x64xf32>, vector<64x64xf32>, vector<64x64xf32> -> vector<64x64xf32>
    %162 = arith.addf %155, %161 : vector<64x64xf32>
    %c0_168 = arith.constant 0 : index
    %c0_169 = arith.constant 0 : index
    %163 = vector.load %arg9[%c0_168, %c0_169] : memref<1x64xf32, #tpu.memory_space<vmem>>, vector<1x64xf32>
    %164 = vector.broadcast %163 : vector<1x64xf32> to vector<64x64xf32>
    %165 = arith.addf %162, %164 : vector<64x64xf32>
    %cst_170 = arith.constant 0.000000e+00 : f32
    %166 = vector.broadcast %cst_170 : f32 to vector<64x64xf32>
    %167 = arith.cmpf ogt, %165, %166 : vector<64x64xf32>
    %cst_171 = arith.constant 0.000000e+00 : f32
    %168 = vector.broadcast %cst_171 : f32 to vector<64x64xf32>
    %169 = arith.minimumf %165, %168 : vector<64x64xf32>
    %170 = math.exp %169 : vector<64x64xf32>
    %cst_172 = arith.constant 1.000000e+00 : f32
    %171 = vector.broadcast %cst_172 : f32 to vector<64x64xf32>
    %172 = arith.subf %170, %171 : vector<64x64xf32>
    %173 = arith.select %167, %165, %172 : vector<64x64xi1>, vector<64x64xf32>
    %174 = vector.shape_cast %173 : vector<64x64xf32> to vector<1x64x64xf32>
    %c0_173 = arith.constant 0 : index
    %c0_174 = arith.constant 0 : index
    %c0_175 = arith.constant 0 : index
    %175 = vector.load %arg10[%c0_173, %c0_174, %c0_175] : memref<1x64x64xf32, #tpu.memory_space<vmem>>, vector<1x64x64xf32>
    tpu.vector_store %arg10[%c0_173, %c0_174, %c0_175], %174 {strides = array<i32>} : memref<1x64x64xf32, #tpu.memory_space<vmem>>, vector<1x64x64xf32>,
    return
  }
  func.func @transform_0(%arg0: i32) -> (i32, i32, i32) {
    %c0_i32 = arith.constant 0 : i32
    %c0_i32_0 = arith.constant 0 : i32
    %c0_i32_1 = arith.constant 0 : i32
    return %arg0, %c0_i32, %c0_i32_0 : i32, i32, i32
  }
  func.func @transform_1(%arg0: i32) -> (i32, i32, i32) {
    %c0_i32 = arith.constant 0 : i32
    %c0_i32_0 = arith.constant 0 : i32
    %c0_i32_1 = arith.constant 0 : i32
    %c0_i32_2 = arith.constant 0 : i32
    return %c0_i32, %c0_i32_0, %c0_i32_1 : i32, i32, i32
  }
  func.func @transform_2(%arg0: i32) -> (i32, i32, i32) {
    %c0_i32 = arith.constant 0 : i32
    %c0_i32_0 = arith.constant 0 : i32
    %c0_i32_1 = arith.constant 0 : i32
    %c0_i32_2 = arith.constant 0 : i32
    return %c0_i32, %c0_i32_0, %c0_i32_1 : i32, i32, i32
  }
  func.func @transform_3(%arg0: i32) -> (i32, i32) {
    %c0_i32 = arith.constant 0 : i32
    %c0_i32_0 = arith.constant 0 : i32
    %c0_i32_1 = arith.constant 0 : i32
    return %c0_i32, %c0_i32_0 : i32, i32
  }
  func.func @transform_4(%arg0: i32) -> (i32, i32, i32) {
    %c0_i32 = arith.constant 0 : i32
    %c0_i32_0 = arith.constant 0 : i32
    %c0_i32_1 = arith.constant 0 : i32
    %c0_i32_2 = arith.constant 0 : i32
    return %c0_i32, %c0_i32_0, %c0_i32_1 : i32, i32, i32
  }
  func.func @transform_5(%arg0: i32) -> (i32, i32, i32) {
    %c0_i32 = arith.constant 0 : i32
    %c0_i32_0 = arith.constant 0 : i32
    %c0_i32_1 = arith.constant 0 : i32
    %c0_i32_2 = arith.constant 0 : i32
    return %c0_i32, %c0_i32_0, %c0_i32_1 : i32, i32, i32
  }
  func.func @transform_6(%arg0: i32) -> (i32, i32, i32) {
    %c0_i32 = arith.constant 0 : i32
    %c0_i32_0 = arith.constant 0 : i32
    %c0_i32_1 = arith.constant 0 : i32
    %c0_i32_2 = arith.constant 0 : i32
    return %c0_i32, %c0_i32_0, %c0_i32_1 : i32, i32, i32
  }
  func.func @transform_7(%arg0: i32) -> (i32, i32, i32) {
    %c0_i32 = arith.constant 0 : i32
    %c0_i32_0 = arith.constant 0 : i32
    %c0_i32_1 = arith.constant 0 : i32
    %c0_i32_2 = arith.constant 0 : i32
    return %c0_i32, %c0_i32_0, %c0_i32_1 : i32, i32, i32
  }
  func.func @transform_8(%arg0: i32) -> (i32, i32) {
    %c0_i32 = arith.constant 0 : i32
    %c0_i32_0 = arith.constant 0 : i32
    %c0_i32_1 = arith.constant 0 : i32
    return %c0_i32, %c0_i32_0 : i32, i32
  }
  func.func @transform_9(%arg0: i32) -> (i32, i32, i32) {
    %c0_i32 = arith.constant 0 : i32
    %c0_i32_0 = arith.constant 0 : i32
    %c0_i32_1 = arith.constant 0 : i32
    return %arg0, %c0_i32, %c0_i32_0 : i32, i32, i32
  }
}

module attributes {stable_mosaic.version = 11 : i64} {
  func.func @_head_kernel(%arg0: memref<2x4096xf32, #tpu.memory_space<vmem>>, %arg1: memref<4096x32xf32, #tpu.memory_space<vmem>>, %arg2: memref<1x32xf32, #tpu.memory_space<vmem>>, %arg3: memref<32x1xf32, #tpu.memory_space<vmem>>, %arg4: memref<1x1xf32, #tpu.memory_space<vmem>>, %arg5: memref<2x1xf32, #tpu.memory_space<vmem>>) attributes {dimension_semantics = [], scalar_prefetch = 0 : i64, scratch_operands = 0 : i64, tpu.core_type = #tpu.core_type<tc>} {
    %c0 = arith.constant 0 : index
    %c0_0 = arith.constant 0 : index
    %0 = vector.load %arg0[%c0, %c0_0] : memref<2x4096xf32, #tpu.memory_space<vmem>>, vector<2x4096xf32>
    %c0_1 = arith.constant 0 : index
    %c0_2 = arith.constant 0 : index
    %1 = vector.load %arg1[%c0_1, %c0_2] : memref<4096x32xf32, #tpu.memory_space<vmem>>, vector<4096x32xf32>
    %cst = arith.constant dense<0.000000e+00> : vector<2x32xf32>
    %2 = tpu.matmul %0, %1, %cst {dimension_numbers = #tpu.dot_dimension_numbers<[1], [0], [0], [1], [0, 0, 1, 1], [], []>} : vector<2x4096xf32>, vector<4096x32xf32>, vector<2x32xf32> -> vector<2x32xf32>
    %c0_3 = arith.constant 0 : index
    %c0_4 = arith.constant 0 : index
    %3 = vector.load %arg2[%c0_3, %c0_4] : memref<1x32xf32, #tpu.memory_space<vmem>>, vector<1x32xf32>
    %4 = vector.broadcast %3 : vector<1x32xf32> to vector<2x32xf32>
    %5 = arith.addf %2, %4 : vector<2x32xf32>
    %cst_5 = arith.constant 0.000000e+00 : f32
    %6 = vector.broadcast %cst_5 : f32 to vector<2x32xf32>
    %7 = arith.cmpf ogt, %5, %6 : vector<2x32xf32>
    %cst_6 = arith.constant 0.000000e+00 : f32
    %8 = vector.broadcast %cst_6 : f32 to vector<2x32xf32>
    %9 = arith.minimumf %5, %8 : vector<2x32xf32>
    %10 = math.exp %9 : vector<2x32xf32>
    %cst_7 = arith.constant 1.000000e+00 : f32
    %11 = vector.broadcast %cst_7 : f32 to vector<2x32xf32>
    %12 = arith.subf %10, %11 : vector<2x32xf32>
    %13 = arith.select %7, %5, %12 : vector<2x32xi1>, vector<2x32xf32>
    %c0_8 = arith.constant 0 : index
    %c0_9 = arith.constant 0 : index
    %14 = vector.load %arg3[%c0_8, %c0_9] : memref<32x1xf32, #tpu.memory_space<vmem>>, vector<32x1xf32>
    %cst_10 = arith.constant dense<0.000000e+00> : vector<2x1xf32>
    %15 = tpu.matmul %13, %14, %cst_10 {dimension_numbers = #tpu.dot_dimension_numbers<[1], [0], [0], [1], [0, 0, 1, 1], [], []>} : vector<2x32xf32>, vector<32x1xf32>, vector<2x1xf32> -> vector<2x1xf32>
    %c0_11 = arith.constant 0 : index
    %c0_12 = arith.constant 0 : index
    %16 = vector.load %arg4[%c0_11, %c0_12] : memref<1x1xf32, #tpu.memory_space<vmem>>, vector<1x1xf32>
    %17 = vector.broadcast %16 : vector<1x1xf32> to vector<2x1xf32>
    %18 = arith.addf %15, %17 : vector<2x1xf32>
    %c0_13 = arith.constant 0 : index
    %c0_14 = arith.constant 0 : index
    %19 = vector.load %arg5[%c0_13, %c0_14] : memref<2x1xf32, #tpu.memory_space<vmem>>, vector<2x1xf32>
    tpu.vector_store %arg5[%c0_13, %c0_14], %18 {strides = array<i32>} : memref<2x1xf32, #tpu.memory_space<vmem>>, vector<2x1xf32>,
    return
  }
}

</mosaic_0001>

<bundles_post_ra>
// kernel: net_forward.3
= control target key start
LH: loop header
LB: loop body
LE: loop exit
PB: predicated region body
PF: predicated region fallthrough
CT: control target
= control target key end

     0   :  { %v2535_v30 = vmov 1983009808   ;;  %v561_v32 = vlaneseq  ;;  %vm2537_vm0 = vmmov 0   ;;  %vm1862_vm1 = vcmask 261120   ;;  %s4167_s1 = inlined_call_operand.vmem [shape: f32[4096,32], index: 1, kind: input, shape index: {}]   ;;  %s4168_s0 = inlined_call_operand.vmem [shape: f32[2,4096], index: 0, kind: input, shape index: {}]   ;;  %s4169_s3 = inlined_call_operand.vmem [shape: f32[32,1], index: 3, kind: input, shape index: {}]   ;;  %s4170_s4 = inlined_call_operand.<no memory space> [shape: f32[1,1], index: 4, kind: input, shape index: {}]   ;;  %s4171_s2 = inlined_call_operand.vmem [shape: f32[1,32], index: 2, kind: input, shape index: {}]   ;;  %s4172_s5 = inlined_call_operand.vmem [shape: f32[2,1], index: 5, kind: output, shape index: {}]  }
   0x1   :  { %v61_v0 = vld [vmem:[%s4167_s1 + $0xf8] sm:$0xff]  ;;  %v60_v4 = vld [vmem:[%s4167_s1 + $0xf0] sm:$0xff]  ;;  %v59_v8 = vld [vmem:[%s4167_s1 + $0xe8] sm:$0xff]  ;;  %v559_v31 = vunpack.c.l.s4 %v2535_v30  ;;  %vm1936_vm3 = vcmask 1024  }
   0x2   :  { %v93_v1 = vld [vmem:[%s4167_s1 + $0x1f8] sm:$0xff]  ;;  %1946 = vmatprep.subr.mxu0 %v61_v0  ;;  %v92_v5 = vld [vmem:[%s4167_s1 + $0x1f0] sm:$0xff]  ;;  %v91_v9 = vld [vmem:[%s4167_s1 + $0x1e8] sm:$0xff]  ;;  %v562_v42 = vshrl.u32 %v561_v32, 7 }
   0x3   :  { %v45_v2 = vld [vmem:[%s4167_s1 + $0x78] sm:$0xff]  ;;  %1981 = vmatprep.subr.mxu1 %v93_v1  ;;  %v44_v6 = vld [vmem:[%s4167_s1 + $0x70] sm:$0xff]  ;;  %v43_v10 = vld [vmem:[%s4167_s1 + $0x68] sm:$0xff]  ;;  %v560_v41 = vunpack.c.0.s8 %v559_v31 }
   0x4   :  { %v77_v3 = vld [vmem:[%s4167_s1 + $0x178] sm:$0xff]  ;;  %1947 = vmatpush3.msra.mxu0 %v45_v2  ;;  %v76_v7 = vld [vmem:[%s4167_s1 + $0x170] sm:$0xff]  ;;  %v75_v11 = vld [vmem:[%s4167_s1 + $0x168] sm:$0xff] }
   0x5   :  { %1982 = vmatpush3.msra.mxu1 %v77_v3  ;;  %1948 = vmatprep.subr.mxu0 %v60_v4  ;;  %v58_v12 = vld [vmem:[%s4167_s1 + $0xe0] sm:$0xff]  ;;  %v57_v16 = vld [vmem:[%s4167_s1 + $0xd8] sm:$0xff]  ;;  %v56_v20 = vld [vmem:[%s4167_s1 + $0xd0] sm:$0xff]  ;;  %v2706_v51 = vsub.s32 %v560_v41, %v562_v42 }
   0x6   :  { %1983 = vmatprep.subr.mxu1 %v92_v5  ;;  %1949 = vmatpush3.msra.mxu0 %v44_v6  ;;  %v90_v13 = vld [vmem:[%s4167_s1 + $0x1e0] sm:$0xff]  ;;  %v89_v17 = vld [vmem:[%s4167_s1 + $0x1d8] sm:$0xff]  ;;  %v88_v21 = vld [vmem:[%s4167_s1 + $0x1d0] sm:$0xff] }
   0x7   :  { %1984 = vmatpush3.msra.mxu1 %v76_v7  ;;  %1950 = vmatprep.subr.mxu0 %v59_v8  ;;  %v42_v14 = vld [vmem:[%s4167_s1 + $0x60] sm:$0xff]  ;;  %v41_v18 = vld [vmem:[%s4167_s1 + $0x58] sm:$0xff]  ;;  %v40_v22 = vld [vmem:[%s4167_s1 + $0x50] sm:$0xff] }
   0x8   :  { %1985 = vmatprep.subr.mxu1 %v91_v9  ;;  %v74_v15 = vld [vmem:[%s4167_s1 + $0x160] sm:$0xff]  ;;  %1951 = vmatpush3.msra.mxu0 %v43_v10  ;;  %v73_v19 = vld [vmem:[%s4167_s1 + $0x158] sm:$0xff]  ;;  %v72_v23 = vld [vmem:[%s4167_s1 + $0x150] sm:$0xff] }
   0x9   :  { %1986 = vmatpush3.msra.mxu1 %v75_v11  ;;  %1952 = vmatprep.subr.mxu0 %v58_v12  ;;  %v55_v24 = vld [vmem:[%s4167_s1 + $0xc8] sm:$0xff]  ;;  %v54_v28 = vld [vmem:[%s4167_s1 + $0xc0] sm:$0xff]  ;;  %v53_v35 = vld [vmem:[%s4167_s1 + $0xb8] sm:$0xff] }
   0xa   :  { %1987 = vmatprep.subr.mxu1 %v90_v13  ;;  %1953 = vmatpush3.msra.mxu0 %v42_v14  ;;  %v87_v25 = vld [vmem:[%s4167_s1 + $0x1c8] sm:$0xff]  ;;  %v86_v29 = vld [vmem:[%s4167_s1 + $0x1c0] sm:$0xff]  ;;  %v85_v36 = vld [vmem:[%s4167_s1 + $0x1b8] sm:$0xff] }
   0xb   :  { %1988 = vmatpush3.msra.mxu1 %v74_v15  ;;  %1954 = vmatprep.subr.mxu0 %v57_v16  ;;  %v39_v26 = vld [vmem:[%s4167_s1 + $0x48] sm:$0xff]  ;;  %v38_v33 = vld [vmem:[%s4167_s1 + $0x40] sm:$0xff]  ;;  %v37_v37 = vld [vmem:[%s4167_s1 + $0x38] sm:$0xff] }
   0xc   :  { %1989 = vmatprep.subr.mxu1 %v89_v17  ;;  %1955 = vmatpush3.msra.mxu0 %v41_v18  ;;  %v71_v27 = vld [vmem:[%s4167_s1 + $0x148] sm:$0xff]  ;;  %v70_v34 = vld [vmem:[%s4167_s1 + $0x140] sm:$0xff]  ;;  %v69_v38 = vld [vmem:[%s4167_s1 + $0x138] sm:$0xff] }
   0xd   :  { %1990 = vmatpush3.msra.mxu1 %v73_v19  ;;  %1956 = vmatprep.subr.mxu0 %v56_v20  ;;  %v52_v39 = vld [vmem:[%s4167_s1 + $0xb0] sm:$0xff]  ;;  %v51_v45 = vld [vmem:[%s4167_s1 + $0xa8] sm:$0xff]  ;;  %v50_v49 = vld [vmem:[%s4167_s1 + $0xa0] sm:$0xff] }
   0xe   :  { %1991 = vmatprep.subr.mxu1 %v88_v21  ;;  %1957 = vmatpush3.msra.mxu0 %v40_v22  ;;  %v84_v40 = vld [vmem:[%s4167_s1 + $0x1b0] sm:$0xff]  ;;  %v83_v46 = vld [vmem:[%s4167_s1 + $0x1a8] sm:$0xff]  ;;  %v82_v50 = vld [vmem:[%s4167_s1 + $0x1a0] sm:$0xff] }
   0xf   :  { %1992 = vmatpush3.msra.mxu1 %v72_v23  ;;  %1958 = vmatprep.subr.mxu0 %v55_v24  ;;  %v36_v43 = vld [vmem:[%s4167_s1 + $0x30] sm:$0xff]  ;;  %v35_v47 = vld [vmem:[%s4167_s1 + $0x28] sm:$0xff]  ;;  %v34_v52 = vld [vmem:[%s4167_s1 + $0x20] sm:$0xff] }
  0x10   :  { %1993 = vmatprep.subr.mxu1 %v87_v25  ;;  %1959 = vmatpush3.msra.mxu0 %v39_v26  ;;  %v68_v44 = vld [vmem:[%s4167_s1 + $0x130] sm:$0xff]  ;;  %v67_v48 = vld [vmem:[%s4167_s1 + $0x128] sm:$0xff]  ;;  %v66_v53 = vld [vmem:[%s4167_s1 + $0x120] sm:$0xff] }
  0x11   :  { %1994 = vmatpush3.msra.mxu1 %v71_v27  ;;  %1960 = vmatprep.subr.mxu0 %v54_v28  ;;  %v22_v54 = vld [vmem:[%s4168_s0] sm:$0xff]  ;;  %v49_v55 = vld [vmem:[%s4167_s1 + $0x98] sm:$0xff]  ;;  %v48_v60 = vld [vmem:[%s4167_s1 + $0x90] sm:$0xff] }
  0x12   :  { %1995 = vmatprep.subr.mxu1 %v86_v29  ;;  %1961 = vmatpush3.msra.mxu0 %v38_v33  ;;  %v81_v56 = vld [vmem:[%s4167_s1 + $0x198] sm:$0xff]  ;;  %v557_v57 = vcombine.high %v22_v54, %v22_v54  ;;  %v80_v61 = vld [vmem:[%s4167_s1 + $0x190] sm:$0xff]  ;;  %v564_v62 = vrot.slane %v22_v54, %v2706_v51  ;;  %v47_v1 = vld [vmem:[%s4167_s1 + $0x88] sm:$0xff] }
  0x13   :  { %1996 = vmatpush3.msra.mxu1 %v70_v34  ;;  %1962 = vmatprep.subr.mxu0 %v53_v35  ;;  %v33_v58 = vld [vmem:[%s4167_s1 + $0x18] sm:$0xff]  ;;  %v32_v63 = vld [vmem:[%s4167_s1 + $0x10] sm:$0xff]  ;;  %v79_v2 = vld [vmem:[%s4167_s1 + $0x188] sm:$0xff] }
  0x14   :  { %1997 = vmatprep.subr.mxu1 %v85_v36  ;;  %1963 = vmatpush3.msra.mxu0 %v37_v37  ;;  %v65_v59 = vld [vmem:[%s4167_s1 + $0x118] sm:$0xff]  ;;  %v64_v0 = vld [vmem:[%s4167_s1 + $0x110] sm:$0xff]  ;;  %v571_v3 = vrot.slane %v557_v57, %v2706_v51  ;;  %v31_v4 = vld [vmem:[%s4167_s1 + $0x8] sm:$0xff]  ;;  %v572_v8 = vcombine.high %v564_v62, %v564_v62 }
  0x15   :  { %1998 = vmatpush3.msra.mxu1 %v69_v38  ;;  %1964 = vmatprep.subr.mxu0 %v52_v39  ;;  %v63_v5 = vld [vmem:[%s4167_s1 + $0x108] sm:$0xff]  ;;  %v46_v6 = vld [vmem:[%s4167_s1 + $0x80] sm:$0xff]  ;;  %v125_v12 = vld [vmem:[%s4167_s1 + $0x2f8] sm:$0xff] }
  0x16   :  { %1999 = vmatprep.subr.mxu1 %v84_v40  ;;  %1965 = vmatpush3.msra.mxu0 %v36_v43  ;;  %v78_v7 = vld [vmem:[%s4167_s1 + $0x180] sm:$0xff]  ;;  %v573_v11 = vcombine.high %v571_v3, %v571_v3  ;;  %v157_v13 = vld [vmem:[%s4167_s1 + $0x3f8] sm:$0xff]  ;;  %v124_v16 = vld [vmem:[%s4167_s1 + $0x2f0] sm:$0xff] }
  0x17   :  { %2000 = vmatpush3.msra.mxu1 %v68_v44  ;;  %1966 = vmatprep.subr.mxu0 %v51_v45  ;;  %v30_v9 = vld [vmem:[%s4167_s1] sm:$0xff]  ;;  %v109_v14 = vld [vmem:[%s4167_s1 + $0x278] sm:$0xff]  ;;  %v156_v17 = vld [vmem:[%s4167_s1 + $0x3f0] sm:$0xff] }
  0x18   :  { %2001 = vmatprep.subr.mxu1 %v83_v46  ;;  %1967 = vmatpush3.msra.mxu0 %v35_v47  ;;  %v62_v10 = vld [vmem:[%s4167_s1 + $0x100] sm:$0xff]  ;;  %v141_v15 = vld [vmem:[%s4167_s1 + $0x378] sm:$0xff]  ;;  %v108_v18 = vld [vmem:[%s4167_s1 + $0x270] sm:$0xff] }
  0x19   :  { %2002 = vmatpush3.msra.mxu1 %v67_v48  ;;  %1968 = vmatprep.subr.mxu0 %v50_v49  ;;  %v140_v19 = vld [vmem:[%s4167_s1 + $0x370] sm:$0xff]  ;;  %v123_v20 = vld [vmem:[%s4167_s1 + $0x2e8] sm:$0xff]  ;;  %v122_v24 = vld [vmem:[%s4167_s1 + $0x2e0] sm:$0xff] }
  0x1a   :  { %2003 = vmatprep.subr.mxu1 %v82_v50  ;;  %1969 = vmatpush3.msra.mxu0 %v34_v52  ;;  %v155_v21 = vld [vmem:[%s4167_s1 + $0x3e8] sm:$0xff]  ;;  %v154_v25 = vld [vmem:[%s4167_s1 + $0x3e0] sm:$0xff]  ;;  %v121_v28 = vld [vmem:[%s4167_s1 + $0x2d8] sm:$0xff] }
  0x1b   :  { %2004 = vmatpush3.msra.mxu1 %v66_v53  ;;  %1970 = vmatprep.subr.mxu0 %v49_v55  ;;  %v107_v22 = vld [vmem:[%s4167_s1 + $0x268] sm:$0xff]  ;;  %v106_v26 = vld [vmem:[%s4167_s1 + $0x260] sm:$0xff]  ;;  %v153_v29 = vld [vmem:[%s4167_s1 + $0x3d8] sm:$0xff] }
  0x1c   :  { %2005 = vmatprep.subr.mxu1 %v81_v56  ;;  %1971 = vmatpush3.msra.mxu0 %v33_v58  ;;  %v139_v23 = vld [vmem:[%s4167_s1 + $0x368] sm:$0xff]  ;;  %v138_v27 = vld [vmem:[%s4167_s1 + $0x360] sm:$0xff]  ;;  %v105_v30 = vld [vmem:[%s4167_s1 + $0x258] sm:$0xff] }
  0x1d   :  { %2006 = vmatpush3.msra.mxu1 %v65_v59  ;;  %1972 = vmatprep.subr.mxu0 %v48_v60  ;;  %v137_v31 = vld [vmem:[%s4167_s1 + $0x358] sm:$0xff]  ;;  %v120_v32 = vld [vmem:[%s4167_s1 + $0x2d0] sm:$0xff]  ;;  %v119_v36 = vld [vmem:[%s4167_s1 + $0x2c8] sm:$0xff] }
  0x1e   :  { %2007 = vmatprep.subr.mxu1 %v80_v61  ;;  %1973 = vmatpush3.msra.mxu0 %v32_v63  ;;  %v152_v33 = vld [vmem:[%s4167_s1 + $0x3d0] sm:$0xff]  ;;  %v151_v37 = vld [vmem:[%s4167_s1 + $0x3c8] sm:$0xff]  ;;  %v118_v40 = vld [vmem:[%s4167_s1 + $0x2c0] sm:$0xff] }
  0x1f   :  { %2008 = vmatpush3.msra.mxu1 %v64_v0  ;;  %1974 = vmatprep.subr.mxu0 %v47_v1  ;;  %v104_v34 = vld [vmem:[%s4167_s1 + $0x250] sm:$0xff]  ;;  %v103_v38 = vld [vmem:[%s4167_s1 + $0x248] sm:$0xff]  ;;  %v150_v41 = vld [vmem:[%s4167_s1 + $0x3c0] sm:$0xff] }
  0x20   :  { %2009 = vmatprep.subr.mxu1 %v79_v2  ;;  %1975 = vmatpush3.msra.mxu0 %v31_v4  ;;  %v136_v35 = vld [vmem:[%s4167_s1 + $0x350] sm:$0xff]  ;;  %v135_v39 = vld [vmem:[%s4167_s1 + $0x348] sm:$0xff]  ;;  %v102_v42 = vld [vmem:[%s4167_s1 + $0x240] sm:$0xff] }
  0x21   :  { %2010 = vmatpush3.msra.mxu1 %v63_v5  ;;  %1976 = vmatprep.subr.mxu0 %v46_v6  ;;  %v134_v43 = vld [vmem:[%s4167_s1 + $0x340] sm:$0xff]  ;;  %v117_v44 = vld [vmem:[%s4167_s1 + $0x2b8] sm:$0xff]  ;;  %v116_v48 = vld [vmem:[%s4167_s1 + $0x2b0] sm:$0xff] }
  0x22   :  { %2011 = vmatprep.subr.mxu1 %v78_v7  ;;  %1977 = vmatpush3.msra.mxu0 %v30_v9  ;;  %v149_v45 = vld [vmem:[%s4167_s1 + $0x3b8] sm:$0xff]  ;;  %v148_v49 = vld [vmem:[%s4167_s1 + $0x3b0] sm:$0xff]  ;;  %v115_v53 = vld [vmem:[%s4167_s1 + $0x2a8] sm:$0xff] }
  0x23   :  { %789 = vmatprep.mubr.f32.mxu0 %v572_v8  ;;  %2012 = vmatpush3.msra.mxu1 %v62_v10  ;;  %v101_v46 = vld [vmem:[%s4167_s1 + $0x238] sm:$0xff]  ;;  %v100_v50 = vld [vmem:[%s4167_s1 + $0x230] sm:$0xff]  ;;  %v147_v54 = vld [vmem:[%s4167_s1 + $0x3a8] sm:$0xff] }
  0x24   :  { %790 = vmatmul.mubr.f32.vlgmr.msra.gmra.mxu0 %v564_v62  ;;  %859 = vmatprep.mubr.f32.mxu1 %v573_v11  ;;  %v133_v47 = vld [vmem:[%s4167_s1 + $0x338] sm:$0xff]  ;;  %v132_v52 = vld [vmem:[%s4167_s1 + $0x330] sm:$0xff]  ;;  %v99_v55 = vld [vmem:[%s4167_s1 + $0x228] sm:$0xff] }
  0x25   :  { %2016 = vmatprep.subr.mxu0 %v125_v12  ;;  %2051 = vmatprep.subr.mxu1 %v157_v13  ;;  %v131_v56 = vld [vmem:[%s4167_s1 + $0x328] sm:$0xff]  ;;  %v114_v58 = vld [vmem:[%s4167_s1 + $0x2a0] sm:$0xff]  ;;  %v113_v62 = vld [vmem:[%s4167_s1 + $0x298] sm:$0xff] }
  0x26   :  { %860 = vmatmul.mubr.f32.vlgmr.msra.gmra.mxu1 %v571_v3  ;;  %2017 = vmatpush3.msra.mxu0 %v109_v14  ;;  %v23_v57 = vld [vmem:[%s4168_s0 + $0x8] sm:$0xff]  ;;  %v146_v59 = vld [vmem:[%s4167_s1 + $0x3a0] sm:$0xff]  ;;  %v145_v63 = vld [vmem:[%s4167_s1 + $0x398] sm:$0xff] }
  0x27   :  { %2052 = vmatpush3.msra.mxu1 %v141_v15  ;;  %2018 = vmatprep.subr.mxu0 %v124_v16  ;;  %v98_v60 = vld [vmem:[%s4167_s1 + $0x220] sm:$0xff]  ;;  %v574_v0 = vcombine.high %v23_v57, %v23_v57  ;;  %v97_v1 = vld [vmem:[%s4167_s1 + $0x218] sm:$0xff]  ;;  %v112_v3 = vld [vmem:[%s4167_s1 + $0x290] sm:$0xff]  ;;  %v581_v5 = vrot.slane %v23_v57, %v2706_v51 }
  0x28   :  { %2053 = vmatprep.subr.mxu1 %v156_v17  ;;  %2019 = vmatpush3.msra.mxu0 %v108_v18  ;;  %v130_v61 = vld [vmem:[%s4167_s1 + $0x320] sm:$0xff]  ;;  %v129_v2 = vld [vmem:[%s4167_s1 + $0x318] sm:$0xff]  ;;  %v144_v4 = vld [vmem:[%s4167_s1 + $0x390] sm:$0xff] }
  0x29   :  { %2054 = vmatpush3.msra.mxu1 %v140_v19  ;;  %2020 = vmatprep.subr.mxu0 %v123_v20  ;;  %v96_v6 = vld [vmem:[%s4167_s1 + $0x210] sm:$0xff]  ;;  %v111_v8 = vld [vmem:[%s4167_s1 + $0x288] sm:$0xff]  ;;  %v588_v10 = vrot.slane %v574_v0, %v2706_v51  ;;  %v110_v13 = vld [vmem:[%s4167_s1 + $0x280] sm:$0xff]  ;;  %v589_v15 = vcombine.high %v581_v5, %v581_v5 }
  0x2a   :  { %2055 = vmatprep.subr.mxu1 %v155_v21  ;;  %2021 = vmatpush3.msra.mxu0 %v107_v22  ;;  %v128_v7 = vld [vmem:[%s4167_s1 + $0x310] sm:$0xff]  ;;  %v143_v9 = vld [vmem:[%s4167_s1 + $0x388] sm:$0xff]  ;;  %v142_v14 = vld [vmem:[%s4167_s1 + $0x380] sm:$0xff] }
  0x2b   :  { %2056 = vmatpush3.msra.mxu1 %v139_v23  ;;  %2022 = vmatprep.subr.mxu0 %v122_v24  ;;  %v95_v11 = vld [vmem:[%s4167_s1 + $0x208] sm:$0xff]  ;;  %v94_v16 = vld [vmem:[%s4167_s1 + $0x200] sm:$0xff]  ;;  %v590_v18 = vcombine.high %v588_v10, %v588_v10  ;;  %v189_v19 = vld [vmem:[%s4167_s1 + $0x4f8] sm:$0xff] }
  0x2c   :  { %2057 = vmatprep.subr.mxu1 %v154_v25  ;;  %2023 = vmatpush3.msra.mxu0 %v106_v26  ;;  %v127_v12 = vld [vmem:[%s4167_s1 + $0x308] sm:$0xff]  ;;  %v126_v17 = vld [vmem:[%s4167_s1 + $0x300] sm:$0xff]  ;;  %v221_v20 = vld [vmem:[%s4167_s1 + $0x5f8] sm:$0xff] }
  0x2d   :  { %2058 = vmatpush3.msra.mxu1 %v138_v27  ;;  %2024 = vmatprep.subr.mxu0 %v121_v28  ;;  %v173_v21 = vld [vmem:[%s4167_s1 + $0x478] sm:$0xff]  ;;  %v188_v23 = vld [vmem:[%s4167_s1 + $0x4f0] sm:$0xff]  ;;  %v187_v27 = vld [vmem:[%s4167_s1 + $0x4e8] sm:$0xff] }
  0x2e   :  { %2059 = vmatprep.subr.mxu1 %v153_v29  ;;  %2025 = vmatpush3.msra.mxu0 %v105_v30  ;;  %v205_v22 = vld [vmem:[%s4167_s1 + $0x578] sm:$0xff]  ;;  %v220_v24 = vld [vmem:[%s4167_s1 + $0x5f0] sm:$0xff]  ;;  %v219_v28 = vld [vmem:[%s4167_s1 + $0x5e8] sm:$0xff] }
  0x2f   :  { %2060 = vmatpush3.msra.mxu1 %v137_v31  ;;  %2026 = vmatprep.subr.mxu0 %v120_v32  ;;  %v172_v25 = vld [vmem:[%s4167_s1 + $0x470] sm:$0xff]  ;;  %v171_v29 = vld [vmem:[%s4167_s1 + $0x468] sm:$0xff]  ;;  %v186_v31 = vld [vmem:[%s4167_s1 + $0x4e0] sm:$0xff] }
  0x30   :  { %2061 = vmatprep.subr.mxu1 %v152_v33  ;;  %2027 = vmatpush3.msra.mxu0 %v104_v34  ;;  %v204_v26 = vld [vmem:[%s4167_s1 + $0x570] sm:$0xff]  ;;  %v203_v30 = vld [vmem:[%s4167_s1 + $0x568] sm:$0xff]  ;;  %v218_v32 = vld [vmem:[%s4167_s1 + $0x5e0] sm:$0xff] }
  0x31   :  { %2062 = vmatpush3.msra.mxu1 %v136_v35  ;;  %2028 = vmatprep.subr.mxu0 %v119_v36  ;;  %v170_v33 = vld [vmem:[%s4167_s1 + $0x460] sm:$0xff]  ;;  %v185_v35 = vld [vmem:[%s4167_s1 + $0x4d8] sm:$0xff]  ;;  %v212_v57 = vld [vmem:[%s4167_s1 + $0x5b0] sm:$0xff] }
  0x32   :  { %2063 = vmatprep.subr.mxu1 %v151_v37  ;;  %2029 = vmatpush3.msra.mxu0 %v103_v38  ;;  %v202_v34 = vld [vmem:[%s4167_s1 + $0x560] sm:$0xff]  ;;  %v217_v36 = vld [vmem:[%s4167_s1 + $0x5d8] sm:$0xff]  ;;  %v24_v0 = vld [vmem:[%s4168_s0 + $0x10] sm:$0xff] }
  0x33   :  { %2064 = vmatpush3.msra.mxu1 %v135_v39  ;;  %2030 = vmatprep.subr.mxu0 %v118_v40  ;;  %v169_v37 = vld [vmem:[%s4167_s1 + $0x458] sm:$0xff]  ;;  %v184_v39 = vld [vmem:[%s4167_s1 + $0x4d0] sm:$0xff] }
  0x34   :  { %2065 = vmatprep.subr.mxu1 %v150_v41  ;;  %2031 = vmatpush3.msra.mxu0 %v102_v42  ;;  %v201_v38 = vld [vmem:[%s4167_s1 + $0x558] sm:$0xff]  ;;  %v216_v40 = vld [vmem:[%s4167_s1 + $0x5d0] sm:$0xff] }
  0x35   :  { %2066 = vmatpush3.msra.mxu1 %v134_v43  ;;  %2032 = vmatprep.subr.mxu0 %v117_v44  ;;  %v168_v41 = vld [vmem:[%s4167_s1 + $0x450] sm:$0xff]  ;;  %v183_v43 = vld [vmem:[%s4167_s1 + $0x4c8] sm:$0xff] }
  0x36   :  { %2067 = vmatprep.subr.mxu1 %v149_v45  ;;  %2033 = vmatpush3.msra.mxu0 %v101_v46  ;;  %v200_v42 = vld [vmem:[%s4167_s1 + $0x550] sm:$0xff]  ;;  %v215_v44 = vld [vmem:[%s4167_s1 + $0x5c8] sm:$0xff] }
  0x37   :  { %2068 = vmatpush3.msra.mxu1 %v133_v47  ;;  %2034 = vmatprep.subr.mxu0 %v116_v48  ;;  %v167_v45 = vld [vmem:[%s4167_s1 + $0x448] sm:$0xff]  ;;  %v182_v47 = vld [vmem:[%s4167_s1 + $0x4c0] sm:$0xff] }
  0x38   :  { %2069 = vmatprep.subr.mxu1 %v148_v49  ;;  %2035 = vmatpush3.msra.mxu0 %v100_v50  ;;  %v199_v46 = vld [vmem:[%s4167_s1 + $0x548] sm:$0xff]  ;;  %v214_v48 = vld [vmem:[%s4167_s1 + $0x5c0] sm:$0xff] }
  0x39   :  { %2070 = vmatpush3.msra.mxu1 %v132_v52  ;;  %2036 = vmatprep.subr.mxu0 %v115_v53  ;;  %v166_v49 = vld [vmem:[%s4167_s1 + $0x440] sm:$0xff]  ;;  %v181_v52 = vld [vmem:[%s4167_s1 + $0x4b8] sm:$0xff] }
  0x3a   :  { %2071 = vmatprep.subr.mxu1 %v147_v54  ;;  %2037 = vmatpush3.msra.mxu0 %v99_v55  ;;  %v198_v50 = vld [vmem:[%s4167_s1 + $0x540] sm:$0xff]  ;;  %v213_v53 = vld [vmem:[%s4167_s1 + $0x5b8] sm:$0xff] }
  0x3b   :  { %2072 = vmatpush3.msra.mxu1 %v131_v56  ;;  %2038 = vmatprep.subr.mxu0 %v114_v58  ;;  %v165_v54 = vld [vmem:[%s4167_s1 + $0x438] sm:$0xff]  ;;  %v180_v56 = vld [vmem:[%s4167_s1 + $0x4b0] sm:$0xff] }
  0x3c   :  { %2073 = vmatprep.subr.mxu1 %v146_v59  ;;  %2039 = vmatpush3.msra.mxu0 %v98_v60  ;;  %v197_v55 = vld [vmem:[%s4167_s1 + $0x538] sm:$0xff]  ;;  %v164_v58 = vld [vmem:[%s4167_s1 + $0x430] sm:$0xff]  ;;  %v179_v60 = vld [vmem:[%s4167_s1 + $0x4a8] sm:$0xff] }
  0x3d   :  { %2074 = vmatpush3.msra.mxu1 %v130_v61  ;;  %2040 = vmatprep.subr.mxu0 %v113_v62  ;;  %v196_v59 = vld [vmem:[%s4167_s1 + $0x530] sm:$0xff]  ;;  %v211_v61 = vld [vmem:[%s4167_s1 + $0x5a8] sm:$0xff] }
  0x3e   :  { %2075 = vmatprep.subr.mxu1 %v145_v63  ;;  %2041 = vmatpush3.msra.mxu0 %v97_v1  ;;  %v163_v62 = vld [vmem:[%s4167_s1 + $0x428] sm:$0xff]  ;;  %v178_v1 = vld [vmem:[%s4167_s1 + $0x4a0] sm:$0xff] }
  0x3f   :  { %2076 = vmatpush3.msra.mxu1 %v129_v2  ;;  %2042 = vmatprep.subr.mxu0 %v112_v3  ;;  %v195_v63 = vld [vmem:[%s4167_s1 + $0x528] sm:$0xff]  ;;  %v210_v2 = vld [vmem:[%s4167_s1 + $0x5a0] sm:$0xff] }
  0x40   :  { %2077 = vmatprep.subr.mxu1 %v144_v4  ;;  %2043 = vmatpush3.msra.mxu0 %v96_v6  ;;  %v162_v3 = vld [vmem:[%s4167_s1 + $0x420] sm:$0xff]  ;;  %v209_v6 = vld [vmem:[%s4167_s1 + $0x598] sm:$0xff] }
  0x41   :  { %2078 = vmatpush3.msra.mxu1 %v128_v7  ;;  %2044 = vmatprep.subr.mxu0 %v111_v8  ;;  %v194_v4 = vld [vmem:[%s4167_s1 + $0x520] sm:$0xff]  ;;  %v591_v7 = vcombine.high %v24_v0, %v24_v0  ;;  %v161_v8 = vld [vmem:[%s4167_s1 + $0x418] sm:$0xff] }
  0x42   :  { %2079 = vmatprep.subr.mxu1 %v143_v9  ;;  %2045 = vmatpush3.msra.mxu0 %v95_v11  ;;  %v193_v9 = vld [vmem:[%s4167_s1 + $0x518] sm:$0xff]  ;;  %v208_v11 = vld [vmem:[%s4167_s1 + $0x590] sm:$0xff] }
  0x43   :  { %2080 = vmatpush3.msra.mxu1 %v127_v12  ;;  %2046 = vmatprep.subr.mxu0 %v110_v13  ;;  %v598_v12 = vrot.slane %v24_v0, %v2706_v51  ;;  %v160_v13 = vld [vmem:[%s4167_s1 + $0x410] sm:$0xff] }
  0x44   :  { %2081 = vmatprep.subr.mxu1 %v142_v14  ;;  %2047 = vmatpush3.msra.mxu0 %v94_v16  ;;  %v192_v14 = vld [vmem:[%s4167_s1 + $0x510] sm:$0xff]  ;;  %v207_v16 = vld [vmem:[%s4167_s1 + $0x588] sm:$0xff] }
  0x45   :  { %929 = vmatprep.mubr.f32.mxu0 %v589_v15  ;;  %2082 = vmatpush3.msra.mxu1 %v126_v17  ;;  %v175_v15 = vld [vmem:[%s4167_s1 + $0x488] sm:$0xff]  ;;  %v605_v17 = vrot.slane %v591_v7, %v2706_v51  ;;  %v276_v0 = vld [vmem:[%s4167_s1 + $0x7b0] sm:$0xff]  ;;  %v25_v7 = vld [vmem:[%s4168_s0 + $0x18] sm:$0xff] }
  0x46   :  { %930 = vmatmul.mubr.f32.vlgmr.msra.gmra.mxu0 %v581_v5  ;;  %999 = vmatprep.mubr.f32.mxu1 %v590_v18  ;;  %v177_v5 = vld [vmem:[%s4167_s1 + $0x498] sm:$0xff]  ;;  %v159_v18 = vld [vmem:[%s4167_s1 + $0x408] sm:$0xff] }
  0x47   :  { %2086 = vmatprep.subr.mxu0 %v189_v19  ;;  %2121 = vmatprep.subr.mxu1 %v221_v20  ;;  %v191_v19 = vld [vmem:[%s4167_s1 + $0x508] sm:$0xff]  ;;  %v174_v20 = vld [vmem:[%s4167_s1 + $0x480] sm:$0xff] }
  0x48   :  { %1000 = vmatmul.mubr.f32.vlgmr.msra.gmra.mxu1 %v588_v10  ;;  %2087 = vmatpush3.msra.mxu0 %v173_v21  ;;  %v176_v10 = vld [vmem:[%s4167_s1 + $0x490] sm:$0xff]  ;;  %v206_v21 = vld [vmem:[%s4167_s1 + $0x580] sm:$0xff] }
  0x49   :  { %2122 = vmatpush3.msra.mxu1 %v205_v22  ;;  %2088 = vmatprep.subr.mxu0 %v188_v23  ;;  %v606_v22 = vcombine.high %v598_v12, %v598_v12  ;;  %v158_v23 = vld [vmem:[%s4167_s1 + $0x400] sm:$0xff] }
  0x4a   :  { %2123 = vmatprep.subr.mxu1 %v220_v24  ;;  %2089 = vmatpush3.msra.mxu0 %v172_v25  ;;  %v190_v24 = vld [vmem:[%s4167_s1 + $0x500] sm:$0xff]  ;;  %v607_v25 = vcombine.high %v605_v17, %v605_v17 }
  0x4b   :  { %2124 = vmatpush3.msra.mxu1 %v204_v26  ;;  %2090 = vmatprep.subr.mxu0 %v187_v27  ;;  %v253_v26 = vld [vmem:[%s4167_s1 + $0x6f8] sm:$0xff] }
  0x4c   :  { %2125 = vmatprep.subr.mxu1 %v219_v28  ;;  %2091 = vmatpush3.msra.mxu0 %v171_v29  ;;  %v285_v27 = vld [vmem:[%s4167_s1 + $0x7f8] sm:$0xff] }
  0x4d   :  { %2126 = vmatpush3.msra.mxu1 %v203_v30  ;;  %2092 = vmatprep.subr.mxu0 %v186_v31  ;;  %v237_v28 = vld [vmem:[%s4167_s1 + $0x678] sm:$0xff]  ;;  %v252_v30 = vld [vmem:[%s4167_s1 + $0x6f0] sm:$0xff] }
  0x4e   :  { %2127 = vmatprep.subr.mxu1 %v218_v32  ;;  %2093 = vmatpush3.msra.mxu0 %v170_v33  ;;  %v269_v29 = vld [vmem:[%s4167_s1 + $0x778] sm:$0xff]  ;;  %v284_v31 = vld [vmem:[%s4167_s1 + $0x7f0] sm:$0xff] }
  0x4f   :  { %2128 = vmatpush3.msra.mxu1 %v202_v34  ;;  %2094 = vmatprep.subr.mxu0 %v185_v35  ;;  %v236_v32 = vld [vmem:[%s4167_s1 + $0x670] sm:$0xff]  ;;  %v251_v34 = vld [vmem:[%s4167_s1 + $0x6e8] sm:$0xff] }
  0x50   :  { %2129 = vmatprep.subr.mxu1 %v217_v36  ;;  %2095 = vmatpush3.msra.mxu0 %v169_v37  ;;  %v268_v33 = vld [vmem:[%s4167_s1 + $0x770] sm:$0xff]  ;;  %v283_v35 = vld [vmem:[%s4167_s1 + $0x7e8] sm:$0xff] }
  0x51   :  { %2130 = vmatpush3.msra.mxu1 %v201_v38  ;;  %2096 = vmatprep.subr.mxu0 %v184_v39  ;;  %v235_v36 = vld [vmem:[%s4167_s1 + $0x668] sm:$0xff]  ;;  %v250_v38 = vld [vmem:[%s4167_s1 + $0x6e0] sm:$0xff] }
  0x52   :  { %2131 = vmatprep.subr.mxu1 %v216_v40  ;;  %2097 = vmatpush3.msra.mxu0 %v168_v41  ;;  %v267_v37 = vld [vmem:[%s4167_s1 + $0x768] sm:$0xff]  ;;  %v282_v39 = vld [vmem:[%s4167_s1 + $0x7e0] sm:$0xff] }
  0x53   :  { %2132 = vmatpush3.msra.mxu1 %v200_v42  ;;  %2098 = vmatprep.subr.mxu0 %v183_v43  ;;  %v234_v40 = vld [vmem:[%s4167_s1 + $0x660] sm:$0xff]  ;;  %v249_v42 = vld [vmem:[%s4167_s1 + $0x6d8] sm:$0xff] }
  0x54   :  { %2133 = vmatprep.subr.mxu1 %v215_v44  ;;  %2099 = vmatpush3.msra.mxu0 %v167_v45  ;;  %v266_v41 = vld [vmem:[%s4167_s1 + $0x760] sm:$0xff]  ;;  %v281_v43 = vld [vmem:[%s4167_s1 + $0x7d8] sm:$0xff] }
  0x55   :  { %2134 = vmatpush3.msra.mxu1 %v199_v46  ;;  %2100 = vmatprep.subr.mxu0 %v182_v47  ;;  %v233_v44 = vld [vmem:[%s4167_s1 + $0x658] sm:$0xff]  ;;  %v248_v46 = vld [vmem:[%s4167_s1 + $0x6d0] sm:$0xff] }
  0x56   :  { %2135 = vmatprep.subr.mxu1 %v214_v48  ;;  %2101 = vmatpush3.msra.mxu0 %v166_v49  ;;  %v265_v45 = vld [vmem:[%s4167_s1 + $0x758] sm:$0xff]  ;;  %v280_v47 = vld [vmem:[%s4167_s1 + $0x7d0] sm:$0xff] }
  0x57   :  { %2136 = vmatpush3.msra.mxu1 %v198_v50  ;;  %2102 = vmatprep.subr.mxu0 %v181_v52  ;;  %v232_v48 = vld [vmem:[%s4167_s1 + $0x650] sm:$0xff]  ;;  %v247_v50 = vld [vmem:[%s4167_s1 + $0x6c8] sm:$0xff] }
  0x58   :  { %2137 = vmatprep.subr.mxu1 %v213_v53  ;;  %2103 = vmatpush3.msra.mxu0 %v165_v54  ;;  %v264_v49 = vld [vmem:[%s4167_s1 + $0x750] sm:$0xff]  ;;  %v279_v52 = vld [vmem:[%s4167_s1 + $0x7c8] sm:$0xff] }
  0x59   :  { %2138 = vmatpush3.msra.mxu1 %v197_v55  ;;  %2104 = vmatprep.subr.mxu0 %v180_v56  ;;  %v231_v53 = vld [vmem:[%s4167_s1 + $0x648] sm:$0xff]  ;;  %v246_v55 = vld [vmem:[%s4167_s1 + $0x6c0] sm:$0xff] }
  0x5a   :  { %2139 = vmatprep.subr.mxu1 %v212_v57  ;;  %2105 = vmatpush3.msra.mxu0 %v164_v58  ;;  %v263_v54 = vld [vmem:[%s4167_s1 + $0x748] sm:$0xff]  ;;  %v278_v56 = vld [vmem:[%s4167_s1 + $0x7c0] sm:$0xff] }
  0x5b   :  { %2140 = vmatpush3.msra.mxu1 %v196_v59  ;;  %2106 = vmatprep.subr.mxu0 %v179_v60  ;;  %v230_v57 = vld [vmem:[%s4167_s1 + $0x640] sm:$0xff]  ;;  %v245_v59 = vld [vmem:[%s4167_s1 + $0x6b8] sm:$0xff] }
  0x5c   :  { %2141 = vmatprep.subr.mxu1 %v211_v61  ;;  %2107 = vmatpush3.msra.mxu0 %v163_v62  ;;  %v262_v58 = vld [vmem:[%s4167_s1 + $0x740] sm:$0xff]  ;;  %v277_v60 = vld [vmem:[%s4167_s1 + $0x7b8] sm:$0xff] }
  0x5d   :  { %2142 = vmatpush3.msra.mxu1 %v195_v63  ;;  %2108 = vmatprep.subr.mxu0 %v178_v1  ;;  %v229_v61 = vld [vmem:[%s4167_s1 + $0x638] sm:$0xff]  ;;  %v244_v63 = vld [vmem:[%s4167_s1 + $0x6b0] sm:$0xff] }
  0x5e   :  { %2143 = vmatprep.subr.mxu1 %v210_v2  ;;  %2109 = vmatpush3.msra.mxu0 %v162_v3  ;;  %v261_v62 = vld [vmem:[%s4167_s1 + $0x738] sm:$0xff]  ;;  %v228_v1 = vld [vmem:[%s4167_s1 + $0x630] sm:$0xff]  ;;  %v243_v3 = vld [vmem:[%s4167_s1 + $0x6a8] sm:$0xff] }
  0x5f   :  { %2144 = vmatpush3.msra.mxu1 %v194_v4  ;;  %2110 = vmatprep.subr.mxu0 %v177_v5  ;;  %v260_v2 = vld [vmem:[%s4167_s1 + $0x730] sm:$0xff]  ;;  %v275_v4 = vld [vmem:[%s4167_s1 + $0x7a8] sm:$0xff] }
  0x60   :  { %2145 = vmatprep.subr.mxu1 %v209_v6  ;;  %2111 = vmatpush3.msra.mxu0 %v161_v8  ;;  %v227_v5 = vld [vmem:[%s4167_s1 + $0x628] sm:$0xff]  ;;  %v242_v8 = vld [vmem:[%s4167_s1 + $0x6a0] sm:$0xff] }
  0x61   :  { %2146 = vmatpush3.msra.mxu1 %v193_v9  ;;  %2112 = vmatprep.subr.mxu0 %v176_v10  ;;  %v259_v6 = vld [vmem:[%s4167_s1 + $0x728] sm:$0xff]  ;;  %v274_v9 = vld [vmem:[%s4167_s1 + $0x7a0] sm:$0xff] }
  0x62   :  { %2147 = vmatprep.subr.mxu1 %v208_v11  ;;  %2113 = vmatpush3.msra.mxu0 %v160_v13  ;;  %v226_v10 = vld [vmem:[%s4167_s1 + $0x620] sm:$0xff]  ;;  %v273_v13 = vld [vmem:[%s4167_s1 + $0x798] sm:$0xff] }
  0x63   :  { %2148 = vmatpush3.msra.mxu1 %v192_v14  ;;  %2114 = vmatprep.subr.mxu0 %v175_v15  ;;  %v258_v11 = vld [vmem:[%s4167_s1 + $0x720] sm:$0xff]  ;;  %v608_v14 = vcombine.high %v25_v7, %v25_v7  ;;  %v225_v15 = vld [vmem:[%s4167_s1 + $0x618] sm:$0xff] }
  0x64   :  { %2149 = vmatprep.subr.mxu1 %v207_v16  ;;  %2115 = vmatpush3.msra.mxu0 %v159_v18  ;;  %v257_v16 = vld [vmem:[%s4167_s1 + $0x718] sm:$0xff]  ;;  %v272_v18 = vld [vmem:[%s4167_s1 + $0x790] sm:$0xff] }
  0x65   :  { %2150 = vmatpush3.msra.mxu1 %v191_v19  ;;  %2116 = vmatprep.subr.mxu0 %v174_v20  ;;  %v615_v19 = vrot.slane %v25_v7, %v2706_v51  ;;  %v224_v20 = vld [vmem:[%s4167_s1 + $0x610] sm:$0xff] }
  0x66   :  { %2151 = vmatprep.subr.mxu1 %v206_v21  ;;  %2117 = vmatpush3.msra.mxu0 %v158_v23  ;;  %v256_v21 = vld [vmem:[%s4167_s1 + $0x710] sm:$0xff]  ;;  %v271_v23 = vld [vmem:[%s4167_s1 + $0x788] sm:$0xff] }
  0x67   :  { %1069 = vmatprep.mubr.f32.mxu0 %v606_v22  ;;  %2152 = vmatpush3.msra.mxu1 %v190_v24  ;;  %v239_v22 = vld [vmem:[%s4167_s1 + $0x688] sm:$0xff]  ;;  %v622_v24 = vrot.slane %v608_v14, %v2706_v51  ;;  %v340_v7 = vld [vmem:[%s4167_s1 + $0x9b0] sm:$0xff]  ;;  %v26_v14 = vld [vmem:[%s4168_s0 + $0x20] sm:$0xff] }
  0x68   :  { %1070 = vmatmul.mubr.f32.vlgmr.msra.gmra.mxu0 %v598_v12  ;;  %1139 = vmatprep.mubr.f32.mxu1 %v607_v25  ;;  %v241_v12 = vld [vmem:[%s4167_s1 + $0x698] sm:$0xff]  ;;  %v223_v25 = vld [vmem:[%s4167_s1 + $0x608] sm:$0xff] }
  0x69   :  { %2156 = vmatprep.subr.mxu0 %v253_v26  ;;  %2191 = vmatprep.subr.mxu1 %v285_v27  ;;  %v255_v26 = vld [vmem:[%s4167_s1 + $0x708] sm:$0xff]  ;;  %v238_v27 = vld [vmem:[%s4167_s1 + $0x680] sm:$0xff] }
  0x6a   :  { %1140 = vmatmul.mubr.f32.vlgmr.msra.gmra.mxu1 %v605_v17  ;;  %2157 = vmatpush3.msra.mxu0 %v237_v28  ;;  %v240_v17 = vld [vmem:[%s4167_s1 + $0x690] sm:$0xff]  ;;  %v270_v28 = vld [vmem:[%s4167_s1 + $0x780] sm:$0xff] }
  0x6b   :  { %2192 = vmatpush3.msra.mxu1 %v269_v29  ;;  %2158 = vmatprep.subr.mxu0 %v252_v30  ;;  %v623_v29 = vcombine.high %v615_v19, %v615_v19  ;;  %v222_v30 = vld [vmem:[%s4167_s1 + $0x600] sm:$0xff] }
  0x6c   :  { %2193 = vmatprep.subr.mxu1 %v284_v31  ;;  %2159 = vmatpush3.msra.mxu0 %v236_v32  ;;  %v254_v31 = vld [vmem:[%s4167_s1 + $0x700] sm:$0xff]  ;;  %v624_v32 = vcombine.high %v622_v24, %v622_v24 }
  0x6d   :  { %2194 = vmatpush3.msra.mxu1 %v268_v33  ;;  %2160 = vmatprep.subr.mxu0 %v251_v34  ;;  %v317_v33 = vld [vmem:[%s4167_s1 + $0x8f8] sm:$0xff] }
  0x6e   :  { %2195 = vmatprep.subr.mxu1 %v283_v35  ;;  %2161 = vmatpush3.msra.mxu0 %v235_v36  ;;  %v349_v34 = vld [vmem:[%s4167_s1 + $0x9f8] sm:$0xff] }
  0x6f   :  { %2196 = vmatpush3.msra.mxu1 %v267_v37  ;;  %2162 = vmatprep.subr.mxu0 %v250_v38  ;;  %v301_v35 = vld [vmem:[%s4167_s1 + $0x878] sm:$0xff]  ;;  %v316_v37 = vld [vmem:[%s4167_s1 + $0x8f0] sm:$0xff] }
  0x70   :  { %2197 = vmatprep.subr.mxu1 %v282_v39  ;;  %2163 = vmatpush3.msra.mxu0 %v234_v40  ;;  %v333_v36 = vld [vmem:[%s4167_s1 + $0x978] sm:$0xff]  ;;  %v348_v38 = vld [vmem:[%s4167_s1 + $0x9f0] sm:$0xff] }
  0x71   :  { %2198 = vmatpush3.msra.mxu1 %v266_v41  ;;  %2164 = vmatprep.subr.mxu0 %v249_v42  ;;  %v300_v39 = vld [vmem:[%s4167_s1 + $0x870] sm:$0xff]  ;;  %v315_v41 = vld [vmem:[%s4167_s1 + $0x8e8] sm:$0xff] }
  0x72   :  { %2199 = vmatprep.subr.mxu1 %v281_v43  ;;  %2165 = vmatpush3.msra.mxu0 %v233_v44  ;;  %v332_v40 = vld [vmem:[%s4167_s1 + $0x970] sm:$0xff]  ;;  %v347_v42 = vld [vmem:[%s4167_s1 + $0x9e8] sm:$0xff] }
  0x73   :  { %2200 = vmatpush3.msra.mxu1 %v265_v45  ;;  %2166 = vmatprep.subr.mxu0 %v248_v46  ;;  %v299_v43 = vld [vmem:[%s4167_s1 + $0x868] sm:$0xff]  ;;  %v314_v45 = vld [vmem:[%s4167_s1 + $0x8e0] sm:$0xff] }
  0x74   :  { %2201 = vmatprep.subr.mxu1 %v280_v47  ;;  %2167 = vmatpush3.msra.mxu0 %v232_v48  ;;  %v331_v44 = vld [vmem:[%s4167_s1 + $0x968] sm:$0xff]  ;;  %v346_v46 = vld [vmem:[%s4167_s1 + $0x9e0] sm:$0xff] }
  0x75   :  { %2202 = vmatpush3.msra.mxu1 %v264_v49  ;;  %2168 = vmatprep.subr.mxu0 %v247_v50  ;;  %v298_v47 = vld [vmem:[%s4167_s1 + $0x860] sm:$0xff]  ;;  %v313_v49 = vld [vmem:[%s4167_s1 + $0x8d8] sm:$0xff] }
  0x76   :  { %2203 = vmatprep.subr.mxu1 %v279_v52  ;;  %2169 = vmatpush3.msra.mxu0 %v231_v53  ;;  %v330_v48 = vld [vmem:[%s4167_s1 + $0x960] sm:$0xff]  ;;  %v345_v50 = vld [vmem:[%s4167_s1 + $0x9d8] sm:$0xff] }
  0x77   :  { %2204 = vmatpush3.msra.mxu1 %v263_v54  ;;  %2170 = vmatprep.subr.mxu0 %v246_v55  ;;  %v297_v52 = vld [vmem:[%s4167_s1 + $0x858] sm:$0xff]  ;;  %v312_v54 = vld [vmem:[%s4167_s1 + $0x8d0] sm:$0xff] }
  0x78   :  { %2205 = vmatprep.subr.mxu1 %v278_v56  ;;  %2171 = vmatpush3.msra.mxu0 %v230_v57  ;;  %v329_v53 = vld [vmem:[%s4167_s1 + $0x958] sm:$0xff]  ;;  %v344_v55 = vld [vmem:[%s4167_s1 + $0x9d0] sm:$0xff] }
  0x79   :  { %2206 = vmatpush3.msra.mxu1 %v262_v58  ;;  %2172 = vmatprep.subr.mxu0 %v245_v59  ;;  %v296_v56 = vld [vmem:[%s4167_s1 + $0x850] sm:$0xff]  ;;  %v311_v58 = vld [vmem:[%s4167_s1 + $0x8c8] sm:$0xff] }
  0x7a   :  { %2207 = vmatprep.subr.mxu1 %v277_v60  ;;  %2173 = vmatpush3.msra.mxu0 %v229_v61  ;;  %v328_v57 = vld [vmem:[%s4167_s1 + $0x950] sm:$0xff]  ;;  %v343_v59 = vld [vmem:[%s4167_s1 + $0x9c8] sm:$0xff] }
  0x7b   :  { %2208 = vmatpush3.msra.mxu1 %v261_v62  ;;  %2174 = vmatprep.subr.mxu0 %v244_v63  ;;  %v295_v60 = vld [vmem:[%s4167_s1 + $0x848] sm:$0xff]  ;;  %v310_v62 = vld [vmem:[%s4167_s1 + $0x8c0] sm:$0xff] }
  0x7c   :  { %2209 = vmatprep.subr.mxu1 %v276_v0  ;;  %2175 = vmatpush3.msra.mxu0 %v228_v1  ;;  %v327_v61 = vld [vmem:[%s4167_s1 + $0x948] sm:$0xff]  ;;  %v342_v63 = vld [vmem:[%s4167_s1 + $0x9c0] sm:$0xff] }
  0x7d   :  { %2210 = vmatpush3.msra.mxu1 %v260_v2  ;;  %2176 = vmatprep.subr.mxu0 %v243_v3  ;;  %v294_v0 = vld [vmem:[%s4167_s1 + $0x840] sm:$0xff]  ;;  %v309_v2 = vld [vmem:[%s4167_s1 + $0x8b8] sm:$0xff] }
  0x7e   :  { %2211 = vmatprep.subr.mxu1 %v275_v4  ;;  %2177 = vmatpush3.msra.mxu0 %v227_v5  ;;  %v326_v1 = vld [vmem:[%s4167_s1 + $0x940] sm:$0xff]  ;;  %v341_v3 = vld [vmem:[%s4167_s1 + $0x9b8] sm:$0xff] }
  0x7f   :  { %2212 = vmatpush3.msra.mxu1 %v259_v6  ;;  %2178 = vmatprep.subr.mxu0 %v242_v8  ;;  %v293_v4 = vld [vmem:[%s4167_s1 + $0x838] sm:$0xff]  ;;  %v308_v6 = vld [vmem:[%s4167_s1 + $0x8b0] sm:$0xff] }
  0x80   :  { %2213 = vmatprep.subr.mxu1 %v274_v9  ;;  %2179 = vmatpush3.msra.mxu0 %v226_v10  ;;  %v325_v5 = vld [vmem:[%s4167_s1 + $0x938] sm:$0xff]  ;;  %v292_v8 = vld [vmem:[%s4167_s1 + $0x830] sm:$0xff]  ;;  %v307_v10 = vld [vmem:[%s4167_s1 + $0x8a8] sm:$0xff] }
  0x81   :  { %2214 = vmatpush3.msra.mxu1 %v258_v11  ;;  %2180 = vmatprep.subr.mxu0 %v241_v12  ;;  %v324_v9 = vld [vmem:[%s4167_s1 + $0x930] sm:$0xff]  ;;  %v339_v11 = vld [vmem:[%s4167_s1 + $0x9a8] sm:$0xff] }
  0x82   :  { %2215 = vmatprep.subr.mxu1 %v273_v13  ;;  %2181 = vmatpush3.msra.mxu0 %v225_v15  ;;  %v291_v12 = vld [vmem:[%s4167_s1 + $0x828] sm:$0xff]  ;;  %v306_v15 = vld [vmem:[%s4167_s1 + $0x8a0] sm:$0xff] }
  0x83   :  { %2216 = vmatpush3.msra.mxu1 %v257_v16  ;;  %2182 = vmatprep.subr.mxu0 %v240_v17  ;;  %v323_v13 = vld [vmem:[%s4167_s1 + $0x928] sm:$0xff]  ;;  %v338_v16 = vld [vmem:[%s4167_s1 + $0x9a0] sm:$0xff] }
  0x84   :  { %2217 = vmatprep.subr.mxu1 %v272_v18  ;;  %2183 = vmatpush3.msra.mxu0 %v224_v20  ;;  %v290_v17 = vld [vmem:[%s4167_s1 + $0x820] sm:$0xff]  ;;  %v337_v20 = vld [vmem:[%s4167_s1 + $0x998] sm:$0xff] }
  0x85   :  { %2218 = vmatpush3.msra.mxu1 %v256_v21  ;;  %2184 = vmatprep.subr.mxu0 %v239_v22  ;;  %v322_v18 = vld [vmem:[%s4167_s1 + $0x920] sm:$0xff]  ;;  %v625_v21 = vcombine.high %v26_v14, %v26_v14  ;;  %v289_v22 = vld [vmem:[%s4167_s1 + $0x818] sm:$0xff] }
  0x86   :  { %2219 = vmatprep.subr.mxu1 %v271_v23  ;;  %2185 = vmatpush3.msra.mxu0 %v223_v25  ;;  %v321_v23 = vld [vmem:[%s4167_s1 + $0x918] sm:$0xff]  ;;  %v336_v25 = vld [vmem:[%s4167_s1 + $0x990] sm:$0xff] }
  0x87   :  { %2220 = vmatpush3.msra.mxu1 %v255_v26  ;;  %2186 = vmatprep.subr.mxu0 %v238_v27  ;;  %v632_v26 = vrot.slane %v26_v14, %v2706_v51  ;;  %v288_v27 = vld [vmem:[%s4167_s1 + $0x810] sm:$0xff] }
  0x88   :  { %2221 = vmatprep.subr.mxu1 %v270_v28  ;;  %2187 = vmatpush3.msra.mxu0 %v222_v30  ;;  %v320_v28 = vld [vmem:[%s4167_s1 + $0x910] sm:$0xff]  ;;  %v335_v30 = vld [vmem:[%s4167_s1 + $0x988] sm:$0xff] }
  0x89   :  { %1209 = vmatprep.mubr.f32.mxu0 %v623_v29  ;;  %2222 = vmatpush3.msra.mxu1 %v254_v31  ;;  %v303_v29 = vld [vmem:[%s4167_s1 + $0x888] sm:$0xff]  ;;  %v639_v31 = vrot.slane %v625_v21, %v2706_v51  ;;  %v404_v14 = vld [vmem:[%s4167_s1 + $0xbb0] sm:$0xff] }
  0x8a   :  { %1210 = vmatmul.mubr.f32.vlgmr.msra.gmra.mxu0 %v615_v19  ;;  %1279 = vmatprep.mubr.f32.mxu1 %v624_v32  ;;  %v305_v19 = vld [vmem:[%s4167_s1 + $0x898] sm:$0xff]  ;;  %v287_v32 = vld [vmem:[%s4167_s1 + $0x808] sm:$0xff] }
  0x8b   :  { %2226 = vmatprep.subr.mxu0 %v317_v33  ;;  %2261 = vmatprep.subr.mxu1 %v349_v34  ;;  %v319_v33 = vld [vmem:[%s4167_s1 + $0x908] sm:$0xff]  ;;  %v302_v34 = vld [vmem:[%s4167_s1 + $0x880] sm:$0xff] }
  0x8c   :  { %1280 = vmatmul.mubr.f32.vlgmr.msra.gmra.mxu1 %v622_v24  ;;  %2227 = vmatpush3.msra.mxu0 %v301_v35  ;;  %v304_v24 = vld [vmem:[%s4167_s1 + $0x890] sm:$0xff]  ;;  %v334_v35 = vld [vmem:[%s4167_s1 + $0x980] sm:$0xff]  ;;  %v27_v21 = vld [vmem:[%s4168_s0 + $0x28] sm:$0xff] }
  0x8d   :  { %2262 = vmatpush3.msra.mxu1 %v333_v36  ;;  %2228 = vmatprep.subr.mxu0 %v316_v37  ;;  %v640_v36 = vcombine.high %v632_v26, %v632_v26  ;;  %v286_v37 = vld [vmem:[%s4167_s1 + $0x800] sm:$0xff] }
  0x8e   :  { %2263 = vmatprep.subr.mxu1 %v348_v38  ;;  %2229 = vmatpush3.msra.mxu0 %v300_v39  ;;  %v318_v38 = vld [vmem:[%s4167_s1 + $0x900] sm:$0xff]  ;;  %v641_v39 = vcombine.high %v639_v31, %v639_v31 }
  0x8f   :  { %2264 = vmatpush3.msra.mxu1 %v332_v40  ;;  %2230 = vmatprep.subr.mxu0 %v315_v41  ;;  %v381_v40 = vld [vmem:[%s4167_s1 + $0xaf8] sm:$0xff] }
  0x90   :  { %2265 = vmatprep.subr.mxu1 %v347_v42  ;;  %2231 = vmatpush3.msra.mxu0 %v299_v43  ;;  %v413_v41 = vld [vmem:[%s4167_s1 + $0xbf8] sm:$0xff] }
  0x91   :  { %2266 = vmatpush3.msra.mxu1 %v331_v44  ;;  %2232 = vmatprep.subr.mxu0 %v314_v45  ;;  %v365_v42 = vld [vmem:[%s4167_s1 + $0xa78] sm:$0xff]  ;;  %v380_v44 = vld [vmem:[%s4167_s1 + $0xaf0] sm:$0xff] }
  0x92   :  { %2267 = vmatprep.subr.mxu1 %v346_v46  ;;  %2233 = vmatpush3.msra.mxu0 %v298_v47  ;;  %v397_v43 = vld [vmem:[%s4167_s1 + $0xb78] sm:$0xff]  ;;  %v412_v45 = vld [vmem:[%s4167_s1 + $0xbf0] sm:$0xff] }
  0x93   :  { %2268 = vmatpush3.msra.mxu1 %v330_v48  ;;  %2234 = vmatprep.subr.mxu0 %v313_v49  ;;  %v364_v46 = vld [vmem:[%s4167_s1 + $0xa70] sm:$0xff]  ;;  %v379_v48 = vld [vmem:[%s4167_s1 + $0xae8] sm:$0xff] }
  0x94   :  { %2269 = vmatprep.subr.mxu1 %v345_v50  ;;  %2235 = vmatpush3.msra.mxu0 %v297_v52  ;;  %v396_v47 = vld [vmem:[%s4167_s1 + $0xb70] sm:$0xff]  ;;  %v411_v49 = vld [vmem:[%s4167_s1 + $0xbe8] sm:$0xff] }
  0x95   :  { %2270 = vmatpush3.msra.mxu1 %v329_v53  ;;  %2236 = vmatprep.subr.mxu0 %v312_v54  ;;  %v363_v50 = vld [vmem:[%s4167_s1 + $0xa68] sm:$0xff]  ;;  %v378_v53 = vld [vmem:[%s4167_s1 + $0xae0] sm:$0xff] }
  0x96   :  { %2271 = vmatprep.subr.mxu1 %v344_v55  ;;  %2237 = vmatpush3.msra.mxu0 %v296_v56  ;;  %v395_v52 = vld [vmem:[%s4167_s1 + $0xb68] sm:$0xff]  ;;  %v410_v54 = vld [vmem:[%s4167_s1 + $0xbe0] sm:$0xff] }
  0x97   :  { %2272 = vmatpush3.msra.mxu1 %v328_v57  ;;  %2238 = vmatprep.subr.mxu0 %v311_v58  ;;  %v362_v55 = vld [vmem:[%s4167_s1 + $0xa60] sm:$0xff]  ;;  %v377_v57 = vld [vmem:[%s4167_s1 + $0xad8] sm:$0xff] }
  0x98   :  { %2273 = vmatprep.subr.mxu1 %v343_v59  ;;  %2239 = vmatpush3.msra.mxu0 %v295_v60  ;;  %v394_v56 = vld [vmem:[%s4167_s1 + $0xb60] sm:$0xff]  ;;  %v409_v58 = vld [vmem:[%s4167_s1 + $0xbd8] sm:$0xff] }
  0x99   :  { %2274 = vmatpush3.msra.mxu1 %v327_v61  ;;  %2240 = vmatprep.subr.mxu0 %v310_v62  ;;  %v361_v59 = vld [vmem:[%s4167_s1 + $0xa58] sm:$0xff]  ;;  %v376_v61 = vld [vmem:[%s4167_s1 + $0xad0] sm:$0xff] }
  0x9a   :  { %2275 = vmatprep.subr.mxu1 %v342_v63  ;;  %2241 = vmatpush3.msra.mxu0 %v294_v0  ;;  %v393_v60 = vld [vmem:[%s4167_s1 + $0xb58] sm:$0xff]  ;;  %v408_v62 = vld [vmem:[%s4167_s1 + $0xbd0] sm:$0xff] }
  0x9b   :  { %2276 = vmatpush3.msra.mxu1 %v326_v1  ;;  %2242 = vmatprep.subr.mxu0 %v309_v2  ;;  %v360_v63 = vld [vmem:[%s4167_s1 + $0xa50] sm:$0xff]  ;;  %v375_v1 = vld [vmem:[%s4167_s1 + $0xac8] sm:$0xff] }
  0x9c   :  { %2277 = vmatprep.subr.mxu1 %v341_v3  ;;  %2243 = vmatpush3.msra.mxu0 %v293_v4  ;;  %v392_v0 = vld [vmem:[%s4167_s1 + $0xb50] sm:$0xff]  ;;  %v407_v2 = vld [vmem:[%s4167_s1 + $0xbc8] sm:$0xff] }
  0x9d   :  { %2278 = vmatpush3.msra.mxu1 %v325_v5  ;;  %2244 = vmatprep.subr.mxu0 %v308_v6  ;;  %v359_v3 = vld [vmem:[%s4167_s1 + $0xa48] sm:$0xff]  ;;  %v374_v5 = vld [vmem:[%s4167_s1 + $0xac0] sm:$0xff] }
  0x9e   :  { %2279 = vmatprep.subr.mxu1 %v340_v7  ;;  %2245 = vmatpush3.msra.mxu0 %v292_v8  ;;  %v391_v4 = vld [vmem:[%s4167_s1 + $0xb48] sm:$0xff]  ;;  %v406_v6 = vld [vmem:[%s4167_s1 + $0xbc0] sm:$0xff] }
  0x9f   :  { %2280 = vmatpush3.msra.mxu1 %v324_v9  ;;  %2246 = vmatprep.subr.mxu0 %v307_v10  ;;  %v358_v7 = vld [vmem:[%s4167_s1 + $0xa40] sm:$0xff]  ;;  %v373_v9 = vld [vmem:[%s4167_s1 + $0xab8] sm:$0xff] }
  0xa0   :  { %2281 = vmatprep.subr.mxu1 %v339_v11  ;;  %2247 = vmatpush3.msra.mxu0 %v291_v12  ;;  %v390_v8 = vld [vmem:[%s4167_s1 + $0xb40] sm:$0xff]  ;;  %v405_v10 = vld [vmem:[%s4167_s1 + $0xbb8] sm:$0xff] }
  0xa1   :  { %2282 = vmatpush3.msra.mxu1 %v323_v13  ;;  %2248 = vmatprep.subr.mxu0 %v306_v15  ;;  %v357_v11 = vld [vmem:[%s4167_s1 + $0xa38] sm:$0xff]  ;;  %v372_v13 = vld [vmem:[%s4167_s1 + $0xab0] sm:$0xff] }
  0xa2   :  { %2283 = vmatprep.subr.mxu1 %v338_v16  ;;  %2249 = vmatpush3.msra.mxu0 %v290_v17  ;;  %v389_v12 = vld [vmem:[%s4167_s1 + $0xb38] sm:$0xff]  ;;  %v356_v15 = vld [vmem:[%s4167_s1 + $0xa30] sm:$0xff]  ;;  %v371_v17 = vld [vmem:[%s4167_s1 + $0xaa8] sm:$0xff] }
  0xa3   :  { %2284 = vmatpush3.msra.mxu1 %v322_v18  ;;  %2250 = vmatprep.subr.mxu0 %v305_v19  ;;  %v388_v16 = vld [vmem:[%s4167_s1 + $0xb30] sm:$0xff]  ;;  %v403_v18 = vld [vmem:[%s4167_s1 + $0xba8] sm:$0xff] }
  0xa4   :  { %2285 = vmatprep.subr.mxu1 %v337_v20  ;;  %2251 = vmatpush3.msra.mxu0 %v289_v22  ;;  %v355_v19 = vld [vmem:[%s4167_s1 + $0xa28] sm:$0xff]  ;;  %v370_v22 = vld [vmem:[%s4167_s1 + $0xaa0] sm:$0xff] }
  0xa5   :  { %2286 = vmatpush3.msra.mxu1 %v321_v23  ;;  %2252 = vmatprep.subr.mxu0 %v304_v24  ;;  %v387_v20 = vld [vmem:[%s4167_s1 + $0xb28] sm:$0xff]  ;;  %v402_v23 = vld [vmem:[%s4167_s1 + $0xba0] sm:$0xff] }
  0xa6   :  { %2287 = vmatprep.subr.mxu1 %v336_v25  ;;  %2253 = vmatpush3.msra.mxu0 %v288_v27  ;;  %v354_v24 = vld [vmem:[%s4167_s1 + $0xa20] sm:$0xff]  ;;  %v401_v27 = vld [vmem:[%s4167_s1 + $0xb98] sm:$0xff] }
  0xa7   :  { %2288 = vmatpush3.msra.mxu1 %v320_v28  ;;  %2254 = vmatprep.subr.mxu0 %v303_v29  ;;  %v386_v25 = vld [vmem:[%s4167_s1 + $0xb20] sm:$0xff]  ;;  %v642_v28 = vcombine.high %v27_v21, %v27_v21  ;;  %v353_v29 = vld [vmem:[%s4167_s1 + $0xa18] sm:$0xff] }
  0xa8   :  { %2289 = vmatprep.subr.mxu1 %v335_v30  ;;  %2255 = vmatpush3.msra.mxu0 %v287_v32  ;;  %v385_v30 = vld [vmem:[%s4167_s1 + $0xb18] sm:$0xff]  ;;  %v400_v32 = vld [vmem:[%s4167_s1 + $0xb90] sm:$0xff] }
  0xa9   :  { %2290 = vmatpush3.msra.mxu1 %v319_v33  ;;  %2256 = vmatprep.subr.mxu0 %v302_v34  ;;  %v649_v33 = vrot.slane %v27_v21, %v2706_v51  ;;  %v352_v34 = vld [vmem:[%s4167_s1 + $0xa10] sm:$0xff] }
  0xaa   :  { %2291 = vmatprep.subr.mxu1 %v334_v35  ;;  %2257 = vmatpush3.msra.mxu0 %v286_v37  ;;  %v384_v35 = vld [vmem:[%s4167_s1 + $0xb10] sm:$0xff]  ;;  %v399_v37 = vld [vmem:[%s4167_s1 + $0xb88] sm:$0xff] }
  0xab   :  { %1349 = vmatprep.mubr.f32.mxu0 %v640_v36  ;;  %2292 = vmatpush3.msra.mxu1 %v318_v38  ;;  %v367_v36 = vld [vmem:[%s4167_s1 + $0xa88] sm:$0xff]  ;;  %v656_v38 = vrot.slane %v642_v28, %v2706_v51  ;;  %v468_v21 = vld [vmem:[%s4167_s1 + $0xdb0] sm:$0xff] }
  0xac   :  { %1350 = vmatmul.mubr.f32.vlgmr.msra.gmra.mxu0 %v632_v26  ;;  %1419 = vmatprep.mubr.f32.mxu1 %v641_v39  ;;  %v369_v26 = vld [vmem:[%s4167_s1 + $0xa98] sm:$0xff]  ;;  %v351_v39 = vld [vmem:[%s4167_s1 + $0xa08] sm:$0xff]  ;;  %v28_v28 = vld [vmem:[%s4168_s0 + $0x30] sm:$0xff] }
  0xad   :  { %2296 = vmatprep.subr.mxu0 %v381_v40  ;;  %2331 = vmatprep.subr.mxu1 %v413_v41  ;;  %v383_v40 = vld [vmem:[%s4167_s1 + $0xb08] sm:$0xff]  ;;  %v366_v41 = vld [vmem:[%s4167_s1 + $0xa80] sm:$0xff] }
  0xae   :  { %1420 = vmatmul.mubr.f32.vlgmr.msra.gmra.mxu1 %v639_v31  ;;  %2297 = vmatpush3.msra.mxu0 %v365_v42  ;;  %v368_v31 = vld [vmem:[%s4167_s1 + $0xa90] sm:$0xff]  ;;  %v398_v42 = vld [vmem:[%s4167_s1 + $0xb80] sm:$0xff] }
  0xaf   :  { %2332 = vmatpush3.msra.mxu1 %v397_v43  ;;  %2298 = vmatprep.subr.mxu0 %v380_v44  ;;  %v657_v43 = vcombine.high %v649_v33, %v649_v33  ;;  %v350_v44 = vld [vmem:[%s4167_s1 + $0xa00] sm:$0xff] }
  0xb0   :  { %2333 = vmatprep.subr.mxu1 %v412_v45  ;;  %2299 = vmatpush3.msra.mxu0 %v364_v46  ;;  %v382_v45 = vld [vmem:[%s4167_s1 + $0xb00] sm:$0xff]  ;;  %v658_v46 = vcombine.high %v656_v38, %v656_v38 }
  0xb1   :  { %2334 = vmatpush3.msra.mxu1 %v396_v47  ;;  %2300 = vmatprep.subr.mxu0 %v379_v48  ;;  %v445_v47 = vld [vmem:[%s4167_s1 + $0xcf8] sm:$0xff] }
  0xb2   :  { %2335 = vmatprep.subr.mxu1 %v411_v49  ;;  %2301 = vmatpush3.msra.mxu0 %v363_v50  ;;  %v477_v48 = vld [vmem:[%s4167_s1 + $0xdf8] sm:$0xff] }
  0xb3   :  { %2336 = vmatpush3.msra.mxu1 %v395_v52  ;;  %2302 = vmatprep.subr.mxu0 %v378_v53  ;;  %v429_v49 = vld [vmem:[%s4167_s1 + $0xc78] sm:$0xff]  ;;  %v444_v52 = vld [vmem:[%s4167_s1 + $0xcf0] sm:$0xff] }
  0xb4   :  { %2337 = vmatprep.subr.mxu1 %v410_v54  ;;  %2303 = vmatpush3.msra.mxu0 %v362_v55  ;;  %v461_v50 = vld [vmem:[%s4167_s1 + $0xd78] sm:$0xff]  ;;  %v476_v53 = vld [vmem:[%s4167_s1 + $0xdf0] sm:$0xff] }
  0xb5   :  { %2338 = vmatpush3.msra.mxu1 %v394_v56  ;;  %2304 = vmatprep.subr.mxu0 %v377_v57  ;;  %v428_v54 = vld [vmem:[%s4167_s1 + $0xc70] sm:$0xff]  ;;  %v443_v56 = vld [vmem:[%s4167_s1 + $0xce8] sm:$0xff] }
  0xb6   :  { %2339 = vmatprep.subr.mxu1 %v409_v58  ;;  %2305 = vmatpush3.msra.mxu0 %v361_v59  ;;  %v460_v55 = vld [vmem:[%s4167_s1 + $0xd70] sm:$0xff]  ;;  %v475_v57 = vld [vmem:[%s4167_s1 + $0xde8] sm:$0xff] }
  0xb7   :  { %2340 = vmatpush3.msra.mxu1 %v393_v60  ;;  %2306 = vmatprep.subr.mxu0 %v376_v61  ;;  %v427_v58 = vld [vmem:[%s4167_s1 + $0xc68] sm:$0xff]  ;;  %v442_v60 = vld [vmem:[%s4167_s1 + $0xce0] sm:$0xff] }
  0xb8   :  { %2341 = vmatprep.subr.mxu1 %v408_v62  ;;  %2307 = vmatpush3.msra.mxu0 %v360_v63  ;;  %v459_v59 = vld [vmem:[%s4167_s1 + $0xd68] sm:$0xff]  ;;  %v474_v61 = vld [vmem:[%s4167_s1 + $0xde0] sm:$0xff] }
  0xb9   :  { %2342 = vmatpush3.msra.mxu1 %v392_v0  ;;  %2308 = vmatprep.subr.mxu0 %v375_v1  ;;  %v426_v62 = vld [vmem:[%s4167_s1 + $0xc60] sm:$0xff]  ;;  %v441_v0 = vld [vmem:[%s4167_s1 + $0xcd8] sm:$0xff] }
  0xba   :  { %2343 = vmatprep.subr.mxu1 %v407_v2  ;;  %2309 = vmatpush3.msra.mxu0 %v359_v3  ;;  %v458_v63 = vld [vmem:[%s4167_s1 + $0xd60] sm:$0xff]  ;;  %v473_v1 = vld [vmem:[%s4167_s1 + $0xdd8] sm:$0xff] }
  0xbb   :  { %2344 = vmatpush3.msra.mxu1 %v391_v4  ;;  %2310 = vmatprep.subr.mxu0 %v374_v5  ;;  %v425_v2 = vld [vmem:[%s4167_s1 + $0xc58] sm:$0xff]  ;;  %v440_v4 = vld [vmem:[%s4167_s1 + $0xcd0] sm:$0xff] }
  0xbc   :  { %2345 = vmatprep.subr.mxu1 %v406_v6  ;;  %2311 = vmatpush3.msra.mxu0 %v358_v7  ;;  %v457_v3 = vld [vmem:[%s4167_s1 + $0xd58] sm:$0xff]  ;;  %v472_v5 = vld [vmem:[%s4167_s1 + $0xdd0] sm:$0xff] }
  0xbd   :  { %2346 = vmatpush3.msra.mxu1 %v390_v8  ;;  %2312 = vmatprep.subr.mxu0 %v373_v9  ;;  %v424_v6 = vld [vmem:[%s4167_s1 + $0xc50] sm:$0xff]  ;;  %v439_v8 = vld [vmem:[%s4167_s1 + $0xcc8] sm:$0xff] }
  0xbe   :  { %2347 = vmatprep.subr.mxu1 %v405_v10  ;;  %2313 = vmatpush3.msra.mxu0 %v357_v11  ;;  %v456_v7 = vld [vmem:[%s4167_s1 + $0xd50] sm:$0xff]  ;;  %v471_v9 = vld [vmem:[%s4167_s1 + $0xdc8] sm:$0xff] }
  0xbf   :  { %2348 = vmatpush3.msra.mxu1 %v389_v12  ;;  %2314 = vmatprep.subr.mxu0 %v372_v13  ;;  %v423_v10 = vld [vmem:[%s4167_s1 + $0xc48] sm:$0xff]  ;;  %v438_v12 = vld [vmem:[%s4167_s1 + $0xcc0] sm:$0xff] }
  0xc0   :  { %2349 = vmatprep.subr.mxu1 %v404_v14  ;;  %2315 = vmatpush3.msra.mxu0 %v356_v15  ;;  %v455_v11 = vld [vmem:[%s4167_s1 + $0xd48] sm:$0xff]  ;;  %v470_v13 = vld [vmem:[%s4167_s1 + $0xdc0] sm:$0xff] }
  0xc1   :  { %2350 = vmatpush3.msra.mxu1 %v388_v16  ;;  %2316 = vmatprep.subr.mxu0 %v371_v17  ;;  %v422_v14 = vld [vmem:[%s4167_s1 + $0xc40] sm:$0xff]  ;;  %v437_v16 = vld [vmem:[%s4167_s1 + $0xcb8] sm:$0xff] }
  0xc2   :  { %2351 = vmatprep.subr.mxu1 %v403_v18  ;;  %2317 = vmatpush3.msra.mxu0 %v355_v19  ;;  %v454_v15 = vld [vmem:[%s4167_s1 + $0xd40] sm:$0xff]  ;;  %v469_v17 = vld [vmem:[%s4167_s1 + $0xdb8] sm:$0xff] }
  0xc3   :  { %2352 = vmatpush3.msra.mxu1 %v387_v20  ;;  %2318 = vmatprep.subr.mxu0 %v370_v22  ;;  %v421_v18 = vld [vmem:[%s4167_s1 + $0xc38] sm:$0xff]  ;;  %v436_v20 = vld [vmem:[%s4167_s1 + $0xcb0] sm:$0xff] }
  0xc4   :  { %2353 = vmatprep.subr.mxu1 %v402_v23  ;;  %2319 = vmatpush3.msra.mxu0 %v354_v24  ;;  %v453_v19 = vld [vmem:[%s4167_s1 + $0xd38] sm:$0xff]  ;;  %v420_v22 = vld [vmem:[%s4167_s1 + $0xc30] sm:$0xff]  ;;  %v435_v24 = vld [vmem:[%s4167_s1 + $0xca8] sm:$0xff] }
  0xc5   :  { %2354 = vmatpush3.msra.mxu1 %v386_v25  ;;  %2320 = vmatprep.subr.mxu0 %v369_v26  ;;  %v452_v23 = vld [vmem:[%s4167_s1 + $0xd30] sm:$0xff]  ;;  %v467_v25 = vld [vmem:[%s4167_s1 + $0xda8] sm:$0xff] }
  0xc6   :  { %2355 = vmatprep.subr.mxu1 %v401_v27  ;;  %2321 = vmatpush3.msra.mxu0 %v353_v29  ;;  %v419_v26 = vld [vmem:[%s4167_s1 + $0xc28] sm:$0xff]  ;;  %v434_v29 = vld [vmem:[%s4167_s1 + $0xca0] sm:$0xff] }
  0xc7   :  { %2356 = vmatpush3.msra.mxu1 %v385_v30  ;;  %2322 = vmatprep.subr.mxu0 %v368_v31  ;;  %v451_v27 = vld [vmem:[%s4167_s1 + $0xd28] sm:$0xff]  ;;  %v466_v30 = vld [vmem:[%s4167_s1 + $0xda0] sm:$0xff] }
  0xc8   :  { %2357 = vmatprep.subr.mxu1 %v400_v32  ;;  %2323 = vmatpush3.msra.mxu0 %v352_v34  ;;  %v418_v31 = vld [vmem:[%s4167_s1 + $0xc20] sm:$0xff]  ;;  %v465_v34 = vld [vmem:[%s4167_s1 + $0xd98] sm:$0xff] }
  0xc9   :  { %2358 = vmatpush3.msra.mxu1 %v384_v35  ;;  %2324 = vmatprep.subr.mxu0 %v367_v36  ;;  %v450_v32 = vld [vmem:[%s4167_s1 + $0xd20] sm:$0xff]  ;;  %v659_v35 = vcombine.high %v28_v28, %v28_v28  ;;  %v417_v36 = vld [vmem:[%s4167_s1 + $0xc18] sm:$0xff] }
  0xca   :  { %2359 = vmatprep.subr.mxu1 %v399_v37  ;;  %2325 = vmatpush3.msra.mxu0 %v351_v39  ;;  %v449_v37 = vld [vmem:[%s4167_s1 + $0xd18] sm:$0xff]  ;;  %v464_v39 = vld [vmem:[%s4167_s1 + $0xd90] sm:$0xff] }
  0xcb   :  { %2360 = vmatpush3.msra.mxu1 %v383_v40  ;;  %2326 = vmatprep.subr.mxu0 %v366_v41  ;;  %v666_v40 = vrot.slane %v28_v28, %v2706_v51  ;;  %v416_v41 = vld [vmem:[%s4167_s1 + $0xc10] sm:$0xff] }
  0xcc   :  { %2361 = vmatprep.subr.mxu1 %v398_v42  ;;  %2327 = vmatpush3.msra.mxu0 %v350_v44  ;;  %v448_v42 = vld [vmem:[%s4167_s1 + $0xd10] sm:$0xff]  ;;  %v463_v44 = vld [vmem:[%s4167_s1 + $0xd88] sm:$0xff] }
  0xcd   :  { %1489 = vmatprep.mubr.f32.mxu0 %v657_v43  ;;  %2362 = vmatpush3.msra.mxu1 %v382_v45  ;;  %v431_v43 = vld [vmem:[%s4167_s1 + $0xc88] sm:$0xff]  ;;  %v673_v45 = vrot.slane %v659_v35, %v2706_v51  ;;  %v532_v28 = vld [vmem:[%s4167_s1 + $0xfb0] sm:$0xff] }
  0xce   :  { %1490 = vmatmul.mubr.f32.vlgmr.msra.gmra.mxu0 %v649_v33  ;;  %1559 = vmatprep.mubr.f32.mxu1 %v658_v46  ;;  %v433_v33 = vld [vmem:[%s4167_s1 + $0xc98] sm:$0xff]  ;;  %v415_v46 = vld [vmem:[%s4167_s1 + $0xc08] sm:$0xff] }
  0xcf   :  { %2366 = vmatprep.subr.mxu0 %v445_v47  ;;  %2401 = vmatprep.subr.mxu1 %v477_v48  ;;  %v447_v47 = vld [vmem:[%s4167_s1 + $0xd08] sm:$0xff]  ;;  %v430_v48 = vld [vmem:[%s4167_s1 + $0xc80] sm:$0xff] }
  0xd0   :  { %1560 = vmatmul.mubr.f32.vlgmr.msra.gmra.mxu1 %v656_v38  ;;  %2367 = vmatpush3.msra.mxu0 %v429_v49  ;;  %v432_v38 = vld [vmem:[%s4167_s1 + $0xc90] sm:$0xff]  ;;  %v462_v49 = vld [vmem:[%s4167_s1 + $0xd80] sm:$0xff]  ;;  %v515_v35 = vld [vmem:[%s4167_s1 + $0xf28] sm:$0xff] }
  0xd1   :  { %2402 = vmatpush3.msra.mxu1 %v461_v50  ;;  %2368 = vmatprep.subr.mxu0 %v444_v52  ;;  %v674_v50 = vcombine.high %v666_v40, %v666_v40  ;;  %v414_v52 = vld [vmem:[%s4167_s1 + $0xc00] sm:$0xff] }
  0xd2   :  { %2403 = vmatprep.subr.mxu1 %v476_v53  ;;  %2369 = vmatpush3.msra.mxu0 %v428_v54  ;;  %v446_v53 = vld [vmem:[%s4167_s1 + $0xd00] sm:$0xff]  ;;  %v675_v54 = vcombine.high %v673_v45, %v673_v45 }
  0xd3   :  { %2404 = vmatpush3.msra.mxu1 %v460_v55  ;;  %2370 = vmatprep.subr.mxu0 %v443_v56  ;;  %v509_v55 = vld [vmem:[%s4167_s1 + $0xef8] sm:$0xff] }
  0xd4   :  { %2405 = vmatprep.subr.mxu1 %v475_v57  ;;  %2371 = vmatpush3.msra.mxu0 %v427_v58  ;;  %v541_v56 = vld [vmem:[%s4167_s1 + $0xff8] sm:$0xff] }
  0xd5   :  { %2406 = vmatpush3.msra.mxu1 %v459_v59  ;;  %2372 = vmatprep.subr.mxu0 %v442_v60  ;;  %v493_v57 = vld [vmem:[%s4167_s1 + $0xe78] sm:$0xff]  ;;  %v508_v59 = vld [vmem:[%s4167_s1 + $0xef0] sm:$0xff] }
  0xd6   :  { %2407 = vmatprep.subr.mxu1 %v474_v61  ;;  %2373 = vmatpush3.msra.mxu0 %v426_v62  ;;  %v525_v58 = vld [vmem:[%s4167_s1 + $0xf78] sm:$0xff]  ;;  %v540_v60 = vld [vmem:[%s4167_s1 + $0xff0] sm:$0xff] }
  0xd7   :  { %2408 = vmatpush3.msra.mxu1 %v458_v63  ;;  %2374 = vmatprep.subr.mxu0 %v441_v0  ;;  %v492_v61 = vld [vmem:[%s4167_s1 + $0xe70] sm:$0xff]  ;;  %v507_v63 = vld [vmem:[%s4167_s1 + $0xee8] sm:$0xff] }
  0xd8   :  { %2409 = vmatprep.subr.mxu1 %v473_v1  ;;  %2375 = vmatpush3.msra.mxu0 %v425_v2  ;;  %v524_v62 = vld [vmem:[%s4167_s1 + $0xf70] sm:$0xff]  ;;  %v539_v0 = vld [vmem:[%s4167_s1 + $0xfe8] sm:$0xff] }
  0xd9   :  { %2410 = vmatpush3.msra.mxu1 %v457_v3  ;;  %2376 = vmatprep.subr.mxu0 %v440_v4  ;;  %v491_v1 = vld [vmem:[%s4167_s1 + $0xe68] sm:$0xff]  ;;  %v506_v3 = vld [vmem:[%s4167_s1 + $0xee0] sm:$0xff] }
  0xda   :  { %2411 = vmatprep.subr.mxu1 %v472_v5  ;;  %2377 = vmatpush3.msra.mxu0 %v424_v6  ;;  %v523_v2 = vld [vmem:[%s4167_s1 + $0xf68] sm:$0xff]  ;;  %v538_v4 = vld [vmem:[%s4167_s1 + $0xfe0] sm:$0xff] }
  0xdb   :  { %2412 = vmatpush3.msra.mxu1 %v456_v7  ;;  %2378 = vmatprep.subr.mxu0 %v439_v8  ;;  %v490_v5 = vld [vmem:[%s4167_s1 + $0xe60] sm:$0xff]  ;;  %v505_v7 = vld [vmem:[%s4167_s1 + $0xed8] sm:$0xff] }
  0xdc   :  { %2413 = vmatprep.subr.mxu1 %v471_v9  ;;  %2379 = vmatpush3.msra.mxu0 %v423_v10  ;;  %v522_v6 = vld [vmem:[%s4167_s1 + $0xf60] sm:$0xff]  ;;  %v537_v8 = vld [vmem:[%s4167_s1 + $0xfd8] sm:$0xff] }
  0xdd   :  { %2414 = vmatpush3.msra.mxu1 %v455_v11  ;;  %2380 = vmatprep.subr.mxu0 %v438_v12  ;;  %v489_v9 = vld [vmem:[%s4167_s1 + $0xe58] sm:$0xff]  ;;  %v504_v11 = vld [vmem:[%s4167_s1 + $0xed0] sm:$0xff] }
  0xde   :  { %2415 = vmatprep.subr.mxu1 %v470_v13  ;;  %2381 = vmatpush3.msra.mxu0 %v422_v14  ;;  %v521_v10 = vld [vmem:[%s4167_s1 + $0xf58] sm:$0xff]  ;;  %v536_v12 = vld [vmem:[%s4167_s1 + $0xfd0] sm:$0xff] }
  0xdf   :  { %2416 = vmatpush3.msra.mxu1 %v454_v15  ;;  %2382 = vmatprep.subr.mxu0 %v437_v16  ;;  %v488_v13 = vld [vmem:[%s4167_s1 + $0xe50] sm:$0xff]  ;;  %v503_v15 = vld [vmem:[%s4167_s1 + $0xec8] sm:$0xff] }
  0xe0   :  { %2417 = vmatprep.subr.mxu1 %v469_v17  ;;  %2383 = vmatpush3.msra.mxu0 %v421_v18  ;;  %v520_v14 = vld [vmem:[%s4167_s1 + $0xf50] sm:$0xff]  ;;  %v535_v16 = vld [vmem:[%s4167_s1 + $0xfc8] sm:$0xff] }
  0xe1   :  { %2418 = vmatpush3.msra.mxu1 %v453_v19  ;;  %2384 = vmatprep.subr.mxu0 %v436_v20  ;;  %v487_v17 = vld [vmem:[%s4167_s1 + $0xe48] sm:$0xff]  ;;  %v502_v19 = vld [vmem:[%s4167_s1 + $0xec0] sm:$0xff] }
  0xe2   :  { %2419 = vmatprep.subr.mxu1 %v468_v21  ;;  %2385 = vmatpush3.msra.mxu0 %v420_v22  ;;  %v519_v18 = vld [vmem:[%s4167_s1 + $0xf48] sm:$0xff]  ;;  %v534_v20 = vld [vmem:[%s4167_s1 + $0xfc0] sm:$0xff] }
  0xe3   :  { %2420 = vmatpush3.msra.mxu1 %v452_v23  ;;  %2386 = vmatprep.subr.mxu0 %v435_v24  ;;  %v486_v21 = vld [vmem:[%s4167_s1 + $0xe40] sm:$0xff]  ;;  %v501_v23 = vld [vmem:[%s4167_s1 + $0xeb8] sm:$0xff] }
  0xe4   :  { %2421 = vmatprep.subr.mxu1 %v467_v25  ;;  %2387 = vmatpush3.msra.mxu0 %v419_v26  ;;  %v518_v22 = vld [vmem:[%s4167_s1 + $0xf40] sm:$0xff]  ;;  %v533_v24 = vld [vmem:[%s4167_s1 + $0xfb8] sm:$0xff] }
  0xe5   :  { %2422 = vmatpush3.msra.mxu1 %v451_v27  ;;  %2388 = vmatprep.subr.mxu0 %v434_v29  ;;  %v485_v25 = vld [vmem:[%s4167_s1 + $0xe38] sm:$0xff]  ;;  %v500_v27 = vld [vmem:[%s4167_s1 + $0xeb0] sm:$0xff] }
  0xe6   :  { %2423 = vmatprep.subr.mxu1 %v466_v30  ;;  %2389 = vmatpush3.msra.mxu0 %v418_v31  ;;  %v517_v26 = vld [vmem:[%s4167_s1 + $0xf38] sm:$0xff]  ;;  %v484_v29 = vld [vmem:[%s4167_s1 + $0xe30] sm:$0xff]  ;;  %v499_v31 = vld [vmem:[%s4167_s1 + $0xea8] sm:$0xff] }
  0xe7   :  { %2424 = vmatpush3.msra.mxu1 %v450_v32  ;;  %2390 = vmatprep.subr.mxu0 %v433_v33  ;;  %v516_v30 = vld [vmem:[%s4167_s1 + $0xf30] sm:$0xff]  ;;  %v531_v32 = vld [vmem:[%s4167_s1 + $0xfa8] sm:$0xff]  ;;  %v29_v33 = vld [vmem:[%s4168_s0 + $0x38] sm:$0xff] }
  0xe8   :  { %2425 = vmatprep.subr.mxu1 %v465_v34  ;;  %2391 = vmatpush3.msra.mxu0 %v417_v36  ;;  %v483_v34 = vld [vmem:[%s4167_s1 + $0xe28] sm:$0xff]  ;;  %v498_v36 = vld [vmem:[%s4167_s1 + $0xea0] sm:$0xff] }
  0xe9   :  { %2426 = vmatpush3.msra.mxu1 %v449_v37  ;;  %2392 = vmatprep.subr.mxu0 %v432_v38  ;;  %v530_v37 = vld [vmem:[%s4167_s1 + $0xfa0] sm:$0xff] }
  0xea   :  { %2427 = vmatprep.subr.mxu1 %v464_v39  ;;  %2393 = vmatpush3.msra.mxu0 %v416_v41  ;;  %v482_v38 = vld [vmem:[%s4167_s1 + $0xe20] sm:$0xff]  ;;  %v497_v41 = vld [vmem:[%s4167_s1 + $0xe98] sm:$0xff] }
  0xeb   :  { %2428 = vmatpush3.msra.mxu1 %v448_v42  ;;  %2394 = vmatprep.subr.mxu0 %v431_v43  ;;  %v514_v39 = vld [vmem:[%s4167_s1 + $0xf20] sm:$0xff]  ;;  %v529_v42 = vld [vmem:[%s4167_s1 + $0xf98] sm:$0xff] }
  0xec   :  { %2429 = vmatprep.subr.mxu1 %v463_v44  ;;  %2395 = vmatpush3.msra.mxu0 %v415_v46  ;;  %v481_v43 = vld [vmem:[%s4167_s1 + $0xe18] sm:$0xff]  ;;  %v528_v46 = vld [vmem:[%s4167_s1 + $0xf90] sm:$0xff] }
  0xed   :  { %2430 = vmatpush3.msra.mxu1 %v447_v47  ;;  %2396 = vmatprep.subr.mxu0 %v430_v48  ;;  %v513_v44 = vld [vmem:[%s4167_s1 + $0xf18] sm:$0xff]  ;;  %v683_v47 = vrot.slane %v29_v33, %v2706_v51  ;;  %v480_v48 = vld [vmem:[%s4167_s1 + $0xe10] sm:$0xff] }
  0xee   :  { %2431 = vmatprep.subr.mxu1 %v462_v49  ;;  %2397 = vmatpush3.msra.mxu0 %v414_v52  ;;  %v512_v49 = vld [vmem:[%s4167_s1 + $0xf10] sm:$0xff]  ;;  %v495_v52 = vld [vmem:[%s4167_s1 + $0xe88] sm:$0xff] }
  0xef   :  { %1629 = vmatprep.mubr.f32.mxu0 %v674_v50  ;;  %2432 = vmatpush3.msra.mxu1 %v446_v53  ;;  %v527_v53 = vld [vmem:[%s4167_s1 + $0xf88] sm:$0xff] }
  0xf0   :  { %1630 = vmatmul.mubr.f32.vlgmr.msra.gmra.mxu0 %v666_v40  ;;  %1699 = vmatprep.mubr.f32.mxu1 %v675_v54  ;;  %v676_v40 = vcombine.high %v29_v33, %v29_v33  ;;  %v479_v54 = vld [vmem:[%s4167_s1 + $0xe08] sm:$0xff] }
  0xf1   :  { %2436 = vmatprep.subr.mxu0 %v509_v55  ;;  %2471 = vmatprep.subr.mxu1 %v541_v56  ;;  %v494_v55 = vld [vmem:[%s4167_s1 + $0xe80] sm:$0xff] }
  0xf2   :  { %1700 = vmatmul.mubr.f32.vlgmr.msra.gmra.mxu1 %v673_v45  ;;  %2437 = vmatpush3.msra.mxu0 %v493_v57  ;;  %v496_v45 = vld [vmem:[%s4167_s1 + $0xe90] sm:$0xff]  ;;  %v690_v50 = vrot.slane %v676_v40, %v2706_v51  ;;  %v511_v51 = vld [vmem:[%s4167_s1 + $0xf08] sm:$0xff]  ;;  %v526_v56 = vld [vmem:[%s4167_s1 + $0xf80] sm:$0xff]  ;;  %v691_v57 = vcombine.high %v683_v47, %v683_v47 }
  0xf3   :  { %2472 = vmatpush3.msra.mxu1 %v525_v58  ;;  %2438 = vmatprep.subr.mxu0 %v508_v59  ;;  %v478_v58 = vld [vmem:[%s4167_s1 + $0xe00] sm:$0xff] }
  0xf4   :  { %2473 = vmatprep.subr.mxu1 %v540_v60  ;;  %2439 = vmatpush3.msra.mxu0 %v492_v61  ;;  %v692_v59 = vcombine.high %v690_v50, %v690_v50  ;;  %v510_v60 = vld [vmem:[%s4167_s1 + $0xf00] sm:$0xff]  ;;  %v2536_v61 = vmov 0.0  }
  0xf5   :  { %2474 = vmatpush3.msra.mxu1 %v524_v62  ;;  %2440 = vmatprep.subr.mxu0 %v507_v63  ;;  %v1854_v62 = vld [vmem:[%s4169_s3 + $0x18] sm:$0xff]  ;;  %v1853_v63 = vld [vmem:[%s4169_s3 + $0x10] sm:$0xff] }
  0xf6   :  { %2475 = vmatprep.subr.mxu1 %v539_v0  ;;  %2441 = vmatpush3.msra.mxu0 %v491_v1  ;;  %v1852_v0 = vld [vmem:[%s4169_s3 + $0x8] sm:$0xff]  ;;  %v1851_v1 = vld [vmem:[%s4169_s3] sm:$0xff] }
  0xf7   :  { %2476 = vmatpush3.msra.mxu1 %v523_v2  ;;  %2442 = vmatprep.subr.mxu0 %v506_v3  ;;  %v10_v2 = vstv %s4170_s4  ;;  %v1978_v3 = vpop.f32.mrf.mxu0 }
  0xf8   :  { %2477 = vmatprep.subr.mxu1 %v538_v4  ;;  %2443 = vmatpush3.msra.mxu0 %v490_v5  ;;  %11 = vst [vmem:[#allocation2] sm:$0x1] %v10_v2  ;;  %v2013_v4 = vpop.f32.mrf.mxu1 }
  0xf9   :  { %2478 = vmatpush3.msra.mxu1 %v522_v6  ;;  %2444 = vmatprep.subr.mxu0 %v505_v7  ;;  %v1979_v5 = vpop.f32.mrf.mxu0 }
  0xfa   :  { %2479 = vmatprep.subr.mxu1 %v537_v8  ;;  %2445 = vmatpush3.msra.mxu0 %v489_v9  ;;  %v1980_v7 = vadd.f32 %v1979_v5, %v1978_v3  ;;  %v1942_v8 = vld [vmem:[%s4171_s2] ss:$0 sm:$0xff]  ;;  %v2014_v9 = vpop.f32.mrf.mxu1 }
  0xfb   :  { %2480 = vmatpush3.msra.mxu1 %v521_v10  ;;  %2446 = vmatprep.subr.mxu0 %v504_v11 }
  0xfc   :  { %2481 = vmatprep.subr.mxu1 %v536_v12  ;;  %2447 = vmatpush3.msra.mxu0 %v488_v13  ;;  %v792_v12 = vadd.f32 %v1980_v7, %v1942_v8  ;;  %v2015_v13 = vadd.f32 %v2014_v9, %v2013_v4 }
  0xfd   :  { %2482 = vmatpush3.msra.mxu1 %v520_v14  ;;  %2448 = vmatprep.subr.mxu0 %v503_v15 }
  0xfe   :  { %2483 = vmatprep.subr.mxu1 %v535_v16  ;;  %2449 = vmatpush3.msra.mxu0 %v487_v17  ;;  %v862_v17 = vadd.f32 %v2015_v13, %v792_v12 }
  0xff   :  { %2484 = vmatpush3.msra.mxu1 %v519_v18  ;;  %2450 = vmatprep.subr.mxu0 %v502_v19  ;;  %v1944_v9 = vld [vmem:[#allocation2] ss:$0 sm:$0xff] }
 0x100   :  { %2485 = vmatprep.subr.mxu1 %v534_v20  ;;  %2451 = vmatpush3.msra.mxu0 %v486_v21 }
 0x101   :  { %2486 = vmatpush3.msra.mxu1 %v518_v22  ;;  %2452 = vmatprep.subr.mxu0 %v501_v23 }
 0x102   :  { %2487 = vmatprep.subr.mxu1 %v533_v24  ;;  %2453 = vmatpush3.msra.mxu0 %v485_v25 }
 0x103   :  { %2488 = vmatpush3.msra.mxu1 %v517_v26  ;;  %2454 = vmatprep.subr.mxu0 %v500_v27 }
 0x104   :  { %2489 = vmatprep.subr.mxu1 %v532_v28  ;;  %2455 = vmatpush3.msra.mxu0 %v484_v29 }
 0x105   :  { %2490 = vmatpush3.msra.mxu1 %v516_v30  ;;  %2456 = vmatprep.subr.mxu0 %v499_v31 }
 0x106   :  { %2491 = vmatprep.subr.mxu1 %v531_v32  ;;  %2457 = vmatpush3.msra.mxu0 %v483_v34  ;;  %v2048_v6 = vpop.f32.mrf.mxu0 }
 0x107   :  { %2492 = vmatpush3.msra.mxu1 %v515_v35  ;;  %2458 = vmatprep.subr.mxu0 %v498_v36 }
 0x108   :  { %2493 = vmatprep.subr.mxu1 %v530_v37  ;;  %2459 = vmatpush3.msra.mxu0 %v482_v38  ;;  %v2083_v10 = vpop.f32.mrf.mxu1  ;;  %v2049_v11 = vpop.f32.mrf.mxu0 }
 0x109   :  { %2494 = vmatpush3.msra.mxu1 %v514_v39  ;;  %2460 = vmatprep.subr.mxu0 %v497_v41  ;;  %v2050_v15 = vadd.f32 %v2049_v11, %v2048_v6 }
 0x10a   :  { %2495 = vmatprep.subr.mxu1 %v529_v42  ;;  %2461 = vmatpush3.msra.mxu0 %v481_v43  ;;  %v2084_v16 = vpop.f32.mrf.mxu1 }
 0x10b   :  { %2496 = vmatpush3.msra.mxu1 %v513_v44  ;;  %2462 = vmatprep.subr.mxu0 %v496_v45  ;;  %v932_v20 = vadd.f32 %v2050_v15, %v862_v17  ;;  %v2085_v21 = vadd.f32 %v2084_v16, %v2083_v10 }
 0x10c   :  { %2497 = vmatprep.subr.mxu1 %v528_v46  ;;  %2463 = vmatpush3.msra.mxu0 %v480_v48 }
 0x10d   :  { %2498 = vmatpush3.msra.mxu1 %v512_v49  ;;  %2464 = vmatprep.subr.mxu0 %v495_v52  ;;  %v1002_v25 = vadd.f32 %v2085_v21, %v932_v20 }
 0x10e   :  { %2499 = vmatprep.subr.mxu1 %v527_v53  ;;  %2465 = vmatpush3.msra.mxu0 %v479_v54 }
 0x10f   :  { %2500 = vmatpush3.msra.mxu1 %v511_v51  ;;  %2466 = vmatprep.subr.mxu0 %v494_v55 }
 0x110   :  { %2501 = vmatprep.subr.mxu1 %v526_v56  ;;  %2467 = vmatpush3.msra.mxu0 %v478_v58 }
 0x111   :  { %1769 = vmatprep.mubr.f32.mxu0 %v691_v57  ;;  %2502 = vmatpush3.msra.mxu1 %v510_v60 }
 0x112   :  { %1839 = vmatprep.mubr.f32.mxu1 %v692_v59  ;;  %1770 = vmatmul.mubr.f32.vlgmr.msra.gmra.mxu0 %v683_v47 }
 0x113   :  { %1840 = vmatmul.mubr.f32.vlgmr.msra.gmra.mxu1 %v690_v50  ;;  %2511 = vmatprep.subr.mxu0 %v2536_v61 }
 0x114   :  { %2519 = vmatprep.mubr.msk.f32.mxu0 %vm2537_vm0, %v2536_v61  ;;  %2512 = vmatpush3.msra.mxu0 %v1854_v62 }
 0x115   :  { %2513 = vmatprep.subr.mxu0 %v2536_v61 }
 0x116   :  { %2514 = vmatpush3.msra.mxu0 %v1853_v63 }
 0x117   :  { %2515 = vmatprep.subr.mxu0 %v2536_v61 }
 0x118   :  { %2516 = vmatpush3.msra.mxu0 %v1852_v0 }
 0x119   :  { %2517 = vmatprep.subr.mxu0 %v2536_v61 }
 0x11a   :  { %2518 = vmatpush3.msra.mxu0 %v1851_v1 }
 0x128   :  { %v2118_v14 = vpop.f32.mrf.mxu0 }
 0x12a   :  { %v2153_v18 = vpop.f32.mrf.mxu1  ;;  %v2119_v19 = vpop.f32.mrf.mxu0 }
 0x12b   :  { %v2120_v23 = vadd.f32 %v2119_v19, %v2118_v14 }
 0x12c   :  { %v2154_v24 = vpop.f32.mrf.mxu1 }
 0x12d   :  { %v1072_v28 = vadd.f32 %v2120_v23, %v1002_v25  ;;  %v2155_v29 = vadd.f32 %v2154_v24, %v2153_v18 }
 0x12f   :  { %v1142_v33 = vadd.f32 %v2155_v29, %v1072_v28 }
 0x14a   :  { %v2188_v22 = vpop.f32.mrf.mxu0 }
 0x14c   :  { %v2223_v26 = vpop.f32.mrf.mxu1  ;;  %v2189_v27 = vpop.f32.mrf.mxu0 }
 0x14d   :  { %v2190_v31 = vadd.f32 %v2189_v27, %v2188_v22 }
 0x14e   :  { %v2224_v32 = vpop.f32.mrf.mxu1 }
 0x14f   :  { %v1212_v36 = vadd.f32 %v2190_v31, %v1142_v33  ;;  %v2225_v37 = vadd.f32 %v2224_v32, %v2223_v26 }
 0x151   :  { %v1282_v41 = vadd.f32 %v2225_v37, %v1212_v36 }
 0x16c   :  { %v2258_v30 = vpop.f32.mrf.mxu0 }
 0x16e   :  { %v2293_v34 = vpop.f32.mrf.mxu1  ;;  %v2259_v35 = vpop.f32.mrf.mxu0 }
 0x16f   :  { %v2260_v39 = vadd.f32 %v2259_v35, %v2258_v30 }
 0x170   :  { %v2294_v40 = vpop.f32.mrf.mxu1 }
 0x171   :  { %v1352_v44 = vadd.f32 %v2260_v39, %v1282_v41  ;;  %v2295_v45 = vadd.f32 %v2294_v40, %v2293_v34 }
 0x173   :  { %v1422_v49 = vadd.f32 %v2295_v45, %v1352_v44 }
 0x18e   :  { %v2328_v38 = vpop.f32.mrf.mxu0 }
 0x190   :  { %v2363_v42 = vpop.f32.mrf.mxu1  ;;  %v2329_v43 = vpop.f32.mrf.mxu0 }
 0x191   :  { %v2330_v47 = vadd.f32 %v2329_v43, %v2328_v38 }
 0x192   :  { %v2364_v48 = vpop.f32.mrf.mxu1 }
 0x193   :  { %v1492_v53 = vadd.f32 %v2330_v47, %v1422_v49  ;;  %v2365_v54 = vadd.f32 %v2364_v48, %v2363_v42 }
 0x195   :  { %v1562_v56 = vadd.f32 %v2365_v54, %v1492_v53 }
 0x1b0   :  { %v2398_v46 = vpop.f32.mrf.mxu0 }
 0x1b2   :  { %v2433_v50 = vpop.f32.mrf.mxu1  ;;  %v2399_v52 = vpop.f32.mrf.mxu0 }
 0x1b3   :  { %v2400_v51 = vadd.f32 %v2399_v52, %v2398_v46 }
 0x1b4   :  { %v2434_v55 = vpop.f32.mrf.mxu1 }
 0x1b5   :  { %v1632_v57 = vadd.f32 %v2400_v51, %v1562_v56  ;;  %v2435_v58 = vadd.f32 %v2434_v55, %v2433_v50 }
 0x1b7   :  { %v1702_v63 = vadd.f32 %v2435_v58, %v1632_v57 }
 0x1d2   :  { %v2468_v59 = vpop.f32.mrf.mxu0 }
 0x1d3   :  { %v2503_v60 = vpop.f32.mrf.mxu1 }
 0x1d4   :  { %v2469_v61 = vpop.f32.mrf.mxu0 }
 0x1d5   :  { %v2504_v62 = vpop.f32.mrf.mxu1  ;;  %v2470_v0 = vadd.f32 %v2469_v61, %v2468_v59 }
 0x1d6   :  { %v2505_v2 = vadd.f32 %v2504_v62, %v2503_v60 }
 0x1d7   :  { %v1772_v1 = vadd.f32 %v2470_v0, %v1702_v63 }
 0x1d9   :  { %v1842_v3 = vadd.f32 %v2505_v2, %v1772_v1 }
 0x1db   :  { %v1846_v4 = vmin.f32 %v1842_v3, 0.0  ;;  %vm1845_vm2 = vcmp.gt.f32.partialorder %v1842_v3, 0.0 }
 0x1dd   :  { %v1847_v5 = vmul.f32 1.442695, %v1846_v4 }
 0x1df   :  { %2533 = vpow2.f32 %v1847_v5 }
 0x1ec   :  { %v2534_v6 = vpop.eup %2533 }
 0x1ed   :  { %v1943_v7 = vadd.f32 -1.0, %v2534_v6 }
 0x1ef   :  { %v1850_v8 = vsel %vm1845_vm2, %v1842_v3, %v1943_v7 }
 0x1f0   :  { %2520 = vmatmul.mubr.msk.f32.vlgmr.msra.gmra.mxu0 %vm1862_vm1, %v1850_v8 }
 0x2b0   :  { %v1932_v10 = vpop.f32.mrf.mxu0 }
 0x2b1   :  { %v1933_v11 = vadd.f32 %v1944_v9, %v1932_v10 }
 0x2b2   :  { %v2521_v12 = vpop.f32.mrf.mxu0 }
 0x2b3   :  { %1937 = vst.msk [vmem:[%s4172_s5] sm:$0x3] %vm1936_vm3, %v1933_v11 }

// kernel: net_forward.2
= control target key start
LH: loop header
LB: loop body
LE: loop exit
PB: predicated region body
PF: predicated region fallthrough
CT: control target
= control target key end

     0   :  { %s13796_s30 = smov 0   ;;  %s19356_s0 = inlined_call_operand.vmem [shape: f32[2,256,64], index: 0, kind: input, shape index: {}]   ;;  %s19357_s1 = inlined_call_operand.vmem [shape: f32[9,256,256], index: 1, kind: input, shape index: {}]   ;;  %s19358_s2 = inlined_call_operand.vmem [shape: f32[9,64,128], index: 2, kind: input, shape index: {}]   ;;  %s19359_s3 = inlined_call_operand.vmem [shape: f32[1,128], index: 3, kind: input, shape index: {}]   ;;  %s19360_s4 = inlined_call_operand.vmem [shape: f32[2,128,64], index: 4, kind: input, shape index: {}]   ;;  %s19361_s5 = inlined_call_operand.vmem [shape: f32[4,64,256], index: 5, kind: input, shape index: {}]   ;;  %s19362_s6 = inlined_call_operand.vmem [shape: f32[9,64,64], index: 6, kind: input, shape index: {}]   ;;  %s19363_s7 = inlined_call_operand.vmem [shape: f32[9,64,64], index: 7, kind: input, shape index: {}]   ;;  %s19364_s8 = inlined_call_operand.vmem [shape: f32[1,64], index: 8, kind: input, shape index: {}]   ;;  %s19365_s9 = inlined_call_operand.vmem [shape: f32[2,64,64], index: 9, kind: output, shape index: {}]  }
   0x1 LB: > { %s10089_s10 = sadd.s32 4294967295, %s13743_s30   ;;  %p10093_p0 = scmp.ge.s32.totalorder %s13743_s30, 1  ;;  %s13743_s30 = sphi %s13796_s30, %s19_s30  }
   0x2   : > { %p287_p1 = scmp.lt.s32.totalorder %s13743_s30, 3 }
   0x4   : > { %p288_p2 = pnand %p10093_p0, %p287_p1 }
   0x6   : > { %291 = sbr.rel (%p288_p2) target bundleno = 4136 (0x1028), region = 56 }
   0xb   : > { %p323_p3 = scmp.lt.s32.totalorder %s10089_s10, 1  ;;  %v366_v0 = vld [vmem:[%s19357_s1 + $0x8] sm:$0xff]  ;;  %v19366_v2 = vmov 0.0   ;;  %v365_v35 = vld [vmem:[%s19357_s1] sm:$0xff]  ;;  %v368_v37 = vld [vmem:[%s19357_s1 + $0x18] sm:$0xff]  ;;  %vm961_vm0 = vcmask 523264  }
   0xc   : > { %v10099_v1 = vld [vmem:[%s19357_s1 + $0x208] sm:$0xff]  ;;  %429 = vmatprep.subr.mxu0 %v19366_v2  ;;  %727 = vmatprep.subr.mxu1 %v19366_v2  ;;  %v10098_v36 = vld [vmem:[%s19357_s1 + $0x200] sm:$0xff]  ;;  %v10101_v38 = vld [vmem:[%s19357_s1 + $0x218] sm:$0xff] }
   0xd   : > { %s19601_s10 = smov (!%p323_p3, %s10089_s10), 1  ;;  %493 = vmatprep.mubr.f32.mxu0 %v366_v0  ;;  %791 = vmatprep.mubr.f32.mxu1 %v10099_v1  ;;  %v10169_v39 = vld [vmem:[%s19358_s2 + $0x78] sm:$0xff]  ;;  %v367_v41 = vld [vmem:[%s19357_s1 + $0x10] sm:$0xff]  ;;  %v370_v43 = vld [vmem:[%s19357_s1 + $0x28] sm:$0xff] }
   0xe   : > { %s11342_s15 = sshll.u32 %s19601_s10, 8  ;;  %v661_v40 = vld [vmem:[%s19358_s2 + $0x38] sm:$0xff]  ;;  %v10100_v42 = vld [vmem:[%s19357_s1 + $0x210] sm:$0xff]  ;;  %v10103_v44 = vld [vmem:[%s19357_s1 + $0x228] sm:$0xff]  ;;  %s11343_s26 = sshll.u32 %s19601_s10, 6 }
   0xf   : > { %s13818_s18 = scalar_lea.vmem %s19356_s0, %s11342_s15  ;;  %v10168_v45 = vld [vmem:[%s19358_s2 + $0x70] sm:$0xff]  ;;  %v369_v47 = vld [vmem:[%s19357_s1 + $0x20] sm:$0xff]  ;;  %v372_v49 = vld [vmem:[%s19357_s1 + $0x38] sm:$0xff]  ;;  %s19331_s29 = scalar_lea.vmem %s19365_s9, %s11343_s26 }
  0x10   : > { %v13821_v3 = vld [vmem:[%s13818_s18 + $0x78] sm:$0xff]  ;;  %v13824_v4 = vld [vmem:[%s13818_s18 + $0x70] sm:$0xff]  ;;  %v13831_v5 = vld [vmem:[%s13818_s18 + $0x68] sm:$0xff] }
  0x11   : > { %430 = vmatpush1.msra.mxu0 %v13821_v3  ;;  %728 = vmatpush1.msra.mxu1 %v13821_v3  ;;  %v13838_v6 = vld [vmem:[%s13818_s18 + $0x60] sm:$0xff]  ;;  %v13845_v7 = vld [vmem:[%s13818_s18 + $0x58] sm:$0xff]  ;;  %v13852_v8 = vld [vmem:[%s13818_s18 + $0x50] sm:$0xff] }
  0x12   : > { %431 = vmatprep.subr.mxu0 %v19366_v2  ;;  %729 = vmatprep.subr.mxu1 %v19366_v2  ;;  %v13859_v9 = vld [vmem:[%s13818_s18 + $0x48] sm:$0xff]  ;;  %v13866_v10 = vld [vmem:[%s13818_s18 + $0x40] sm:$0xff]  ;;  %v13873_v11 = vld [vmem:[%s13818_s18 + $0x38] sm:$0xff] }
  0x13   : > { %432 = vmatpush1.msra.mxu0 %v13824_v4  ;;  %730 = vmatpush1.msra.mxu1 %v13824_v4  ;;  %v13880_v12 = vld [vmem:[%s13818_s18 + $0x30] sm:$0xff]  ;;  %v13887_v13 = vld [vmem:[%s13818_s18 + $0x28] sm:$0xff]  ;;  %v13894_v14 = vld [vmem:[%s13818_s18 + $0x20] sm:$0xff] }
  0x14   : > { %433 = vmatprep.subr.mxu0 %v19366_v2  ;;  %731 = vmatprep.subr.mxu1 %v19366_v2  ;;  %v13901_v15 = vld [vmem:[%s13818_s18 + $0x18] sm:$0xff]  ;;  %v13908_v16 = vld [vmem:[%s13818_s18 + $0x10] sm:$0xff]  ;;  %v13915_v17 = vld [vmem:[%s13818_s18 + $0x8] sm:$0xff] }
  0x15   : > { %434 = vmatpush1.msra.mxu0 %v13831_v5  ;;  %732 = vmatpush1.msra.mxu1 %v13831_v5  ;;  %v13922_v18 = vld [vmem:[%s13818_s18] sm:$0xff]  ;;  %v13929_v19 = vld [vmem:[%s13818_s18 + $0xf8] sm:$0xff]  ;;  %v13936_v20 = vld [vmem:[%s13818_s18 + $0xf0] sm:$0xff] }
  0x16   : > { %435 = vmatprep.subr.mxu0 %v19366_v2  ;;  %733 = vmatprep.subr.mxu1 %v19366_v2  ;;  %v13943_v21 = vld [vmem:[%s13818_s18 + $0xe8] sm:$0xff]  ;;  %v13950_v22 = vld [vmem:[%s13818_s18 + $0xe0] sm:$0xff]  ;;  %v13957_v23 = vld [vmem:[%s13818_s18 + $0xd8] sm:$0xff] }
  0x17   : > { %436 = vmatpush1.msra.mxu0 %v13838_v6  ;;  %734 = vmatpush1.msra.mxu1 %v13838_v6  ;;  %v13964_v24 = vld [vmem:[%s13818_s18 + $0xd0] sm:$0xff]  ;;  %v13971_v25 = vld [vmem:[%s13818_s18 + $0xc8] sm:$0xff]  ;;  %v13978_v26 = vld [vmem:[%s13818_s18 + $0xc0] sm:$0xff] }
  0x18   : > { %437 = vmatprep.subr.mxu0 %v19366_v2  ;;  %735 = vmatprep.subr.mxu1 %v19366_v2  ;;  %v13985_v27 = vld [vmem:[%s13818_s18 + $0xb8] sm:$0xff]  ;;  %v13992_v28 = vld [vmem:[%s13818_s18 + $0xb0] sm:$0xff]  ;;  %v13999_v29 = vld [vmem:[%s13818_s18 + $0xa8] sm:$0xff] }
  0x19   : > { %438 = vmatpush1.msra.mxu0 %v13845_v7  ;;  %736 = vmatpush1.msra.mxu1 %v13845_v7  ;;  %v14006_v30 = vld [vmem:[%s13818_s18 + $0xa0] sm:$0xff]  ;;  %v14013_v31 = vld [vmem:[%s13818_s18 + $0x98] sm:$0xff]  ;;  %v14020_v32 = vld [vmem:[%s13818_s18 + $0x90] sm:$0xff] }
  0x1a   : > { %439 = vmatprep.subr.mxu0 %v19366_v2  ;;  %737 = vmatprep.subr.mxu1 %v19366_v2  ;;  %v14027_v33 = vld [vmem:[%s13818_s18 + $0x88] sm:$0xff]  ;;  %v14034_v34 = vld [vmem:[%s13818_s18 + $0x80] sm:$0xff]  ;;  %v660_v46 = vld [vmem:[%s19358_s2 + $0x30] sm:$0xff] }
  0x1b   : > { %440 = vmatpush1.msra.mxu0 %v13852_v8  ;;  %738 = vmatpush1.msra.mxu1 %v13852_v8  ;;  %v10102_v48 = vld [vmem:[%s19357_s1 + $0x220] sm:$0xff]  ;;  %v10105_v50 = vld [vmem:[%s19357_s1 + $0x238] sm:$0xff]  ;;  %v10167_v51 = vld [vmem:[%s19358_s2 + $0x68] sm:$0xff] }
  0x1c   : > { %441 = vmatprep.subr.mxu0 %v19366_v2  ;;  %739 = vmatprep.subr.mxu1 %v19366_v2  ;;  %v659_v52 = vld [vmem:[%s19358_s2 + $0x28] sm:$0xff]  ;;  %v371_v53 = vld [vmem:[%s19357_s1 + $0x30] sm:$0xff]  ;;  %v10166_v57 = vld [vmem:[%s19358_s2 + $0x60] sm:$0xff] }
  0x1d   : > { %442 = vmatpush1.msra.mxu0 %v13859_v9  ;;  %740 = vmatpush1.msra.mxu1 %v13859_v9  ;;  %v10104_v54 = vld [vmem:[%s19357_s1 + $0x230] sm:$0xff]  ;;  %v374_v55 = vld [vmem:[%s19357_s1 + $0x48] sm:$0xff]  ;;  %v658_v58 = vld [vmem:[%s19358_s2 + $0x20] sm:$0xff] }
  0x1e   : > { %443 = vmatprep.subr.mxu0 %v19366_v2  ;;  %741 = vmatprep.subr.mxu1 %v19366_v2  ;;  %v10107_v56 = vld [vmem:[%s19357_s1 + $0x248] sm:$0xff]  ;;  %v373_v59 = vld [vmem:[%s19357_s1 + $0x40] sm:$0xff]  ;;  %v376_v61 = vld [vmem:[%s19357_s1 + $0x58] sm:$0xff] }
  0x1f   : > { %444 = vmatpush1.msra.mxu0 %v13866_v10  ;;  %742 = vmatpush1.msra.mxu1 %v13866_v10  ;;  %v10106_v60 = vld [vmem:[%s19357_s1 + $0x240] sm:$0xff]  ;;  %v10109_v62 = vld [vmem:[%s19357_s1 + $0x258] sm:$0xff]  ;;  %v375_v1 = vld [vmem:[%s19357_s1 + $0x50] sm:$0xff] }
  0x20   : > { %445 = vmatprep.subr.mxu0 %v19366_v2  ;;  %743 = vmatprep.subr.mxu1 %v19366_v2  ;;  %v10165_v63 = vld [vmem:[%s19358_s2 + $0x58] sm:$0xff] }
  0x21   : > { %446 = vmatpush1.msra.mxu0 %v13873_v11  ;;  %744 = vmatpush1.msra.mxu1 %v13873_v11  ;;  %v657_v0 = vld [vmem:[%s19358_s2 + $0x18] sm:$0xff] }
  0x22   : > { %447 = vmatprep.subr.mxu0 %v19366_v2  ;;  %745 = vmatprep.subr.mxu1 %v19366_v2 }
  0x23   : > { %448 = vmatpush1.msra.mxu0 %v13880_v12  ;;  %746 = vmatpush1.msra.mxu1 %v13880_v12 }
  0x24   : > { %449 = vmatprep.subr.mxu0 %v19366_v2  ;;  %747 = vmatprep.subr.mxu1 %v19366_v2 }
  0x25   : > { %450 = vmatpush1.msra.mxu0 %v13887_v13  ;;  %748 = vmatpush1.msra.mxu1 %v13887_v13 }
  0x26   : > { %451 = vmatprep.subr.mxu0 %v19366_v2  ;;  %749 = vmatprep.subr.mxu1 %v19366_v2 }
  0x27   : > { %452 = vmatpush1.msra.mxu0 %v13894_v14  ;;  %750 = vmatpush1.msra.mxu1 %v13894_v14 }
  0x28   : > { %453 = vmatprep.subr.mxu0 %v19366_v2  ;;  %751 = vmatprep.subr.mxu1 %v19366_v2 }
  0x29   : > { %454 = vmatpush1.msra.mxu0 %v13901_v15  ;;  %752 = vmatpush1.msra.mxu1 %v13901_v15 }
  0x2a   : > { %455 = vmatprep.subr.mxu0 %v19366_v2  ;;  %753 = vmatprep.subr.mxu1 %v19366_v2 }
  0x2b   : > { %456 = vmatpush1.msra.mxu0 %v13908_v16  ;;  %754 = vmatpush1.msra.mxu1 %v13908_v16 }
  0x2c   : > { %457 = vmatprep.subr.mxu0 %v19366_v2  ;;  %755 = vmatprep.subr.mxu1 %v19366_v2 }
  0x2d   : > { %458 = vmatpush1.msra.mxu0 %v13915_v17  ;;  %756 = vmatpush1.msra.mxu1 %v13915_v17 }
  0x2e   : > { %459 = vmatprep.subr.mxu0 %v19366_v2  ;;  %757 = vmatprep.subr.mxu1 %v19366_v2 }
  0x2f   : > { %460 = vmatpush1.msra.mxu0 %v13922_v18  ;;  %758 = vmatpush1.msra.mxu1 %v13922_v18 }
  0x30   : > { %461 = vmatprep.subr.mxu0 %v19366_v2  ;;  %759 = vmatprep.subr.mxu1 %v19366_v2 }
  0x31   : > { %462 = vmatpush2.msra.mxu0 %v13929_v19  ;;  %760 = vmatpush2.msra.mxu1 %v13929_v19 }
  0x32   : > { %463 = vmatprep.subr.mxu0 %v19366_v2  ;;  %761 = vmatprep.subr.mxu1 %v19366_v2 }
  0x33   : > { %464 = vmatpush2.msra.mxu0 %v13936_v20  ;;  %762 = vmatpush2.msra.mxu1 %v13936_v20 }
  0x34   : > { %465 = vmatprep.subr.mxu0 %v19366_v2  ;;  %763 = vmatprep.subr.mxu1 %v19366_v2 }
  0x35   : > { %466 = vmatpush2.msra.mxu0 %v13943_v21  ;;  %764 = vmatpush2.msra.mxu1 %v13943_v21 }
  0x36   : > { %467 = vmatprep.subr.mxu0 %v19366_v2  ;;  %765 = vmatprep.subr.mxu1 %v19366_v2 }
  0x37   : > { %468 = vmatpush2.msra.mxu0 %v13950_v22  ;;  %766 = vmatpush2.msra.mxu1 %v13950_v22 }
  0x38   : > { %469 = vmatprep.subr.mxu0 %v19366_v2  ;;  %767 = vmatprep.subr.mxu1 %v19366_v2 }
  0x39   : > { %470 = vmatpush2.msra.mxu0 %v13957_v23  ;;  %768 = vmatpush2.msra.mxu1 %v13957_v23 }
  0x3a   : > { %471 = vmatprep.subr.mxu0 %v19366_v2  ;;  %769 = vmatprep.subr.mxu1 %v19366_v2 }
  0x3b   : > { %472 = vmatpush2.msra.mxu0 %v13964_v24  ;;  %770 = vmatpush2.msra.mxu1 %v13964_v24 }
  0x3c   : > { %473 = vmatprep.subr.mxu0 %v19366_v2  ;;  %771 = vmatprep.subr.mxu1 %v19366_v2 }
  0x3d   : > { %474 = vmatpush2.msra.mxu0 %v13971_v25  ;;  %772 = vmatpush2.msra.mxu1 %v13971_v25 }
  0x3e   : > { %475 = vmatprep.subr.mxu0 %v19366_v2  ;;  %773 = vmatprep.subr.mxu1 %v19366_v2 }
  0x3f   : > { %476 = vmatpush2.msra.mxu0 %v13978_v26  ;;  %774 = vmatpush2.msra.mxu1 %v13978_v26 }
  0x40   : > { %477 = vmatprep.subr.mxu0 %v19366_v2  ;;  %775 = vmatprep.subr.mxu1 %v19366_v2 }
  0x41   : > { %478 = vmatpush2.msra.mxu0 %v13985_v27  ;;  %776 = vmatpush2.msra.mxu1 %v13985_v27 }
  0x42   : > { %479 = vmatprep.subr.mxu0 %v19366_v2  ;;  %777 = vmatprep.subr.mxu1 %v19366_v2 }
  0x43   : > { %480 = vmatpush2.msra.mxu0 %v13992_v28  ;;  %778 = vmatpush2.msra.mxu1 %v13992_v28 }
  0x44   : > { %481 = vmatprep.subr.mxu0 %v19366_v2  ;;  %779 = vmatprep.subr.mxu1 %v19366_v2 }
  0x45   : > { %482 = vmatpush2.msra.mxu0 %v13999_v29  ;;  %780 = vmatpush2.msra.mxu1 %v13999_v29 }
  0x46   : > { %483 = vmatprep.subr.mxu0 %v19366_v2  ;;  %781 = vmatprep.subr.mxu1 %v19366_v2 }
  0x47   : > { %484 = vmatpush2.msra.mxu0 %v14006_v30  ;;  %782 = vmatpush2.msra.mxu1 %v14006_v30 }
  0x48   : > { %485 = vmatprep.subr.mxu0 %v19366_v2  ;;  %783 = vmatprep.subr.mxu1 %v19366_v2 }
  0x49   : > { %486 = vmatpush2.msra.mxu0 %v14013_v31  ;;  %784 = vmatpush2.msra.mxu1 %v14013_v31 }
  0x4a   : > { %487 = vmatprep.subr.mxu0 %v19366_v2  ;;  %785 = vmatprep.subr.mxu1 %v19366_v2 }
  0x4b   : > { %488 = vmatpush2.msra.mxu0 %v14020_v32  ;;  %786 = vmatpush2.msra.mxu1 %v14020_v32 }
  0x4c   : > { %489 = vmatprep.subr.mxu0 %v19366_v2  ;;  %787 = vmatprep.subr.mxu1 %v19366_v2 }
  0x4d   : > { %490 = vmatpush2.msra.mxu0 %v14027_v33  ;;  %788 = vmatpush2.msra.mxu1 %v14027_v33 }
  0x4e   : > { %491 = vmatprep.subr.mxu0 %v19366_v2  ;;  %789 = vmatprep.subr.mxu1 %v19366_v2 }
  0x4f   : > { %492 = vmatpush2.msra.mxu0 %v14034_v34  ;;  %790 = vmatpush2.msra.mxu1 %v14034_v34 }
  0x50   : > { %494 = vmatmul.mubr.f32.vlgmr.msra.gmra.mxu0 %v365_v35  ;;  %792 = vmatmul.mubr.f32.vlgmr.msra.gmra.mxu1 %v10098_v36  ;;  %v10108_v35 = vld [vmem:[%s19357_s1 + $0x250] sm:$0xff]  ;;  %v378_v36 = vld [vmem:[%s19357_s1 + $0x68] sm:$0xff] }
  0x51   : > { %498 = vmatprep.mubr.f32.mxu0 %v368_v37  ;;  %796 = vmatprep.mubr.f32.mxu1 %v10101_v38  ;;  %v10111_v37 = vld [vmem:[%s19357_s1 + $0x268] sm:$0xff]  ;;  %v10164_v38 = vld [vmem:[%s19358_s2 + $0x50] sm:$0xff] }
  0x52   : > { %12312 = vmatprep.subr.mxu0 %v10169_v39  ;;  %12376 = vmatprep.subr.mxu1 %v661_v40 }
  0x53   : > { %12313 = vmatpush3.msra.mxu0 %v10169_v39  ;;  %12377 = vmatpush3.msra.mxu1 %v661_v40  ;;  %v656_v39 = vld [vmem:[%s19358_s2 + $0x10] sm:$0xff]  ;;  %v377_v40 = vld [vmem:[%s19357_s1 + $0x60] sm:$0xff] }
  0x54   : > { %499 = vmatmul.mubr.f32.gmra.mxu0 %v367_v41  ;;  %797 = vmatmul.mubr.f32.gmra.mxu1 %v10100_v42  ;;  %v10110_v41 = vld [vmem:[%s19357_s1 + $0x260] sm:$0xff]  ;;  %v380_v42 = vld [vmem:[%s19357_s1 + $0x78] sm:$0xff] }
  0x55   : > { %503 = vmatprep.mubr.f32.mxu0 %v370_v43  ;;  %801 = vmatprep.mubr.f32.mxu1 %v10103_v44  ;;  %v10113_v43 = vld [vmem:[%s19357_s1 + $0x278] sm:$0xff]  ;;  %v379_v44 = vld [vmem:[%s19357_s1 + $0x70] sm:$0xff] }
  0x56   : > { %12314 = vmatprep.subr.mxu0 %v10168_v45  ;;  %12378 = vmatprep.subr.mxu1 %v660_v46 }
  0x57   : > { %12315 = vmatpush3.msra.mxu0 %v10168_v45  ;;  %12379 = vmatpush3.msra.mxu1 %v660_v46  ;;  %v10112_v45 = vld [vmem:[%s19357_s1 + $0x270] sm:$0xff]  ;;  %v382_v46 = vld [vmem:[%s19357_s1 + $0x88] sm:$0xff] }
  0x58   : > { %504 = vmatmul.mubr.f32.gmra.mxu0 %v369_v47  ;;  %802 = vmatmul.mubr.f32.gmra.mxu1 %v10102_v48  ;;  %v10115_v47 = vld [vmem:[%s19357_s1 + $0x288] sm:$0xff]  ;;  %v381_v48 = vld [vmem:[%s19357_s1 + $0x80] sm:$0xff] }
  0x59   : > { %508 = vmatprep.mubr.f32.mxu0 %v372_v49  ;;  %806 = vmatprep.mubr.f32.mxu1 %v10105_v50  ;;  %v10114_v49 = vld [vmem:[%s19357_s1 + $0x280] sm:$0xff]  ;;  %v384_v50 = vld [vmem:[%s19357_s1 + $0x98] sm:$0xff] }
  0x5a   : > { %12316 = vmatprep.subr.mxu0 %v10167_v51  ;;  %12380 = vmatprep.subr.mxu1 %v659_v52 }
  0x5b   : > { %12317 = vmatpush3.msra.mxu0 %v10167_v51  ;;  %12381 = vmatpush3.msra.mxu1 %v659_v52  ;;  %v10117_v51 = vld [vmem:[%s19357_s1 + $0x298] sm:$0xff]  ;;  %v383_v52 = vld [vmem:[%s19357_s1 + $0x90] sm:$0xff] }
  0x5c   : > { %509 = vmatmul.mubr.f32.gmra.mxu0 %v371_v53  ;;  %807 = vmatmul.mubr.f32.gmra.mxu1 %v10104_v54  ;;  %v10116_v53 = vld [vmem:[%s19357_s1 + $0x290] sm:$0xff]  ;;  %v386_v54 = vld [vmem:[%s19357_s1 + $0xa8] sm:$0xff] }
  0x5d   : > { %513 = vmatprep.mubr.f32.mxu0 %v374_v55  ;;  %811 = vmatprep.mubr.f32.mxu1 %v10107_v56  ;;  %v10119_v55 = vld [vmem:[%s19357_s1 + $0x2a8] sm:$0xff]  ;;  %v385_v56 = vld [vmem:[%s19357_s1 + $0xa0] sm:$0xff] }
  0x5e   : > { %12318 = vmatprep.subr.mxu0 %v10166_v57  ;;  %12382 = vmatprep.subr.mxu1 %v658_v58 }
  0x5f   : > { %12319 = vmatpush3.msra.mxu0 %v10166_v57  ;;  %12383 = vmatpush3.msra.mxu1 %v658_v58  ;;  %v10118_v57 = vld [vmem:[%s19357_s1 + $0x2a0] sm:$0xff]  ;;  %v388_v58 = vld [vmem:[%s19357_s1 + $0xb8] sm:$0xff] }
  0x60   : > { %514 = vmatmul.mubr.f32.gmra.mxu0 %v373_v59  ;;  %812 = vmatmul.mubr.f32.gmra.mxu1 %v10106_v60  ;;  %v10121_v59 = vld [vmem:[%s19357_s1 + $0x2b8] sm:$0xff]  ;;  %v387_v60 = vld [vmem:[%s19357_s1 + $0xb0] sm:$0xff] }
  0x61   : > { %518 = vmatprep.mubr.f32.mxu0 %v376_v61  ;;  %816 = vmatprep.mubr.f32.mxu1 %v10109_v62  ;;  %v10120_v61 = vld [vmem:[%s19357_s1 + $0x2b0] sm:$0xff]  ;;  %v390_v62 = vld [vmem:[%s19357_s1 + $0xc8] sm:$0xff] }
  0x62   : > { %12320 = vmatprep.subr.mxu0 %v10165_v63  ;;  %12384 = vmatprep.subr.mxu1 %v657_v0 }
  0x63   : > { %12321 = vmatpush3.msra.mxu0 %v10165_v63  ;;  %12385 = vmatpush3.msra.mxu1 %v657_v0  ;;  %v10123_v63 = vld [vmem:[%s19357_s1 + $0x2c8] sm:$0xff]  ;;  %v389_v0 = vld [vmem:[%s19357_s1 + $0xc0] sm:$0xff] }
  0x64   : > { %519 = vmatmul.mubr.f32.gmra.mxu0 %v375_v1  ;;  %817 = vmatmul.mubr.f32.gmra.mxu1 %v10108_v35  ;;  %v10122_v1 = vld [vmem:[%s19357_s1 + $0x2c0] sm:$0xff]  ;;  %v392_v35 = vld [vmem:[%s19357_s1 + $0xd8] sm:$0xff] }
  0x65   : > { %523 = vmatprep.mubr.f32.mxu0 %v378_v36  ;;  %821 = vmatprep.mubr.f32.mxu1 %v10111_v37  ;;  %v10125_v36 = vld [vmem:[%s19357_s1 + $0x2d8] sm:$0xff]  ;;  %v391_v37 = vld [vmem:[%s19357_s1 + $0xd0] sm:$0xff] }
  0x66   : > { %12322 = vmatprep.subr.mxu0 %v10164_v38  ;;  %12386 = vmatprep.subr.mxu1 %v656_v39 }
  0x67   : > { %12323 = vmatpush3.msra.mxu0 %v10164_v38  ;;  %12387 = vmatpush3.msra.mxu1 %v656_v39  ;;  %v10124_v38 = vld [vmem:[%s19357_s1 + $0x2d0] sm:$0xff]  ;;  %v394_v39 = vld [vmem:[%s19357_s1 + $0xe8] sm:$0xff] }
  0x68   : > { %524 = vmatmul.mubr.f32.gmra.mxu0 %v377_v40  ;;  %822 = vmatmul.mubr.f32.gmra.mxu1 %v10110_v41  ;;  %v10127_v40 = vld [vmem:[%s19357_s1 + $0x2e8] sm:$0xff]  ;;  %v393_v41 = vld [vmem:[%s19357_s1 + $0xe0] sm:$0xff] }
  0x69   : > { %528 = vmatprep.mubr.f32.mxu0 %v380_v42  ;;  %826 = vmatprep.mubr.f32.mxu1 %v10113_v43  ;;  %v10126_v42 = vld [vmem:[%s19357_s1 + $0x2e0] sm:$0xff]  ;;  %v396_v43 = vld [vmem:[%s19357_s1 + $0xf8] sm:$0xff] }
  0x6c   : > { %529 = vmatmul.mubr.f32.gmra.mxu0 %v379_v44  ;;  %827 = vmatmul.mubr.f32.gmra.mxu1 %v10112_v45  ;;  %v10129_v44 = vld [vmem:[%s19357_s1 + $0x2f8] sm:$0xff]  ;;  %v395_v45 = vld [vmem:[%s19357_s1 + $0xf0] sm:$0xff] }
  0x6d   : > { %533 = vmatprep.mubr.f32.mxu0 %v382_v46  ;;  %831 = vmatprep.mubr.f32.mxu1 %v10115_v47  ;;  %v10128_v46 = vld [vmem:[%s19357_s1 + $0x2f0] sm:$0xff]  ;;  %v398_v47 = vld [vmem:[%s19357_s1 + $0x108] sm:$0xff] }
  0x70   : > { %534 = vmatmul.mubr.f32.gmra.mxu0 %v381_v48  ;;  %832 = vmatmul.mubr.f32.gmra.mxu1 %v10114_v49  ;;  %v10131_v48 = vld [vmem:[%s19357_s1 + $0x308] sm:$0xff]  ;;  %v397_v49 = vld [vmem:[%s19357_s1 + $0x100] sm:$0xff] }
  0x71   : > { %538 = vmatprep.mubr.f32.mxu0 %v384_v50  ;;  %836 = vmatprep.mubr.f32.mxu1 %v10117_v51  ;;  %v10130_v50 = vld [vmem:[%s19357_s1 + $0x300] sm:$0xff]  ;;  %v400_v51 = vld [vmem:[%s19357_s1 + $0x118] sm:$0xff] }
  0x74   : > { %539 = vmatmul.mubr.f32.gmra.mxu0 %v383_v52  ;;  %837 = vmatmul.mubr.f32.gmra.mxu1 %v10116_v53  ;;  %v10133_v52 = vld [vmem:[%s19357_s1 + $0x318] sm:$0xff]  ;;  %v10163_v53 = vld [vmem:[%s19358_s2 + $0x48] sm:$0xff] }
  0x75   : > { %543 = vmatprep.mubr.f32.mxu0 %v386_v54  ;;  %841 = vmatprep.mubr.f32.mxu1 %v10119_v55  ;;  %v655_v54 = vld [vmem:[%s19358_s2 + $0x8] sm:$0xff]  ;;  %v399_v55 = vld [vmem:[%s19357_s1 + $0x110] sm:$0xff] }
  0x76   : > { %12324 = vmatprep.subr.mxu0 %v10163_v53  ;;  %12388 = vmatprep.subr.mxu1 %v655_v54 }
  0x77   : > { %12325 = vmatpush3.msra.mxu0 %v10163_v53  ;;  %12389 = vmatpush3.msra.mxu1 %v655_v54  ;;  %v10147_v53 = vld [vmem:[%s19357_s1 + $0x388] sm:$0xff]  ;;  %v413_v54 = vld [vmem:[%s19357_s1 + $0x180] sm:$0xff] }
  0x78   : > { %544 = vmatmul.mubr.f32.gmra.mxu0 %v385_v56  ;;  %842 = vmatmul.mubr.f32.gmra.mxu1 %v10118_v57  ;;  %v10132_v56 = vld [vmem:[%s19357_s1 + $0x310] sm:$0xff]  ;;  %v402_v57 = vld [vmem:[%s19357_s1 + $0x128] sm:$0xff] }
  0x79   : > { %548 = vmatprep.mubr.f32.mxu0 %v388_v58  ;;  %846 = vmatprep.mubr.f32.mxu1 %v10121_v59  ;;  %v10135_v58 = vld [vmem:[%s19357_s1 + $0x328] sm:$0xff]  ;;  %v10162_v59 = vld [vmem:[%s19358_s2 + $0x40] sm:$0xff] }
  0x7a   : > { %12326 = vmatprep.subr.mxu0 %v10162_v59 }
  0x7b   : > { %12327 = vmatpush3.msra.mxu0 %v10162_v59  ;;  %v10148_v59 = vld [vmem:[%s19357_s1 + $0x390] sm:$0xff] }
  0x7c   : > { %549 = vmatmul.mubr.f32.gmra.mxu0 %v387_v60  ;;  %847 = vmatmul.mubr.f32.gmra.mxu1 %v10120_v61  ;;  %v654_v60 = vld [vmem:[%s19358_s2] sm:$0xff] }
  0x7d   : > { %553 = vmatprep.mubr.f32.mxu0 %v390_v62  ;;  %851 = vmatprep.mubr.f32.mxu1 %v10123_v63  ;;  %v401_v61 = vld [vmem:[%s19357_s1 + $0x120] sm:$0xff]  ;;  %v404_v63 = vld [vmem:[%s19357_s1 + $0x138] sm:$0xff] }
  0x7e   : > { %v10134_v62 = vld [vmem:[%s19357_s1 + $0x320] sm:$0xff]  ;;  %12390 = vmatprep.subr.mxu1 %v654_v60  ;;  %1669 = vmatprep.subr.mxu0 %v19366_v2 }
  0x7f   : > { %12391 = vmatpush3.msra.mxu1 %v654_v60  ;;  %v418_v60 = vld [vmem:[%s19357_s1 + $0x1a8] sm:$0xff] }
  0x80   : > { %554 = vmatmul.mubr.f32.gmra.mxu0 %v389_v0  ;;  %852 = vmatmul.mubr.f32.gmra.mxu1 %v10122_v1  ;;  %v10137_v0 = vld [vmem:[%s19357_s1 + $0x338] sm:$0xff]  ;;  %v403_v1 = vld [vmem:[%s19357_s1 + $0x130] sm:$0xff] }
  0x81   : > { %558 = vmatprep.mubr.f32.mxu0 %v392_v35  ;;  %856 = vmatprep.mubr.f32.mxu1 %v10125_v36  ;;  %v10136_v35 = vld [vmem:[%s19357_s1 + $0x330] sm:$0xff]  ;;  %v406_v36 = vld [vmem:[%s19357_s1 + $0x148] sm:$0xff] }
  0x84   : > { %559 = vmatmul.mubr.f32.gmra.mxu0 %v391_v37  ;;  %857 = vmatmul.mubr.f32.gmra.mxu1 %v10124_v38  ;;  %v10139_v37 = vld [vmem:[%s19357_s1 + $0x348] sm:$0xff]  ;;  %v405_v38 = vld [vmem:[%s19357_s1 + $0x140] sm:$0xff] }
  0x85   : > { %563 = vmatprep.mubr.f32.mxu0 %v394_v39  ;;  %861 = vmatprep.mubr.f32.mxu1 %v10127_v40  ;;  %v10138_v39 = vld [vmem:[%s19357_s1 + $0x340] sm:$0xff]  ;;  %v408_v40 = vld [vmem:[%s19357_s1 + $0x158] sm:$0xff] }
  0x88   : > { %564 = vmatmul.mubr.f32.gmra.mxu0 %v393_v41  ;;  %862 = vmatmul.mubr.f32.gmra.mxu1 %v10126_v42  ;;  %v10141_v41 = vld [vmem:[%s19357_s1 + $0x358] sm:$0xff]  ;;  %v407_v42 = vld [vmem:[%s19357_s1 + $0x150] sm:$0xff] }
  0x89   : > { %568 = vmatprep.mubr.f32.mxu0 %v396_v43  ;;  %866 = vmatprep.mubr.f32.mxu1 %v10129_v44  ;;  %v10140_v43 = vld [vmem:[%s19357_s1 + $0x350] sm:$0xff]  ;;  %v410_v44 = vld [vmem:[%s19357_s1 + $0x168] sm:$0xff] }
  0x8c   : > { %569 = vmatmul.mubr.f32.gmra.mxu0 %v395_v45  ;;  %867 = vmatmul.mubr.f32.gmra.mxu1 %v10128_v46  ;;  %v10143_v45 = vld [vmem:[%s19357_s1 + $0x368] sm:$0xff]  ;;  %v409_v46 = vld [vmem:[%s19357_s1 + $0x160] sm:$0xff] }
  0x8d   : > { %573 = vmatprep.mubr.f32.mxu0 %v398_v47  ;;  %871 = vmatprep.mubr.f32.mxu1 %v10131_v48  ;;  %v10142_v47 = vld [vmem:[%s19357_s1 + $0x360] sm:$0xff]  ;;  %v412_v48 = vld [vmem:[%s19357_s1 + $0x178] sm:$0xff] }
  0x90   : > { %574 = vmatmul.mubr.f32.gmra.mxu0 %v397_v49  ;;  %872 = vmatmul.mubr.f32.gmra.mxu1 %v10130_v50  ;;  %v10145_v49 = vld [vmem:[%s19357_s1 + $0x378] sm:$0xff]  ;;  %v411_v50 = vld [vmem:[%s19357_s1 + $0x170] sm:$0xff] }
  0x91   : > { %578 = vmatprep.mubr.f32.mxu0 %v400_v51  ;;  %876 = vmatprep.mubr.f32.mxu1 %v10133_v52  ;;  %v10144_v51 = vld [vmem:[%s19357_s1 + $0x370] sm:$0xff]  ;;  %v414_v52 = vld [vmem:[%s19357_s1 + $0x188] sm:$0xff] }
  0x94   : > { %579 = vmatmul.mubr.f32.gmra.mxu0 %v399_v55  ;;  %877 = vmatmul.mubr.f32.gmra.mxu1 %v10132_v56  ;;  %v10146_v55 = vld [vmem:[%s19357_s1 + $0x380] sm:$0xff]  ;;  %v416_v56 = vld [vmem:[%s19357_s1 + $0x198] sm:$0xff] }
  0x95   : > { %583 = vmatprep.mubr.f32.mxu0 %v402_v57  ;;  %881 = vmatprep.mubr.f32.mxu1 %v10135_v58  ;;  %v10149_v57 = vld [vmem:[%s19357_s1 + $0x398] sm:$0xff]  ;;  %v415_v58 = vld [vmem:[%s19357_s1 + $0x190] sm:$0xff] }
  0x98   : > { %584 = vmatmul.mubr.f32.gmra.mxu0 %v401_v61  ;;  %882 = vmatmul.mubr.f32.gmra.mxu1 %v10134_v62  ;;  %v10151_v61 = vld [vmem:[%s19357_s1 + $0x3a8] sm:$0xff]  ;;  %v417_v62 = vld [vmem:[%s19357_s1 + $0x1a0] sm:$0xff] }
  0x99   : > { %588 = vmatprep.mubr.f32.mxu0 %v404_v63  ;;  %886 = vmatprep.mubr.f32.mxu1 %v10137_v0  ;;  %v10150_v63 = vld [vmem:[%s19357_s1 + $0x3a0] sm:$0xff]  ;;  %v420_v0 = vld [vmem:[%s19357_s1 + $0x1b8] sm:$0xff] }
  0x9c   : > { %589 = vmatmul.mubr.f32.gmra.mxu0 %v403_v1  ;;  %887 = vmatmul.mubr.f32.gmra.mxu1 %v10136_v35  ;;  %v10153_v1 = vld [vmem:[%s19357_s1 + $0x3b8] sm:$0xff]  ;;  %v419_v35 = vld [vmem:[%s19357_s1 + $0x1b0] sm:$0xff] }
  0x9d   : > { %593 = vmatprep.mubr.f32.mxu0 %v406_v36  ;;  %891 = vmatprep.mubr.f32.mxu1 %v10139_v37  ;;  %v10152_v36 = vld [vmem:[%s19357_s1 + $0x3b0] sm:$0xff]  ;;  %v422_v37 = vld [vmem:[%s19357_s1 + $0x1c8] sm:$0xff] }
  0xa0   : > { %594 = vmatmul.mubr.f32.gmra.mxu0 %v405_v38  ;;  %892 = vmatmul.mubr.f32.gmra.mxu1 %v10138_v39  ;;  %v10155_v38 = vld [vmem:[%s19357_s1 + $0x3c8] sm:$0xff]  ;;  %v421_v39 = vld [vmem:[%s19357_s1 + $0x1c0] sm:$0xff] }
  0xa1   : > { %598 = vmatprep.mubr.f32.mxu0 %v408_v40  ;;  %896 = vmatprep.mubr.f32.mxu1 %v10141_v41  ;;  %v10154_v40 = vld [vmem:[%s19357_s1 + $0x3c0] sm:$0xff]  ;;  %v424_v41 = vld [vmem:[%s19357_s1 + $0x1d8] sm:$0xff] }
  0xa4   : > { %599 = vmatmul.mubr.f32.gmra.mxu0 %v407_v42  ;;  %897 = vmatmul.mubr.f32.gmra.mxu1 %v10140_v43  ;;  %v10157_v42 = vld [vmem:[%s19357_s1 + $0x3d8] sm:$0xff]  ;;  %v423_v43 = vld [vmem:[%s19357_s1 + $0x1d0] sm:$0xff] }
  0xa5   : > { %603 = vmatprep.mubr.f32.mxu0 %v410_v44  ;;  %901 = vmatprep.mubr.f32.mxu1 %v10143_v45  ;;  %v10156_v44 = vld [vmem:[%s19357_s1 + $0x3d0] sm:$0xff]  ;;  %v426_v45 = vld [vmem:[%s19357_s1 + $0x1e8] sm:$0xff] }
  0xa8   : > { %604 = vmatmul.mubr.f32.gmra.mxu0 %v409_v46  ;;  %902 = vmatmul.mubr.f32.gmra.mxu1 %v10142_v47  ;;  %v10159_v46 = vld [vmem:[%s19357_s1 + $0x3e8] sm:$0xff]  ;;  %v425_v47 = vld [vmem:[%s19357_s1 + $0x1e0] sm:$0xff] }
  0xa9   : > { %608 = vmatprep.mubr.f32.mxu0 %v412_v48  ;;  %906 = vmatprep.mubr.f32.mxu1 %v10145_v49  ;;  %v10158_v48 = vld [vmem:[%s19357_s1 + $0x3e0] sm:$0xff]  ;;  %v428_v49 = vld [vmem:[%s19357_s1 + $0x1f8] sm:$0xff] }
  0xac   : > { %609 = vmatmul.mubr.f32.gmra.mxu0 %v411_v50  ;;  %907 = vmatmul.mubr.f32.gmra.mxu1 %v10144_v51  ;;  %v10161_v50 = vld [vmem:[%s19357_s1 + $0x3f8] sm:$0xff]  ;;  %v427_v51 = vld [vmem:[%s19357_s1 + $0x1f0] sm:$0xff] }
  0xad   : > { %613 = vmatprep.mubr.f32.mxu0 %v414_v52  ;;  %911 = vmatprep.mubr.f32.mxu1 %v10147_v53  ;;  %v10160_v52 = vld [vmem:[%s19357_s1 + $0x3f0] sm:$0xff] }
  0xb0   : > { %614 = vmatmul.mubr.f32.gmra.mxu0 %v413_v54  ;;  %912 = vmatmul.mubr.f32.gmra.mxu1 %v10146_v55 }
  0xb1   : > { %618 = vmatprep.mubr.f32.mxu0 %v416_v56  ;;  %916 = vmatprep.mubr.f32.mxu1 %v10149_v57 }
  0xb4   : > { %619 = vmatmul.mubr.f32.gmra.mxu0 %v415_v58  ;;  %917 = vmatmul.mubr.f32.gmra.mxu1 %v10148_v59 }
  0xb5   : > { %623 = vmatprep.mubr.f32.mxu0 %v418_v60  ;;  %921 = vmatprep.mubr.f32.mxu1 %v10151_v61 }
  0xb8   : > { %624 = vmatmul.mubr.f32.gmra.mxu0 %v417_v62  ;;  %922 = vmatmul.mubr.f32.gmra.mxu1 %v10150_v63 }
  0xb9   : > { %628 = vmatprep.mubr.f32.mxu0 %v420_v0  ;;  %926 = vmatprep.mubr.f32.mxu1 %v10153_v1 }
  0xbc   : > { %629 = vmatmul.mubr.f32.gmra.mxu0 %v419_v35  ;;  %927 = vmatmul.mubr.f32.gmra.mxu1 %v10152_v36 }
  0xbd   : > { %633 = vmatprep.mubr.f32.mxu0 %v422_v37  ;;  %931 = vmatprep.mubr.f32.mxu1 %v10155_v38 }
  0xc0   : > { %634 = vmatmul.mubr.f32.gmra.mxu0 %v421_v39  ;;  %932 = vmatmul.mubr.f32.gmra.mxu1 %v10154_v40 }
  0xc1   : > { %638 = vmatprep.mubr.f32.mxu0 %v424_v41  ;;  %936 = vmatprep.mubr.f32.mxu1 %v10157_v42 }
  0xc4   : > { %639 = vmatmul.mubr.f32.gmra.mxu0 %v423_v43  ;;  %937 = vmatmul.mubr.f32.gmra.mxu1 %v10156_v44 }
  0xc5   : > { %643 = vmatprep.mubr.f32.mxu0 %v426_v45  ;;  %941 = vmatprep.mubr.f32.mxu1 %v10159_v46 }
  0xc8   : > { %644 = vmatmul.mubr.f32.gmra.mxu0 %v425_v47  ;;  %942 = vmatmul.mubr.f32.gmra.mxu1 %v10158_v48 }
  0xc9   : > { %648 = vmatprep.mubr.f32.mxu0 %v428_v49  ;;  %946 = vmatprep.mubr.f32.mxu1 %v10161_v50 }
  0xcc   : > { %649 = vmatmul.mubr.f32.gmra.mxu0 %v427_v51  ;;  %947 = vmatmul.mubr.f32.gmra.mxu1 %v10160_v52 }
 0x110   : > { %v495_v53 = vpop.f32.mrf.mxu0  ;;  %v793_v54 = vpop.f32.mrf.mxu1 }
 0x111   : > { %12328 = vmatprep.mubr.msk.f32.mxu0 %vm961_vm0, %v793_v54  ;;  %12392 = vmatprep.mubr.msk.f32.mxu1 %vm961_vm0, %v495_v53 }
 0x112   : > { %v497_v55 = vpop.f32.mrf.mxu0  ;;  %v795_v56 = vpop.f32.mrf.mxu1 }
 0x114   : > { %v500_v57 = vpop.f32.mrf.mxu0  ;;  %v798_v58 = vpop.f32.mrf.mxu1 }
 0x115   : > { %12329 = vmatmul.mubr.msk.f32.vlgmr.msra.gmra.mxu0 %vm961_vm0, %v798_v58  ;;  %12393 = vmatmul.mubr.msk.f32.vlgmr.msra.gmra.mxu1 %vm961_vm0, %v500_v57 }
 0x116   : > { %v502_v59 = vpop.f32.mrf.mxu0  ;;  %v800_v60 = vpop.f32.mrf.mxu1  ;;  %1670 = vmatpush1.msra.mxu0 %v13821_v3 }
 0x117   : > { %1671 = vmatprep.subr.mxu0 %v19366_v2 }
 0x118   : > { %v505_v61 = vpop.f32.mrf.mxu0  ;;  %v803_v62 = vpop.f32.mrf.mxu1  ;;  %1672 = vmatpush1.msra.mxu0 %v13824_v4 }
 0x119   : > { %12331 = vmatprep.mubr.msk.f32.mxu0 %vm961_vm0, %v803_v62  ;;  %12395 = vmatprep.mubr.msk.f32.mxu1 %vm961_vm0, %v505_v61 }
 0x11a   : > { %v507_v63 = vpop.f32.mrf.mxu0  ;;  %v805_v0 = vpop.f32.mrf.mxu1  ;;  %1673 = vmatprep.subr.mxu0 %v19366_v2 }
 0x11b   : > { %1674 = vmatpush1.msra.mxu0 %v13831_v5 }
 0x11c   : > { %v510_v1 = vpop.f32.mrf.mxu0  ;;  %v808_v35 = vpop.f32.mrf.mxu1  ;;  %1675 = vmatprep.subr.mxu0 %v19366_v2 }
 0x11d   : > { %12332 = vmatmul.mubr.msk.f32.gmra.mxu0 %vm961_vm0, %v808_v35  ;;  %12396 = vmatmul.mubr.msk.f32.gmra.mxu1 %vm961_vm0, %v510_v1 }
 0x11e   : > { %v512_v3 = vpop.f32.mrf.mxu0  ;;  %v810_v4 = vpop.f32.mrf.mxu1  ;;  %1676 = vmatpush1.msra.mxu0 %v13838_v6 }
 0x11f   : > { %1677 = vmatprep.subr.mxu0 %v19366_v2 }
 0x120   : > { %v515_v36 = vpop.f32.mrf.mxu0  ;;  %v813_v37 = vpop.f32.mrf.mxu1  ;;  %1678 = vmatpush1.msra.mxu0 %v13845_v7 }
 0x121   : > { %12334 = vmatprep.mubr.msk.f32.mxu0 %vm961_vm0, %v813_v37  ;;  %12398 = vmatprep.mubr.msk.f32.mxu1 %vm961_vm0, %v515_v36 }
 0x122   : > { %v517_v5 = vpop.f32.mrf.mxu0  ;;  %v815_v38 = vpop.f32.mrf.mxu1  ;;  %1679 = vmatprep.subr.mxu0 %v19366_v2 }
 0x123   : > { %1680 = vmatpush1.msra.mxu0 %v13852_v8 }
 0x124   : > { %v520_v39 = vpop.f32.mrf.mxu0  ;;  %v818_v40 = vpop.f32.mrf.mxu1  ;;  %1681 = vmatprep.subr.mxu0 %v19366_v2 }
 0x125   : > { %12335 = vmatmul.mubr.msk.f32.gmra.mxu0 %vm961_vm0, %v818_v40  ;;  %12399 = vmatmul.mubr.msk.f32.gmra.mxu1 %vm961_vm0, %v520_v39 }
 0x126   : > { %v522_v6 = vpop.f32.mrf.mxu0  ;;  %v820_v7 = vpop.f32.mrf.mxu1  ;;  %1682 = vmatpush1.msra.mxu0 %v13859_v9 }
 0x127   : > { %1683 = vmatprep.subr.mxu0 %v19366_v2 }
 0x128   : > { %v525_v41 = vpop.f32.mrf.mxu0  ;;  %v823_v42 = vpop.f32.mrf.mxu1  ;;  %1684 = vmatpush1.msra.mxu0 %v13866_v10 }
 0x129   : > { %12337 = vmatprep.mubr.msk.f32.mxu0 %vm961_vm0, %v823_v42  ;;  %12401 = vmatprep.mubr.msk.f32.mxu1 %vm961_vm0, %v525_v41 }
 0x12a   : > { %v527_v8 = vpop.f32.mrf.mxu0  ;;  %v825_v43 = vpop.f32.mrf.mxu1  ;;  %1685 = vmatprep.subr.mxu0 %v19366_v2 }
 0x12b   : > { %1686 = vmatpush1.msra.mxu0 %v13873_v11 }
 0x12c   : > { %v530_v44 = vpop.f32.mrf.mxu0  ;;  %v828_v45 = vpop.f32.mrf.mxu1  ;;  %1687 = vmatprep.subr.mxu0 %v19366_v2 }
 0x12d   : > { %12338 = vmatmul.mubr.msk.f32.gmra.mxu0 %vm961_vm0, %v828_v45  ;;  %12402 = vmatmul.mubr.msk.f32.gmra.mxu1 %vm961_vm0, %v530_v44 }
 0x12e   : > { %v532_v9 = vpop.f32.mrf.mxu0  ;;  %v830_v10 = vpop.f32.mrf.mxu1  ;;  %1688 = vmatpush1.msra.mxu0 %v13880_v12 }
 0x12f   : > { %1689 = vmatprep.subr.mxu0 %v19366_v2 }
 0x130   : > { %v535_v46 = vpop.f32.mrf.mxu0  ;;  %v833_v47 = vpop.f32.mrf.mxu1  ;;  %1690 = vmatpush1.msra.mxu0 %v13887_v13 }
 0x131   : > { %12340 = vmatprep.mubr.msk.f32.mxu0 %vm961_vm0, %v833_v47  ;;  %12404 = vmatprep.mubr.msk.f32.mxu1 %vm961_vm0, %v535_v46 }
 0x132   : > { %v537_v11 = vpop.f32.mrf.mxu0  ;;  %v835_v48 = vpop.f32.mrf.mxu1  ;;  %1691 = vmatprep.subr.mxu0 %v19366_v2 }
 0x133   : > { %1692 = vmatpush1.msra.mxu0 %v13894_v14 }
 0x134   : > { %v540_v49 = vpop.f32.mrf.mxu0  ;;  %v838_v50 = vpop.f32.mrf.mxu1  ;;  %1693 = vmatprep.subr.mxu0 %v19366_v2 }
 0x135   : > { %12341 = vmatmul.mubr.msk.f32.gmra.mxu0 %vm961_vm0, %v838_v50  ;;  %12405 = vmatmul.mubr.msk.f32.gmra.mxu1 %vm961_vm0, %v540_v49 }
 0x136   : > { %v542_v12 = vpop.f32.mrf.mxu0  ;;  %v840_v13 = vpop.f32.mrf.mxu1  ;;  %1694 = vmatpush1.msra.mxu0 %v13901_v15 }
 0x137   : > { %1695 = vmatprep.subr.mxu0 %v19366_v2 }
 0x138   : > { %v545_v51 = vpop.f32.mrf.mxu0  ;;  %v843_v52 = vpop.f32.mrf.mxu1  ;;  %1696 = vmatpush1.msra.mxu0 %v13908_v16 }
 0x139   : > { %12343 = vmatprep.mubr.msk.f32.mxu0 %vm961_vm0, %v843_v52  ;;  %12407 = vmatprep.mubr.msk.f32.mxu1 %vm961_vm0, %v545_v51 }
 0x13a   : > { %v547_v14 = vpop.f32.mrf.mxu0  ;;  %v845_v53 = vpop.f32.mrf.mxu1  ;;  %1697 = vmatprep.subr.mxu0 %v19366_v2 }
 0x13b   : > { %1698 = vmatpush1.msra.mxu0 %v13915_v17 }
 0x13c   : > { %v550_v54 = vpop.f32.mrf.mxu0  ;;  %v848_v55 = vpop.f32.mrf.mxu1  ;;  %1699 = vmatprep.subr.mxu0 %v19366_v2 }
 0x13d   : > { %12344 = vmatmul.mubr.msk.f32.gmra.mxu0 %vm961_vm0, %v848_v55  ;;  %12408 = vmatmul.mubr.msk.f32.gmra.mxu1 %vm961_vm0, %v550_v54 }
 0x13e   : > { %v552_v15 = vpop.f32.mrf.mxu0  ;;  %v850_v16 = vpop.f32.mrf.mxu1  ;;  %1700 = vmatpush1.msra.mxu0 %v13922_v18 }
 0x13f   : > { %1701 = vmatprep.subr.mxu0 %v19366_v2 }
 0x140   : > { %v555_v56 = vpop.f32.mrf.mxu0  ;;  %v853_v57 = vpop.f32.mrf.mxu1  ;;  %1702 = vmatpush2.msra.mxu0 %v13929_v19 }
 0x141   : > { %12346 = vmatprep.mubr.msk.f32.mxu0 %vm961_vm0, %v853_v57  ;;  %12410 = vmatprep.mubr.msk.f32.mxu1 %vm961_vm0, %v555_v56 }
 0x142   : > { %v557_v17 = vpop.f32.mrf.mxu0  ;;  %v855_v58 = vpop.f32.mrf.mxu1  ;;  %1703 = vmatprep.subr.mxu0 %v19366_v2 }
 0x143   : > { %1704 = vmatpush2.msra.mxu0 %v13936_v20 }
 0x144   : > { %v560_v59 = vpop.f32.mrf.mxu0  ;;  %v858_v60 = vpop.f32.mrf.mxu1  ;;  %1705 = vmatprep.subr.mxu0 %v19366_v2 }
 0x145   : > { %12347 = vmatmul.mubr.msk.f32.gmra.mxu0 %vm961_vm0, %v858_v60  ;;  %12411 = vmatmul.mubr.msk.f32.gmra.mxu1 %vm961_vm0, %v560_v59 }
 0x146   : > { %v562_v18 = vpop.f32.mrf.mxu0  ;;  %v860_v19 = vpop.f32.mrf.mxu1  ;;  %1706 = vmatpush2.msra.mxu0 %v13943_v21 }
 0x147   : > { %1707 = vmatprep.subr.mxu0 %v19366_v2 }
 0x148   : > { %v565_v61 = vpop.f32.mrf.mxu0  ;;  %v863_v62 = vpop.f32.mrf.mxu1  ;;  %1708 = vmatpush2.msra.mxu0 %v13950_v22 }
 0x149   : > { %12349 = vmatprep.mubr.msk.f32.mxu0 %vm961_vm0, %v863_v62  ;;  %12413 = vmatprep.mubr.msk.f32.mxu1 %vm961_vm0, %v565_v61 }
 0x14a   : > { %v567_v20 = vpop.f32.mrf.mxu0  ;;  %v865_v63 = vpop.f32.mrf.mxu1  ;;  %1709 = vmatprep.subr.mxu0 %v19366_v2 }
 0x14b   : > { %1710 = vmatpush2.msra.mxu0 %v13957_v23 }
 0x14c   : > { %v570_v0 = vpop.f32.mrf.mxu0  ;;  %v868_v1 = vpop.f32.mrf.mxu1  ;;  %1711 = vmatprep.subr.mxu0 %v19366_v2 }
 0x14d   : > { %12350 = vmatmul.mubr.msk.f32.gmra.mxu0 %vm961_vm0, %v868_v1  ;;  %12414 = vmatmul.mubr.msk.f32.gmra.mxu1 %vm961_vm0, %v570_v0  ;;  %v10235_v1 = vld [vmem:[%s19357_s1 + $0x408] sm:$0xff] }
 0x14e   : > { %v572_v21 = vpop.f32.mrf.mxu0  ;;  %v870_v22 = vpop.f32.mrf.mxu1  ;;  %1712 = vmatpush2.msra.mxu0 %v13964_v24 }
 0x14f   : > { %1713 = vmatprep.subr.mxu0 %v19366_v2 }
 0x150   : > { %v575_v35 = vpop.f32.mrf.mxu0  ;;  %v873_v3 = vpop.f32.mrf.mxu1  ;;  %1714 = vmatpush2.msra.mxu0 %v13971_v25 }
 0x151   : > { %12352 = vmatprep.mubr.msk.f32.mxu0 %vm961_vm0, %v873_v3  ;;  %12416 = vmatprep.mubr.msk.f32.mxu1 %vm961_vm0, %v575_v35  ;;  %v10234_v3 = vld [vmem:[%s19357_s1 + $0x400] sm:$0xff] }
 0x152   : > { %v577_v23 = vpop.f32.mrf.mxu0  ;;  %v875_v4 = vpop.f32.mrf.mxu1  ;;  %1715 = vmatprep.subr.mxu0 %v19366_v2 }
 0x153   : > { %1716 = vmatpush2.msra.mxu0 %v13978_v26  ;;  %v10237_v4 = vld [vmem:[%s19357_s1 + $0x418] sm:$0xff] }
 0x154   : > { %v580_v36 = vpop.f32.mrf.mxu0  ;;  %v878_v37 = vpop.f32.mrf.mxu1  ;;  %1717 = vmatprep.subr.mxu0 %v19366_v2 }
 0x155   : > { %12353 = vmatmul.mubr.msk.f32.gmra.mxu0 %vm961_vm0, %v878_v37  ;;  %12417 = vmatmul.mubr.msk.f32.gmra.mxu1 %vm961_vm0, %v580_v36  ;;  %v10236_v36 = vld [vmem:[%s19357_s1 + $0x410] sm:$0xff]  ;;  %v10239_v37 = vld [vmem:[%s19357_s1 + $0x428] sm:$0xff] }
 0x156   : > { %v582_v24 = vpop.f32.mrf.mxu0  ;;  %v880_v25 = vpop.f32.mrf.mxu1  ;;  %1718 = vmatpush2.msra.mxu0 %v13985_v27 }
 0x157   : > { %1719 = vmatprep.subr.mxu0 %v19366_v2  ;;  %v10238_v24 = vld [vmem:[%s19357_s1 + $0x420] sm:$0xff]  ;;  %v10241_v25 = vld [vmem:[%s19357_s1 + $0x438] sm:$0xff] }
 0x158   : > { %v585_v5 = vpop.f32.mrf.mxu0  ;;  %v883_v38 = vpop.f32.mrf.mxu1  ;;  %1720 = vmatpush2.msra.mxu0 %v13992_v28 }
 0x159   : > { %12355 = vmatprep.mubr.msk.f32.mxu0 %vm961_vm0, %v883_v38  ;;  %12419 = vmatprep.mubr.msk.f32.mxu1 %vm961_vm0, %v585_v5  ;;  %v10240_v5 = vld [vmem:[%s19357_s1 + $0x430] sm:$0xff]  ;;  %v10243_v38 = vld [vmem:[%s19357_s1 + $0x448] sm:$0xff] }
 0x15a   : > { %v587_v26 = vpop.f32.mrf.mxu0  ;;  %v885_v39 = vpop.f32.mrf.mxu1  ;;  %1721 = vmatprep.subr.mxu0 %v19366_v2 }
 0x15b   : > { %1722 = vmatpush2.msra.mxu0 %v13999_v29  ;;  %v10242_v26 = vld [vmem:[%s19357_s1 + $0x440] sm:$0xff]  ;;  %v10245_v39 = vld [vmem:[%s19357_s1 + $0x458] sm:$0xff] }
 0x15c   : > { %v590_v40 = vpop.f32.mrf.mxu0  ;;  %v888_v6 = vpop.f32.mrf.mxu1  ;;  %1723 = vmatprep.subr.mxu0 %v19366_v2 }
 0x15d   : > { %12356 = vmatmul.mubr.msk.f32.gmra.mxu0 %vm961_vm0, %v888_v6  ;;  %12420 = vmatmul.mubr.msk.f32.gmra.mxu1 %vm961_vm0, %v590_v40  ;;  %v10244_v40 = vld [vmem:[%s19357_s1 + $0x450] sm:$0xff]  ;;  %v10247_v6 = vld [vmem:[%s19357_s1 + $0x468] sm:$0xff] }
 0x15e   : > { %v592_v27 = vpop.f32.mrf.mxu0  ;;  %v890_v28 = vpop.f32.mrf.mxu1  ;;  %1724 = vmatpush2.msra.mxu0 %v14006_v30 }
 0x15f   : > { %1725 = vmatprep.subr.mxu0 %v19366_v2  ;;  %v10246_v27 = vld [vmem:[%s19357_s1 + $0x460] sm:$0xff]  ;;  %v10249_v28 = vld [vmem:[%s19357_s1 + $0x478] sm:$0xff] }
 0x160   : > { %v595_v7 = vpop.f32.mrf.mxu0  ;;  %v893_v41 = vpop.f32.mrf.mxu1  ;;  %1726 = vmatpush2.msra.mxu0 %v14013_v31 }
 0x161   : > { %12358 = vmatprep.mubr.msk.f32.mxu0 %vm961_vm0, %v893_v41  ;;  %12422 = vmatprep.mubr.msk.f32.mxu1 %vm961_vm0, %v595_v7  ;;  %v10248_v7 = vld [vmem:[%s19357_s1 + $0x470] sm:$0xff]  ;;  %v10251_v41 = vld [vmem:[%s19357_s1 + $0x488] sm:$0xff] }
 0x162   : > { %v597_v29 = vpop.f32.mrf.mxu0  ;;  %v895_v42 = vpop.f32.mrf.mxu1  ;;  %1727 = vmatprep.subr.mxu0 %v19366_v2 }
 0x163   : > { %1728 = vmatpush2.msra.mxu0 %v14020_v32  ;;  %v10250_v29 = vld [vmem:[%s19357_s1 + $0x480] sm:$0xff]  ;;  %v10253_v42 = vld [vmem:[%s19357_s1 + $0x498] sm:$0xff] }
 0x164   : > { %v600_v8 = vpop.f32.mrf.mxu0  ;;  %v898_v43 = vpop.f32.mrf.mxu1  ;;  %1729 = vmatprep.subr.mxu0 %v19366_v2 }
 0x165   : > { %12359 = vmatmul.mubr.msk.f32.gmra.mxu0 %vm961_vm0, %v898_v43  ;;  %12423 = vmatmul.mubr.msk.f32.gmra.mxu1 %vm961_vm0, %v600_v8  ;;  %v10252_v8 = vld [vmem:[%s19357_s1 + $0x490] sm:$0xff]  ;;  %v10255_v43 = vld [vmem:[%s19357_s1 + $0x4a8] sm:$0xff] }
 0x166   : > { %v602_v30 = vpop.f32.mrf.mxu0  ;;  %v900_v31 = vpop.f32.mrf.mxu1  ;;  %1730 = vmatpush2.msra.mxu0 %v14027_v33 }
 0x167   : > { %1731 = vmatprep.subr.mxu0 %v19366_v2  ;;  %v10254_v30 = vld [vmem:[%s19357_s1 + $0x4a0] sm:$0xff]  ;;  %v10257_v31 = vld [vmem:[%s19357_s1 + $0x4b8] sm:$0xff] }
 0x168   : > { %v605_v44 = vpop.f32.mrf.mxu0  ;;  %v903_v45 = vpop.f32.mrf.mxu1  ;;  %1732 = vmatpush2.msra.mxu0 %v14034_v34 }
 0x169   : > { %12361 = vmatprep.mubr.msk.f32.mxu0 %vm961_vm0, %v903_v45  ;;  %12425 = vmatprep.mubr.msk.f32.mxu1 %vm961_vm0, %v605_v44  ;;  %v10256_v44 = vld [vmem:[%s19357_s1 + $0x4b0] sm:$0xff]  ;;  %v10259_v45 = vld [vmem:[%s19357_s1 + $0x4c8] sm:$0xff] }
 0x16a   : > { %v607_v32 = vpop.f32.mrf.mxu0  ;;  %v905_v9 = vpop.f32.mrf.mxu1 }
 0x16b   : > { %v10258_v32 = vld [vmem:[%s19357_s1 + $0x4c0] sm:$0xff]  ;;  %v10261_v9 = vld [vmem:[%s19357_s1 + $0x4d8] sm:$0xff] }
 0x16c   : > { %v610_v10 = vpop.f32.mrf.mxu0  ;;  %v908_v46 = vpop.f32.mrf.mxu1 }
 0x16d   : > { %12362 = vmatmul.mubr.msk.f32.gmra.mxu0 %vm961_vm0, %v908_v46  ;;  %12426 = vmatmul.mubr.msk.f32.gmra.mxu1 %vm961_vm0, %v610_v10  ;;  %v10260_v10 = vld [vmem:[%s19357_s1 + $0x4d0] sm:$0xff]  ;;  %v10263_v46 = vld [vmem:[%s19357_s1 + $0x4e8] sm:$0xff] }
 0x16e   : > { %v612_v47 = vpop.f32.mrf.mxu0  ;;  %v910_v33 = vpop.f32.mrf.mxu1 }
 0x16f   : > { %v10305_v47 = vld [vmem:[%s19358_s2 + $0xb8] sm:$0xff]  ;;  %v10262_v33 = vld [vmem:[%s19357_s1 + $0x4e0] sm:$0xff] }
 0x170   : > { %v615_v11 = vpop.f32.mrf.mxu0  ;;  %v913_v48 = vpop.f32.mrf.mxu1  ;;  %12440 = vmatprep.subr.mxu1 %v10305_v47 }
 0x171   : > { %12364 = vmatprep.mubr.msk.f32.mxu0 %vm961_vm0, %v913_v48  ;;  %12428 = vmatprep.mubr.msk.f32.mxu1 %vm961_vm0, %v615_v11  ;;  %v10265_v11 = vld [vmem:[%s19357_s1 + $0x4f8] sm:$0xff]  ;;  %v10304_v48 = vld [vmem:[%s19358_s2 + $0xb0] sm:$0xff] }
 0x172   : > { %v617_v34 = vpop.f32.mrf.mxu0  ;;  %v915_v49 = vpop.f32.mrf.mxu1  ;;  %12441 = vmatpush3.msra.mxu1 %v10305_v47 }
 0x173   : > { %12442 = vmatprep.subr.mxu1 %v10304_v48  ;;  %v10303_v34 = vld [vmem:[%s19358_s2 + $0xa8] sm:$0xff]  ;;  %v10302_v49 = vld [vmem:[%s19358_s2 + $0xa0] sm:$0xff] }
 0x174   : > { %v620_v50 = vpop.f32.mrf.mxu0  ;;  %v918_v12 = vpop.f32.mrf.mxu1  ;;  %12443 = vmatpush3.msra.mxu1 %v10304_v48  ;;  %v10292_v48 = vld [vmem:[%s19357_s1 + $0x5d0] sm:$0xff] }
 0x175   : > { %12365 = vmatmul.mubr.msk.f32.gmra.mxu0 %vm961_vm0, %v918_v12  ;;  %12429 = vmatmul.mubr.msk.f32.gmra.mxu1 %vm961_vm0, %v620_v50  ;;  %v10264_v50 = vld [vmem:[%s19357_s1 + $0x4f0] sm:$0xff]  ;;  %v10267_v12 = vld [vmem:[%s19357_s1 + $0x508] sm:$0xff] }
 0x176   : > { %v622_v13 = vpop.f32.mrf.mxu0  ;;  %v920_v51 = vpop.f32.mrf.mxu1  ;;  %12444 = vmatprep.subr.mxu1 %v10303_v34 }
 0x177   : > { %12445 = vmatpush3.msra.mxu1 %v10303_v34  ;;  %v10301_v13 = vld [vmem:[%s19358_s2 + $0x98] sm:$0xff]  ;;  %v10266_v51 = vld [vmem:[%s19357_s1 + $0x500] sm:$0xff] }
 0x178   : > { %v625_v52 = vpop.f32.mrf.mxu0  ;;  %v923_v14 = vpop.f32.mrf.mxu1  ;;  %12446 = vmatprep.subr.mxu1 %v10302_v49 }
 0x179   : > { %12367 = vmatprep.mubr.msk.f32.mxu0 %vm961_vm0, %v923_v14  ;;  %12431 = vmatprep.mubr.msk.f32.mxu1 %vm961_vm0, %v625_v52  ;;  %v10269_v52 = vld [vmem:[%s19357_s1 + $0x518] sm:$0xff]  ;;  %v10300_v14 = vld [vmem:[%s19358_s2 + $0x90] sm:$0xff] }
 0x17a   : > { %v627_v53 = vpop.f32.mrf.mxu0  ;;  %v925_v54 = vpop.f32.mrf.mxu1  ;;  %12447 = vmatpush3.msra.mxu1 %v10302_v49 }
 0x17b   : > { %12448 = vmatprep.subr.mxu1 %v10301_v13  ;;  %v10299_v53 = vld [vmem:[%s19358_s2 + $0x88] sm:$0xff]  ;;  %v10268_v54 = vld [vmem:[%s19357_s1 + $0x510] sm:$0xff] }
 0x17c   : > { %v630_v55 = vpop.f32.mrf.mxu0  ;;  %v928_v15 = vpop.f32.mrf.mxu1  ;;  %12449 = vmatpush3.msra.mxu1 %v10301_v13 }
 0x17d   : > { %12368 = vmatmul.mubr.msk.f32.gmra.mxu0 %vm961_vm0, %v928_v15  ;;  %12432 = vmatmul.mubr.msk.f32.gmra.mxu1 %vm961_vm0, %v630_v55  ;;  %v10271_v55 = vld [vmem:[%s19357_s1 + $0x528] sm:$0xff]  ;;  %v10298_v15 = vld [vmem:[%s19358_s2 + $0x80] sm:$0xff] }
 0x17e   : > { %v632_v16 = vpop.f32.mrf.mxu0  ;;  %v930_v56 = vpop.f32.mrf.mxu1  ;;  %12450 = vmatprep.subr.mxu1 %v10300_v14 }
 0x17f   : > { %12451 = vmatpush3.msra.mxu1 %v10300_v14  ;;  %v10297_v14 = vld [vmem:[%s19357_s1 + $0x5f8] sm:$0xff] }
 0x180   : > { %v635_v57 = vpop.f32.mrf.mxu0  ;;  %v933_v17 = vpop.f32.mrf.mxu1  ;;  %12452 = vmatprep.subr.mxu1 %v10299_v53 }
 0x181   : > { %12370 = vmatprep.mubr.msk.f32.mxu0 %vm961_vm0, %v933_v17  ;;  %12434 = vmatprep.mubr.msk.f32.mxu1 %vm961_vm0, %v635_v57  ;;  %v10270_v17 = vld [vmem:[%s19357_s1 + $0x520] sm:$0xff] }
 0x182   : > { %v637_v58 = vpop.f32.mrf.mxu0  ;;  %v935_v59 = vpop.f32.mrf.mxu1  ;;  %12453 = vmatpush3.msra.mxu1 %v10299_v53  ;;  %v10296_v53 = vld [vmem:[%s19357_s1 + $0x5f0] sm:$0xff] }
 0x183   : > { %12454 = vmatprep.subr.mxu1 %v10298_v15  ;;  %v10273_v58 = vld [vmem:[%s19357_s1 + $0x538] sm:$0xff]  ;;  %v10272_v59 = vld [vmem:[%s19357_s1 + $0x530] sm:$0xff] }
 0x184   : > { %v640_v60 = vpop.f32.mrf.mxu0  ;;  %v938_v18 = vpop.f32.mrf.mxu1  ;;  %12455 = vmatpush3.msra.mxu1 %v10298_v15 }
 0x185   : > { %12371 = vmatmul.mubr.msk.f32.gmra.mxu0 %vm961_vm0, %v938_v18  ;;  %12435 = vmatmul.mubr.msk.f32.gmra.mxu1 %vm961_vm0, %v640_v60 }
 0x186   : > { %v642_v19 = vpop.f32.mrf.mxu0  ;;  %v940_v61 = vpop.f32.mrf.mxu1  ;;  %2321 = vmatprep.subr.mxu1 %v19366_v2 }
 0x187   : > { %v10275_v19 = vld [vmem:[%s19357_s1 + $0x548] sm:$0xff] }
 0x188   : > { %v645_v62 = vpop.f32.mrf.mxu0  ;;  %v943_v20 = vpop.f32.mrf.mxu1 }
 0x189   : > { %12373 = vmatprep.mubr.msk.f32.mxu0 %vm961_vm0, %v943_v20  ;;  %12437 = vmatprep.mubr.msk.f32.mxu1 %vm961_vm0, %v645_v62 }
 0x18a   : > { %v647_v63 = vpop.f32.mrf.mxu0  ;;  %v945_v0 = vpop.f32.mrf.mxu1 }
 0x18b   : > { %v10274_v63 = vld [vmem:[%s19357_s1 + $0x540] sm:$0xff]  ;;  %v10277_v0 = vld [vmem:[%s19357_s1 + $0x558] sm:$0xff] }
 0x18c   : > { %v650_v21 = vpop.f32.mrf.mxu0  ;;  %v948_v22 = vpop.f32.mrf.mxu1 }
 0x18d   : > { %12374 = vmatmul.mubr.msk.f32.gmra.mxu0 %vm961_vm0, %v948_v22  ;;  %12438 = vmatmul.mubr.msk.f32.gmra.mxu1 %vm961_vm0, %v650_v21 }
 0x18e   : > { %v950_v35 = vpop.f32.mrf.mxu1  ;;  %1733 = vmatprep.mubr.f32.mxu0 %v10235_v1  ;;  %v652_v23 = vpop.f32.mrf.mxu0  ;;  %v10276_v1 = vld [vmem:[%s19357_s1 + $0x550] sm:$0xff] }
 0x18f   : > { %v10279_v35 = vld [vmem:[%s19357_s1 + $0x568] sm:$0xff] }
 0x191   : > { %1734 = vmatmul.mubr.f32.vlgmr.msra.gmra.mxu0 %v10234_v3 }
 0x192   : > { %1738 = vmatprep.mubr.f32.mxu0 %v10237_v4 }
 0x195   : > { %1739 = vmatmul.mubr.f32.gmra.mxu0 %v10236_v36  ;;  %v10278_v36 = vld [vmem:[%s19357_s1 + $0x560] sm:$0xff] }
 0x196   : > { %1743 = vmatprep.mubr.f32.mxu0 %v10239_v37  ;;  %v10281_v37 = vld [vmem:[%s19357_s1 + $0x578] sm:$0xff] }
 0x199   : > { %1744 = vmatmul.mubr.f32.gmra.mxu0 %v10238_v24  ;;  %v10280_v24 = vld [vmem:[%s19357_s1 + $0x570] sm:$0xff] }
 0x19a   : > { %1748 = vmatprep.mubr.f32.mxu0 %v10241_v25 }
 0x19d   : > { %1749 = vmatmul.mubr.f32.gmra.mxu0 %v10240_v5 }
 0x19e   : > { %1753 = vmatprep.mubr.f32.mxu0 %v10243_v38  ;;  %v10283_v38 = vld [vmem:[%s19357_s1 + $0x588] sm:$0xff] }
 0x1a1   : > { %1754 = vmatmul.mubr.f32.gmra.mxu0 %v10242_v26 }
 0x1a2   : > { %1758 = vmatprep.mubr.f32.mxu0 %v10245_v39 }
 0x1a5   : > { %1759 = vmatmul.mubr.f32.gmra.mxu0 %v10244_v40 }
 0x1a6   : > { %1763 = vmatprep.mubr.f32.mxu0 %v10247_v6  ;;  %v10282_v6 = vld [vmem:[%s19357_s1 + $0x580] sm:$0xff] }
 0x1a9   : > { %1764 = vmatmul.mubr.f32.gmra.mxu0 %v10246_v27  ;;  %v10285_v27 = vld [vmem:[%s19357_s1 + $0x598] sm:$0xff] }
 0x1aa   : > { %1768 = vmatprep.mubr.f32.mxu0 %v10249_v28  ;;  %v10284_v28 = vld [vmem:[%s19357_s1 + $0x590] sm:$0xff] }
 0x1ad   : > { %1769 = vmatmul.mubr.f32.gmra.mxu0 %v10248_v7 }
 0x1ae   : > { %1773 = vmatprep.mubr.f32.mxu0 %v10251_v41 }
 0x1b1   : > { %1774 = vmatmul.mubr.f32.gmra.mxu0 %v10250_v29  ;;  %v10287_v29 = vld [vmem:[%s19357_s1 + $0x5a8] sm:$0xff] }
 0x1b2   : > { %1778 = vmatprep.mubr.f32.mxu0 %v10253_v42 }
 0x1b5   : > { %1779 = vmatmul.mubr.f32.gmra.mxu0 %v10252_v8 }
 0x1b6   : > { %1783 = vmatprep.mubr.f32.mxu0 %v10255_v43 }
 0x1b9   : > { %1784 = vmatmul.mubr.f32.gmra.mxu0 %v10254_v30  ;;  %v10286_v30 = vld [vmem:[%s19357_s1 + $0x5a0] sm:$0xff] }
 0x1ba   : > { %1788 = vmatprep.mubr.f32.mxu0 %v10257_v31  ;;  %v10289_v31 = vld [vmem:[%s19357_s1 + $0x5b8] sm:$0xff] }
 0x1bd   : > { %1789 = vmatmul.mubr.f32.gmra.mxu0 %v10256_v44  ;;  %v10288_v44 = vld [vmem:[%s19357_s1 + $0x5b0] sm:$0xff] }
 0x1be   : > { %1793 = vmatprep.mubr.f32.mxu0 %v10259_v45 }
 0x1c1   : > { %1794 = vmatmul.mubr.f32.gmra.mxu0 %v10258_v32 }
 0x1c2   : > { %1798 = vmatprep.mubr.f32.mxu0 %v10261_v9  ;;  %v10291_v9 = vld [vmem:[%s19357_s1 + $0x5c8] sm:$0xff] }
 0x1c5   : > { %1799 = vmatmul.mubr.f32.gmra.mxu0 %v10260_v10 }
 0x1c6   : > { %1803 = vmatprep.mubr.f32.mxu0 %v10263_v46 }
 0x1c9   : > { %1804 = vmatmul.mubr.f32.gmra.mxu0 %v10262_v33  ;;  %v10290_v33 = vld [vmem:[%s19357_s1 + $0x5c0] sm:$0xff] }
 0x1ca   : > { %1808 = vmatprep.mubr.f32.mxu0 %v10265_v11  ;;  %v10293_v11 = vld [vmem:[%s19357_s1 + $0x5d8] sm:$0xff] }
 0x1cd   : > { %1809 = vmatmul.mubr.f32.gmra.mxu0 %v10264_v50  ;;  %v10295_v50 = vld [vmem:[%s19357_s1 + $0x5e8] sm:$0xff] }
 0x1ce   : > { %1813 = vmatprep.mubr.f32.mxu0 %v10267_v12 }
 0x1d1   : > { %1814 = vmatmul.mubr.f32.gmra.mxu0 %v10266_v51 }
 0x1d2   : > { %1818 = vmatprep.mubr.f32.mxu0 %v10269_v52  ;;  %v10294_v52 = vld [vmem:[%s19357_s1 + $0x5e0] sm:$0xff] }
 0x1d5   : > { %v12330_v16 = vpop.f32.mrf.mxu0  ;;  %v12394_v56 = vpop.f32.mrf.mxu1  ;;  %1819 = vmatmul.mubr.f32.gmra.mxu0 %v10268_v54 }
 0x1d6   : > { %v14731_v57 = vadd.f32 %v12394_v56, %v12330_v16  ;;  %1823 = vmatprep.mubr.f32.mxu0 %v10271_v55 }
 0x1d7   : > { %v14743_v60 = vpop.f32.mrf.mxu0  ;;  %v14745_v18 = vpop.f32.mrf.mxu1 }
 0x1d9   : > { %1824 = vmatmul.mubr.f32.gmra.mxu0 %v10270_v17 }
 0x1da   : > { %1828 = vmatprep.mubr.f32.mxu0 %v10273_v58 }
 0x1dd   : > { %v12333_v61 = vpop.f32.mrf.mxu0  ;;  %v12397_v62 = vpop.f32.mrf.mxu1  ;;  %1829 = vmatmul.mubr.f32.gmra.mxu0 %v10272_v59 }
 0x1de   : > { %v14750_v20 = vadd.f32 %v12397_v62, %v12333_v61  ;;  %1833 = vmatprep.mubr.f32.mxu0 %v10275_v19 }
 0x1df   : > { %v14761_v21 = vpop.f32.mrf.mxu0  ;;  %v14763_v22 = vpop.f32.mrf.mxu1 }
 0x1e0   : > { %19373 = vst [vmem:[#allocation2_spill] sm:$0xff] %v14761_v21  ;;  %19374 = vst [vmem:[#allocation3_spill] sm:$0xff] %v14763_v22 }
 0x1e1   : > { %1834 = vmatmul.mubr.f32.gmra.mxu0 %v10274_v63 }
 0x1e2   : > { %1838 = vmatprep.mubr.f32.mxu0 %v10277_v0 }
 0x1e5   : > { %v12336_v3 = vpop.f32.mrf.mxu0  ;;  %v12400_v23 = vpop.f32.mrf.mxu1  ;;  %1839 = vmatmul.mubr.f32.gmra.mxu0 %v10276_v1 }
 0x1e6   : > { %v14768_v4 = vadd.f32 %v12400_v23, %v12336_v3  ;;  %1843 = vmatprep.mubr.f32.mxu0 %v10279_v35 }
 0x1e7   : > { %v14779_v25 = vpop.f32.mrf.mxu0  ;;  %v14781_v5 = vpop.f32.mrf.mxu1 }
 0x1e8   : > { %19375 = vst [vmem:[#allocation4_spill] sm:$0xff] %v14779_v25  ;;  %19376 = vst [vmem:[#allocation5_spill] sm:$0xff] %v14781_v5 }
 0x1e9   : > { %1844 = vmatmul.mubr.f32.gmra.mxu0 %v10278_v36 }
 0x1ea   : > { %1848 = vmatprep.mubr.f32.mxu0 %v10281_v37 }
 0x1ed   : > { %v12339_v26 = vpop.f32.mrf.mxu0  ;;  %v12403_v39 = vpop.f32.mrf.mxu1  ;;  %1849 = vmatmul.mubr.f32.gmra.mxu0 %v10280_v24 }
 0x1ee   : > { %v14786_v40 = vadd.f32 %v12403_v39, %v12339_v26  ;;  %1853 = vmatprep.mubr.f32.mxu0 %v10283_v38 }
 0x1ef   : > { %v14797_v7 = vpop.f32.mrf.mxu0  ;;  %v14799_v41 = vpop.f32.mrf.mxu1 }
 0x1f0   : > { %19377 = vst [vmem:[#allocation6_spill] sm:$0xff] %v14797_v7  ;;  %19378 = vst [vmem:[#allocation7_spill] sm:$0xff] %v14799_v41 }
 0x1f1   : > { %1854 = vmatmul.mubr.f32.gmra.mxu0 %v10282_v6 }
 0x1f2   : > { %1858 = vmatprep.mubr.f32.mxu0 %v10285_v27 }
 0x1f5   : > { %v12342_v42 = vpop.f32.mrf.mxu0  ;;  %v12406_v8 = vpop.f32.mrf.mxu1  ;;  %1859 = vmatmul.mubr.f32.gmra.mxu0 %v10284_v28 }
 0x1f6   : > { %v14804_v43 = vadd.f32 %v12406_v8, %v12342_v42  ;;  %1863 = vmatprep.mubr.f32.mxu0 %v10287_v29 }
 0x1f7   : > { %v14815_v45 = vpop.f32.mrf.mxu0  ;;  %v14817_v32 = vpop.f32.mrf.mxu1 }
 0x1f8   : > { %19379 = vst [vmem:[#allocation8_spill] sm:$0xff] %v14815_v45  ;;  %19380 = vst [vmem:[#allocation9_spill] sm:$0xff] %v14817_v32 }
 0x1f9   : > { %1864 = vmatmul.mubr.f32.gmra.mxu0 %v10286_v30 }
 0x1fa   : > { %1868 = vmatprep.mubr.f32.mxu0 %v10289_v31 }
 0x1fd   : > { %v12345_v10 = vpop.f32.mrf.mxu0  ;;  %v12409_v46 = vpop.f32.mrf.mxu1  ;;  %1869 = vmatmul.mubr.f32.gmra.mxu0 %v10288_v44 }
 0x1fe   : > { %v14822_v47 = vadd.f32 %v12409_v46, %v12345_v10  ;;  %1873 = vmatprep.mubr.f32.mxu0 %v10291_v9 }
 0x1ff   : > { %v14833_v34 = vpop.f32.mrf.mxu0  ;;  %v14835_v49 = vpop.f32.mrf.mxu1 }
 0x200   : > { %19381 = vst [vmem:[#allocation10_spill] sm:$0xff] %v14833_v34  ;;  %19382 = vst [vmem:[#allocation11_spill] sm:$0xff] %v14835_v49 }
 0x201   : > { %1874 = vmatmul.mubr.f32.gmra.mxu0 %v10290_v33 }
 0x202   : > { %1878 = vmatprep.mubr.f32.mxu0 %v10293_v11 }
 0x205   : > { %v12348_v12 = vpop.f32.mrf.mxu0  ;;  %v12412_v13 = vpop.f32.mrf.mxu1  ;;  %1879 = vmatmul.mubr.f32.gmra.mxu0 %v10292_v48 }
 0x206   : > { %v14840_v51 = vadd.f32 %v12412_v13, %v12348_v12  ;;  %1883 = vmatprep.mubr.f32.mxu0 %v10295_v50 }
 0x207   : > { %v14851_v54 = vpop.f32.mrf.mxu0  ;;  %v14853_v55 = vpop.f32.mrf.mxu1 }
 0x208   : > { %19383 = vst [vmem:[#allocation12_spill] sm:$0xff] %v14851_v54  ;;  %19384 = vst [vmem:[#allocation13_spill] sm:$0xff] %v14853_v55  ;;  %v15075_v55 = vld [vmem:[%s13818_s18 + $0x88] sm:$0xff]  ;;  %v15080_v54 = vld [vmem:[%s13818_s18 + $0x80] sm:$0xff] }
 0x209   : > { %1884 = vmatmul.mubr.f32.gmra.mxu0 %v10294_v52 }
 0x20a   : > { %1888 = vmatprep.mubr.f32.mxu0 %v10297_v14 }
 0x20d   : > { %v12351_v15 = vpop.f32.mrf.mxu0  ;;  %v12415_v16 = vpop.f32.mrf.mxu1  ;;  %1889 = vmatmul.mubr.f32.gmra.mxu0 %v10296_v53 }
 0x20e   : > { %v14855_v56 = vadd.f32 %v12415_v16, %v12351_v15 }
 0x20f   : > { %v14857_v17 = vpop.f32.mrf.mxu0  ;;  %v14859_v58 = vpop.f32.mrf.mxu1 }
 0x210   : > { %19385 = vst [vmem:[#allocation14_spill] sm:$0xff] %v14857_v17  ;;  %19386 = vst [vmem:[#allocation15_spill] sm:$0xff] %v14859_v58  ;;  %v15064_v58 = vld [vmem:[%s13818_s18 + $0x98] sm:$0xff]  ;;  %v15069_v17 = vld [vmem:[%s13818_s18 + $0x90] sm:$0xff] }
 0x215   : > { %v12354_v59 = vpop.f32.mrf.mxu0  ;;  %v12418_v19 = vpop.f32.mrf.mxu1 }
 0x216   : > { %v14861_v61 = vadd.f32 %v12418_v19, %v12354_v59 }
 0x217   : > { %v14863_v62 = vpop.f32.mrf.mxu0  ;;  %v14865_v63 = vpop.f32.mrf.mxu1 }
 0x218   : > { %19387 = vst [vmem:[#allocation16_spill] sm:$0xff] %v14863_v62  ;;  %19388 = vst [vmem:[#allocation17_spill] sm:$0xff] %v14865_v63  ;;  %v15053_v63 = vld [vmem:[%s13818_s18 + $0xa8] sm:$0xff]  ;;  %v15058_v62 = vld [vmem:[%s13818_s18 + $0xa0] sm:$0xff] }
 0x21d   : > { %v12357_v0 = vpop.f32.mrf.mxu0  ;;  %v12421_v1 = vpop.f32.mrf.mxu1 }
 0x21e   : > { %v14867_v35 = vadd.f32 %v12421_v1, %v12357_v0 }
 0x21f   : > { %v14869_v3 = vpop.f32.mrf.mxu0  ;;  %v14871_v23 = vpop.f32.mrf.mxu1 }
 0x220   : > { %19389 = vst [vmem:[#allocation18_spill] sm:$0xff] %v14869_v3  ;;  %19390 = vst [vmem:[#allocation19_spill] sm:$0xff] %v14871_v23  ;;  %v15042_v23 = vld [vmem:[%s13818_s18 + $0xb8] sm:$0xff]  ;;  %v15047_v3 = vld [vmem:[%s13818_s18 + $0xb0] sm:$0xff] }
 0x225   : > { %v12360_v36 = vpop.f32.mrf.mxu0  ;;  %v12424_v37 = vpop.f32.mrf.mxu1 }
 0x226   : > { %v14873_v24 = vadd.f32 %v12424_v37, %v12360_v36  ;;  %v14910_v36 = vld [vmem:[%s13818_s18 + $0x78] sm:$0xff] }
 0x227   : > { %v14875_v38 = vpop.f32.mrf.mxu0  ;;  %v14877_v26 = vpop.f32.mrf.mxu1 }
 0x228   : > { %19391 = vst [vmem:[#allocation20_spill] sm:$0xff] %v14875_v38  ;;  %19392 = vst [vmem:[#allocation21_spill] sm:$0xff] %v14877_v26  ;;  %v15031_v26 = vld [vmem:[%s13818_s18 + $0xc8] sm:$0xff]  ;;  %v15036_v38 = vld [vmem:[%s13818_s18 + $0xc0] sm:$0xff] }
 0x22d   : > { %v12363_v39 = vpop.f32.mrf.mxu0  ;;  %v12427_v6 = vpop.f32.mrf.mxu1 }
 0x22e   : > { %v14879_v27 = vadd.f32 %v12427_v6, %v12363_v39  ;;  %v14915_v39 = vld [vmem:[%s13818_s18 + $0x70] sm:$0xff] }
 0x22f   : > { %v14881_v28 = vpop.f32.mrf.mxu0  ;;  %v14883_v29 = vpop.f32.mrf.mxu1 }
 0x230   : > { %19393 = vst [vmem:[#allocation22_spill] sm:$0xff] %v14881_v28  ;;  %19394 = vst [vmem:[#allocation23_spill] sm:$0xff] %v14883_v29  ;;  %v15020_v29 = vld [vmem:[%s13818_s18 + $0xd8] sm:$0xff]  ;;  %v15025_v28 = vld [vmem:[%s13818_s18 + $0xd0] sm:$0xff] }
 0x235   : > { %v12366_v42 = vpop.f32.mrf.mxu0  ;;  %v12430_v8 = vpop.f32.mrf.mxu1 }
 0x236   : > { %v14885_v30 = vadd.f32 %v12430_v8, %v12366_v42  ;;  %v14921_v42 = vld [vmem:[%s13818_s18 + $0x68] sm:$0xff] }
 0x237   : > { %v14887_v31 = vpop.f32.mrf.mxu0  ;;  %v14889_v44 = vpop.f32.mrf.mxu1 }
 0x238   : > { %19395 = vst [vmem:[#allocation24_spill] sm:$0xff] %v14887_v31  ;;  %19396 = vst [vmem:[#allocation25_spill] sm:$0xff] %v14889_v44  ;;  %v15009_v44 = vld [vmem:[%s13818_s18 + $0xe8] sm:$0xff]  ;;  %v15014_v31 = vld [vmem:[%s13818_s18 + $0xe0] sm:$0xff] }
 0x23d   : > { %v12369_v9 = vpop.f32.mrf.mxu0  ;;  %v12433_v10 = vpop.f32.mrf.mxu1 }
 0x23e   : > { %v14891_v46 = vadd.f32 %v12433_v10, %v12369_v9  ;;  %v14926_v9 = vld [vmem:[%s13818_s18 + $0x60] sm:$0xff] }
 0x23f   : > { %v14893_v33 = vpop.f32.mrf.mxu0  ;;  %v14895_v11 = vpop.f32.mrf.mxu1 }
 0x240   : > { %19397 = vst [vmem:[#allocation26_spill] sm:$0xff] %v14893_v33  ;;  %19398 = vst [vmem:[#allocation27_spill] sm:$0xff] %v14895_v11  ;;  %v14998_v11 = vld [vmem:[%s13818_s18 + $0xf8] sm:$0xff]  ;;  %v15003_v33 = vld [vmem:[%s13818_s18 + $0xf0] sm:$0xff] }
 0x245   : > { %v12372_v48 = vpop.f32.mrf.mxu0  ;;  %v12436_v50 = vpop.f32.mrf.mxu1 }
 0x246   : > { %v14897_v12 = vadd.f32 %v12436_v50, %v12372_v48  ;;  %v14932_v48 = vld [vmem:[%s13818_s18 + $0x58] sm:$0xff] }
 0x247   : > { %v14899_v13 = vpop.f32.mrf.mxu0  ;;  %v14901_v52 = vpop.f32.mrf.mxu1 }
 0x248   : > { %19399 = vst [vmem:[#allocation28_spill] sm:$0xff] %v14899_v13  ;;  %19400 = vst [vmem:[#allocation29_spill] sm:$0xff] %v14901_v52  ;;  %v14987_v52 = vld [vmem:[%s13818_s18 + $0x8] sm:$0xff]  ;;  %v14992_v13 = vld [vmem:[%s13818_s18] sm:$0xff] }
 0x24d   : > { %v12375_v14 = vpop.f32.mrf.mxu0  ;;  %v12439_v53 = vpop.f32.mrf.mxu1 }
 0x24e   : > { %v14903_v15 = vadd.f32 %v12439_v53, %v12375_v14  ;;  %v14937_v14 = vld [vmem:[%s13818_s18 + $0x50] sm:$0xff] }
 0x24f   : > { %v14905_v16 = vpop.f32.mrf.mxu0 }
 0x250   : > { %19401 = vst [vmem:[#allocation30_spill] sm:$0xff] %v14905_v16  ;;  %v14981_v16 = vld [vmem:[%s13818_s18 + $0x10] sm:$0xff] }
 0x251   : > { %v1735_v59 = vpop.f32.mrf.mxu0 }
 0x252   : > { %12456 = vmatprep.mubr.msk.f32.mxu1 %vm961_vm0, %v1735_v59  ;;  %v14943_v59 = vld [vmem:[%s13818_s18 + $0x48] sm:$0xff] }
 0x253   : > { %v1737_v19 = vpop.f32.mrf.mxu0 }
 0x255   : > { %v1740_v0 = vpop.f32.mrf.mxu0 }
 0x256   : > { %12457 = vmatmul.mubr.msk.f32.vlgmr.msra.gmra.mxu1 %vm961_vm0, %v1740_v0  ;;  %v14948_v0 = vld [vmem:[%s13818_s18 + $0x40] sm:$0xff] }
 0x257   : > { %v1742_v1 = vpop.f32.mrf.mxu0  ;;  %2322 = vmatpush1.msra.mxu1 %v14910_v36 }
 0x258   : > { %2323 = vmatprep.subr.mxu1 %v19366_v2 }
 0x259   : > { %v1745_v37 = vpop.f32.mrf.mxu0  ;;  %2324 = vmatpush1.msra.mxu1 %v14915_v39 }
 0x25a   : > { %12459 = vmatprep.mubr.msk.f32.mxu1 %vm961_vm0, %v1745_v37  ;;  %2325 = vmatprep.subr.mxu1 %v19366_v2  ;;  %v14954_v37 = vld [vmem:[%s13818_s18 + $0x38] sm:$0xff] }
 0x25b   : > { %v1747_v6 = vpop.f32.mrf.mxu0  ;;  %2326 = vmatpush1.msra.mxu1 %v14921_v42 }
 0x25c   : > { %2327 = vmatprep.subr.mxu1 %v19366_v2 }
 0x25d   : > { %v1750_v8 = vpop.f32.mrf.mxu0  ;;  %2328 = vmatpush1.msra.mxu1 %v14926_v9 }
 0x25e   : > { %12460 = vmatmul.mubr.msk.f32.gmra.mxu1 %vm961_vm0, %v1750_v8  ;;  %2329 = vmatprep.subr.mxu1 %v19366_v2  ;;  %v14959_v8 = vld [vmem:[%s13818_s18 + $0x30] sm:$0xff] }
 0x25f   : > { %v1752_v10 = vpop.f32.mrf.mxu0  ;;  %2330 = vmatpush1.msra.mxu1 %v14932_v48 }
 0x260   : > { %2331 = vmatprep.subr.mxu1 %v19366_v2 }
 0x261   : > { %v1755_v50 = vpop.f32.mrf.mxu0  ;;  %2332 = vmatpush1.msra.mxu1 %v14937_v14 }
 0x262   : > { %12462 = vmatprep.mubr.msk.f32.mxu1 %vm961_vm0, %v1755_v50  ;;  %2333 = vmatprep.subr.mxu1 %v19366_v2  ;;  %v14965_v50 = vld [vmem:[%s13818_s18 + $0x28] sm:$0xff] }
 0x263   : > { %v1757_v53 = vpop.f32.mrf.mxu0  ;;  %2334 = vmatpush1.msra.mxu1 %v14943_v59 }
 0x264   : > { %2335 = vmatprep.subr.mxu1 %v19366_v2 }
 0x265   : > { %v1760_v19 = vpop.f32.mrf.mxu0  ;;  %2336 = vmatpush1.msra.mxu1 %v14948_v0 }
 0x266   : > { %12463 = vmatmul.mubr.msk.f32.gmra.mxu1 %vm961_vm0, %v1760_v19  ;;  %2337 = vmatprep.subr.mxu1 %v19366_v2  ;;  %v14970_v19 = vld [vmem:[%s13818_s18 + $0x20] sm:$0xff] }
 0x267   : > { %v1762_v1 = vpop.f32.mrf.mxu0  ;;  %2338 = vmatpush1.msra.mxu1 %v14954_v37 }
 0x268   : > { %2339 = vmatprep.subr.mxu1 %v19366_v2 }
 0x269   : > { %v1765_v6 = vpop.f32.mrf.mxu0  ;;  %2340 = vmatpush1.msra.mxu1 %v14959_v8 }
 0x26a   : > { %12465 = vmatprep.mubr.msk.f32.mxu1 %vm961_vm0, %v1765_v6  ;;  %2341 = vmatprep.subr.mxu1 %v19366_v2  ;;  %v14976_v6 = vld [vmem:[%s13818_s18 + $0x18] sm:$0xff] }
 0x26b   : > { %v1767_v10 = vpop.f32.mrf.mxu0  ;;  %2342 = vmatpush1.msra.mxu1 %v14965_v50 }
 0x26c   : > { %2343 = vmatprep.subr.mxu1 %v19366_v2 }
 0x26d   : > { %v1770_v53 = vpop.f32.mrf.mxu0  ;;  %2344 = vmatpush1.msra.mxu1 %v14970_v19 }
 0x26e   : > { %12466 = vmatmul.mubr.msk.f32.gmra.mxu1 %vm961_vm0, %v1770_v53  ;;  %2345 = vmatprep.subr.mxu1 %v19366_v2 }
 0x26f   : > { %v1772_v1 = vpop.f32.mrf.mxu0  ;;  %2346 = vmatpush1.msra.mxu1 %v14976_v6 }
 0x270   : > { %2347 = vmatprep.subr.mxu1 %v19366_v2 }
 0x271   : > { %v1775_v10 = vpop.f32.mrf.mxu0  ;;  %2348 = vmatpush1.msra.mxu1 %v14981_v16 }
 0x272   : > { %12468 = vmatprep.mubr.msk.f32.mxu1 %vm961_vm0, %v1775_v10  ;;  %2349 = vmatprep.subr.mxu1 %v19366_v2 }
 0x273   : > { %v1777_v53 = vpop.f32.mrf.mxu0  ;;  %2350 = vmatpush1.msra.mxu1 %v14987_v52 }
 0x274   : > { %2351 = vmatprep.subr.mxu1 %v19366_v2 }
 0x275   : > { %v1780_v1 = vpop.f32.mrf.mxu0  ;;  %2352 = vmatpush1.msra.mxu1 %v14992_v13 }
 0x276   : > { %12469 = vmatmul.mubr.msk.f32.gmra.mxu1 %vm961_vm0, %v1780_v1  ;;  %2353 = vmatprep.subr.mxu1 %v19366_v2 }
 0x277   : > { %v1782_v10 = vpop.f32.mrf.mxu0  ;;  %2354 = vmatpush2.msra.mxu1 %v14998_v11 }
 0x278   : > { %2355 = vmatprep.subr.mxu1 %v19366_v2 }
 0x279   : > { %v1785_v53 = vpop.f32.mrf.mxu0  ;;  %2356 = vmatpush2.msra.mxu1 %v15003_v33 }
 0x27a   : > { %12471 = vmatprep.mubr.msk.f32.mxu1 %vm961_vm0, %v1785_v53  ;;  %2357 = vmatprep.subr.mxu1 %v19366_v2 }
 0x27b   : > { %v1787_v1 = vpop.f32.mrf.mxu0  ;;  %2358 = vmatpush2.msra.mxu1 %v15009_v44 }
 0x27c   : > { %2359 = vmatprep.subr.mxu1 %v19366_v2 }
 0x27d   : > { %v1790_v10 = vpop.f32.mrf.mxu0  ;;  %2360 = vmatpush2.msra.mxu1 %v15014_v31 }
 0x27e   : > { %12472 = vmatmul.mubr.msk.f32.gmra.mxu1 %vm961_vm0, %v1790_v10  ;;  %2361 = vmatprep.subr.mxu1 %v19366_v2 }
 0x27f   : > { %v1792_v53 = vpop.f32.mrf.mxu0  ;;  %2362 = vmatpush2.msra.mxu1 %v15020_v29 }
 0x280   : > { %2363 = vmatprep.subr.mxu1 %v19366_v2 }
 0x281   : > { %v1795_v1 = vpop.f32.mrf.mxu0  ;;  %2364 = vmatpush2.msra.mxu1 %v15025_v28 }
 0x282   : > { %12474 = vmatprep.mubr.msk.f32.mxu1 %vm961_vm0, %v1795_v1  ;;  %2365 = vmatprep.subr.mxu1 %v19366_v2 }
 0x283   : > { %v1797_v10 = vpop.f32.mrf.mxu0  ;;  %2366 = vmatpush2.msra.mxu1 %v15031_v26 }
 0x284   : > { %2367 = vmatprep.subr.mxu1 %v19366_v2 }
 0x285   : > { %v1800_v53 = vpop.f32.mrf.mxu0  ;;  %2368 = vmatpush2.msra.mxu1 %v15036_v38 }
 0x286   : > { %12475 = vmatmul.mubr.msk.f32.gmra.mxu1 %vm961_vm0, %v1800_v53  ;;  %2369 = vmatprep.subr.mxu1 %v19366_v2 }
 0x287   : > { %v1802_v1 = vpop.f32.mrf.mxu0  ;;  %2370 = vmatpush2.msra.mxu1 %v15042_v23 }
 0x288   : > { %2371 = vmatprep.subr.mxu1 %v19366_v2 }
 0x289   : > { %v1805_v10 = vpop.f32.mrf.mxu0  ;;  %2372 = vmatpush2.msra.mxu1 %v15047_v3 }
 0x28a   : > { %12477 = vmatprep.mubr.msk.f32.mxu1 %vm961_vm0, %v1805_v10  ;;  %2373 = vmatprep.subr.mxu1 %v19366_v2 }
 0x28b   : > { %v1807_v53 = vpop.f32.mrf.mxu0  ;;  %2374 = vmatpush2.msra.mxu1 %v15053_v63 }
 0x28c   : > { %2375 = vmatprep.subr.mxu1 %v19366_v2 }
 0x28d   : > { %v1810_v1 = vpop.f32.mrf.mxu0  ;;  %2376 = vmatpush2.msra.mxu1 %v15058_v62 }
 0x28e   : > { %12478 = vmatmul.mubr.msk.f32.gmra.mxu1 %vm961_vm0, %v1810_v1  ;;  %2377 = vmatprep.subr.mxu1 %v19366_v2 }
 0x28f   : > { %v1812_v10 = vpop.f32.mrf.mxu0  ;;  %2378 = vmatpush2.msra.mxu1 %v15064_v58 }
 0x290   : > { %2379 = vmatprep.subr.mxu1 %v19366_v2 }
 0x291   : > { %v1815_v53 = vpop.f32.mrf.mxu0  ;;  %2380 = vmatpush2.msra.mxu1 %v15069_v17 }
 0x292   : > { %12480 = vmatprep.mubr.msk.f32.mxu1 %vm961_vm0, %v1815_v53  ;;  %2381 = vmatprep.subr.mxu1 %v19366_v2 }
 0x293   : > { %v1817_v1 = vpop.f32.mrf.mxu0  ;;  %2382 = vmatpush2.msra.mxu1 %v15075_v55 }
 0x294   : > { %2383 = vmatprep.subr.mxu1 %v19366_v2 }
 0x295   : > { %v1820_v10 = vpop.f32.mrf.mxu0  ;;  %2384 = vmatpush2.msra.mxu1 %v15080_v54 }
 0x296   : > { %12481 = vmatmul.mubr.msk.f32.gmra.mxu1 %vm961_vm0, %v1820_v10 }
 0x297   : > { %v1822_v49 = vpop.f32.mrf.mxu0 }
 0x299   : > { %v1825_v34 = vpop.f32.mrf.mxu0 }
 0x29a   : > { %12483 = vmatprep.mubr.msk.f32.mxu1 %vm961_vm0, %v1825_v34 }
 0x29b   : > { %v1827_v53 = vpop.f32.mrf.mxu0 }
 0x29d   : > { %v1830_v32 = vpop.f32.mrf.mxu0 }
 0x29e   : > { %12484 = vmatmul.mubr.msk.f32.gmra.mxu1 %vm961_vm0, %v1830_v32 }
 0x29f   : > { %v1832_v1 = vpop.f32.mrf.mxu0 }
 0x2a1   : > { %v1835_v45 = vpop.f32.mrf.mxu0 }
 0x2a2   : > { %12486 = vmatprep.mubr.msk.f32.mxu1 %vm961_vm0, %v1835_v45 }
 0x2a3   : > { %v1837_v2 = vpop.f32.mrf.mxu0 }
 0x2a5   : > { %v1840_v41 = vpop.f32.mrf.mxu0 }
 0x2a6   : > { %12487 = vmatmul.mubr.msk.f32.gmra.mxu1 %vm961_vm0, %v1840_v41 }
 0x2a7   : > { %v1842_v7 = vpop.f32.mrf.mxu0 }
 0x2a9   : > { %v1845_v5 = vpop.f32.mrf.mxu0 }
 0x2aa   : > { %12489 = vmatprep.mubr.msk.f32.mxu1 %vm961_vm0, %v1845_v5 }
 0x2ab   : > { %v1847_v49 = vpop.f32.mrf.mxu0 }
 0x2ad   : > { %v1850_v10 = vpop.f32.mrf.mxu0 }
 0x2ae   : > { %12490 = vmatmul.mubr.msk.f32.gmra.mxu1 %vm961_vm0, %v1850_v10 }
 0x2af   : > { %v1852_v34 = vpop.f32.mrf.mxu0 }
 0x2b1   : > { %v1855_v53 = vpop.f32.mrf.mxu0 }
 0x2b2   : > { %12492 = vmatprep.mubr.msk.f32.mxu1 %vm961_vm0, %v1855_v53 }
 0x2b3   : > { %v1857_v32 = vpop.f32.mrf.mxu0 }
 0x2b5   : > { %v1860_v1 = vpop.f32.mrf.mxu0 }
 0x2b6   : > { %12493 = vmatmul.mubr.msk.f32.gmra.mxu1 %vm961_vm0, %v1860_v1 }
 0x2b7   : > { %v1862_v2 = vpop.f32.mrf.mxu0 }
 0x2b8   : > { %v10339_v2 = vld [vmem:[%s19357_s1 + $0x608] sm:$0xff] }
 0x2b9   : > { %v1865_v45 = vpop.f32.mrf.mxu0 }
 0x2ba   : > { %12495 = vmatprep.mubr.msk.f32.mxu1 %vm961_vm0, %v1865_v45 }
 0x2bb   : > { %v1867_v7 = vpop.f32.mrf.mxu0 }
 0x2bd   : > { %v1870_v41 = vpop.f32.mrf.mxu0 }
 0x2be   : > { %12496 = vmatmul.mubr.msk.f32.gmra.mxu1 %vm961_vm0, %v1870_v41  ;;  %v10338_v41 = vld [vmem:[%s19357_s1 + $0x600] sm:$0xff] }
 0x2bf   : > { %v1872_v5 = vpop.f32.mrf.mxu0 }
 0x2c0   : > { %v10341_v5 = vld [vmem:[%s19357_s1 + $0x618] sm:$0xff] }
 0x2c1   : > { %v1875_v49 = vpop.f32.mrf.mxu0 }
 0x2c2   : > { %12498 = vmatprep.mubr.msk.f32.mxu1 %vm961_vm0, %v1875_v49  ;;  %v10340_v49 = vld [vmem:[%s19357_s1 + $0x610] sm:$0xff] }
 0x2c3   : > { %v1877_v10 = vpop.f32.mrf.mxu0 }
 0x2c4   : > { %v10343_v10 = vld [vmem:[%s19357_s1 + $0x628] sm:$0xff] }
 0x2c5   : > { %v1880_v34 = vpop.f32.mrf.mxu0 }
 0x2c6   : > { %12499 = vmatmul.mubr.msk.f32.gmra.mxu1 %vm961_vm0, %v1880_v34  ;;  %v10342_v34 = vld [vmem:[%s19357_s1 + $0x620] sm:$0xff] }
 0x2c7   : > { %v1882_v53 = vpop.f32.mrf.mxu0 }
 0x2c8   : > { %v10345_v53 = vld [vmem:[%s19357_s1 + $0x638] sm:$0xff] }
 0x2c9   : > { %v1885_v32 = vpop.f32.mrf.mxu0 }
 0x2ca   : > { %12501 = vmatprep.mubr.msk.f32.mxu1 %vm961_vm0, %v1885_v32  ;;  %v10344_v32 = vld [vmem:[%s19357_s1 + $0x630] sm:$0xff] }
 0x2cb   : > { %v1887_v1 = vpop.f32.mrf.mxu0 }
 0x2cc   : > { %v10347_v1 = vld [vmem:[%s19357_s1 + $0x648] sm:$0xff] }
 0x2cd   : > { %v1890_v45 = vpop.f32.mrf.mxu0 }
 0x2ce   : > { %12502 = vmatmul.mubr.msk.f32.gmra.mxu1 %vm961_vm0, %v1890_v45  ;;  %v10349_v45 = vld [vmem:[%s19357_s1 + $0x658] sm:$0xff] }
 0x2cf   : > { %v1892_v7 = vpop.f32.mrf.mxu0  ;;  %2385 = vmatprep.mubr.f32.mxu1 %v10339_v2  ;;  %v10346_v2 = vld [vmem:[%s19357_s1 + $0x640] sm:$0xff] }
 0x2d0   : > { %v10348_v7 = vld [vmem:[%s19357_s1 + $0x650] sm:$0xff] }
 0x2d2   : > { %2386 = vmatmul.mubr.f32.vlgmr.msra.gmra.mxu1 %v10338_v41  ;;  %v10351_v41 = vld [vmem:[%s19357_s1 + $0x668] sm:$0xff] }
 0x2d3   : > { %2390 = vmatprep.mubr.f32.mxu1 %v10341_v5  ;;  %v10350_v5 = vld [vmem:[%s19357_s1 + $0x660] sm:$0xff] }
 0x2d6   : > { %2391 = vmatmul.mubr.f32.gmra.mxu1 %v10340_v49  ;;  %v10353_v49 = vld [vmem:[%s19357_s1 + $0x678] sm:$0xff] }
 0x2d7   : > { %2395 = vmatprep.mubr.f32.mxu1 %v10343_v10  ;;  %v10352_v10 = vld [vmem:[%s19357_s1 + $0x670] sm:$0xff] }
 0x2da   : > { %2396 = vmatmul.mubr.f32.gmra.mxu1 %v10342_v34  ;;  %v10355_v34 = vld [vmem:[%s19357_s1 + $0x688] sm:$0xff] }
 0x2db   : > { %2400 = vmatprep.mubr.f32.mxu1 %v10345_v53  ;;  %v10354_v53 = vld [vmem:[%s19357_s1 + $0x680] sm:$0xff] }
 0x2de   : > { %2401 = vmatmul.mubr.f32.gmra.mxu1 %v10344_v32  ;;  %v10357_v32 = vld [vmem:[%s19357_s1 + $0x698] sm:$0xff] }
 0x2df   : > { %2405 = vmatprep.mubr.f32.mxu1 %v10347_v1  ;;  %v10409_v1 = vld [vmem:[%s19358_s2 + $0xf8] sm:$0xff] }
 0x2e0   : > { %12504 = vmatprep.subr.mxu0 %v10409_v1 }
 0x2e1   : > { %12505 = vmatpush3.msra.mxu0 %v10409_v1  ;;  %v10367_v1 = vld [vmem:[%s19357_s1 + $0x6e8] sm:$0xff] }
 0x2e2   : > { %2406 = vmatmul.mubr.f32.gmra.mxu1 %v10346_v2  ;;  %v10356_v2 = vld [vmem:[%s19357_s1 + $0x690] sm:$0xff] }
 0x2e3   : > { %2410 = vmatprep.mubr.f32.mxu1 %v10349_v45  ;;  %v10359_v45 = vld [vmem:[%s19357_s1 + $0x6a8] sm:$0xff] }
 0x2e6   : > { %2411 = vmatmul.mubr.f32.gmra.mxu1 %v10348_v7  ;;  %v10358_v7 = vld [vmem:[%s19357_s1 + $0x6a0] sm:$0xff] }
 0x2e7   : > { %2415 = vmatprep.mubr.f32.mxu1 %v10351_v41  ;;  %v10361_v41 = vld [vmem:[%s19357_s1 + $0x6b8] sm:$0xff] }
 0x2ea   : > { %2416 = vmatmul.mubr.f32.gmra.mxu1 %v10350_v5  ;;  %v10360_v5 = vld [vmem:[%s19357_s1 + $0x6b0] sm:$0xff] }
 0x2eb   : > { %2420 = vmatprep.mubr.f32.mxu1 %v10353_v49  ;;  %v10363_v49 = vld [vmem:[%s19357_s1 + $0x6c8] sm:$0xff] }
 0x2ee   : > { %2421 = vmatmul.mubr.f32.gmra.mxu1 %v10352_v10  ;;  %v10362_v10 = vld [vmem:[%s19357_s1 + $0x6c0] sm:$0xff] }
 0x2ef   : > { %2425 = vmatprep.mubr.f32.mxu1 %v10355_v34  ;;  %v10365_v34 = vld [vmem:[%s19357_s1 + $0x6d8] sm:$0xff] }
 0x2f2   : > { %2426 = vmatmul.mubr.f32.gmra.mxu1 %v10354_v53  ;;  %v10408_v53 = vld [vmem:[%s19358_s2 + $0xf0] sm:$0xff] }
 0x2f3   : > { %2430 = vmatprep.mubr.f32.mxu1 %v10357_v32  ;;  %12506 = vmatprep.subr.mxu0 %v10408_v53  ;;  %v10364_v32 = vld [vmem:[%s19357_s1 + $0x6d0] sm:$0xff] }
 0x2f4   : > { %12507 = vmatpush3.msra.mxu0 %v10408_v53  ;;  %v10373_v53 = vld [vmem:[%s19357_s1 + $0x718] sm:$0xff] }
 0x2f6   : > { %2431 = vmatmul.mubr.f32.gmra.mxu1 %v10356_v2  ;;  %v10366_v2 = vld [vmem:[%s19357_s1 + $0x6e0] sm:$0xff] }
 0x2f7   : > { %2435 = vmatprep.mubr.f32.mxu1 %v10359_v45  ;;  %v10369_v45 = vld [vmem:[%s19357_s1 + $0x6f8] sm:$0xff] }
 0x2fa   : > { %2436 = vmatmul.mubr.f32.gmra.mxu1 %v10358_v7  ;;  %v10407_v7 = vld [vmem:[%s19358_s2 + $0xe8] sm:$0xff] }
 0x2fb   : > { %2440 = vmatprep.mubr.f32.mxu1 %v10361_v41  ;;  %v10406_v41 = vld [vmem:[%s19358_s2 + $0xe0] sm:$0xff]  ;;  %12508 = vmatprep.subr.mxu0 %v10407_v7 }
 0x2fc   : > { %12509 = vmatpush3.msra.mxu0 %v10407_v7  ;;  %v10375_v7 = vld [vmem:[%s19357_s1 + $0x728] sm:$0xff] }
 0x2fd   : > { %12510 = vmatprep.subr.mxu0 %v10406_v41 }
 0x2fe   : > { %2441 = vmatmul.mubr.f32.gmra.mxu1 %v10360_v5  ;;  %v10368_v5 = vld [vmem:[%s19357_s1 + $0x6f0] sm:$0xff]  ;;  %12511 = vmatpush3.msra.mxu0 %v10406_v41  ;;  %v10402_v41 = vld [vmem:[%s19358_s2 + $0xc0] sm:$0xff] }
 0x2ff   : > { %2445 = vmatprep.mubr.f32.mxu1 %v10363_v49  ;;  %v10371_v49 = vld [vmem:[%s19357_s1 + $0x708] sm:$0xff] }
 0x302   : > { %2446 = vmatmul.mubr.f32.gmra.mxu1 %v10362_v10  ;;  %v10405_v10 = vld [vmem:[%s19358_s2 + $0xd8] sm:$0xff] }
 0x303   : > { %2450 = vmatprep.mubr.f32.mxu1 %v10365_v34  ;;  %v10370_v34 = vld [vmem:[%s19357_s1 + $0x700] sm:$0xff]  ;;  %12512 = vmatprep.subr.mxu0 %v10405_v10 }
 0x304   : > { %12513 = vmatpush3.msra.mxu0 %v10405_v10  ;;  %v10374_v10 = vld [vmem:[%s19357_s1 + $0x720] sm:$0xff] }
 0x306   : > { %2451 = vmatmul.mubr.f32.gmra.mxu1 %v10364_v32  ;;  %v10404_v32 = vld [vmem:[%s19358_s2 + $0xd0] sm:$0xff] }
 0x307   : > { %2455 = vmatprep.mubr.f32.mxu1 %v10367_v1  ;;  %12514 = vmatprep.subr.mxu0 %v10404_v32  ;;  %v10403_v1 = vld [vmem:[%s19358_s2 + $0xc8] sm:$0xff] }
 0x308   : > { %12515 = vmatpush3.msra.mxu0 %v10404_v32  ;;  %v10376_v32 = vld [vmem:[%s19357_s1 + $0x730] sm:$0xff] }
 0x309   : > { %12516 = vmatprep.subr.mxu0 %v10403_v1 }
 0x30a   : > { %2456 = vmatmul.mubr.f32.gmra.mxu1 %v10366_v2  ;;  %v10372_v2 = vld [vmem:[%s19357_s1 + $0x710] sm:$0xff]  ;;  %12517 = vmatpush3.msra.mxu0 %v10403_v1 }
 0x30b   : > { %2460 = vmatprep.mubr.f32.mxu1 %v10369_v45  ;;  %v15227_v45 = vpop.f32.mrf.mxu1  ;;  %12518 = vmatprep.subr.mxu0 %v10402_v41 }
 0x30c   : > { %19402 = vst [vmem:[#allocation31_spill] sm:$0xff] %v15227_v45  ;;  %12519 = vmatpush3.msra.mxu0 %v10402_v41  ;;  %v10378_v41 = vld [vmem:[%s19357_s1 + $0x740] sm:$0xff] }
 0x30e   : > { %2461 = vmatmul.mubr.f32.gmra.mxu1 %v10368_v5 }
 0x30f   : > { %2465 = vmatprep.mubr.f32.mxu1 %v10371_v49 }
 0x312   : > { %2466 = vmatmul.mubr.f32.gmra.mxu1 %v10370_v34  ;;  %v19403_v34 = vmov 0.0  }
 0x313   : > { %2470 = vmatprep.mubr.f32.mxu1 %v10373_v53  ;;  %2973 = vmatprep.subr.mxu0 %v19403_v34  ;;  %v10377_v53 = vld [vmem:[%s19357_s1 + $0x738] sm:$0xff] }
 0x316   : > { %v12458_v5 = vpop.f32.mrf.mxu1  ;;  %2471 = vmatmul.mubr.f32.gmra.mxu1 %v10372_v2 }
 0x317   : > { %v15236_v49 = vadd.f32 %v12458_v5, %v14731_v57  ;;  %2475 = vmatprep.mubr.f32.mxu1 %v10375_v7  ;;  %v10379_v57 = vld [vmem:[%s19357_s1 + $0x748] sm:$0xff]  ;;  %v10381_v5 = vld [vmem:[%s19357_s1 + $0x758] sm:$0xff] }
 0x318   : > { %v15248_v1 = vpop.f32.mrf.mxu1 }
 0x31a   : > { %2476 = vmatmul.mubr.f32.gmra.mxu1 %v10374_v10  ;;  %v10380_v10 = vld [vmem:[%s19357_s1 + $0x750] sm:$0xff] }
 0x31b   : > { %2480 = vmatprep.mubr.f32.mxu1 %v10377_v53 }
 0x31e   : > { %v12461_v2 = vpop.f32.mrf.mxu1  ;;  %2481 = vmatmul.mubr.f32.gmra.mxu1 %v10376_v32 }
 0x31f   : > { %v15254_v7 = vadd.f32 %v12461_v2, %v14750_v20  ;;  %2485 = vmatprep.mubr.f32.mxu1 %v10379_v57  ;;  %v10383_v20 = vld [vmem:[%s19357_s1 + $0x768] sm:$0xff]  ;;  %v10382_v2 = vld [vmem:[%s19357_s1 + $0x760] sm:$0xff] }
 0x320   : > { %v15265_v53 = vpop.f32.mrf.mxu1 }
 0x321   : > { %19404 = vst [vmem:[#allocation32_spill] sm:$0xff] %v15265_v53 }
 0x322   : > { %2486 = vmatmul.mubr.f32.gmra.mxu1 %v10378_v41  ;;  %v10385_v41 = vld [vmem:[%s19357_s1 + $0x778] sm:$0xff] }
 0x323   : > { %2490 = vmatprep.mubr.f32.mxu1 %v10381_v5  ;;  %v10384_v5 = vld [vmem:[%s19357_s1 + $0x770] sm:$0xff] }
 0x326   : > { %v12464_v32 = vpop.f32.mrf.mxu1  ;;  %2491 = vmatmul.mubr.f32.gmra.mxu1 %v10380_v10 }
 0x327   : > { %v15271_v57 = vadd.f32 %v12464_v32, %v14768_v4  ;;  %2495 = vmatprep.mubr.f32.mxu1 %v10383_v20  ;;  %v10387_v4 = vld [vmem:[%s19357_s1 + $0x788] sm:$0xff]  ;;  %v10386_v32 = vld [vmem:[%s19357_s1 + $0x780] sm:$0xff] }
 0x328   : > { %v15282_v45 = vpop.f32.mrf.mxu1 }
 0x329   : > { %19405 = vst [vmem:[#allocation33_spill] sm:$0xff] %v15282_v45 }
 0x32a   : > { %2496 = vmatmul.mubr.f32.gmra.mxu1 %v10382_v2  ;;  %v10389_v2 = vld [vmem:[%s19357_s1 + $0x798] sm:$0xff] }
 0x32b   : > { %2500 = vmatprep.mubr.f32.mxu1 %v10385_v41  ;;  %v10388_v41 = vld [vmem:[%s19357_s1 + $0x790] sm:$0xff] }
 0x32e   : > { %v12467_v10 = vpop.f32.mrf.mxu1  ;;  %2501 = vmatmul.mubr.f32.gmra.mxu1 %v10384_v5 }
 0x32f   : > { %v15288_v20 = vadd.f32 %v12467_v10, %v14786_v40  ;;  %2505 = vmatprep.mubr.f32.mxu1 %v10387_v4  ;;  %v10391_v40 = vld [vmem:[%s19357_s1 + $0x7a8] sm:$0xff]  ;;  %v10390_v10 = vld [vmem:[%s19357_s1 + $0x7a0] sm:$0xff] }
 0x330   : > { %v15299_v45 = vpop.f32.mrf.mxu1 }
 0x331   : > { %19406 = vst [vmem:[#allocation34_spill] sm:$0xff] %v15299_v45 }
 0x332   : > { %2506 = vmatmul.mubr.f32.gmra.mxu1 %v10386_v32  ;;  %v10393_v32 = vld [vmem:[%s19357_s1 + $0x7b8] sm:$0xff] }
 0x333   : > { %2510 = vmatprep.mubr.f32.mxu1 %v10389_v2  ;;  %v10392_v2 = vld [vmem:[%s19357_s1 + $0x7b0] sm:$0xff] }
 0x336   : > { %v12470_v5 = vpop.f32.mrf.mxu1  ;;  %2511 = vmatmul.mubr.f32.gmra.mxu1 %v10388_v41 }
 0x337   : > { %v15305_v4 = vadd.f32 %v12470_v5, %v14804_v43  ;;  %2515 = vmatprep.mubr.f32.mxu1 %v10391_v40  ;;  %v10395_v43 = vld [vmem:[%s19357_s1 + $0x7c8] sm:$0xff]  ;;  %v10394_v5 = vld [vmem:[%s19357_s1 + $0x7c0] sm:$0xff] }
 0x338   : > { %v15316_v45 = vpop.f32.mrf.mxu1 }
 0x339   : > { %19407 = vst [vmem:[#allocation35_spill] sm:$0xff] %v15316_v45 }
 0x33a   : > { %2516 = vmatmul.mubr.f32.gmra.mxu1 %v10390_v10  ;;  %v10397_v10 = vld [vmem:[%s19357_s1 + $0x7d8] sm:$0xff] }
 0x33b   : > { %2520 = vmatprep.mubr.f32.mxu1 %v10393_v32  ;;  %v10396_v32 = vld [vmem:[%s19357_s1 + $0x7d0] sm:$0xff] }
 0x33e   : > { %v12473_v41 = vpop.f32.mrf.mxu1  ;;  %2521 = vmatmul.mubr.f32.gmra.mxu1 %v10392_v2 }
 0x33f   : > { %v15322_v40 = vadd.f32 %v12473_v41, %v14822_v47  ;;  %2525 = vmatprep.mubr.f32.mxu1 %v10395_v43  ;;  %v10399_v47 = vld [vmem:[%s19357_s1 + $0x7e8] sm:$0xff]  ;;  %v10398_v41 = vld [vmem:[%s19357_s1 + $0x7e0] sm:$0xff] }
 0x340   : > { %v15333_v45 = vpop.f32.mrf.mxu1 }
 0x341   : > { %19408 = vst [vmem:[#allocation36_spill] sm:$0xff] %v15333_v45 }
 0x342   : > { %2526 = vmatmul.mubr.f32.gmra.mxu1 %v10394_v5  ;;  %v10401_v5 = vld [vmem:[%s19357_s1 + $0x7f8] sm:$0xff] }
 0x343   : > { %2530 = vmatprep.mubr.f32.mxu1 %v10397_v10  ;;  %v10400_v10 = vld [vmem:[%s19357_s1 + $0x7f0] sm:$0xff] }
 0x346   : > { %v12476_v2 = vpop.f32.mrf.mxu1  ;;  %2531 = vmatmul.mubr.f32.gmra.mxu1 %v10396_v32 }
 0x347   : > { %v15339_v43 = vadd.f32 %v12476_v2, %v14840_v51  ;;  %2535 = vmatprep.mubr.f32.mxu1 %v10399_v47 }
 0x348   : > { %v15350_v45 = vpop.f32.mrf.mxu1 }
 0x349   : > { %19409 = vst [vmem:[#allocation37_spill] sm:$0xff] %v15350_v45 }
 0x34a   : > { %2536 = vmatmul.mubr.f32.gmra.mxu1 %v10398_v41 }
 0x34b   : > { %2540 = vmatprep.mubr.f32.mxu1 %v10401_v5 }
 0x34e   : > { %v12479_v32 = vpop.f32.mrf.mxu1  ;;  %2541 = vmatmul.mubr.f32.gmra.mxu1 %v10400_v10 }
 0x34f   : > { %v15353_v51 = vadd.f32 %v12479_v32, %v14855_v56 }
 0x350   : > { %v15355_v47 = vpop.f32.mrf.mxu1 }
 0x351   : > { %19410 = vst [vmem:[#allocation38_spill] sm:$0xff] %v15355_v47 }
 0x356   : > { %v12482_v2 = vpop.f32.mrf.mxu1 }
 0x357   : > { %v15358_v25 = vadd.f32 %v12482_v2, %v14861_v61 }
 0x358   : > { %v15360_v53 = vpop.f32.mrf.mxu1 }
 0x359   : > { %19411 = vst [vmem:[#allocation39_spill] sm:$0xff] %v15360_v53 }
 0x35e   : > { %v12485_v41 = vpop.f32.mrf.mxu1 }
 0x35f   : > { %v15363_v5 = vadd.f32 %v12485_v41, %v14867_v35 }
 0x360   : > { %v15365_v22 = vpop.f32.mrf.mxu1 }
 0x361   : > { %19412 = vst [vmem:[#allocation40_spill] sm:$0xff] %v15365_v22 }
 0x366   : > { %v12488_v45 = vpop.f32.mrf.mxu1 }
 0x367   : > { %v15368_v10 = vadd.f32 %v12488_v45, %v14873_v24 }
 0x368   : > { %v15370_v56 = vpop.f32.mrf.mxu1 }
 0x369   : > { %19413 = vst [vmem:[#allocation41_spill] sm:$0xff] %v15370_v56 }
 0x36e   : > { %v12491_v32 = vpop.f32.mrf.mxu1 }
 0x36f   : > { %v15373_v47 = vadd.f32 %v12491_v32, %v14879_v27 }
 0x370   : > { %v15375_v61 = vpop.f32.mrf.mxu1 }
 0x371   : > { %19414 = vst [vmem:[#allocation42_spill] sm:$0xff] %v15375_v61 }
 0x376   : > { %v12494_v2 = vpop.f32.mrf.mxu1 }
 0x377   : > { %v15378_v53 = vadd.f32 %v12494_v2, %v14885_v30 }
 0x378   : > { %v15380_v35 = vpop.f32.mrf.mxu1 }
 0x379   : > { %19415 = vst [vmem:[#allocation43_spill] sm:$0xff] %v15380_v35 }
 0x37e   : > { %v12497_v41 = vpop.f32.mrf.mxu1 }
 0x37f   : > { %v15383_v22 = vadd.f32 %v12497_v41, %v14891_v46 }
 0x380   : > { %v15385_v24 = vpop.f32.mrf.mxu1 }
 0x381   : > { %19416 = vst [vmem:[#allocation44_spill] sm:$0xff] %v15385_v24  ;;  %v15935_v24 = vld [vmem:[%s13818_s18 + $0xa8] sm:$0xff] }
 0x386   : > { %v12500_v45 = vpop.f32.mrf.mxu1 }
 0x387   : > { %v15388_v56 = vadd.f32 %v12500_v45, %v14897_v12 }
 0x388   : > { %v15390_v27 = vpop.f32.mrf.mxu1 }
 0x389   : > { %19417 = vst [vmem:[#allocation45_spill] sm:$0xff] %v15390_v27  ;;  %v15924_v27 = vld [vmem:[%s13818_s18 + $0xb8] sm:$0xff] }
 0x38e   : > { %v12503_v32 = vpop.f32.mrf.mxu1 }
 0x38f   : > { %v15393_v61 = vadd.f32 %v12503_v32, %v14903_v15 }
 0x390   : > { %v15395_v30 = vpop.f32.mrf.mxu1 }
 0x391   : > { %19418 = vst [vmem:[#allocation46_spill] sm:$0xff] %v15395_v30  ;;  %v15913_v30 = vld [vmem:[%s13818_s18 + $0xc8] sm:$0xff] }
 0x392   : > { %v2387_v2 = vpop.f32.mrf.mxu1 }
 0x393   : > { %12520 = vmatprep.mubr.msk.f32.mxu0 %vm961_vm0, %v2387_v2 }
 0x394   : > { %v2389_v35 = vpop.f32.mrf.mxu1 }
 0x396   : > { %v2392_v46 = vpop.f32.mrf.mxu1 }
 0x397   : > { %12521 = vmatmul.mubr.msk.f32.vlgmr.msra.gmra.mxu0 %vm961_vm0, %v2392_v46 }
 0x398   : > { %v2394_v41 = vpop.f32.mrf.mxu1  ;;  %2974 = vmatpush1.msra.mxu0 %v14910_v36 }
 0x399   : > { %2975 = vmatprep.subr.mxu0 %v19403_v34 }
 0x39a   : > { %v2397_v12 = vpop.f32.mrf.mxu1  ;;  %2976 = vmatpush1.msra.mxu0 %v14915_v39 }
 0x39b   : > { %12523 = vmatprep.mubr.msk.f32.mxu0 %vm961_vm0, %v2397_v12  ;;  %2977 = vmatprep.subr.mxu0 %v19403_v34 }
 0x39c   : > { %v2399_v15 = vpop.f32.mrf.mxu1  ;;  %2978 = vmatpush1.msra.mxu0 %v14921_v42 }
 0x39d   : > { %2979 = vmatprep.subr.mxu0 %v19403_v34 }
 0x39e   : > { %v2402_v35 = vpop.f32.mrf.mxu1  ;;  %2980 = vmatpush1.msra.mxu0 %v14926_v9 }
 0x39f   : > { %12524 = vmatmul.mubr.msk.f32.gmra.mxu0 %vm961_vm0, %v2402_v35  ;;  %2981 = vmatprep.subr.mxu0 %v19403_v34 }
 0x3a0   : > { %v2404_v36 = vpop.f32.mrf.mxu1  ;;  %2982 = vmatpush1.msra.mxu0 %v14932_v48 }
 0x3a1   : > { %2983 = vmatprep.subr.mxu0 %v19403_v34 }
 0x3a2   : > { %v2407_v39 = vpop.f32.mrf.mxu1  ;;  %2984 = vmatpush1.msra.mxu0 %v14937_v14 }
 0x3a3   : > { %12526 = vmatprep.mubr.msk.f32.mxu0 %vm961_vm0, %v2407_v39  ;;  %2985 = vmatprep.subr.mxu0 %v19403_v34 }
 0x3a4   : > { %v2409_v42 = vpop.f32.mrf.mxu1  ;;  %2986 = vmatpush1.msra.mxu0 %v14943_v59 }
 0x3a5   : > { %2987 = vmatprep.subr.mxu0 %v19403_v34 }
 0x3a6   : > { %v2412_v9 = vpop.f32.mrf.mxu1  ;;  %2988 = vmatpush1.msra.mxu0 %v14948_v0 }
 0x3a7   : > { %12527 = vmatmul.mubr.msk.f32.gmra.mxu0 %vm961_vm0, %v2412_v9  ;;  %2989 = vmatprep.subr.mxu0 %v19403_v34 }
 0x3a8   : > { %v2414_v48 = vpop.f32.mrf.mxu1  ;;  %2990 = vmatpush1.msra.mxu0 %v14954_v37 }
 0x3a9   : > { %2991 = vmatprep.subr.mxu0 %v19403_v34 }
 0x3aa   : > { %v2417_v14 = vpop.f32.mrf.mxu1  ;;  %2992 = vmatpush1.msra.mxu0 %v14959_v8 }
 0x3ab   : > { %12529 = vmatprep.mubr.msk.f32.mxu0 %vm961_vm0, %v2417_v14  ;;  %2993 = vmatprep.subr.mxu0 %v19403_v34 }
 0x3ac   : > { %v2419_v59 = vpop.f32.mrf.mxu1  ;;  %2994 = vmatpush1.msra.mxu0 %v14965_v50 }
 0x3ad   : > { %2995 = vmatprep.subr.mxu0 %v19403_v34 }
 0x3ae   : > { %v2422_v0 = vpop.f32.mrf.mxu1  ;;  %2996 = vmatpush1.msra.mxu0 %v14970_v19 }
 0x3af   : > { %12530 = vmatmul.mubr.msk.f32.gmra.mxu0 %vm961_vm0, %v2422_v0  ;;  %2997 = vmatprep.subr.mxu0 %v19403_v34 }
 0x3b0   : > { %v2424_v37 = vpop.f32.mrf.mxu1  ;;  %2998 = vmatpush1.msra.mxu0 %v14976_v6 }
 0x3b1   : > { %2999 = vmatprep.subr.mxu0 %v19403_v34 }
 0x3b2   : > { %v2427_v8 = vpop.f32.mrf.mxu1  ;;  %3000 = vmatpush1.msra.mxu0 %v14981_v16 }
 0x3b3   : > { %12532 = vmatprep.mubr.msk.f32.mxu0 %vm961_vm0, %v2427_v8  ;;  %3001 = vmatprep.subr.mxu0 %v19403_v34 }
 0x3b4   : > { %v2429_v50 = vpop.f32.mrf.mxu1  ;;  %3002 = vmatpush1.msra.mxu0 %v14987_v52 }
 0x3b5   : > { %3003 = vmatprep.subr.mxu0 %v19403_v34 }
 0x3b6   : > { %v2432_v19 = vpop.f32.mrf.mxu1  ;;  %3004 = vmatpush1.msra.mxu0 %v14992_v13 }
 0x3b7   : > { %12533 = vmatmul.mubr.msk.f32.gmra.mxu0 %vm961_vm0, %v2432_v19  ;;  %3005 = vmatprep.subr.mxu0 %v19403_v34 }
 0x3b8   : > { %v2434_v6 = vpop.f32.mrf.mxu1  ;;  %3006 = vmatpush2.msra.mxu0 %v14998_v11 }
 0x3b9   : > { %3007 = vmatprep.subr.mxu0 %v19403_v34 }
 0x3ba   : > { %v2437_v16 = vpop.f32.mrf.mxu1  ;;  %3008 = vmatpush2.msra.mxu0 %v15003_v33 }
 0x3bb   : > { %12535 = vmatprep.mubr.msk.f32.mxu0 %vm961_vm0, %v2437_v16  ;;  %3009 = vmatprep.subr.mxu0 %v19403_v34 }
 0x3bc   : > { %v2439_v52 = vpop.f32.mrf.mxu1  ;;  %3010 = vmatpush2.msra.mxu0 %v15009_v44 }
 0x3bd   : > { %3011 = vmatprep.subr.mxu0 %v19403_v34 }
 0x3be   : > { %v2442_v13 = vpop.f32.mrf.mxu1  ;;  %3012 = vmatpush2.msra.mxu0 %v15014_v31 }
 0x3bf   : > { %12536 = vmatmul.mubr.msk.f32.gmra.mxu0 %vm961_vm0, %v2442_v13  ;;  %3013 = vmatprep.subr.mxu0 %v19403_v34  ;;  %v10443_v13 = vld [vmem:[%s19357_s1 + $0x808] sm:$0xff] }
 0x3c0   : > { %v2444_v11 = vpop.f32.mrf.mxu1  ;;  %3014 = vmatpush2.msra.mxu0 %v15020_v29 }
 0x3c1   : > { %3015 = vmatprep.subr.mxu0 %v19403_v34 }
 0x3c2   : > { %v2447_v33 = vpop.f32.mrf.mxu1  ;;  %3016 = vmatpush2.msra.mxu0 %v15025_v28 }
 0x3c3   : > { %12538 = vmatprep.mubr.msk.f32.mxu0 %vm961_vm0, %v2447_v33  ;;  %3017 = vmatprep.subr.mxu0 %v19403_v34 }
 0x3c4   : > { %v2449_v44 = vpop.f32.mrf.mxu1  ;;  %3018 = vmatpush2.msra.mxu0 %v15031_v26 }
 0x3c5   : > { %3019 = vmatprep.subr.mxu0 %v19403_v34  ;;  %v10442_v44 = vld [vmem:[%s19357_s1 + $0x800] sm:$0xff] }
 0x3c6   : > { %v2452_v31 = vpop.f32.mrf.mxu1  ;;  %3020 = vmatpush2.msra.mxu0 %v15036_v38 }
 0x3c7   : > { %12539 = vmatmul.mubr.msk.f32.gmra.mxu0 %vm961_vm0, %v2452_v31  ;;  %3021 = vmatprep.subr.mxu0 %v19403_v34  ;;  %v10445_v31 = vld [vmem:[%s19357_s1 + $0x818] sm:$0xff] }
 0x3c8   : > { %v2454_v29 = vpop.f32.mrf.mxu1  ;;  %3022 = vmatpush2.msra.mxu0 %v15042_v23 }
 0x3c9   : > { %3023 = vmatprep.subr.mxu0 %v19403_v34  ;;  %v10444_v29 = vld [vmem:[%s19357_s1 + $0x810] sm:$0xff] }
 0x3ca   : > { %v2457_v28 = vpop.f32.mrf.mxu1  ;;  %3024 = vmatpush2.msra.mxu0 %v15047_v3 }
 0x3cb   : > { %12541 = vmatprep.mubr.msk.f32.mxu0 %vm961_vm0, %v2457_v28  ;;  %3025 = vmatprep.subr.mxu0 %v19403_v34  ;;  %v10447_v28 = vld [vmem:[%s19357_s1 + $0x828] sm:$0xff] }
 0x3cc   : > { %v2459_v26 = vpop.f32.mrf.mxu1  ;;  %3026 = vmatpush2.msra.mxu0 %v15053_v63 }
 0x3cd   : > { %3027 = vmatprep.subr.mxu0 %v19403_v34  ;;  %v10446_v26 = vld [vmem:[%s19357_s1 + $0x820] sm:$0xff] }
 0x3ce   : > { %v2462_v38 = vpop.f32.mrf.mxu1  ;;  %3028 = vmatpush2.msra.mxu0 %v15058_v62 }
 0x3cf   : > { %12542 = vmatmul.mubr.msk.f32.gmra.mxu0 %vm961_vm0, %v2462_v38  ;;  %3029 = vmatprep.subr.mxu0 %v19403_v34  ;;  %v10449_v38 = vld [vmem:[%s19357_s1 + $0x838] sm:$0xff] }
 0x3d0   : > { %v2464_v23 = vpop.f32.mrf.mxu1  ;;  %3030 = vmatpush2.msra.mxu0 %v15064_v58 }
 0x3d1   : > { %3031 = vmatprep.subr.mxu0 %v19403_v34  ;;  %v10448_v23 = vld [vmem:[%s19357_s1 + $0x830] sm:$0xff] }
 0x3d2   : > { %v2467_v3 = vpop.f32.mrf.mxu1  ;;  %3032 = vmatpush2.msra.mxu0 %v15069_v17 }
 0x3d3   : > { %12544 = vmatprep.mubr.msk.f32.mxu0 %vm961_vm0, %v2467_v3  ;;  %3033 = vmatprep.subr.mxu0 %v19403_v34  ;;  %v10451_v3 = vld [vmem:[%s19357_s1 + $0x848] sm:$0xff] }
 0x3d4   : > { %v2469_v63 = vpop.f32.mrf.mxu1  ;;  %3034 = vmatpush2.msra.mxu0 %v15075_v55 }
 0x3d5   : > { %3035 = vmatprep.subr.mxu0 %v19403_v34  ;;  %v10450_v63 = vld [vmem:[%s19357_s1 + $0x840] sm:$0xff] }
 0x3d6   : > { %v2472_v62 = vpop.f32.mrf.mxu1  ;;  %3036 = vmatpush2.msra.mxu0 %v15080_v54 }
 0x3d7   : > { %12545 = vmatmul.mubr.msk.f32.gmra.mxu0 %vm961_vm0, %v2472_v62  ;;  %v10453_v62 = vld [vmem:[%s19357_s1 + $0x858] sm:$0xff] }
 0x3d8   : > { %v2474_v58 = vpop.f32.mrf.mxu1 }
 0x3d9   : > { %v10452_v58 = vld [vmem:[%s19357_s1 + $0x850] sm:$0xff] }
 0x3da   : > { %v2477_v45 = vpop.f32.mrf.mxu1 }
 0x3db   : > { %12547 = vmatprep.mubr.msk.f32.mxu0 %vm961_vm0, %v2477_v45  ;;  %v10455_v45 = vld [vmem:[%s19357_s1 + $0x868] sm:$0xff] }
 0x3dc   : > { %v2479_v32 = vpop.f32.mrf.mxu1 }
 0x3dd   : > { %v10454_v32 = vld [vmem:[%s19357_s1 + $0x860] sm:$0xff] }
 0x3de   : > { %v2482_v17 = vpop.f32.mrf.mxu1 }
 0x3df   : > { %12548 = vmatmul.mubr.msk.f32.gmra.mxu0 %vm961_vm0, %v2482_v17  ;;  %v10457_v17 = vld [vmem:[%s19357_s1 + $0x878] sm:$0xff] }
 0x3e0   : > { %v2484_v2 = vpop.f32.mrf.mxu1 }
 0x3e1   : > { %v10456_v2 = vld [vmem:[%s19357_s1 + $0x870] sm:$0xff] }
 0x3e2   : > { %v2487_v46 = vpop.f32.mrf.mxu1 }
 0x3e3   : > { %12550 = vmatprep.mubr.msk.f32.mxu0 %vm961_vm0, %v2487_v46  ;;  %v10459_v46 = vld [vmem:[%s19357_s1 + $0x888] sm:$0xff] }
 0x3e4   : > { %v2489_v55 = vpop.f32.mrf.mxu1 }
 0x3e5   : > { %v10458_v55 = vld [vmem:[%s19357_s1 + $0x880] sm:$0xff] }
 0x3e6   : > { %v2492_v41 = vpop.f32.mrf.mxu1 }
 0x3e7   : > { %12551 = vmatmul.mubr.msk.f32.gmra.mxu0 %vm961_vm0, %v2492_v41  ;;  %v10461_v41 = vld [vmem:[%s19357_s1 + $0x898] sm:$0xff] }
 0x3e8   : > { %v2494_v12 = vpop.f32.mrf.mxu1 }
 0x3e9   : > { %v10513_v12 = vld [vmem:[%s19358_s2 + $0x138] sm:$0xff] }
 0x3ea   : > { %v2497_v54 = vpop.f32.mrf.mxu1  ;;  %12568 = vmatprep.subr.mxu1 %v10513_v12 }
 0x3eb   : > { %12553 = vmatprep.mubr.msk.f32.mxu0 %vm961_vm0, %v2497_v54  ;;  %v10460_v54 = vld [vmem:[%s19357_s1 + $0x890] sm:$0xff]  ;;  %12569 = vmatpush3.msra.mxu1 %v10513_v12  ;;  %v10486_v12 = vld [vmem:[%s19357_s1 + $0x960] sm:$0xff] }
 0x3ec   : > { %v2499_v15 = vpop.f32.mrf.mxu1 }
 0x3ed   : > { %v10463_v15 = vld [vmem:[%s19357_s1 + $0x8a8] sm:$0xff] }
 0x3ee   : > { %v2502_v35 = vpop.f32.mrf.mxu1 }
 0x3ef   : > { %12554 = vmatmul.mubr.msk.f32.gmra.mxu0 %vm961_vm0, %v2502_v35  ;;  %v10462_v35 = vld [vmem:[%s19357_s1 + $0x8a0] sm:$0xff] }
 0x3f0   : > { %v2504_v36 = vpop.f32.mrf.mxu1 }
 0x3f1   : > { %v10465_v36 = vld [vmem:[%s19357_s1 + $0x8b8] sm:$0xff] }
 0x3f2   : > { %v2507_v39 = vpop.f32.mrf.mxu1 }
 0x3f3   : > { %12556 = vmatprep.mubr.msk.f32.mxu0 %vm961_vm0, %v2507_v39  ;;  %v10464_v39 = vld [vmem:[%s19357_s1 + $0x8b0] sm:$0xff] }
 0x3f4   : > { %v2509_v42 = vpop.f32.mrf.mxu1 }
 0x3f5   : > { %v10467_v42 = vld [vmem:[%s19357_s1 + $0x8c8] sm:$0xff] }
 0x3f6   : > { %v2512_v9 = vpop.f32.mrf.mxu1 }
 0x3f7   : > { %12557 = vmatmul.mubr.msk.f32.gmra.mxu0 %vm961_vm0, %v2512_v9  ;;  %v10466_v9 = vld [vmem:[%s19357_s1 + $0x8c0] sm:$0xff] }
 0x3f8   : > { %v2514_v48 = vpop.f32.mrf.mxu1 }
 0x3f9   : > { %v10469_v48 = vld [vmem:[%s19357_s1 + $0x8d8] sm:$0xff] }
 0x3fa   : > { %v2517_v14 = vpop.f32.mrf.mxu1 }
 0x3fb   : > { %12559 = vmatprep.mubr.msk.f32.mxu0 %vm961_vm0, %v2517_v14  ;;  %v10512_v14 = vld [vmem:[%s19358_s2 + $0x130] sm:$0xff] }
 0x3fc   : > { %v2519_v59 = vpop.f32.mrf.mxu1  ;;  %12570 = vmatprep.subr.mxu1 %v10512_v14 }
 0x3fd   : > { %v10468_v59 = vld [vmem:[%s19357_s1 + $0x8d0] sm:$0xff]  ;;  %12571 = vmatpush3.msra.mxu1 %v10512_v14 }
 0x3fe   : > { %v2522_v0 = vpop.f32.mrf.mxu1 }
 0x3ff   : > { %12560 = vmatmul.mubr.msk.f32.gmra.mxu0 %vm961_vm0, %v2522_v0  ;;  %v10471_v0 = vld [vmem:[%s19357_s1 + $0x8e8] sm:$0xff] }
 0x400   : > { %v2524_v37 = vpop.f32.mrf.mxu1 }
 0x401   : > { %v10470_v37 = vld [vmem:[%s19357_s1 + $0x8e0] sm:$0xff] }
 0x402   : > { %v2527_v8 = vpop.f32.mrf.mxu1 }
 0x403   : > { %12562 = vmatprep.mubr.msk.f32.mxu0 %vm961_vm0, %v2527_v8  ;;  %v10473_v8 = vld [vmem:[%s19357_s1 + $0x8f8] sm:$0xff] }
 0x404   : > { %v2529_v50 = vpop.f32.mrf.mxu1 }
 0x405   : > { %v10511_v50 = vld [vmem:[%s19358_s2 + $0x128] sm:$0xff] }
 0x406   : > { %v2532_v19 = vpop.f32.mrf.mxu1  ;;  %12572 = vmatprep.subr.mxu1 %v10511_v50 }
 0x407   : > { %12563 = vmatmul.mubr.msk.f32.gmra.mxu0 %vm961_vm0, %v2532_v19  ;;  %v10510_v19 = vld [vmem:[%s19358_s2 + $0x120] sm:$0xff]  ;;  %12573 = vmatpush3.msra.mxu1 %v10511_v50  ;;  %v10496_v50 = vld [vmem:[%s19357_s1 + $0x9b0] sm:$0xff] }
 0x408   : > { %v2534_v6 = vpop.f32.mrf.mxu1  ;;  %12574 = vmatprep.subr.mxu1 %v10510_v19 }
 0x409   : > { %v10472_v6 = vld [vmem:[%s19357_s1 + $0x8f0] sm:$0xff]  ;;  %12575 = vmatpush3.msra.mxu1 %v10510_v19 }
 0x40a   : > { %v2537_v16 = vpop.f32.mrf.mxu1 }
 0x40b   : > { %12565 = vmatprep.mubr.msk.f32.mxu0 %vm961_vm0, %v2537_v16  ;;  %v10475_v16 = vld [vmem:[%s19357_s1 + $0x908] sm:$0xff] }
 0x40c   : > { %v2539_v52 = vpop.f32.mrf.mxu1 }
 0x40d   : > { %v10509_v52 = vld [vmem:[%s19358_s2 + $0x118] sm:$0xff] }
 0x40e   : > { %v2542_v11 = vpop.f32.mrf.mxu1  ;;  %12576 = vmatprep.subr.mxu1 %v10509_v52 }
 0x40f   : > { %12566 = vmatmul.mubr.msk.f32.gmra.mxu0 %vm961_vm0, %v2542_v11  ;;  %v10477_v11 = vld [vmem:[%s19357_s1 + $0x918] sm:$0xff]  ;;  %12577 = vmatpush3.msra.mxu1 %v10509_v52  ;;  %v10498_v52 = vld [vmem:[%s19357_s1 + $0x9c0] sm:$0xff] }
 0x410   : > { %v2544_v33 = vpop.f32.mrf.mxu1  ;;  %3037 = vmatprep.mubr.f32.mxu0 %v10443_v13  ;;  %v10474_v13 = vld [vmem:[%s19357_s1 + $0x900] sm:$0xff] }
 0x411   : > { %v10508_v33 = vld [vmem:[%s19358_s2 + $0x110] sm:$0xff] }
 0x412   : > { %12578 = vmatprep.subr.mxu1 %v10508_v33 }
 0x413   : > { %3038 = vmatmul.mubr.f32.vlgmr.msra.gmra.mxu0 %v10442_v44  ;;  %12579 = vmatpush3.msra.mxu1 %v10508_v33  ;;  %v10507_v44 = vld [vmem:[%s19358_s2 + $0x108] sm:$0xff] }
 0x414   : > { %3042 = vmatprep.mubr.f32.mxu0 %v10445_v31  ;;  %v10476_v31 = vld [vmem:[%s19357_s1 + $0x910] sm:$0xff]  ;;  %12580 = vmatprep.subr.mxu1 %v10507_v44 }
 0x415   : > { %12581 = vmatpush3.msra.mxu1 %v10507_v44 }
 0x417   : > { %3043 = vmatmul.mubr.f32.gmra.mxu0 %v10444_v29  ;;  %v10479_v29 = vld [vmem:[%s19357_s1 + $0x928] sm:$0xff] }
 0x418   : > { %3047 = vmatprep.mubr.f32.mxu0 %v10447_v28  ;;  %v10506_v28 = vld [vmem:[%s19358_s2 + $0x100] sm:$0xff] }
 0x419   : > { %12582 = vmatprep.subr.mxu1 %v10506_v28 }
 0x41a   : > { %12583 = vmatpush3.msra.mxu1 %v10506_v28  ;;  %v10505_v28 = vld [vmem:[%s19357_s1 + $0x9f8] sm:$0xff] }
 0x41b   : > { %3048 = vmatmul.mubr.f32.gmra.mxu0 %v10446_v26  ;;  %3625 = vmatprep.subr.mxu1 %v19403_v34 }
 0x41c   : > { %3052 = vmatprep.mubr.f32.mxu0 %v10449_v38 }
 0x41f   : > { %3053 = vmatmul.mubr.f32.gmra.mxu0 %v10448_v23  ;;  %v10478_v23 = vld [vmem:[%s19357_s1 + $0x920] sm:$0xff] }
 0x420   : > { %3057 = vmatprep.mubr.f32.mxu0 %v10451_v3  ;;  %v10481_v3 = vld [vmem:[%s19357_s1 + $0x938] sm:$0xff] }
 0x423   : > { %3058 = vmatmul.mubr.f32.gmra.mxu0 %v10450_v63  ;;  %v10480_v63 = vld [vmem:[%s19357_s1 + $0x930] sm:$0xff] }
 0x424   : > { %3062 = vmatprep.mubr.f32.mxu0 %v10453_v62 }
 0x427   : > { %3063 = vmatmul.mubr.f32.gmra.mxu0 %v10452_v58 }
 0x428   : > { %3067 = vmatprep.mubr.f32.mxu0 %v10455_v45 }
 0x42b   : > { %3068 = vmatmul.mubr.f32.gmra.mxu0 %v10454_v32  ;;  %v10482_v32 = vld [vmem:[%s19357_s1 + $0x940] sm:$0xff] }
 0x42c   : > { %3072 = vmatprep.mubr.f32.mxu0 %v10457_v17  ;;  %v10485_v17 = vld [vmem:[%s19357_s1 + $0x958] sm:$0xff] }
 0x42f   : > { %3073 = vmatmul.mubr.f32.gmra.mxu0 %v10456_v2  ;;  %v10484_v2 = vld [vmem:[%s19357_s1 + $0x950] sm:$0xff] }
 0x430   : > { %3077 = vmatprep.mubr.f32.mxu0 %v10459_v46 }
 0x433   : > { %3078 = vmatmul.mubr.f32.gmra.mxu0 %v10458_v55 }
 0x434   : > { %3082 = vmatprep.mubr.f32.mxu0 %v10461_v41 }
 0x437   : > { %3083 = vmatmul.mubr.f32.gmra.mxu0 %v10460_v54  ;;  %v10489_v54 = vld [vmem:[%s19357_s1 + $0x978] sm:$0xff] }
 0x438   : > { %3087 = vmatprep.mubr.f32.mxu0 %v10463_v15  ;;  %v10488_v15 = vld [vmem:[%s19357_s1 + $0x970] sm:$0xff] }
 0x43b   : > { %3088 = vmatmul.mubr.f32.gmra.mxu0 %v10462_v35 }
 0x43c   : > { %3092 = vmatprep.mubr.f32.mxu0 %v10465_v36 }
 0x43f   : > { %3093 = vmatmul.mubr.f32.gmra.mxu0 %v10464_v39 }
 0x440   : > { %3097 = vmatprep.mubr.f32.mxu0 %v10467_v42  ;;  %v10490_v42 = vld [vmem:[%s19357_s1 + $0x980] sm:$0xff] }
 0x443   : > { %3098 = vmatmul.mubr.f32.gmra.mxu0 %v10466_v9  ;;  %v10493_v9 = vld [vmem:[%s19357_s1 + $0x998] sm:$0xff] }
 0x444   : > { %3102 = vmatprep.mubr.f32.mxu0 %v10469_v48  ;;  %v10492_v48 = vld [vmem:[%s19357_s1 + $0x990] sm:$0xff] }
 0x447   : > { %3103 = vmatmul.mubr.f32.gmra.mxu0 %v10468_v59 }
 0x448   : > { %3107 = vmatprep.mubr.f32.mxu0 %v10471_v0 }
 0x44b   : > { %3108 = vmatmul.mubr.f32.gmra.mxu0 %v10470_v37  ;;  %v10494_v37 = vld [vmem:[%s19357_s1 + $0x9a0] sm:$0xff] }
 0x44c   : > { %3112 = vmatprep.mubr.f32.mxu0 %v10473_v8  ;;  %v10497_v8 = vld [vmem:[%s19357_s1 + $0x9b8] sm:$0xff] }
 0x44f   : > { %3113 = vmatmul.mubr.f32.gmra.mxu0 %v10472_v6 }
 0x450   : > { %3117 = vmatprep.mubr.f32.mxu0 %v10475_v16 }
 0x453   : > { %3118 = vmatmul.mubr.f32.gmra.mxu0 %v10474_v13  ;;  %v10501_v13 = vld [vmem:[%s19357_s1 + $0x9d8] sm:$0xff] }
 0x454   : > { %3122 = vmatprep.mubr.f32.mxu0 %v10477_v11  ;;  %v10500_v11 = vld [vmem:[%s19357_s1 + $0x9d0] sm:$0xff] }
 0x457   : > { %v12522_v26 = vpop.f32.mrf.mxu0  ;;  %3123 = vmatmul.mubr.f32.gmra.mxu0 %v10476_v31 }
 0x458   : > { %v15628_v38 = vadd.f32 %v12522_v26, %v15236_v49  ;;  %3127 = vmatprep.mubr.f32.mxu0 %v10479_v29  ;;  %v10483_v49 = vld [vmem:[%s19357_s1 + $0x948] sm:$0xff]  ;;  %v10502_v29 = vld [vmem:[%s19357_s1 + $0x9e0] sm:$0xff]  ;;  %v10504_v26 = vld [vmem:[%s19357_s1 + $0x9f0] sm:$0xff] }
 0x459   : > { %v15640_v62 = vpop.f32.mrf.mxu0 }
 0x45b   : > { %3128 = vmatmul.mubr.f32.gmra.mxu0 %v10478_v23 }
 0x45c   : > { %3132 = vmatprep.mubr.f32.mxu0 %v10481_v3 }
 0x45f   : > { %v12525_v58 = vpop.f32.mrf.mxu0  ;;  %3133 = vmatmul.mubr.f32.gmra.mxu0 %v10480_v63 }
 0x460   : > { %v15646_v45 = vadd.f32 %v12525_v58, %v15254_v7  ;;  %3137 = vmatprep.mubr.f32.mxu0 %v10483_v49  ;;  %v10487_v7 = vld [vmem:[%s19357_s1 + $0x968] sm:$0xff] }
 0x461   : > { %v15657_v46 = vpop.f32.mrf.mxu0 }
 0x462   : > { %19419 = vst [vmem:[#allocation47_spill] sm:$0xff] %v15657_v46 }
 0x463   : > { %3138 = vmatmul.mubr.f32.gmra.mxu0 %v10482_v32 }
 0x464   : > { %3142 = vmatprep.mubr.f32.mxu0 %v10485_v17 }
 0x467   : > { %v12528_v55 = vpop.f32.mrf.mxu0  ;;  %3143 = vmatmul.mubr.f32.gmra.mxu0 %v10484_v2 }
 0x468   : > { %v15663_v41 = vadd.f32 %v12528_v55, %v15271_v57  ;;  %3147 = vmatprep.mubr.f32.mxu0 %v10487_v7  ;;  %v10491_v57 = vld [vmem:[%s19357_s1 + $0x988] sm:$0xff] }
 0x469   : > { %v15674_v35 = vpop.f32.mrf.mxu0 }
 0x46a   : > { %19420 = vst [vmem:[#allocation48_spill] sm:$0xff] %v15674_v35 }
 0x46b   : > { %3148 = vmatmul.mubr.f32.gmra.mxu0 %v10486_v12 }
 0x46c   : > { %3152 = vmatprep.mubr.f32.mxu0 %v10489_v54 }
 0x46f   : > { %v12531_v36 = vpop.f32.mrf.mxu0  ;;  %3153 = vmatmul.mubr.f32.gmra.mxu0 %v10488_v15 }
 0x470   : > { %v15680_v39 = vadd.f32 %v12531_v36, %v15288_v20  ;;  %3157 = vmatprep.mubr.f32.mxu0 %v10491_v57  ;;  %v10495_v20 = vld [vmem:[%s19357_s1 + $0x9a8] sm:$0xff] }
 0x471   : > { %v15691_v14 = vpop.f32.mrf.mxu0 }
 0x472   : > { %19421 = vst [vmem:[#allocation49_spill] sm:$0xff] %v15691_v14 }
 0x473   : > { %3158 = vmatmul.mubr.f32.gmra.mxu0 %v10490_v42 }
 0x474   : > { %3162 = vmatprep.mubr.f32.mxu0 %v10493_v9 }
 0x477   : > { %v12534_v59 = vpop.f32.mrf.mxu0  ;;  %3163 = vmatmul.mubr.f32.gmra.mxu0 %v10492_v48 }
 0x478   : > { %v15697_v0 = vadd.f32 %v12534_v59, %v15305_v4  ;;  %3167 = vmatprep.mubr.f32.mxu0 %v10495_v20  ;;  %v10499_v4 = vld [vmem:[%s19357_s1 + $0x9c8] sm:$0xff] }
 0x479   : > { %v15708_v19 = vpop.f32.mrf.mxu0 }
 0x47a   : > { %19422 = vst [vmem:[#allocation50_spill] sm:$0xff] %v15708_v19 }
 0x47b   : > { %3168 = vmatmul.mubr.f32.gmra.mxu0 %v10494_v37 }
 0x47c   : > { %3172 = vmatprep.mubr.f32.mxu0 %v10497_v8 }
 0x47f   : > { %v12537_v6 = vpop.f32.mrf.mxu0  ;;  %3173 = vmatmul.mubr.f32.gmra.mxu0 %v10496_v50 }
 0x480   : > { %v15714_v16 = vadd.f32 %v12537_v6, %v15322_v40  ;;  %3177 = vmatprep.mubr.f32.mxu0 %v10499_v4  ;;  %v10503_v40 = vld [vmem:[%s19357_s1 + $0x9e8] sm:$0xff]  ;;  %v15797_v6 = vld [vmem:[%s13818_s18 + $0x70] sm:$0xff] }
 0x481   : > { %v15725_v33 = vpop.f32.mrf.mxu0 }
 0x482   : > { %19423 = vst [vmem:[#allocation51_spill] sm:$0xff] %v15725_v33 }
 0x483   : > { %3178 = vmatmul.mubr.f32.gmra.mxu0 %v10498_v52 }
 0x484   : > { %3182 = vmatprep.mubr.f32.mxu0 %v10501_v13  ;;  %v15803_v13 = vld [vmem:[%s13818_s18 + $0x68] sm:$0xff] }
 0x487   : > { %v12540_v44 = vpop.f32.mrf.mxu0  ;;  %3183 = vmatmul.mubr.f32.gmra.mxu0 %v10500_v11 }
 0x488   : > { %v15731_v31 = vadd.f32 %v12540_v44, %v15339_v43  ;;  %3187 = vmatprep.mubr.f32.mxu0 %v10503_v40  ;;  %v15808_v40 = vld [vmem:[%s13818_s18 + $0x60] sm:$0xff] }
 0x489   : > { %v15742_v23 = vpop.f32.mrf.mxu0 }
 0x48a   : > { %19424 = vst [vmem:[#allocation52_spill] sm:$0xff] %v15742_v23 }
 0x48b   : > { %3188 = vmatmul.mubr.f32.gmra.mxu0 %v10502_v29  ;;  %v15814_v29 = vld [vmem:[%s13818_s18 + $0x58] sm:$0xff] }
 0x48c   : > { %3192 = vmatprep.mubr.f32.mxu0 %v10505_v28 }
 0x48f   : > { %v12543_v3 = vpop.f32.mrf.mxu0  ;;  %3193 = vmatmul.mubr.f32.gmra.mxu0 %v10504_v26  ;;  %v15819_v26 = vld [vmem:[%s13818_s18 + $0x50] sm:$0xff] }
 0x490   : > { %v15745_v43 = vadd.f32 %v12543_v3, %v15353_v51 }
 0x491   : > { %v15747_v63 = vpop.f32.mrf.mxu0 }
 0x492   : > { %19425 = vst [vmem:[#allocation53_spill] sm:$0xff] %v15747_v63 }
 0x497   : > { %v12546_v49 = vpop.f32.mrf.mxu0 }
 0x498   : > { %v15750_v58 = vadd.f32 %v12546_v49, %v15358_v25  ;;  %v15825_v49 = vld [vmem:[%s13818_s18 + $0x48] sm:$0xff] }
 0x499   : > { %v15752_v32 = vpop.f32.mrf.mxu0 }
 0x49a   : > { %19426 = vst [vmem:[#allocation54_spill] sm:$0xff] %v15752_v32  ;;  %v15962_v32 = vld [vmem:[%s13818_s18 + $0x80] sm:$0xff] }
 0x49f   : > { %v12549_v17 = vpop.f32.mrf.mxu0 }
 0x4a0   : > { %v15755_v2 = vadd.f32 %v12549_v17, %v15363_v5 }
 0x4a1   : > { %v15757_v7 = vpop.f32.mrf.mxu0 }
 0x4a2   : > { %19427 = vst [vmem:[#allocation55_spill] sm:$0xff] %v15757_v7  ;;  %v15957_v7 = vld [vmem:[%s13818_s18 + $0x88] sm:$0xff] }
 0x4a7   : > { %v12552_v55 = vpop.f32.mrf.mxu0 }
 0x4a8   : > { %v15760_v12 = vadd.f32 %v12552_v55, %v15368_v10  ;;  %v15830_v55 = vld [vmem:[%s13818_s18 + $0x40] sm:$0xff] }
 0x4a9   : > { %v15762_v51 = vpop.f32.mrf.mxu0 }
 0x4aa   : > { %19428 = vst [vmem:[#allocation56_spill] sm:$0xff] %v15762_v51  ;;  %v15951_v51 = vld [vmem:[%s13818_s18 + $0x90] sm:$0xff] }
 0x4af   : > { %v12555_v54 = vpop.f32.mrf.mxu0 }
 0x4b0   : > { %v15765_v15 = vadd.f32 %v12555_v54, %v15373_v47 }
 0x4b1   : > { %v15767_v25 = vpop.f32.mrf.mxu0 }
 0x4b2   : > { %19429 = vst [vmem:[#allocation57_spill] sm:$0xff] %v15767_v25  ;;  %v15946_v25 = vld [vmem:[%s13818_s18 + $0x98] sm:$0xff] }
 0x4b7   : > { %v12558_v57 = vpop.f32.mrf.mxu0 }
 0x4b8   : > { %v15770_v36 = vadd.f32 %v12558_v57, %v15378_v53  ;;  %v15836_v57 = vld [vmem:[%s13818_s18 + $0x38] sm:$0xff] }
 0x4b9   : > { %v15772_v5 = vpop.f32.mrf.mxu0 }
 0x4ba   : > { %19430 = vst [vmem:[#allocation58_spill] sm:$0xff] %v15772_v5  ;;  %v15940_v5 = vld [vmem:[%s13818_s18 + $0xa0] sm:$0xff] }
 0x4bf   : > { %v12561_v42 = vpop.f32.mrf.mxu0 }
 0x4c0   : > { %v15775_v9 = vadd.f32 %v12561_v42, %v15383_v22 }
 0x4c1   : > { %v15777_v10 = vpop.f32.mrf.mxu0 }
 0x4c2   : > { %19431 = vst [vmem:[#allocation59_spill] sm:$0xff] %v15777_v10  ;;  %v15929_v10 = vld [vmem:[%s13818_s18 + $0xb0] sm:$0xff] }
 0x4c7   : > { %v12564_v48 = vpop.f32.mrf.mxu0 }
 0x4c8   : > { %v15780_v47 = vadd.f32 %v12564_v48, %v15388_v56  ;;  %v15792_v56 = vld [vmem:[%s13818_s18 + $0x78] sm:$0xff]  ;;  %v15841_v48 = vld [vmem:[%s13818_s18 + $0x30] sm:$0xff] }
 0x4c9   : > { %v15782_v20 = vpop.f32.mrf.mxu0 }
 0x4ca   : > { %19432 = vst [vmem:[#allocation60_spill] sm:$0xff] %v15782_v20  ;;  %v15918_v20 = vld [vmem:[%s13818_s18 + $0xc0] sm:$0xff] }
 0x4cf   : > { %v12567_v59 = vpop.f32.mrf.mxu0 }
 0x4d0   : > { %v15785_v53 = vadd.f32 %v12567_v59, %v15393_v61 }
 0x4d1   : > { %v15787_v37 = vpop.f32.mrf.mxu0 }
 0x4d2   : > { %19433 = vst [vmem:[#allocation61_spill] sm:$0xff] %v15787_v37  ;;  %v15907_v37 = vld [vmem:[%s13818_s18 + $0xd0] sm:$0xff] }
 0x4d3   : > { %v3039_v8 = vpop.f32.mrf.mxu0 }
 0x4d4   : > { %12584 = vmatprep.mubr.msk.f32.mxu1 %vm961_vm0, %v3039_v8  ;;  %v15847_v8 = vld [vmem:[%s13818_s18 + $0x28] sm:$0xff] }
 0x4d5   : > { %v3041_v22 = vpop.f32.mrf.mxu0 }
 0x4d7   : > { %v3044_v50 = vpop.f32.mrf.mxu0 }
 0x4d8   : > { %12585 = vmatmul.mubr.msk.f32.vlgmr.msra.gmra.mxu1 %vm961_vm0, %v3044_v50  ;;  %v15852_v50 = vld [vmem:[%s13818_s18 + $0x20] sm:$0xff] }
 0x4d9   : > { %v3046_v4 = vpop.f32.mrf.mxu0  ;;  %3626 = vmatpush1.msra.mxu1 %v15792_v56 }
 0x4da   : > { %3627 = vmatprep.subr.mxu1 %v19403_v34 }
 0x4db   : > { %v3049_v61 = vpop.f32.mrf.mxu0  ;;  %3628 = vmatpush1.msra.mxu1 %v15797_v6 }
 0x4dc   : > { %12587 = vmatprep.mubr.msk.f32.mxu1 %vm961_vm0, %v3049_v61  ;;  %3629 = vmatprep.subr.mxu1 %v19403_v34  ;;  %v15858_v61 = vld [vmem:[%s13818_s18 + $0x18] sm:$0xff] }
 0x4dd   : > { %v3051_v52 = vpop.f32.mrf.mxu0  ;;  %3630 = vmatpush1.msra.mxu1 %v15803_v13 }
 0x4de   : > { %3631 = vmatprep.subr.mxu1 %v19403_v34 }
 0x4df   : > { %v3054_v11 = vpop.f32.mrf.mxu0  ;;  %3632 = vmatpush1.msra.mxu1 %v15808_v40 }
 0x4e0   : > { %12588 = vmatmul.mubr.msk.f32.gmra.mxu1 %vm961_vm0, %v3054_v11  ;;  %3633 = vmatprep.subr.mxu1 %v19403_v34  ;;  %v15863_v11 = vld [vmem:[%s13818_s18 + $0x10] sm:$0xff] }
 0x4e1   : > { %v3056_v44 = vpop.f32.mrf.mxu0  ;;  %3634 = vmatpush1.msra.mxu1 %v15814_v29 }
 0x4e2   : > { %3635 = vmatprep.subr.mxu1 %v19403_v34 }
 0x4e3   : > { %v3059_v28 = vpop.f32.mrf.mxu0  ;;  %3636 = vmatpush1.msra.mxu1 %v15819_v26 }
 0x4e4   : > { %12590 = vmatprep.mubr.msk.f32.mxu1 %vm961_vm0, %v3059_v28  ;;  %3637 = vmatprep.subr.mxu1 %v19403_v34  ;;  %v15869_v28 = vld [vmem:[%s13818_s18 + $0x8] sm:$0xff] }
 0x4e5   : > { %v3061_v3 = vpop.f32.mrf.mxu0  ;;  %3638 = vmatpush1.msra.mxu1 %v15825_v49 }
 0x4e6   : > { %3639 = vmatprep.subr.mxu1 %v19403_v34 }
 0x4e7   : > { %v3064_v17 = vpop.f32.mrf.mxu0  ;;  %3640 = vmatpush1.msra.mxu1 %v15830_v55 }
 0x4e8   : > { %12591 = vmatmul.mubr.msk.f32.gmra.mxu1 %vm961_vm0, %v3064_v17  ;;  %3641 = vmatprep.subr.mxu1 %v19403_v34  ;;  %v15874_v17 = vld [vmem:[%s13818_s18] sm:$0xff] }
 0x4e9   : > { %v3066_v54 = vpop.f32.mrf.mxu0  ;;  %3642 = vmatpush1.msra.mxu1 %v15836_v57 }
 0x4ea   : > { %3643 = vmatprep.subr.mxu1 %v19403_v34 }
 0x4eb   : > { %v3069_v42 = vpop.f32.mrf.mxu0  ;;  %3644 = vmatpush1.msra.mxu1 %v15841_v48 }
 0x4ec   : > { %12593 = vmatprep.mubr.msk.f32.mxu1 %vm961_vm0, %v3069_v42  ;;  %3645 = vmatprep.subr.mxu1 %v19403_v34  ;;  %v15880_v42 = vld [vmem:[%s13818_s18 + $0xf8] sm:$0xff] }
 0x4ed   : > { %v3071_v59 = vpop.f32.mrf.mxu0  ;;  %3646 = vmatpush1.msra.mxu1 %v15847_v8 }
 0x4ee   : > { %3647 = vmatprep.subr.mxu1 %v19403_v34 }
 0x4ef   : > { %v3074_v22 = vpop.f32.mrf.mxu0  ;;  %3648 = vmatpush1.msra.mxu1 %v15852_v50 }
 0x4f0   : > { %12594 = vmatmul.mubr.msk.f32.gmra.mxu1 %vm961_vm0, %v3074_v22  ;;  %3649 = vmatprep.subr.mxu1 %v19403_v34  ;;  %v15885_v22 = vld [vmem:[%s13818_s18 + $0xf0] sm:$0xff] }
 0x4f1   : > { %v3076_v4 = vpop.f32.mrf.mxu0  ;;  %3650 = vmatpush1.msra.mxu1 %v15858_v61 }
 0x4f2   : > { %3651 = vmatprep.subr.mxu1 %v19403_v34 }
 0x4f3   : > { %v3079_v52 = vpop.f32.mrf.mxu0  ;;  %3652 = vmatpush1.msra.mxu1 %v15863_v11 }
 0x4f4   : > { %12596 = vmatprep.mubr.msk.f32.mxu1 %vm961_vm0, %v3079_v52  ;;  %3653 = vmatprep.subr.mxu1 %v19403_v34  ;;  %v15891_v52 = vld [vmem:[%s13818_s18 + $0xe8] sm:$0xff] }
 0x4f5   : > { %v3081_v44 = vpop.f32.mrf.mxu0  ;;  %3654 = vmatpush1.msra.mxu1 %v15869_v28 }
 0x4f6   : > { %3655 = vmatprep.subr.mxu1 %v19403_v34 }
 0x4f7   : > { %v3084_v3 = vpop.f32.mrf.mxu0  ;;  %3656 = vmatpush1.msra.mxu1 %v15874_v17 }
 0x4f8   : > { %12597 = vmatmul.mubr.msk.f32.gmra.mxu1 %vm961_vm0, %v3084_v3  ;;  %3657 = vmatprep.subr.mxu1 %v19403_v34  ;;  %v15896_v3 = vld [vmem:[%s13818_s18 + $0xe0] sm:$0xff] }
 0x4f9   : > { %v3086_v54 = vpop.f32.mrf.mxu0  ;;  %3658 = vmatpush2.msra.mxu1 %v15880_v42 }
 0x4fa   : > { %3659 = vmatprep.subr.mxu1 %v19403_v34 }
 0x4fb   : > { %v3089_v59 = vpop.f32.mrf.mxu0  ;;  %3660 = vmatpush2.msra.mxu1 %v15885_v22 }
 0x4fc   : > { %12599 = vmatprep.mubr.msk.f32.mxu1 %vm961_vm0, %v3089_v59  ;;  %3661 = vmatprep.subr.mxu1 %v19403_v34  ;;  %v15902_v59 = vld [vmem:[%s13818_s18 + $0xd8] sm:$0xff] }
 0x4fd   : > { %v3091_v4 = vpop.f32.mrf.mxu0  ;;  %3662 = vmatpush2.msra.mxu1 %v15891_v52 }
 0x4fe   : > { %3663 = vmatprep.subr.mxu1 %v19403_v34 }
 0x4ff   : > { %v3094_v44 = vpop.f32.mrf.mxu0  ;;  %3664 = vmatpush2.msra.mxu1 %v15896_v3 }
 0x500   : > { %12600 = vmatmul.mubr.msk.f32.gmra.mxu1 %vm961_vm0, %v3094_v44  ;;  %3665 = vmatprep.subr.mxu1 %v19403_v34 }
 0x501   : > { %v3096_v54 = vpop.f32.mrf.mxu0  ;;  %3666 = vmatpush2.msra.mxu1 %v15902_v59 }
 0x502   : > { %3667 = vmatprep.subr.mxu1 %v19403_v34 }
 0x503   : > { %v3099_v4 = vpop.f32.mrf.mxu0  ;;  %3668 = vmatpush2.msra.mxu1 %v15907_v37 }
 0x504   : > { %12602 = vmatprep.mubr.msk.f32.mxu1 %vm961_vm0, %v3099_v4  ;;  %3669 = vmatprep.subr.mxu1 %v19403_v34 }
 0x505   : > { %v3101_v44 = vpop.f32.mrf.mxu0  ;;  %3670 = vmatpush2.msra.mxu1 %v15913_v30 }
 0x506   : > { %3671 = vmatprep.subr.mxu1 %v19403_v34 }
 0x507   : > { %v3104_v54 = vpop.f32.mrf.mxu0  ;;  %3672 = vmatpush2.msra.mxu1 %v15918_v20 }
 0x508   : > { %12603 = vmatmul.mubr.msk.f32.gmra.mxu1 %vm961_vm0, %v3104_v54  ;;  %3673 = vmatprep.subr.mxu1 %v19403_v34 }
 0x509   : > { %v3106_v4 = vpop.f32.mrf.mxu0  ;;  %3674 = vmatpush2.msra.mxu1 %v15924_v27 }
 0x50a   : > { %3675 = vmatprep.subr.mxu1 %v19403_v34 }
 0x50b   : > { %v3109_v44 = vpop.f32.mrf.mxu0  ;;  %3676 = vmatpush2.msra.mxu1 %v15929_v10 }
 0x50c   : > { %12605 = vmatprep.mubr.msk.f32.mxu1 %vm961_vm0, %v3109_v44  ;;  %3677 = vmatprep.subr.mxu1 %v19403_v34 }
 0x50d   : > { %v3111_v54 = vpop.f32.mrf.mxu0  ;;  %3678 = vmatpush2.msra.mxu1 %v15935_v24 }
 0x50e   : > { %3679 = vmatprep.subr.mxu1 %v19403_v34 }
 0x50f   : > { %v3114_v4 = vpop.f32.mrf.mxu0  ;;  %3680 = vmatpush2.msra.mxu1 %v15940_v5 }
 0x510   : > { %12606 = vmatmul.mubr.msk.f32.gmra.mxu1 %vm961_vm0, %v3114_v4  ;;  %3681 = vmatprep.subr.mxu1 %v19403_v34 }
 0x511   : > { %v3116_v44 = vpop.f32.mrf.mxu0  ;;  %3682 = vmatpush2.msra.mxu1 %v15946_v25 }
 0x512   : > { %3683 = vmatprep.subr.mxu1 %v19403_v34 }
 0x513   : > { %v3119_v54 = vpop.f32.mrf.mxu0  ;;  %3684 = vmatpush2.msra.mxu1 %v15951_v51 }
 0x514   : > { %12608 = vmatprep.mubr.msk.f32.mxu1 %vm961_vm0, %v3119_v54  ;;  %3685 = vmatprep.subr.mxu1 %v19403_v34 }
 0x515   : > { %v3121_v4 = vpop.f32.mrf.mxu0  ;;  %3686 = vmatpush2.msra.mxu1 %v15957_v7 }
 0x516   : > { %3687 = vmatprep.subr.mxu1 %v19403_v34 }
 0x517   : > { %v3124_v44 = vpop.f32.mrf.mxu0  ;;  %3688 = vmatpush2.msra.mxu1 %v15962_v32 }
 0x518   : > { %12609 = vmatmul.mubr.msk.f32.gmra.mxu1 %vm961_vm0, %v3124_v44 }
 0x519   : > { %v3126_v63 = vpop.f32.mrf.mxu0 }
 0x51b   : > { %v3129_v23 = vpop.f32.mrf.mxu0 }
 0x51c   : > { %12611 = vmatprep.mubr.msk.f32.mxu1 %vm961_vm0, %v3129_v23 }
 0x51d   : > { %v3131_v54 = vpop.f32.mrf.mxu0 }
 0x51f   : > { %v3134_v33 = vpop.f32.mrf.mxu0 }
 0x520   : > { %12612 = vmatmul.mubr.msk.f32.gmra.mxu1 %vm961_vm0, %v3134_v33 }
 0x521   : > { %v3136_v4 = vpop.f32.mrf.mxu0 }
 0x523   : > { %v3139_v19 = vpop.f32.mrf.mxu0 }
 0x524   : > { %12614 = vmatprep.mubr.msk.f32.mxu1 %vm961_vm0, %v3139_v19 }
 0x525   : > { %v3141_v14 = vpop.f32.mrf.mxu0 }
 0x527   : > { %v3144_v35 = vpop.f32.mrf.mxu0 }
 0x528   : > { %12615 = vmatmul.mubr.msk.f32.gmra.mxu1 %vm961_vm0, %v3144_v35 }
 0x529   : > { %v3146_v46 = vpop.f32.mrf.mxu0 }
 0x52b   : > { %v3149_v21 = vpop.f32.mrf.mxu0 }
 0x52c   : > { %12617 = vmatprep.mubr.msk.f32.mxu1 %vm961_vm0, %v3149_v21 }
 0x52d   : > { %v3151_v63 = vpop.f32.mrf.mxu0 }
 0x52f   : > { %v3154_v44 = vpop.f32.mrf.mxu0 }
 0x530   : > { %12618 = vmatmul.mubr.msk.f32.gmra.mxu1 %vm961_vm0, %v3154_v44 }
 0x531   : > { %v3156_v23 = vpop.f32.mrf.mxu0 }
 0x533   : > { %v3159_v54 = vpop.f32.mrf.mxu0 }
 0x534   : > { %12620 = vmatprep.mubr.msk.f32.mxu1 %vm961_vm0, %v3159_v54 }
 0x535   : > { %v3161_v33 = vpop.f32.mrf.mxu0 }
 0x537   : > { %v3164_v4 = vpop.f32.mrf.mxu0 }
 0x538   : > { %12621 = vmatmul.mubr.msk.f32.gmra.mxu1 %vm961_vm0, %v3164_v4 }
 0x539   : > { %v3166_v14 = vpop.f32.mrf.mxu0 }
 0x53a   : > { %v10547_v14 = vld [vmem:[%s19357_s1 + $0xa08] sm:$0xff] }
 0x53b   : > { %v3169_v19 = vpop.f32.mrf.mxu0 }
 0x53c   : > { %12623 = vmatprep.mubr.msk.f32.mxu1 %vm961_vm0, %v3169_v19 }
 0x53d   : > { %v3171_v46 = vpop.f32.mrf.mxu0 }
 0x53f   : > { %v3174_v35 = vpop.f32.mrf.mxu0 }
 0x540   : > { %12624 = vmatmul.mubr.msk.f32.gmra.mxu1 %vm961_vm0, %v3174_v35  ;;  %v10546_v35 = vld [vmem:[%s19357_s1 + $0xa00] sm:$0xff] }
 0x541   : > { %v3176_v21 = vpop.f32.mrf.mxu0 }
 0x542   : > { %v10549_v21 = vld [vmem:[%s19357_s1 + $0xa18] sm:$0xff] }
 0x543   : > { %v3179_v63 = vpop.f32.mrf.mxu0 }
 0x544   : > { %12626 = vmatprep.mubr.msk.f32.mxu1 %vm961_vm0, %v3179_v63  ;;  %v10548_v63 = vld [vmem:[%s19357_s1 + $0xa10] sm:$0xff] }
 0x545   : > { %v3181_v44 = vpop.f32.mrf.mxu0 }
 0x546   : > { %v10551_v44 = vld [vmem:[%s19357_s1 + $0xa28] sm:$0xff] }
 0x547   : > { %v3184_v23 = vpop.f32.mrf.mxu0 }
 0x548   : > { %12627 = vmatmul.mubr.msk.f32.gmra.mxu1 %vm961_vm0, %v3184_v23  ;;  %v10550_v23 = vld [vmem:[%s19357_s1 + $0xa20] sm:$0xff] }
 0x549   : > { %v3186_v54 = vpop.f32.mrf.mxu0 }
 0x54a   : > { %v10553_v54 = vld [vmem:[%s19357_s1 + $0xa38] sm:$0xff] }
 0x54b   : > { %v3189_v33 = vpop.f32.mrf.mxu0 }
 0x54c   : > { %12629 = vmatprep.mubr.msk.f32.mxu1 %vm961_vm0, %v3189_v33  ;;  %v10552_v33 = vld [vmem:[%s19357_s1 + $0xa30] sm:$0xff] }
 0x54d   : > { %v3191_v4 = vpop.f32.mrf.mxu0 }
 0x54e   : > { %v10555_v4 = vld [vmem:[%s19357_s1 + $0xa48] sm:$0xff] }
 0x54f   : > { %v3194_v19 = vpop.f32.mrf.mxu0 }
 0x550   : > { %12630 = vmatmul.mubr.msk.f32.gmra.mxu1 %vm961_vm0, %v3194_v19  ;;  %v10557_v19 = vld [vmem:[%s19357_s1 + $0xa58] sm:$0xff] }
 0x551   : > { %v3196_v46 = vpop.f32.mrf.mxu0  ;;  %3689 = vmatprep.mubr.f32.mxu1 %v10547_v14  ;;  %v10554_v14 = vld [vmem:[%s19357_s1 + $0xa40] sm:$0xff] }
 0x552   : > { %v10556_v46 = vld [vmem:[%s19357_s1 + $0xa50] sm:$0xff] }
 0x554   : > { %3690 = vmatmul.mubr.f32.vlgmr.msra.gmra.mxu1 %v10546_v35  ;;  %v10559_v35 = vld [vmem:[%s19357_s1 + $0xa68] sm:$0xff] }
 0x555   : > { %3694 = vmatprep.mubr.f32.mxu1 %v10549_v21  ;;  %v10558_v21 = vld [vmem:[%s19357_s1 + $0xa60] sm:$0xff] }
 0x558   : > { %3695 = vmatmul.mubr.f32.gmra.mxu1 %v10548_v63  ;;  %v10561_v63 = vld [vmem:[%s19357_s1 + $0xa78] sm:$0xff] }
 0x559   : > { %3699 = vmatprep.mubr.f32.mxu1 %v10551_v44  ;;  %v10560_v44 = vld [vmem:[%s19357_s1 + $0xa70] sm:$0xff] }
 0x55c   : > { %3700 = vmatmul.mubr.f32.gmra.mxu1 %v10550_v23  ;;  %v10563_v23 = vld [vmem:[%s19357_s1 + $0xa88] sm:$0xff] }
 0x55d   : > { %3704 = vmatprep.mubr.f32.mxu1 %v10553_v54  ;;  %v10562_v54 = vld [vmem:[%s19357_s1 + $0xa80] sm:$0xff] }
 0x560   : > { %3705 = vmatmul.mubr.f32.gmra.mxu1 %v10552_v33  ;;  %v10565_v33 = vld [vmem:[%s19357_s1 + $0xa98] sm:$0xff] }
 0x561   : > { %3709 = vmatprep.mubr.f32.mxu1 %v10555_v4  ;;  %v10617_v4 = vld [vmem:[%s19358_s2 + $0x178] sm:$0xff] }
 0x562   : > { %12632 = vmatprep.subr.mxu0 %v10617_v4 }
 0x563   : > { %12633 = vmatpush3.msra.mxu0 %v10617_v4  ;;  %v10575_v4 = vld [vmem:[%s19357_s1 + $0xae8] sm:$0xff] }
 0x564   : > { %3710 = vmatmul.mubr.f32.gmra.mxu1 %v10554_v14  ;;  %v10564_v14 = vld [vmem:[%s19357_s1 + $0xa90] sm:$0xff] }
 0x565   : > { %3714 = vmatprep.mubr.f32.mxu1 %v10557_v19  ;;  %v10567_v19 = vld [vmem:[%s19357_s1 + $0xaa8] sm:$0xff] }
 0x568   : > { %3715 = vmatmul.mubr.f32.gmra.mxu1 %v10556_v46  ;;  %v10566_v46 = vld [vmem:[%s19357_s1 + $0xaa0] sm:$0xff] }
 0x569   : > { %3719 = vmatprep.mubr.f32.mxu1 %v10559_v35  ;;  %v10569_v35 = vld [vmem:[%s19357_s1 + $0xab8] sm:$0xff] }
 0x56c   : > { %3720 = vmatmul.mubr.f32.gmra.mxu1 %v10558_v21  ;;  %v10568_v21 = vld [vmem:[%s19357_s1 + $0xab0] sm:$0xff] }
 0x56d   : > { %3724 = vmatprep.mubr.f32.mxu1 %v10561_v63  ;;  %v10571_v63 = vld [vmem:[%s19357_s1 + $0xac8] sm:$0xff] }
 0x570   : > { %3725 = vmatmul.mubr.f32.gmra.mxu1 %v10560_v44  ;;  %v10570_v44 = vld [vmem:[%s19357_s1 + $0xac0] sm:$0xff] }
 0x571   : > { %3729 = vmatprep.mubr.f32.mxu1 %v10563_v23  ;;  %v10573_v23 = vld [vmem:[%s19357_s1 + $0xad8] sm:$0xff] }
 0x574   : > { %3730 = vmatmul.mubr.f32.gmra.mxu1 %v10562_v54  ;;  %v10616_v54 = vld [vmem:[%s19358_s2 + $0x170] sm:$0xff] }
 0x575   : > { %3734 = vmatprep.mubr.f32.mxu1 %v10565_v33  ;;  %12634 = vmatprep.subr.mxu0 %v10616_v54  ;;  %v10572_v33 = vld [vmem:[%s19357_s1 + $0xad0] sm:$0xff] }
 0x576   : > { %12635 = vmatpush3.msra.mxu0 %v10616_v54  ;;  %v10581_v54 = vld [vmem:[%s19357_s1 + $0xb18] sm:$0xff] }
 0x578   : > { %3735 = vmatmul.mubr.f32.gmra.mxu1 %v10564_v14  ;;  %v10574_v14 = vld [vmem:[%s19357_s1 + $0xae0] sm:$0xff] }
 0x579   : > { %3739 = vmatprep.mubr.f32.mxu1 %v10567_v19  ;;  %v10577_v19 = vld [vmem:[%s19357_s1 + $0xaf8] sm:$0xff] }
 0x57c   : > { %3740 = vmatmul.mubr.f32.gmra.mxu1 %v10566_v46  ;;  %v10615_v46 = vld [vmem:[%s19358_s2 + $0x168] sm:$0xff] }
 0x57d   : > { %3744 = vmatprep.mubr.f32.mxu1 %v10569_v35  ;;  %v10614_v35 = vld [vmem:[%s19358_s2 + $0x160] sm:$0xff]  ;;  %12636 = vmatprep.subr.mxu0 %v10615_v46 }
 0x57e   : > { %12637 = vmatpush3.msra.mxu0 %v10615_v46  ;;  %v10610_v46 = vld [vmem:[%s19358_s2 + $0x140] sm:$0xff] }
 0x57f   : > { %12638 = vmatprep.subr.mxu0 %v10614_v35 }
 0x580   : > { %3745 = vmatmul.mubr.f32.gmra.mxu1 %v10568_v21  ;;  %v10576_v21 = vld [vmem:[%s19357_s1 + $0xaf0] sm:$0xff]  ;;  %12639 = vmatpush3.msra.mxu0 %v10614_v35 }
 0x581   : > { %3749 = vmatprep.mubr.f32.mxu1 %v10571_v63  ;;  %v10579_v63 = vld [vmem:[%s19357_s1 + $0xb08] sm:$0xff] }
 0x584   : > { %3750 = vmatmul.mubr.f32.gmra.mxu1 %v10570_v44  ;;  %v10613_v44 = vld [vmem:[%s19358_s2 + $0x158] sm:$0xff] }
 0x585   : > { %3754 = vmatprep.mubr.f32.mxu1 %v10573_v23  ;;  %v10578_v23 = vld [vmem:[%s19357_s1 + $0xb00] sm:$0xff]  ;;  %12640 = vmatprep.subr.mxu0 %v10613_v44 }
 0x586   : > { %12641 = vmatpush3.msra.mxu0 %v10613_v44  ;;  %v10585_v44 = vld [vmem:[%s19357_s1 + $0xb38] sm:$0xff] }
 0x588   : > { %3755 = vmatmul.mubr.f32.gmra.mxu1 %v10572_v33  ;;  %v10612_v33 = vld [vmem:[%s19358_s2 + $0x150] sm:$0xff] }
 0x589   : > { %3759 = vmatprep.mubr.f32.mxu1 %v10575_v4  ;;  %12642 = vmatprep.subr.mxu0 %v10612_v33  ;;  %v10611_v4 = vld [vmem:[%s19358_s2 + $0x148] sm:$0xff] }
 0x58a   : > { %12643 = vmatpush3.msra.mxu0 %v10612_v33 }
 0x58b   : > { %12644 = vmatprep.subr.mxu0 %v10611_v4 }
 0x58c   : > { %3760 = vmatmul.mubr.f32.gmra.mxu1 %v10574_v14  ;;  %v10580_v14 = vld [vmem:[%s19357_s1 + $0xb10] sm:$0xff]  ;;  %12645 = vmatpush3.msra.mxu0 %v10611_v4 }
 0x58d   : > { %3764 = vmatprep.mubr.f32.mxu1 %v10577_v19  ;;  %v10583_v19 = vld [vmem:[%s19357_s1 + $0xb28] sm:$0xff]  ;;  %12646 = vmatprep.subr.mxu0 %v10610_v46 }
 0x58e   : > { %12647 = vmatpush3.msra.mxu0 %v10610_v46  ;;  %v10588_v46 = vld [vmem:[%s19357_s1 + $0xb50] sm:$0xff] }
 0x58f   : > { %4277 = vmatprep.subr.mxu0 %v19403_v34 }
 0x590   : > { %3765 = vmatmul.mubr.f32.gmra.mxu1 %v10576_v21 }
 0x591   : > { %3769 = vmatprep.mubr.f32.mxu1 %v10579_v63  ;;  %v10582_v63 = vld [vmem:[%s19357_s1 + $0xb20] sm:$0xff] }
 0x594   : > { %3770 = vmatmul.mubr.f32.gmra.mxu1 %v10578_v23  ;;  %v10584_v23 = vld [vmem:[%s19357_s1 + $0xb30] sm:$0xff] }
 0x595   : > { %3774 = vmatprep.mubr.f32.mxu1 %v10581_v54 }
 0x598   : > { %v12586_v35 = vpop.f32.mrf.mxu1  ;;  %3775 = vmatmul.mubr.f32.gmra.mxu1 %v10580_v14  ;;  %v10586_v14 = vld [vmem:[%s19357_s1 + $0xb40] sm:$0xff] }
 0x599   : > { %v16116_v21 = vadd.f32 %v12586_v35, %v15628_v38  ;;  %3779 = vmatprep.mubr.f32.mxu1 %v10583_v19  ;;  %v10587_v38 = vld [vmem:[%s19357_s1 + $0xb48] sm:$0xff]  ;;  %v10589_v19 = vld [vmem:[%s19357_s1 + $0xb58] sm:$0xff] }
 0x59a   : > { %v16128_v54 = vpop.f32.mrf.mxu1 }
 0x59b   : > { %19434 = vst [vmem:[#allocation62_spill] sm:$0xff] %v16128_v54 }
 0x59c   : > { %3780 = vmatmul.mubr.f32.gmra.mxu1 %v10582_v63 }
 0x59d   : > { %3784 = vmatprep.mubr.f32.mxu1 %v10585_v44 }
 0x5a0   : > { %v12589_v33 = vpop.f32.mrf.mxu1  ;;  %3785 = vmatmul.mubr.f32.gmra.mxu1 %v10584_v23  ;;  %v10590_v23 = vld [vmem:[%s19357_s1 + $0xb60] sm:$0xff] }
 0x5a1   : > { %v16134_v4 = vadd.f32 %v12589_v33, %v15646_v45  ;;  %3789 = vmatprep.mubr.f32.mxu1 %v10587_v38  ;;  %v10591_v45 = vld [vmem:[%s19357_s1 + $0xb68] sm:$0xff]  ;;  %v10593_v38 = vld [vmem:[%s19357_s1 + $0xb78] sm:$0xff]  ;;  %v10592_v33 = vld [vmem:[%s19357_s1 + $0xb70] sm:$0xff] }
 0x5a2   : > { %v16145_v35 = vpop.f32.mrf.mxu1 }
 0x5a3   : > { %19435 = vst [vmem:[#allocation63_spill] sm:$0xff] %v16145_v35 }
 0x5a4   : > { %3790 = vmatmul.mubr.f32.gmra.mxu1 %v10586_v14 }
 0x5a5   : > { %3794 = vmatprep.mubr.f32.mxu1 %v10589_v19 }
 0x5a8   : > { %v12592_v63 = vpop.f32.mrf.mxu1  ;;  %3795 = vmatmul.mubr.f32.gmra.mxu1 %v10588_v46 }
 0x5a9   : > { %v16151_v44 = vadd.f32 %v12592_v63, %v15663_v41  ;;  %3799 = vmatprep.mubr.f32.mxu1 %v10591_v45  ;;  %v10595_v41 = vld [vmem:[%s19357_s1 + $0xb88] sm:$0xff]  ;;  %v10594_v45 = vld [vmem:[%s19357_s1 + $0xb80] sm:$0xff]  ;;  %v10597_v63 = vld [vmem:[%s19357_s1 + $0xb98] sm:$0xff] }
 0x5aa   : > { %v16162_v14 = vpop.f32.mrf.mxu1 }
 0x5ab   : > { %19436 = vst [vmem:[#allocation64_spill] sm:$0xff] %v16162_v14 }
 0x5ac   : > { %3800 = vmatmul.mubr.f32.gmra.mxu1 %v10590_v23  ;;  %v10596_v23 = vld [vmem:[%s19357_s1 + $0xb90] sm:$0xff] }
 0x5ad   : > { %3804 = vmatprep.mubr.f32.mxu1 %v10593_v38 }
 0x5b0   : > { %v12595_v19 = vpop.f32.mrf.mxu1  ;;  %3805 = vmatmul.mubr.f32.gmra.mxu1 %v10592_v33 }
 0x5b1   : > { %v16168_v46 = vadd.f32 %v12595_v19, %v15680_v39  ;;  %3809 = vmatprep.mubr.f32.mxu1 %v10595_v41  ;;  %v10599_v39 = vld [vmem:[%s19357_s1 + $0xba8] sm:$0xff]  ;;  %v10598_v19 = vld [vmem:[%s19357_s1 + $0xba0] sm:$0xff] }
 0x5b2   : > { %v16179_v38 = vpop.f32.mrf.mxu1 }
 0x5b3   : > { %19437 = vst [vmem:[#allocation65_spill] sm:$0xff] %v16179_v38 }
 0x5b4   : > { %3810 = vmatmul.mubr.f32.gmra.mxu1 %v10594_v45  ;;  %v10601_v45 = vld [vmem:[%s19357_s1 + $0xbb8] sm:$0xff] }
 0x5b5   : > { %3814 = vmatprep.mubr.f32.mxu1 %v10597_v63  ;;  %v10600_v63 = vld [vmem:[%s19357_s1 + $0xbb0] sm:$0xff] }
 0x5b8   : > { %v12598_v33 = vpop.f32.mrf.mxu1  ;;  %3815 = vmatmul.mubr.f32.gmra.mxu1 %v10596_v23 }
 0x5b9   : > { %v16185_v41 = vadd.f32 %v12598_v33, %v15697_v0  ;;  %3819 = vmatprep.mubr.f32.mxu1 %v10599_v39  ;;  %v10603_v0 = vld [vmem:[%s19357_s1 + $0xbc8] sm:$0xff]  ;;  %v10602_v33 = vld [vmem:[%s19357_s1 + $0xbc0] sm:$0xff] }
 0x5ba   : > { %v16196_v38 = vpop.f32.mrf.mxu1 }
 0x5bb   : > { %19438 = vst [vmem:[#allocation66_spill] sm:$0xff] %v16196_v38 }
 0x5bc   : > { %3820 = vmatmul.mubr.f32.gmra.mxu1 %v10598_v19  ;;  %v10605_v19 = vld [vmem:[%s19357_s1 + $0xbd8] sm:$0xff] }
 0x5bd   : > { %3824 = vmatprep.mubr.f32.mxu1 %v10601_v45  ;;  %v10604_v45 = vld [vmem:[%s19357_s1 + $0xbd0] sm:$0xff] }
 0x5c0   : > { %v12601_v23 = vpop.f32.mrf.mxu1  ;;  %3825 = vmatmul.mubr.f32.gmra.mxu1 %v10600_v63 }
 0x5c1   : > { %v16202_v39 = vadd.f32 %v12601_v23, %v15714_v16  ;;  %3829 = vmatprep.mubr.f32.mxu1 %v10603_v0  ;;  %v10607_v16 = vld [vmem:[%s19357_s1 + $0xbe8] sm:$0xff]  ;;  %v10606_v23 = vld [vmem:[%s19357_s1 + $0xbe0] sm:$0xff] }
 0x5c2   : > { %v16213_v38 = vpop.f32.mrf.mxu1 }
 0x5c3   : > { %19439 = vst [vmem:[#allocation67_spill] sm:$0xff] %v16213_v38 }
 0x5c4   : > { %3830 = vmatmul.mubr.f32.gmra.mxu1 %v10602_v33  ;;  %v10609_v33 = vld [vmem:[%s19357_s1 + $0xbf8] sm:$0xff] }
 0x5c5   : > { %3834 = vmatprep.mubr.f32.mxu1 %v10605_v19  ;;  %v10608_v19 = vld [vmem:[%s19357_s1 + $0xbf0] sm:$0xff] }
 0x5c8   : > { %v12604_v63 = vpop.f32.mrf.mxu1  ;;  %3835 = vmatmul.mubr.f32.gmra.mxu1 %v10604_v45 }
 0x5c9   : > { %v16219_v0 = vadd.f32 %v12604_v63, %v15731_v31  ;;  %3839 = vmatprep.mubr.f32.mxu1 %v10607_v16 }
 0x5ca   : > { %v16230_v38 = vpop.f32.mrf.mxu1 }
 0x5cb   : > { %19440 = vst [vmem:[#allocation68_spill] sm:$0xff] %v16230_v38 }
 0x5cc   : > { %3840 = vmatmul.mubr.f32.gmra.mxu1 %v10606_v23 }
 0x5cd   : > { %3844 = vmatprep.mubr.f32.mxu1 %v10609_v33 }
 0x5d0   : > { %v12607_v45 = vpop.f32.mrf.mxu1  ;;  %3845 = vmatmul.mubr.f32.gmra.mxu1 %v10608_v19 }
 0x5d1   : > { %v16233_v31 = vadd.f32 %v12607_v45, %v15745_v43 }
 0x5d2   : > { %v16235_v16 = vpop.f32.mrf.mxu1 }
 0x5d3   : > { %19441 = vst [vmem:[#allocation69_spill] sm:$0xff] %v16235_v16 }
 0x5d8   : > { %v12610_v63 = vpop.f32.mrf.mxu1 }
 0x5d9   : > { %v16238_v14 = vadd.f32 %v12610_v63, %v15750_v58 }
 0x5da   : > { %v16240_v35 = vpop.f32.mrf.mxu1 }
 0x5db   : > { %19442 = vst [vmem:[#allocation70_spill] sm:$0xff] %v16240_v35 }
 0x5e0   : > { %v12613_v23 = vpop.f32.mrf.mxu1 }
 0x5e1   : > { %v16243_v33 = vadd.f32 %v12613_v23, %v15755_v2 }
 0x5e2   : > { %v16245_v54 = vpop.f32.mrf.mxu1 }
 0x5e3   : > { %19443 = vst [vmem:[#allocation71_spill] sm:$0xff] %v16245_v54 }
 0x5e8   : > { %v12616_v38 = vpop.f32.mrf.mxu1 }
 0x5e9   : > { %v16248_v19 = vadd.f32 %v12616_v38, %v15760_v12 }
 0x5ea   : > { %v16250_v43 = vpop.f32.mrf.mxu1 }
 0x5eb   : > { %19444 = vst [vmem:[#allocation72_spill] sm:$0xff] %v16250_v43 }
 0x5f0   : > { %v12619_v45 = vpop.f32.mrf.mxu1 }
 0x5f1   : > { %v16253_v16 = vadd.f32 %v12619_v45, %v15765_v15 }
 0x5f2   : > { %v16255_v58 = vpop.f32.mrf.mxu1 }
 0x5f3   : > { %19445 = vst [vmem:[#allocation73_spill] sm:$0xff] %v16255_v58 }
 0x5f8   : > { %v12622_v63 = vpop.f32.mrf.mxu1 }
 0x5f9   : > { %v16258_v35 = vadd.f32 %v12622_v63, %v15770_v36 }
 0x5fa   : > { %v16260_v2 = vpop.f32.mrf.mxu1 }
 0x5fb   : > { %19446 = vst [vmem:[#allocation74_spill] sm:$0xff] %v16260_v2 }
 0x600   : > { %v12625_v23 = vpop.f32.mrf.mxu1 }
 0x601   : > { %v16263_v54 = vadd.f32 %v12625_v23, %v15775_v9 }
 0x602   : > { %v16265_v12 = vpop.f32.mrf.mxu1 }
 0x603   : > { %19447 = vst [vmem:[#allocation75_spill] sm:$0xff] %v16265_v12  ;;  %v16815_v12 = vld [vmem:[%s13818_s18 + $0xa8] sm:$0xff] }
 0x608   : > { %v12628_v38 = vpop.f32.mrf.mxu1 }
 0x609   : > { %v16268_v43 = vadd.f32 %v12628_v38, %v15780_v47 }
 0x60a   : > { %v16270_v15 = vpop.f32.mrf.mxu1 }
 0x60b   : > { %19448 = vst [vmem:[#allocation76_spill] sm:$0xff] %v16270_v15  ;;  %v16804_v15 = vld [vmem:[%s13818_s18 + $0xb8] sm:$0xff] }
 0x610   : > { %v12631_v45 = vpop.f32.mrf.mxu1 }
 0x611   : > { %v16273_v58 = vadd.f32 %v12631_v45, %v15785_v53 }
 0x612   : > { %v16275_v36 = vpop.f32.mrf.mxu1 }
 0x613   : > { %19449 = vst [vmem:[#allocation77_spill] sm:$0xff] %v16275_v36  ;;  %v16793_v36 = vld [vmem:[%s13818_s18 + $0xc8] sm:$0xff] }
 0x614   : > { %v3691_v63 = vpop.f32.mrf.mxu1 }
 0x615   : > { %12648 = vmatprep.mubr.msk.f32.mxu0 %vm961_vm0, %v3691_v63 }
 0x616   : > { %v3693_v2 = vpop.f32.mrf.mxu1 }
 0x618   : > { %v3696_v9 = vpop.f32.mrf.mxu1 }
 0x619   : > { %12649 = vmatmul.mubr.msk.f32.vlgmr.msra.gmra.mxu0 %vm961_vm0, %v3696_v9 }
 0x61a   : > { %v3698_v23 = vpop.f32.mrf.mxu1  ;;  %4278 = vmatpush1.msra.mxu0 %v15792_v56 }
 0x61b   : > { %4279 = vmatprep.subr.mxu0 %v19403_v34 }
 0x61c   : > { %v3701_v47 = vpop.f32.mrf.mxu1  ;;  %4280 = vmatpush1.msra.mxu0 %v15797_v6 }
 0x61d   : > { %12651 = vmatprep.mubr.msk.f32.mxu0 %vm961_vm0, %v3701_v47  ;;  %4281 = vmatprep.subr.mxu0 %v19403_v34 }
 0x61e   : > { %v3703_v53 = vpop.f32.mrf.mxu1  ;;  %4282 = vmatpush1.msra.mxu0 %v15803_v13 }
 0x61f   : > { %4283 = vmatprep.subr.mxu0 %v19403_v34 }
 0x620   : > { %v3706_v2 = vpop.f32.mrf.mxu1  ;;  %4284 = vmatpush1.msra.mxu0 %v15808_v40 }
 0x621   : > { %12652 = vmatmul.mubr.msk.f32.gmra.mxu0 %vm961_vm0, %v3706_v2  ;;  %4285 = vmatprep.subr.mxu0 %v19403_v34 }
 0x622   : > { %v3708_v56 = vpop.f32.mrf.mxu1  ;;  %4286 = vmatpush1.msra.mxu0 %v15814_v29 }
 0x623   : > { %4287 = vmatprep.subr.mxu0 %v19403_v34 }
 0x624   : > { %v3711_v6 = vpop.f32.mrf.mxu1  ;;  %4288 = vmatpush1.msra.mxu0 %v15819_v26 }
 0x625   : > { %12654 = vmatprep.mubr.msk.f32.mxu0 %vm961_vm0, %v3711_v6  ;;  %4289 = vmatprep.subr.mxu0 %v19403_v34 }
 0x626   : > { %v3713_v13 = vpop.f32.mrf.mxu1  ;;  %4290 = vmatpush1.msra.mxu0 %v15825_v49 }
 0x627   : > { %4291 = vmatprep.subr.mxu0 %v19403_v34 }
 0x628   : > { %v3716_v40 = vpop.f32.mrf.mxu1  ;;  %4292 = vmatpush1.msra.mxu0 %v15830_v55 }
 0x629   : > { %12655 = vmatmul.mubr.msk.f32.gmra.mxu0 %vm961_vm0, %v3716_v40  ;;  %4293 = vmatprep.subr.mxu0 %v19403_v34 }
 0x62a   : > { %v3718_v29 = vpop.f32.mrf.mxu1  ;;  %4294 = vmatpush1.msra.mxu0 %v15836_v57 }
 0x62b   : > { %4295 = vmatprep.subr.mxu0 %v19403_v34 }
 0x62c   : > { %v3721_v26 = vpop.f32.mrf.mxu1  ;;  %4296 = vmatpush1.msra.mxu0 %v15841_v48 }
 0x62d   : > { %12657 = vmatprep.mubr.msk.f32.mxu0 %vm961_vm0, %v3721_v26  ;;  %4297 = vmatprep.subr.mxu0 %v19403_v34 }
 0x62e   : > { %v3723_v49 = vpop.f32.mrf.mxu1  ;;  %4298 = vmatpush1.msra.mxu0 %v15847_v8 }
 0x62f   : > { %4299 = vmatprep.subr.mxu0 %v19403_v34 }
 0x630   : > { %v3726_v55 = vpop.f32.mrf.mxu1  ;;  %4300 = vmatpush1.msra.mxu0 %v15852_v50 }
 0x631   : > { %12658 = vmatmul.mubr.msk.f32.gmra.mxu0 %vm961_vm0, %v3726_v55  ;;  %4301 = vmatprep.subr.mxu0 %v19403_v34 }
 0x632   : > { %v3728_v57 = vpop.f32.mrf.mxu1  ;;  %4302 = vmatpush1.msra.mxu0 %v15858_v61 }
 0x633   : > { %4303 = vmatprep.subr.mxu0 %v19403_v34 }
 0x634   : > { %v3731_v48 = vpop.f32.mrf.mxu1  ;;  %4304 = vmatpush1.msra.mxu0 %v15863_v11 }
 0x635   : > { %12660 = vmatprep.mubr.msk.f32.mxu0 %vm961_vm0, %v3731_v48  ;;  %4305 = vmatprep.subr.mxu0 %v19403_v34 }
 0x636   : > { %v3733_v8 = vpop.f32.mrf.mxu1  ;;  %4306 = vmatpush1.msra.mxu0 %v15869_v28 }
 0x637   : > { %4307 = vmatprep.subr.mxu0 %v19403_v34 }
 0x638   : > { %v3736_v50 = vpop.f32.mrf.mxu1  ;;  %4308 = vmatpush1.msra.mxu0 %v15874_v17 }
 0x639   : > { %12661 = vmatmul.mubr.msk.f32.gmra.mxu0 %vm961_vm0, %v3736_v50  ;;  %4309 = vmatprep.subr.mxu0 %v19403_v34 }
 0x63a   : > { %v3738_v61 = vpop.f32.mrf.mxu1  ;;  %4310 = vmatpush2.msra.mxu0 %v15880_v42 }
 0x63b   : > { %4311 = vmatprep.subr.mxu0 %v19403_v34 }
 0x63c   : > { %v3741_v11 = vpop.f32.mrf.mxu1  ;;  %4312 = vmatpush2.msra.mxu0 %v15885_v22 }
 0x63d   : > { %12663 = vmatprep.mubr.msk.f32.mxu0 %vm961_vm0, %v3741_v11  ;;  %4313 = vmatprep.subr.mxu0 %v19403_v34 }
 0x63e   : > { %v3743_v28 = vpop.f32.mrf.mxu1  ;;  %4314 = vmatpush2.msra.mxu0 %v15891_v52 }
 0x63f   : > { %4315 = vmatprep.subr.mxu0 %v19403_v34 }
 0x640   : > { %v3746_v17 = vpop.f32.mrf.mxu1  ;;  %4316 = vmatpush2.msra.mxu0 %v15896_v3 }
 0x641   : > { %12664 = vmatmul.mubr.msk.f32.gmra.mxu0 %vm961_vm0, %v3746_v17  ;;  %4317 = vmatprep.subr.mxu0 %v19403_v34  ;;  %v10651_v17 = vld [vmem:[%s19357_s1 + $0xc08] sm:$0xff] }
 0x642   : > { %v3748_v42 = vpop.f32.mrf.mxu1  ;;  %4318 = vmatpush2.msra.mxu0 %v15902_v59 }
 0x643   : > { %4319 = vmatprep.subr.mxu0 %v19403_v34 }
 0x644   : > { %v3751_v22 = vpop.f32.mrf.mxu1  ;;  %4320 = vmatpush2.msra.mxu0 %v15907_v37 }
 0x645   : > { %12666 = vmatprep.mubr.msk.f32.mxu0 %vm961_vm0, %v3751_v22  ;;  %4321 = vmatprep.subr.mxu0 %v19403_v34 }
 0x646   : > { %v3753_v52 = vpop.f32.mrf.mxu1  ;;  %4322 = vmatpush2.msra.mxu0 %v15913_v30 }
 0x647   : > { %4323 = vmatprep.subr.mxu0 %v19403_v34  ;;  %v10650_v52 = vld [vmem:[%s19357_s1 + $0xc00] sm:$0xff] }
 0x648   : > { %v3756_v3 = vpop.f32.mrf.mxu1  ;;  %4324 = vmatpush2.msra.mxu0 %v15918_v20 }
 0x649   : > { %12667 = vmatmul.mubr.msk.f32.gmra.mxu0 %vm961_vm0, %v3756_v3  ;;  %4325 = vmatprep.subr.mxu0 %v19403_v34  ;;  %v10653_v3 = vld [vmem:[%s19357_s1 + $0xc18] sm:$0xff] }
 0x64a   : > { %v3758_v59 = vpop.f32.mrf.mxu1  ;;  %4326 = vmatpush2.msra.mxu0 %v15924_v27 }
 0x64b   : > { %4327 = vmatprep.subr.mxu0 %v19403_v34  ;;  %v10652_v59 = vld [vmem:[%s19357_s1 + $0xc10] sm:$0xff] }
 0x64c   : > { %v3761_v37 = vpop.f32.mrf.mxu1  ;;  %4328 = vmatpush2.msra.mxu0 %v15929_v10 }
 0x64d   : > { %12669 = vmatprep.mubr.msk.f32.mxu0 %vm961_vm0, %v3761_v37  ;;  %4329 = vmatprep.subr.mxu0 %v19403_v34  ;;  %v10655_v37 = vld [vmem:[%s19357_s1 + $0xc28] sm:$0xff] }
 0x64e   : > { %v3763_v30 = vpop.f32.mrf.mxu1  ;;  %4330 = vmatpush2.msra.mxu0 %v15935_v24 }
 0x64f   : > { %4331 = vmatprep.subr.mxu0 %v19403_v34  ;;  %v10654_v30 = vld [vmem:[%s19357_s1 + $0xc20] sm:$0xff] }
 0x650   : > { %v3766_v20 = vpop.f32.mrf.mxu1  ;;  %4332 = vmatpush2.msra.mxu0 %v15940_v5 }
 0x651   : > { %12670 = vmatmul.mubr.msk.f32.gmra.mxu0 %vm961_vm0, %v3766_v20  ;;  %4333 = vmatprep.subr.mxu0 %v19403_v34  ;;  %v10657_v20 = vld [vmem:[%s19357_s1 + $0xc38] sm:$0xff] }
 0x652   : > { %v3768_v27 = vpop.f32.mrf.mxu1  ;;  %4334 = vmatpush2.msra.mxu0 %v15946_v25 }
 0x653   : > { %4335 = vmatprep.subr.mxu0 %v19403_v34  ;;  %v10656_v27 = vld [vmem:[%s19357_s1 + $0xc30] sm:$0xff] }
 0x654   : > { %v3771_v10 = vpop.f32.mrf.mxu1  ;;  %4336 = vmatpush2.msra.mxu0 %v15951_v51 }
 0x655   : > { %12672 = vmatprep.mubr.msk.f32.mxu0 %vm961_vm0, %v3771_v10  ;;  %4337 = vmatprep.subr.mxu0 %v19403_v34  ;;  %v10659_v10 = vld [vmem:[%s19357_s1 + $0xc48] sm:$0xff] }
 0x656   : > { %v3773_v24 = vpop.f32.mrf.mxu1  ;;  %4338 = vmatpush2.msra.mxu0 %v15957_v7 }
 0x657   : > { %4339 = vmatprep.subr.mxu0 %v19403_v34  ;;  %v10658_v24 = vld [vmem:[%s19357_s1 + $0xc40] sm:$0xff] }
 0x658   : > { %v3776_v5 = vpop.f32.mrf.mxu1  ;;  %4340 = vmatpush2.msra.mxu0 %v15962_v32 }
 0x659   : > { %12673 = vmatmul.mubr.msk.f32.gmra.mxu0 %vm961_vm0, %v3776_v5  ;;  %v10661_v5 = vld [vmem:[%s19357_s1 + $0xc58] sm:$0xff] }
 0x65a   : > { %v3778_v25 = vpop.f32.mrf.mxu1 }
 0x65b   : > { %v10660_v25 = vld [vmem:[%s19357_s1 + $0xc50] sm:$0xff] }
 0x65c   : > { %v3781_v38 = vpop.f32.mrf.mxu1 }
 0x65d   : > { %12675 = vmatprep.mubr.msk.f32.mxu0 %vm961_vm0, %v3781_v38  ;;  %v10663_v38 = vld [vmem:[%s19357_s1 + $0xc68] sm:$0xff] }
 0x65e   : > { %v3783_v45 = vpop.f32.mrf.mxu1 }
 0x65f   : > { %v10662_v45 = vld [vmem:[%s19357_s1 + $0xc60] sm:$0xff] }
 0x660   : > { %v3786_v51 = vpop.f32.mrf.mxu1 }
 0x661   : > { %12676 = vmatmul.mubr.msk.f32.gmra.mxu0 %vm961_vm0, %v3786_v51  ;;  %v10665_v51 = vld [vmem:[%s19357_s1 + $0xc78] sm:$0xff] }
 0x662   : > { %v3788_v63 = vpop.f32.mrf.mxu1 }
 0x663   : > { %v10664_v63 = vld [vmem:[%s19357_s1 + $0xc70] sm:$0xff] }
 0x664   : > { %v3791_v9 = vpop.f32.mrf.mxu1 }
 0x665   : > { %12678 = vmatprep.mubr.msk.f32.mxu0 %vm961_vm0, %v3791_v9  ;;  %v10667_v9 = vld [vmem:[%s19357_s1 + $0xc88] sm:$0xff] }
 0x666   : > { %v3793_v7 = vpop.f32.mrf.mxu1 }
 0x667   : > { %v10666_v7 = vld [vmem:[%s19357_s1 + $0xc80] sm:$0xff] }
 0x668   : > { %v3796_v23 = vpop.f32.mrf.mxu1 }
 0x669   : > { %12679 = vmatmul.mubr.msk.f32.gmra.mxu0 %vm961_vm0, %v3796_v23  ;;  %v10669_v23 = vld [vmem:[%s19357_s1 + $0xc98] sm:$0xff] }
 0x66a   : > { %v3798_v47 = vpop.f32.mrf.mxu1 }
 0x66b   : > { %v10721_v47 = vld [vmem:[%s19358_s2 + $0x1b8] sm:$0xff] }
 0x66c   : > { %v3801_v32 = vpop.f32.mrf.mxu1  ;;  %12696 = vmatprep.subr.mxu1 %v10721_v47 }
 0x66d   : > { %12681 = vmatprep.mubr.msk.f32.mxu0 %vm961_vm0, %v3801_v32  ;;  %v10668_v32 = vld [vmem:[%s19357_s1 + $0xc90] sm:$0xff]  ;;  %12697 = vmatpush3.msra.mxu1 %v10721_v47  ;;  %v10694_v47 = vld [vmem:[%s19357_s1 + $0xd60] sm:$0xff] }
 0x66e   : > { %v3803_v53 = vpop.f32.mrf.mxu1 }
 0x66f   : > { %v10671_v53 = vld [vmem:[%s19357_s1 + $0xca8] sm:$0xff] }
 0x670   : > { %v3806_v2 = vpop.f32.mrf.mxu1 }
 0x671   : > { %12682 = vmatmul.mubr.msk.f32.gmra.mxu0 %vm961_vm0, %v3806_v2  ;;  %v10670_v2 = vld [vmem:[%s19357_s1 + $0xca0] sm:$0xff] }
 0x672   : > { %v3808_v56 = vpop.f32.mrf.mxu1 }
 0x673   : > { %v10673_v56 = vld [vmem:[%s19357_s1 + $0xcb8] sm:$0xff] }
 0x674   : > { %v3811_v6 = vpop.f32.mrf.mxu1 }
 0x675   : > { %12684 = vmatprep.mubr.msk.f32.mxu0 %vm961_vm0, %v3811_v6  ;;  %v10672_v6 = vld [vmem:[%s19357_s1 + $0xcb0] sm:$0xff] }
 0x676   : > { %v3813_v13 = vpop.f32.mrf.mxu1 }
 0x677   : > { %v10675_v13 = vld [vmem:[%s19357_s1 + $0xcc8] sm:$0xff] }
 0x678   : > { %v3816_v40 = vpop.f32.mrf.mxu1 }
 0x679   : > { %12685 = vmatmul.mubr.msk.f32.gmra.mxu0 %vm961_vm0, %v3816_v40  ;;  %v10674_v40 = vld [vmem:[%s19357_s1 + $0xcc0] sm:$0xff] }
 0x67a   : > { %v3818_v29 = vpop.f32.mrf.mxu1 }
 0x67b   : > { %v10677_v29 = vld [vmem:[%s19357_s1 + $0xcd8] sm:$0xff] }
 0x67c   : > { %v3821_v26 = vpop.f32.mrf.mxu1 }
 0x67d   : > { %12687 = vmatprep.mubr.msk.f32.mxu0 %vm961_vm0, %v3821_v26  ;;  %v10720_v26 = vld [vmem:[%s19358_s2 + $0x1b0] sm:$0xff] }
 0x67e   : > { %v3823_v49 = vpop.f32.mrf.mxu1  ;;  %12698 = vmatprep.subr.mxu1 %v10720_v26 }
 0x67f   : > { %v10676_v49 = vld [vmem:[%s19357_s1 + $0xcd0] sm:$0xff]  ;;  %12699 = vmatpush3.msra.mxu1 %v10720_v26 }
 0x680   : > { %v3826_v55 = vpop.f32.mrf.mxu1 }
 0x681   : > { %12688 = vmatmul.mubr.msk.f32.gmra.mxu0 %vm961_vm0, %v3826_v55  ;;  %v10679_v55 = vld [vmem:[%s19357_s1 + $0xce8] sm:$0xff] }
 0x682   : > { %v3828_v57 = vpop.f32.mrf.mxu1 }
 0x683   : > { %v10678_v57 = vld [vmem:[%s19357_s1 + $0xce0] sm:$0xff] }
 0x684   : > { %v3831_v48 = vpop.f32.mrf.mxu1 }
 0x685   : > { %12690 = vmatprep.mubr.msk.f32.mxu0 %vm961_vm0, %v3831_v48  ;;  %v10681_v48 = vld [vmem:[%s19357_s1 + $0xcf8] sm:$0xff] }
 0x686   : > { %v3833_v8 = vpop.f32.mrf.mxu1 }
 0x687   : > { %v10719_v8 = vld [vmem:[%s19358_s2 + $0x1a8] sm:$0xff] }
 0x688   : > { %v3836_v50 = vpop.f32.mrf.mxu1  ;;  %12700 = vmatprep.subr.mxu1 %v10719_v8 }
 0x689   : > { %12691 = vmatmul.mubr.msk.f32.gmra.mxu0 %vm961_vm0, %v3836_v50  ;;  %v10718_v50 = vld [vmem:[%s19358_s2 + $0x1a0] sm:$0xff]  ;;  %12701 = vmatpush3.msra.mxu1 %v10719_v8  ;;  %v10704_v8 = vld [vmem:[%s19357_s1 + $0xdb0] sm:$0xff] }
 0x68a   : > { %v3838_v61 = vpop.f32.mrf.mxu1  ;;  %12702 = vmatprep.subr.mxu1 %v10718_v50 }
 0x68b   : > { %v10680_v61 = vld [vmem:[%s19357_s1 + $0xcf0] sm:$0xff]  ;;  %12703 = vmatpush3.msra.mxu1 %v10718_v50 }
 0x68c   : > { %v3841_v11 = vpop.f32.mrf.mxu1 }
 0x68d   : > { %12693 = vmatprep.mubr.msk.f32.mxu0 %vm961_vm0, %v3841_v11  ;;  %v10683_v11 = vld [vmem:[%s19357_s1 + $0xd08] sm:$0xff] }
 0x68e   : > { %v3843_v28 = vpop.f32.mrf.mxu1 }
 0x68f   : > { %v10717_v28 = vld [vmem:[%s19358_s2 + $0x198] sm:$0xff] }
 0x690   : > { %v3846_v42 = vpop.f32.mrf.mxu1  ;;  %12704 = vmatprep.subr.mxu1 %v10717_v28 }
 0x691   : > { %12694 = vmatmul.mubr.msk.f32.gmra.mxu0 %vm961_vm0, %v3846_v42  ;;  %v10685_v42 = vld [vmem:[%s19357_s1 + $0xd18] sm:$0xff]  ;;  %12705 = vmatpush3.msra.mxu1 %v10717_v28  ;;  %v10706_v28 = vld [vmem:[%s19357_s1 + $0xdc0] sm:$0xff] }
 0x692   : > { %v3848_v22 = vpop.f32.mrf.mxu1  ;;  %4341 = vmatprep.mubr.f32.mxu0 %v10651_v17  ;;  %v10682_v17 = vld [vmem:[%s19357_s1 + $0xd00] sm:$0xff] }
 0x693   : > { %v10716_v22 = vld [vmem:[%s19358_s2 + $0x190] sm:$0xff] }
 0x694   : > { %12706 = vmatprep.subr.mxu1 %v10716_v22 }
 0x695   : > { %4342 = vmatmul.mubr.f32.vlgmr.msra.gmra.mxu0 %v10650_v52  ;;  %12707 = vmatpush3.msra.mxu1 %v10716_v22  ;;  %v10715_v52 = vld [vmem:[%s19358_s2 + $0x188] sm:$0xff] }
 0x696   : > { %4346 = vmatprep.mubr.f32.mxu0 %v10653_v3  ;;  %v10684_v3 = vld [vmem:[%s19357_s1 + $0xd10] sm:$0xff]  ;;  %12708 = vmatprep.subr.mxu1 %v10715_v52 }
 0x697   : > { %12709 = vmatpush3.msra.mxu1 %v10715_v52 }
 0x699   : > { %4347 = vmatmul.mubr.f32.gmra.mxu0 %v10652_v59  ;;  %v10687_v59 = vld [vmem:[%s19357_s1 + $0xd28] sm:$0xff] }
 0x69a   : > { %4351 = vmatprep.mubr.f32.mxu0 %v10655_v37  ;;  %v10714_v37 = vld [vmem:[%s19358_s2 + $0x180] sm:$0xff] }
 0x69b   : > { %12710 = vmatprep.subr.mxu1 %v10714_v37 }
 0x69c   : > { %12711 = vmatpush3.msra.mxu1 %v10714_v37  ;;  %v10713_v37 = vld [vmem:[%s19357_s1 + $0xdf8] sm:$0xff] }
 0x69d   : > { %4352 = vmatmul.mubr.f32.gmra.mxu0 %v10654_v30  ;;  %4929 = vmatprep.subr.mxu1 %v19403_v34 }
 0x69e   : > { %4356 = vmatprep.mubr.f32.mxu0 %v10657_v20 }
 0x6a1   : > { %4357 = vmatmul.mubr.f32.gmra.mxu0 %v10656_v27  ;;  %v10686_v27 = vld [vmem:[%s19357_s1 + $0xd20] sm:$0xff] }
 0x6a2   : > { %4361 = vmatprep.mubr.f32.mxu0 %v10659_v10  ;;  %v10689_v10 = vld [vmem:[%s19357_s1 + $0xd38] sm:$0xff] }
 0x6a5   : > { %4362 = vmatmul.mubr.f32.gmra.mxu0 %v10658_v24  ;;  %v10688_v24 = vld [vmem:[%s19357_s1 + $0xd30] sm:$0xff] }
 0x6a6   : > { %4366 = vmatprep.mubr.f32.mxu0 %v10661_v5 }
 0x6a9   : > { %4367 = vmatmul.mubr.f32.gmra.mxu0 %v10660_v25 }
 0x6aa   : > { %4371 = vmatprep.mubr.f32.mxu0 %v10663_v38 }
 0x6ad   : > { %4372 = vmatmul.mubr.f32.gmra.mxu0 %v10662_v45  ;;  %v10690_v45 = vld [vmem:[%s19357_s1 + $0xd40] sm:$0xff] }
 0x6ae   : > { %4376 = vmatprep.mubr.f32.mxu0 %v10665_v51  ;;  %v10693_v51 = vld [vmem:[%s19357_s1 + $0xd58] sm:$0xff] }
 0x6b1   : > { %4377 = vmatmul.mubr.f32.gmra.mxu0 %v10664_v63  ;;  %v10692_v63 = vld [vmem:[%s19357_s1 + $0xd50] sm:$0xff] }
 0x6b2   : > { %4381 = vmatprep.mubr.f32.mxu0 %v10667_v9 }
 0x6b5   : > { %4382 = vmatmul.mubr.f32.gmra.mxu0 %v10666_v7 }
 0x6b6   : > { %4386 = vmatprep.mubr.f32.mxu0 %v10669_v23 }
 0x6b9   : > { %4387 = vmatmul.mubr.f32.gmra.mxu0 %v10668_v32  ;;  %v10697_v32 = vld [vmem:[%s19357_s1 + $0xd78] sm:$0xff] }
 0x6ba   : > { %4391 = vmatprep.mubr.f32.mxu0 %v10671_v53  ;;  %v10696_v53 = vld [vmem:[%s19357_s1 + $0xd70] sm:$0xff] }
 0x6bd   : > { %4392 = vmatmul.mubr.f32.gmra.mxu0 %v10670_v2 }
 0x6be   : > { %4396 = vmatprep.mubr.f32.mxu0 %v10673_v56 }
 0x6c1   : > { %4397 = vmatmul.mubr.f32.gmra.mxu0 %v10672_v6 }
 0x6c2   : > { %4401 = vmatprep.mubr.f32.mxu0 %v10675_v13  ;;  %v10698_v13 = vld [vmem:[%s19357_s1 + $0xd80] sm:$0xff] }
 0x6c5   : > { %4402 = vmatmul.mubr.f32.gmra.mxu0 %v10674_v40  ;;  %v10701_v40 = vld [vmem:[%s19357_s1 + $0xd98] sm:$0xff] }
 0x6c6   : > { %4406 = vmatprep.mubr.f32.mxu0 %v10677_v29  ;;  %v10700_v29 = vld [vmem:[%s19357_s1 + $0xd90] sm:$0xff] }
 0x6c9   : > { %4407 = vmatmul.mubr.f32.gmra.mxu0 %v10676_v49 }
 0x6ca   : > { %4411 = vmatprep.mubr.f32.mxu0 %v10679_v55 }
 0x6cd   : > { %4412 = vmatmul.mubr.f32.gmra.mxu0 %v10678_v57  ;;  %v10702_v57 = vld [vmem:[%s19357_s1 + $0xda0] sm:$0xff] }
 0x6ce   : > { %4416 = vmatprep.mubr.f32.mxu0 %v10681_v48  ;;  %v10705_v48 = vld [vmem:[%s19357_s1 + $0xdb8] sm:$0xff] }
 0x6d1   : > { %4417 = vmatmul.mubr.f32.gmra.mxu0 %v10680_v61 }
 0x6d2   : > { %4421 = vmatprep.mubr.f32.mxu0 %v10683_v11 }
 0x6d5   : > { %4422 = vmatmul.mubr.f32.gmra.mxu0 %v10682_v17  ;;  %v10709_v17 = vld [vmem:[%s19357_s1 + $0xdd8] sm:$0xff] }
 0x6d6   : > { %4426 = vmatprep.mubr.f32.mxu0 %v10685_v42  ;;  %v10708_v42 = vld [vmem:[%s19357_s1 + $0xdd0] sm:$0xff] }
 0x6d9   : > { %v12650_v30 = vpop.f32.mrf.mxu0  ;;  %4427 = vmatmul.mubr.f32.gmra.mxu0 %v10684_v3 }
 0x6da   : > { %v16508_v20 = vadd.f32 %v12650_v30, %v16116_v21  ;;  %4431 = vmatprep.mubr.f32.mxu0 %v10687_v59  ;;  %v10691_v21 = vld [vmem:[%s19357_s1 + $0xd48] sm:$0xff]  ;;  %v10710_v59 = vld [vmem:[%s19357_s1 + $0xde0] sm:$0xff]  ;;  %v10712_v30 = vld [vmem:[%s19357_s1 + $0xdf0] sm:$0xff] }
 0x6db   : > { %v16520_v5 = vpop.f32.mrf.mxu0 }
 0x6dc   : > { %19450 = vst [vmem:[#allocation78_spill] sm:$0xff] %v16520_v5 }
 0x6dd   : > { %4432 = vmatmul.mubr.f32.gmra.mxu0 %v10686_v27 }
 0x6de   : > { %4436 = vmatprep.mubr.f32.mxu0 %v10689_v10 }
 0x6e1   : > { %v12653_v25 = vpop.f32.mrf.mxu0  ;;  %4437 = vmatmul.mubr.f32.gmra.mxu0 %v10688_v24 }
 0x6e2   : > { %v16526_v38 = vadd.f32 %v12653_v25, %v16134_v4  ;;  %4441 = vmatprep.mubr.f32.mxu0 %v10691_v21  ;;  %v10695_v4 = vld [vmem:[%s19357_s1 + $0xd68] sm:$0xff] }
 0x6e3   : > { %v16537_v9 = vpop.f32.mrf.mxu0 }
 0x6e4   : > { %19451 = vst [vmem:[#allocation79_spill] sm:$0xff] %v16537_v9 }
 0x6e5   : > { %4442 = vmatmul.mubr.f32.gmra.mxu0 %v10690_v45 }
 0x6e6   : > { %4446 = vmatprep.mubr.f32.mxu0 %v10693_v51 }
 0x6e9   : > { %v12656_v7 = vpop.f32.mrf.mxu0  ;;  %4447 = vmatmul.mubr.f32.gmra.mxu0 %v10692_v63 }
 0x6ea   : > { %v16543_v23 = vadd.f32 %v12656_v7, %v16151_v44  ;;  %4451 = vmatprep.mubr.f32.mxu0 %v10695_v4  ;;  %v10699_v44 = vld [vmem:[%s19357_s1 + $0xd88] sm:$0xff] }
 0x6eb   : > { %v16554_v2 = vpop.f32.mrf.mxu0 }
 0x6ec   : > { %19452 = vst [vmem:[#allocation80_spill] sm:$0xff] %v16554_v2 }
 0x6ed   : > { %4452 = vmatmul.mubr.f32.gmra.mxu0 %v10694_v47 }
 0x6ee   : > { %4456 = vmatprep.mubr.f32.mxu0 %v10697_v32 }
 0x6f1   : > { %v12659_v56 = vpop.f32.mrf.mxu0  ;;  %4457 = vmatmul.mubr.f32.gmra.mxu0 %v10696_v53 }
 0x6f2   : > { %v16560_v6 = vadd.f32 %v12659_v56, %v16168_v46  ;;  %4461 = vmatprep.mubr.f32.mxu0 %v10699_v44  ;;  %v10703_v46 = vld [vmem:[%s19357_s1 + $0xda8] sm:$0xff] }
 0x6f3   : > { %v16571_v26 = vpop.f32.mrf.mxu0 }
 0x6f4   : > { %19453 = vst [vmem:[#allocation81_spill] sm:$0xff] %v16571_v26 }
 0x6f5   : > { %4462 = vmatmul.mubr.f32.gmra.mxu0 %v10698_v13 }
 0x6f6   : > { %4466 = vmatprep.mubr.f32.mxu0 %v10701_v40 }
 0x6f9   : > { %v12662_v49 = vpop.f32.mrf.mxu0  ;;  %4467 = vmatmul.mubr.f32.gmra.mxu0 %v10700_v29 }
 0x6fa   : > { %v16577_v55 = vadd.f32 %v12662_v49, %v16185_v41  ;;  %4471 = vmatprep.mubr.f32.mxu0 %v10703_v46  ;;  %v10707_v41 = vld [vmem:[%s19357_s1 + $0xdc8] sm:$0xff] }
 0x6fb   : > { %v16588_v50 = vpop.f32.mrf.mxu0 }
 0x6fc   : > { %19454 = vst [vmem:[#allocation82_spill] sm:$0xff] %v16588_v50 }
 0x6fd   : > { %4472 = vmatmul.mubr.f32.gmra.mxu0 %v10702_v57 }
 0x6fe   : > { %4476 = vmatprep.mubr.f32.mxu0 %v10705_v48 }
 0x701   : > { %v12665_v61 = vpop.f32.mrf.mxu0  ;;  %4477 = vmatmul.mubr.f32.gmra.mxu0 %v10704_v8 }
 0x702   : > { %v16594_v11 = vadd.f32 %v12665_v61, %v16202_v39  ;;  %4481 = vmatprep.mubr.f32.mxu0 %v10707_v41  ;;  %v10711_v39 = vld [vmem:[%s19357_s1 + $0xde8] sm:$0xff]  ;;  %v16677_v61 = vld [vmem:[%s13818_s18 + $0x70] sm:$0xff] }
 0x703   : > { %v16605_v22 = vpop.f32.mrf.mxu0 }
 0x704   : > { %19455 = vst [vmem:[#allocation83_spill] sm:$0xff] %v16605_v22 }
 0x705   : > { %4482 = vmatmul.mubr.f32.gmra.mxu0 %v10706_v28 }
 0x706   : > { %4486 = vmatprep.mubr.f32.mxu0 %v10709_v17  ;;  %v16683_v17 = vld [vmem:[%s13818_s18 + $0x68] sm:$0xff] }
 0x709   : > { %v12668_v52 = vpop.f32.mrf.mxu0  ;;  %4487 = vmatmul.mubr.f32.gmra.mxu0 %v10708_v42 }
 0x70a   : > { %v16611_v3 = vadd.f32 %v12668_v52, %v16219_v0  ;;  %4491 = vmatprep.mubr.f32.mxu0 %v10711_v39  ;;  %v16688_v39 = vld [vmem:[%s13818_s18 + $0x60] sm:$0xff] }
 0x70b   : > { %v16622_v27 = vpop.f32.mrf.mxu0 }
 0x70c   : > { %19456 = vst [vmem:[#allocation84_spill] sm:$0xff] %v16622_v27 }
 0x70d   : > { %4492 = vmatmul.mubr.f32.gmra.mxu0 %v10710_v59  ;;  %v16694_v59 = vld [vmem:[%s13818_s18 + $0x58] sm:$0xff] }
 0x70e   : > { %4496 = vmatprep.mubr.f32.mxu0 %v10713_v37 }
 0x711   : > { %v12671_v10 = vpop.f32.mrf.mxu0  ;;  %4497 = vmatmul.mubr.f32.gmra.mxu0 %v10712_v30  ;;  %v16699_v30 = vld [vmem:[%s13818_s18 + $0x50] sm:$0xff] }
 0x712   : > { %v16625_v0 = vadd.f32 %v12671_v10, %v16233_v31 }
 0x713   : > { %v16627_v24 = vpop.f32.mrf.mxu0 }
 0x714   : > { %19457 = vst [vmem:[#allocation85_spill] sm:$0xff] %v16627_v24 }
 0x719   : > { %v12674_v21 = vpop.f32.mrf.mxu0 }
 0x71a   : > { %v16630_v25 = vadd.f32 %v12674_v21, %v16238_v14  ;;  %v16705_v21 = vld [vmem:[%s13818_s18 + $0x48] sm:$0xff] }
 0x71b   : > { %v16632_v45 = vpop.f32.mrf.mxu0 }
 0x71c   : > { %19458 = vst [vmem:[#allocation86_spill] sm:$0xff] %v16632_v45  ;;  %v16842_v45 = vld [vmem:[%s13818_s18 + $0x80] sm:$0xff] }
 0x721   : > { %v12677_v51 = vpop.f32.mrf.mxu0 }
 0x722   : > { %v16635_v63 = vadd.f32 %v12677_v51, %v16243_v33 }
 0x723   : > { %v16637_v4 = vpop.f32.mrf.mxu0 }
 0x724   : > { %19459 = vst [vmem:[#allocation87_spill] sm:$0xff] %v16637_v4  ;;  %v16837_v4 = vld [vmem:[%s13818_s18 + $0x88] sm:$0xff] }
 0x729   : > { %v12680_v7 = vpop.f32.mrf.mxu0 }
 0x72a   : > { %v16640_v47 = vadd.f32 %v12680_v7, %v16248_v19  ;;  %v16710_v7 = vld [vmem:[%s13818_s18 + $0x40] sm:$0xff] }
 0x72b   : > { %v16642_v31 = vpop.f32.mrf.mxu0 }
 0x72c   : > { %19460 = vst [vmem:[#allocation88_spill] sm:$0xff] %v16642_v31  ;;  %v16831_v31 = vld [vmem:[%s13818_s18 + $0x90] sm:$0xff] }
 0x731   : > { %v12683_v32 = vpop.f32.mrf.mxu0 }
 0x732   : > { %v16645_v53 = vadd.f32 %v12683_v32, %v16253_v16 }
 0x733   : > { %v16647_v14 = vpop.f32.mrf.mxu0 }
 0x734   : > { %19461 = vst [vmem:[#allocation89_spill] sm:$0xff] %v16647_v14  ;;  %v16826_v14 = vld [vmem:[%s13818_s18 + $0x98] sm:$0xff] }
 0x739   : > { %v12686_v44 = vpop.f32.mrf.mxu0 }
 0x73a   : > { %v16650_v56 = vadd.f32 %v12686_v44, %v16258_v35  ;;  %v16716_v44 = vld [vmem:[%s13818_s18 + $0x38] sm:$0xff] }
 0x73b   : > { %v16652_v33 = vpop.f32.mrf.mxu0 }
 0x73c   : > { %19462 = vst [vmem:[#allocation90_spill] sm:$0xff] %v16652_v33  ;;  %v16820_v33 = vld [vmem:[%s13818_s18 + $0xa0] sm:$0xff] }
 0x741   : > { %v12689_v13 = vpop.f32.mrf.mxu0 }
 0x742   : > { %v16655_v40 = vadd.f32 %v12689_v13, %v16263_v54 }
 0x743   : > { %v16657_v19 = vpop.f32.mrf.mxu0 }
 0x744   : > { %19463 = vst [vmem:[#allocation91_spill] sm:$0xff] %v16657_v19  ;;  %v16809_v19 = vld [vmem:[%s13818_s18 + $0xb0] sm:$0xff] }
 0x749   : > { %v12692_v29 = vpop.f32.mrf.mxu0 }
 0x74a   : > { %v16660_v16 = vadd.f32 %v12692_v29, %v16268_v43  ;;  %v16672_v43 = vld [vmem:[%s13818_s18 + $0x78] sm:$0xff]  ;;  %v16721_v29 = vld [vmem:[%s13818_s18 + $0x30] sm:$0xff] }
 0x74b   : > { %v16662_v46 = vpop.f32.mrf.mxu0 }
 0x74c   : > { %19464 = vst [vmem:[#allocation92_spill] sm:$0xff] %v16662_v46  ;;  %v16798_v46 = vld [vmem:[%s13818_s18 + $0xc0] sm:$0xff] }
 0x751   : > { %v12695_v49 = vpop.f32.mrf.mxu0 }
 0x752   : > { %v16665_v35 = vadd.f32 %v12695_v49, %v16273_v58 }
 0x753   : > { %v16667_v57 = vpop.f32.mrf.mxu0 }
 0x754   : > { %19465 = vst [vmem:[#allocation93_spill] sm:$0xff] %v16667_v57  ;;  %v16787_v57 = vld [vmem:[%s13818_s18 + $0xd0] sm:$0xff] }
 0x755   : > { %v4343_v48 = vpop.f32.mrf.mxu0 }
 0x756   : > { %12712 = vmatprep.mubr.msk.f32.mxu1 %vm961_vm0, %v4343_v48  ;;  %v16727_v48 = vld [vmem:[%s13818_s18 + $0x28] sm:$0xff] }
 0x757   : > { %v4345_v54 = vpop.f32.mrf.mxu0 }
 0x759   : > { %v4348_v8 = vpop.f32.mrf.mxu0 }
 0x75a   : > { %12713 = vmatmul.mubr.msk.f32.vlgmr.msra.gmra.mxu1 %vm961_vm0, %v4348_v8  ;;  %v16732_v8 = vld [vmem:[%s13818_s18 + $0x20] sm:$0xff] }
 0x75b   : > { %v4350_v41 = vpop.f32.mrf.mxu0  ;;  %4930 = vmatpush1.msra.mxu1 %v16672_v43 }
 0x75c   : > { %4931 = vmatprep.subr.mxu1 %v19403_v34 }
 0x75d   : > { %v4353_v58 = vpop.f32.mrf.mxu0  ;;  %4932 = vmatpush1.msra.mxu1 %v16677_v61 }
 0x75e   : > { %12715 = vmatprep.mubr.msk.f32.mxu1 %vm961_vm0, %v4353_v58  ;;  %4933 = vmatprep.subr.mxu1 %v19403_v34  ;;  %v16738_v58 = vld [vmem:[%s13818_s18 + $0x18] sm:$0xff] }
 0x75f   : > { %v4355_v28 = vpop.f32.mrf.mxu0  ;;  %4934 = vmatpush1.msra.mxu1 %v16683_v17 }
 0x760   : > { %4935 = vmatprep.subr.mxu1 %v19403_v34 }
 0x761   : > { %v4358_v42 = vpop.f32.mrf.mxu0  ;;  %4936 = vmatpush1.msra.mxu1 %v16688_v39 }
 0x762   : > { %12716 = vmatmul.mubr.msk.f32.gmra.mxu1 %vm961_vm0, %v4358_v42  ;;  %4937 = vmatprep.subr.mxu1 %v19403_v34  ;;  %v16743_v42 = vld [vmem:[%s13818_s18 + $0x10] sm:$0xff] }
 0x763   : > { %v4360_v52 = vpop.f32.mrf.mxu0  ;;  %4938 = vmatpush1.msra.mxu1 %v16694_v59 }
 0x764   : > { %4939 = vmatprep.subr.mxu1 %v19403_v34 }
 0x765   : > { %v4363_v37 = vpop.f32.mrf.mxu0  ;;  %4940 = vmatpush1.msra.mxu1 %v16699_v30 }
 0x766   : > { %12718 = vmatprep.mubr.msk.f32.mxu1 %vm961_vm0, %v4363_v37  ;;  %4941 = vmatprep.subr.mxu1 %v19403_v34  ;;  %v16749_v37 = vld [vmem:[%s13818_s18 + $0x8] sm:$0xff] }
 0x767   : > { %v4365_v10 = vpop.f32.mrf.mxu0  ;;  %4942 = vmatpush1.msra.mxu1 %v16705_v21 }
 0x768   : > { %4943 = vmatprep.subr.mxu1 %v19403_v34 }
 0x769   : > { %v4368_v51 = vpop.f32.mrf.mxu0  ;;  %4944 = vmatpush1.msra.mxu1 %v16710_v7 }
 0x76a   : > { %12719 = vmatmul.mubr.msk.f32.gmra.mxu1 %vm961_vm0, %v4368_v51  ;;  %4945 = vmatprep.subr.mxu1 %v19403_v34  ;;  %v16754_v51 = vld [vmem:[%s13818_s18] sm:$0xff] }
 0x76b   : > { %v4370_v32 = vpop.f32.mrf.mxu0  ;;  %4946 = vmatpush1.msra.mxu1 %v16716_v44 }
 0x76c   : > { %4947 = vmatprep.subr.mxu1 %v19403_v34 }
 0x76d   : > { %v4373_v13 = vpop.f32.mrf.mxu0  ;;  %4948 = vmatpush1.msra.mxu1 %v16721_v29 }
 0x76e   : > { %12721 = vmatprep.mubr.msk.f32.mxu1 %vm961_vm0, %v4373_v13  ;;  %4949 = vmatprep.subr.mxu1 %v19403_v34  ;;  %v16760_v13 = vld [vmem:[%s13818_s18 + $0xf8] sm:$0xff] }
 0x76f   : > { %v4375_v49 = vpop.f32.mrf.mxu0  ;;  %4950 = vmatpush1.msra.mxu1 %v16727_v48 }
 0x770   : > { %4951 = vmatprep.subr.mxu1 %v19403_v34 }
 0x771   : > { %v4378_v54 = vpop.f32.mrf.mxu0  ;;  %4952 = vmatpush1.msra.mxu1 %v16732_v8 }
 0x772   : > { %12722 = vmatmul.mubr.msk.f32.gmra.mxu1 %vm961_vm0, %v4378_v54  ;;  %4953 = vmatprep.subr.mxu1 %v19403_v34  ;;  %v16765_v54 = vld [vmem:[%s13818_s18 + $0xf0] sm:$0xff] }
 0x773   : > { %v4380_v41 = vpop.f32.mrf.mxu0  ;;  %4954 = vmatpush1.msra.mxu1 %v16738_v58 }
 0x774   : > { %4955 = vmatprep.subr.mxu1 %v19403_v34 }
 0x775   : > { %v4383_v28 = vpop.f32.mrf.mxu0  ;;  %4956 = vmatpush1.msra.mxu1 %v16743_v42 }
 0x776   : > { %12724 = vmatprep.mubr.msk.f32.mxu1 %vm961_vm0, %v4383_v28  ;;  %4957 = vmatprep.subr.mxu1 %v19403_v34  ;;  %v16771_v28 = vld [vmem:[%s13818_s18 + $0xe8] sm:$0xff] }
 0x777   : > { %v4385_v52 = vpop.f32.mrf.mxu0  ;;  %4958 = vmatpush1.msra.mxu1 %v16749_v37 }
 0x778   : > { %4959 = vmatprep.subr.mxu1 %v19403_v34 }
 0x779   : > { %v4388_v10 = vpop.f32.mrf.mxu0  ;;  %4960 = vmatpush1.msra.mxu1 %v16754_v51 }
 0x77a   : > { %12725 = vmatmul.mubr.msk.f32.gmra.mxu1 %vm961_vm0, %v4388_v10  ;;  %4961 = vmatprep.subr.mxu1 %v19403_v34  ;;  %v16776_v10 = vld [vmem:[%s13818_s18 + $0xe0] sm:$0xff] }
 0x77b   : > { %v4390_v32 = vpop.f32.mrf.mxu0  ;;  %4962 = vmatpush2.msra.mxu1 %v16760_v13 }
 0x77c   : > { %4963 = vmatprep.subr.mxu1 %v19403_v34 }
 0x77d   : > { %v4393_v49 = vpop.f32.mrf.mxu0  ;;  %4964 = vmatpush2.msra.mxu1 %v16765_v54 }
 0x77e   : > { %12727 = vmatprep.mubr.msk.f32.mxu1 %vm961_vm0, %v4393_v49  ;;  %4965 = vmatprep.subr.mxu1 %v19403_v34  ;;  %v16782_v49 = vld [vmem:[%s13818_s18 + $0xd8] sm:$0xff] }
 0x77f   : > { %v4395_v41 = vpop.f32.mrf.mxu0  ;;  %4966 = vmatpush2.msra.mxu1 %v16771_v28 }
 0x780   : > { %4967 = vmatprep.subr.mxu1 %v19403_v34 }
 0x781   : > { %v4398_v52 = vpop.f32.mrf.mxu0  ;;  %4968 = vmatpush2.msra.mxu1 %v16776_v10 }
 0x782   : > { %12728 = vmatmul.mubr.msk.f32.gmra.mxu1 %vm961_vm0, %v4398_v52  ;;  %4969 = vmatprep.subr.mxu1 %v19403_v34 }
 0x783   : > { %v4400_v32 = vpop.f32.mrf.mxu0  ;;  %4970 = vmatpush2.msra.mxu1 %v16782_v49 }
 0x784   : > { %4971 = vmatprep.subr.mxu1 %v19403_v34 }
 0x785   : > { %v4403_v41 = vpop.f32.mrf.mxu0  ;;  %4972 = vmatpush2.msra.mxu1 %v16787_v57 }
 0x786   : > { %12730 = vmatprep.mubr.msk.f32.mxu1 %vm961_vm0, %v4403_v41  ;;  %4973 = vmatprep.subr.mxu1 %v19403_v34 }
 0x787   : > { %v4405_v52 = vpop.f32.mrf.mxu0  ;;  %4974 = vmatpush2.msra.mxu1 %v16793_v36 }
 0x788   : > { %4975 = vmatprep.subr.mxu1 %v19403_v34 }
 0x789   : > { %v4408_v32 = vpop.f32.mrf.mxu0  ;;  %4976 = vmatpush2.msra.mxu1 %v16798_v46 }
 0x78a   : > { %12731 = vmatmul.mubr.msk.f32.gmra.mxu1 %vm961_vm0, %v4408_v32  ;;  %4977 = vmatprep.subr.mxu1 %v19403_v34 }
 0x78b   : > { %v4410_v41 = vpop.f32.mrf.mxu0  ;;  %4978 = vmatpush2.msra.mxu1 %v16804_v15 }
 0x78c   : > { %4979 = vmatprep.subr.mxu1 %v19403_v34 }
 0x78d   : > { %v4413_v52 = vpop.f32.mrf.mxu0  ;;  %4980 = vmatpush2.msra.mxu1 %v16809_v19 }
 0x78e   : > { %12733 = vmatprep.mubr.msk.f32.mxu1 %vm961_vm0, %v4413_v52  ;;  %4981 = vmatprep.subr.mxu1 %v19403_v34 }
 0x78f   : > { %v4415_v32 = vpop.f32.mrf.mxu0  ;;  %4982 = vmatpush2.msra.mxu1 %v16815_v12 }
 0x790   : > { %4983 = vmatprep.subr.mxu1 %v19403_v34 }
 0x791   : > { %v4418_v41 = vpop.f32.mrf.mxu0  ;;  %4984 = vmatpush2.msra.mxu1 %v16820_v33 }
 0x792   : > { %12734 = vmatmul.mubr.msk.f32.gmra.mxu1 %vm961_vm0, %v4418_v41  ;;  %4985 = vmatprep.subr.mxu1 %v19403_v34 }
 0x793   : > { %v4420_v52 = vpop.f32.mrf.mxu0  ;;  %4986 = vmatpush2.msra.mxu1 %v16826_v14 }
 0x794   : > { %4987 = vmatprep.subr.mxu1 %v19403_v34 }
 0x795   : > { %v4423_v32 = vpop.f32.mrf.mxu0  ;;  %4988 = vmatpush2.msra.mxu1 %v16831_v31 }
 0x796   : > { %12736 = vmatprep.mubr.msk.f32.mxu1 %vm961_vm0, %v4423_v32  ;;  %4989 = vmatprep.subr.mxu1 %v19403_v34 }
 0x797   : > { %v4425_v41 = vpop.f32.mrf.mxu0  ;;  %4990 = vmatpush2.msra.mxu1 %v16837_v4 }
 0x798   : > { %4991 = vmatprep.subr.mxu1 %v19403_v34 }
 0x799   : > { %v4428_v52 = vpop.f32.mrf.mxu0  ;;  %4992 = vmatpush2.msra.mxu1 %v16842_v45 }
 0x79a   : > { %12737 = vmatmul.mubr.msk.f32.gmra.mxu1 %vm961_vm0, %v4428_v52 }
 0x79b   : > { %v4430_v24 = vpop.f32.mrf.mxu0 }
 0x79d   : > { %v4433_v27 = vpop.f32.mrf.mxu0 }
 0x79e   : > { %12739 = vmatprep.mubr.msk.f32.mxu1 %vm961_vm0, %v4433_v27 }
 0x79f   : > { %v4435_v32 = vpop.f32.mrf.mxu0 }
 0x7a1   : > { %v4438_v22 = vpop.f32.mrf.mxu0 }
 0x7a2   : > { %12740 = vmatmul.mubr.msk.f32.gmra.mxu1 %vm961_vm0, %v4438_v22 }
 0x7a3   : > { %v4440_v41 = vpop.f32.mrf.mxu0 }
 0x7a5   : > { %v4443_v50 = vpop.f32.mrf.mxu0 }
 0x7a6   : > { %12742 = vmatprep.mubr.msk.f32.mxu1 %vm961_vm0, %v4443_v50 }
 0x7a7   : > { %v4445_v26 = vpop.f32.mrf.mxu0 }
 0x7a9   : > { %v4448_v2 = vpop.f32.mrf.mxu0 }
 0x7aa   : > { %12743 = vmatmul.mubr.msk.f32.gmra.mxu1 %vm961_vm0, %v4448_v2 }
 0x7ab   : > { %v4450_v9 = vpop.f32.mrf.mxu0 }
 0x7ad   : > { %v4453_v5 = vpop.f32.mrf.mxu0 }
 0x7ae   : > { %12745 = vmatprep.mubr.msk.f32.mxu1 %vm961_vm0, %v4453_v5 }
 0x7af   : > { %v4455_v24 = vpop.f32.mrf.mxu0 }
 0x7b1   : > { %v4458_v52 = vpop.f32.mrf.mxu0 }
 0x7b2   : > { %12746 = vmatmul.mubr.msk.f32.gmra.mxu1 %vm961_vm0, %v4458_v52 }
 0x7b3   : > { %v4460_v27 = vpop.f32.mrf.mxu0 }
 0x7b5   : > { %v4463_v32 = vpop.f32.mrf.mxu0 }
 0x7b6   : > { %12748 = vmatprep.mubr.msk.f32.mxu1 %vm961_vm0, %v4463_v32 }
 0x7b7   : > { %v4465_v22 = vpop.f32.mrf.mxu0 }
 0x7b9   : > { %v4468_v41 = vpop.f32.mrf.mxu0 }
 0x7ba   : > { %12749 = vmatmul.mubr.msk.f32.gmra.mxu1 %vm961_vm0, %v4468_v41 }
 0x7bb   : > { %v4470_v26 = vpop.f32.mrf.mxu0 }
 0x7bc   : > { %v10755_v26 = vld [vmem:[%s19357_s1 + $0xe08] sm:$0xff] }
 0x7bd   : > { %v4473_v50 = vpop.f32.mrf.mxu0 }
 0x7be   : > { %12751 = vmatprep.mubr.msk.f32.mxu1 %vm961_vm0, %v4473_v50 }
 0x7bf   : > { %v4475_v9 = vpop.f32.mrf.mxu0 }
 0x7c1   : > { %v4478_v2 = vpop.f32.mrf.mxu0 }
 0x7c2   : > { %12752 = vmatmul.mubr.msk.f32.gmra.mxu1 %vm961_vm0, %v4478_v2  ;;  %v10754_v2 = vld [vmem:[%s19357_s1 + $0xe00] sm:$0xff] }
 0x7c3   : > { %v4480_v5 = vpop.f32.mrf.mxu0 }
 0x7c4   : > { %v10757_v5 = vld [vmem:[%s19357_s1 + $0xe18] sm:$0xff] }
 0x7c5   : > { %v4483_v24 = vpop.f32.mrf.mxu0 }
 0x7c6   : > { %12754 = vmatprep.mubr.msk.f32.mxu1 %vm961_vm0, %v4483_v24  ;;  %v10756_v24 = vld [vmem:[%s19357_s1 + $0xe10] sm:$0xff] }
 0x7c7   : > { %v4485_v52 = vpop.f32.mrf.mxu0 }
 0x7c8   : > { %v10759_v52 = vld [vmem:[%s19357_s1 + $0xe28] sm:$0xff] }
 0x7c9   : > { %v4488_v27 = vpop.f32.mrf.mxu0 }
 0x7ca   : > { %12755 = vmatmul.mubr.msk.f32.gmra.mxu1 %vm961_vm0, %v4488_v27  ;;  %v10758_v27 = vld [vmem:[%s19357_s1 + $0xe20] sm:$0xff] }
 0x7cb   : > { %v4490_v32 = vpop.f32.mrf.mxu0 }
 0x7cc   : > { %v10761_v32 = vld [vmem:[%s19357_s1 + $0xe38] sm:$0xff] }
 0x7cd   : > { %v4493_v22 = vpop.f32.mrf.mxu0 }
 0x7ce   : > { %12757 = vmatprep.mubr.msk.f32.mxu1 %vm961_vm0, %v4493_v22  ;;  %v10760_v22 = vld [vmem:[%s19357_s1 + $0xe30] sm:$0xff] }
 0x7cf   : > { %v4495_v41 = vpop.f32.mrf.mxu0 }
 0x7d0   : > { %v10763_v41 = vld [vmem:[%s19357_s1 + $0xe48] sm:$0xff] }
 0x7d1   : > { %v4498_v50 = vpop.f32.mrf.mxu0 }
 0x7d2   : > { %12758 = vmatmul.mubr.msk.f32.gmra.mxu1 %vm961_vm0, %v4498_v50  ;;  %v10765_v50 = vld [vmem:[%s19357_s1 + $0xe58] sm:$0xff] }
 0x7d3   : > { %v4500_v9 = vpop.f32.mrf.mxu0  ;;  %4993 = vmatprep.mubr.f32.mxu1 %v10755_v26  ;;  %v10762_v26 = vld [vmem:[%s19357_s1 + $0xe40] sm:$0xff] }
 0x7d4   : > { %v10764_v9 = vld [vmem:[%s19357_s1 + $0xe50] sm:$0xff] }
 0x7d6   : > { %4994 = vmatmul.mubr.f32.vlgmr.msra.gmra.mxu1 %v10754_v2  ;;  %v10767_v2 = vld [vmem:[%s19357_s1 + $0xe68] sm:$0xff] }
 0x7d7   : > { %4998 = vmatprep.mubr.f32.mxu1 %v10757_v5  ;;  %v10766_v5 = vld [vmem:[%s19357_s1 + $0xe60] sm:$0xff] }
 0x7da   : > { %4999 = vmatmul.mubr.f32.gmra.mxu1 %v10756_v24  ;;  %v10769_v24 = vld [vmem:[%s19357_s1 + $0xe78] sm:$0xff] }
 0x7db   : > { %5003 = vmatprep.mubr.f32.mxu1 %v10759_v52  ;;  %v10768_v52 = vld [vmem:[%s19357_s1 + $0xe70] sm:$0xff] }
 0x7de   : > { %5004 = vmatmul.mubr.f32.gmra.mxu1 %v10758_v27  ;;  %v10771_v27 = vld [vmem:[%s19357_s1 + $0xe88] sm:$0xff] }
 0x7df   : > { %5008 = vmatprep.mubr.f32.mxu1 %v10761_v32  ;;  %v10770_v32 = vld [vmem:[%s19357_s1 + $0xe80] sm:$0xff] }
 0x7e2   : > { %5009 = vmatmul.mubr.f32.gmra.mxu1 %v10760_v22  ;;  %v10773_v22 = vld [vmem:[%s19357_s1 + $0xe98] sm:$0xff] }
 0x7e3   : > { %5013 = vmatprep.mubr.f32.mxu1 %v10763_v41  ;;  %v10825_v41 = vld [vmem:[%s19358_s2 + $0x1f8] sm:$0xff] }
 0x7e4   : > { %12760 = vmatprep.subr.mxu0 %v10825_v41 }
 0x7e5   : > { %12761 = vmatpush3.msra.mxu0 %v10825_v41  ;;  %v10783_v41 = vld [vmem:[%s19357_s1 + $0xee8] sm:$0xff] }
 0x7e6   : > { %5014 = vmatmul.mubr.f32.gmra.mxu1 %v10762_v26  ;;  %v10772_v26 = vld [vmem:[%s19357_s1 + $0xe90] sm:$0xff] }
 0x7e7   : > { %5018 = vmatprep.mubr.f32.mxu1 %v10765_v50  ;;  %v10775_v50 = vld [vmem:[%s19357_s1 + $0xea8] sm:$0xff] }
 0x7ea   : > { %5019 = vmatmul.mubr.f32.gmra.mxu1 %v10764_v9  ;;  %v10774_v9 = vld [vmem:[%s19357_s1 + $0xea0] sm:$0xff] }
 0x7eb   : > { %5023 = vmatprep.mubr.f32.mxu1 %v10767_v2  ;;  %v10777_v2 = vld [vmem:[%s19357_s1 + $0xeb8] sm:$0xff] }
 0x7ee   : > { %5024 = vmatmul.mubr.f32.gmra.mxu1 %v10766_v5  ;;  %v10776_v5 = vld [vmem:[%s19357_s1 + $0xeb0] sm:$0xff] }
 0x7ef   : > { %5028 = vmatprep.mubr.f32.mxu1 %v10769_v24  ;;  %v10779_v24 = vld [vmem:[%s19357_s1 + $0xec8] sm:$0xff] }
 0x7f2   : > { %5029 = vmatmul.mubr.f32.gmra.mxu1 %v10768_v52  ;;  %v10778_v52 = vld [vmem:[%s19357_s1 + $0xec0] sm:$0xff] }
 0x7f3   : > { %5033 = vmatprep.mubr.f32.mxu1 %v10771_v27  ;;  %v10781_v27 = vld [vmem:[%s19357_s1 + $0xed8] sm:$0xff] }
 0x7f6   : > { %5034 = vmatmul.mubr.f32.gmra.mxu1 %v10770_v32  ;;  %v10824_v32 = vld [vmem:[%s19358_s2 + $0x1f0] sm:$0xff] }
 0x7f7   : > { %5038 = vmatprep.mubr.f32.mxu1 %v10773_v22  ;;  %12762 = vmatprep.subr.mxu0 %v10824_v32  ;;  %v10780_v22 = vld [vmem:[%s19357_s1 + $0xed0] sm:$0xff] }
 0x7f8   : > { %12763 = vmatpush3.msra.mxu0 %v10824_v32  ;;  %v10789_v32 = vld [vmem:[%s19357_s1 + $0xf18] sm:$0xff] }
 0x7fa   : > { %5039 = vmatmul.mubr.f32.gmra.mxu1 %v10772_v26  ;;  %v10782_v26 = vld [vmem:[%s19357_s1 + $0xee0] sm:$0xff] }
 0x7fb   : > { %5043 = vmatprep.mubr.f32.mxu1 %v10775_v50  ;;  %v10785_v50 = vld [vmem:[%s19357_s1 + $0xef8] sm:$0xff] }
 0x7fe   : > { %5044 = vmatmul.mubr.f32.gmra.mxu1 %v10774_v9  ;;  %v10823_v9 = vld [vmem:[%s19358_s2 + $0x1e8] sm:$0xff] }
 0x7ff   : > { %5048 = vmatprep.mubr.f32.mxu1 %v10777_v2  ;;  %v10822_v2 = vld [vmem:[%s19358_s2 + $0x1e0] sm:$0xff]  ;;  %12764 = vmatprep.subr.mxu0 %v10823_v9 }
 0x800   : > { %12765 = vmatpush3.msra.mxu0 %v10823_v9  ;;  %v10818_v9 = vld [vmem:[%s19358_s2 + $0x1c0] sm:$0xff] }
 0x801   : > { %12766 = vmatprep.subr.mxu0 %v10822_v2 }
 0x802   : > { %5049 = vmatmul.mubr.f32.gmra.mxu1 %v10776_v5  ;;  %v10784_v5 = vld [vmem:[%s19357_s1 + $0xef0] sm:$0xff]  ;;  %12767 = vmatpush3.msra.mxu0 %v10822_v2 }
 0x803   : > { %5053 = vmatprep.mubr.f32.mxu1 %v10779_v24  ;;  %v10787_v24 = vld [vmem:[%s19357_s1 + $0xf08] sm:$0xff] }
 0x806   : > { %5054 = vmatmul.mubr.f32.gmra.mxu1 %v10778_v52  ;;  %v10821_v52 = vld [vmem:[%s19358_s2 + $0x1d8] sm:$0xff] }
 0x807   : > { %5058 = vmatprep.mubr.f32.mxu1 %v10781_v27  ;;  %v10786_v27 = vld [vmem:[%s19357_s1 + $0xf00] sm:$0xff]  ;;  %12768 = vmatprep.subr.mxu0 %v10821_v52 }
 0x808   : > { %12769 = vmatpush3.msra.mxu0 %v10821_v52  ;;  %v10793_v52 = vld [vmem:[%s19357_s1 + $0xf38] sm:$0xff] }
 0x80a   : > { %5059 = vmatmul.mubr.f32.gmra.mxu1 %v10780_v22  ;;  %v10820_v22 = vld [vmem:[%s19358_s2 + $0x1d0] sm:$0xff] }
 0x80b   : > { %5063 = vmatprep.mubr.f32.mxu1 %v10783_v41  ;;  %12770 = vmatprep.subr.mxu0 %v10820_v22  ;;  %v10819_v41 = vld [vmem:[%s19358_s2 + $0x1c8] sm:$0xff] }
 0x80c   : > { %12771 = vmatpush3.msra.mxu0 %v10820_v22 }
 0x80d   : > { %12772 = vmatprep.subr.mxu0 %v10819_v41 }
 0x80e   : > { %5064 = vmatmul.mubr.f32.gmra.mxu1 %v10782_v26  ;;  %v10788_v26 = vld [vmem:[%s19357_s1 + $0xf10] sm:$0xff]  ;;  %12773 = vmatpush3.msra.mxu0 %v10819_v41 }
 0x80f   : > { %5068 = vmatprep.mubr.f32.mxu1 %v10785_v50  ;;  %v10791_v50 = vld [vmem:[%s19357_s1 + $0xf28] sm:$0xff]  ;;  %12774 = vmatprep.subr.mxu0 %v10818_v9 }
 0x810   : > { %12775 = vmatpush3.msra.mxu0 %v10818_v9  ;;  %v10796_v9 = vld [vmem:[%s19357_s1 + $0xf50] sm:$0xff] }
 0x811   : > { %5581 = vmatprep.subr.mxu0 %v19403_v34 }
 0x812   : > { %5069 = vmatmul.mubr.f32.gmra.mxu1 %v10784_v5 }
 0x813   : > { %5073 = vmatprep.mubr.f32.mxu1 %v10787_v24  ;;  %v10790_v24 = vld [vmem:[%s19357_s1 + $0xf20] sm:$0xff] }
 0x816   : > { %5074 = vmatmul.mubr.f32.gmra.mxu1 %v10786_v27  ;;  %v10792_v27 = vld [vmem:[%s19357_s1 + $0xf30] sm:$0xff] }
 0x817   : > { %5078 = vmatprep.mubr.f32.mxu1 %v10789_v32 }
 0x81a   : > { %v12714_v2 = vpop.f32.mrf.mxu1  ;;  %5079 = vmatmul.mubr.f32.gmra.mxu1 %v10788_v26  ;;  %v10794_v26 = vld [vmem:[%s19357_s1 + $0xf40] sm:$0xff] }
 0x81b   : > { %v16996_v5 = vadd.f32 %v12714_v2, %v16508_v20  ;;  %5083 = vmatprep.mubr.f32.mxu1 %v10791_v50  ;;  %v10795_v20 = vld [vmem:[%s19357_s1 + $0xf48] sm:$0xff]  ;;  %v10797_v50 = vld [vmem:[%s19357_s1 + $0xf58] sm:$0xff] }
 0x81c   : > { %v17008_v32 = vpop.f32.mrf.mxu1 }
 0x81d   : > { %19466 = vst [vmem:[#allocation94_spill] sm:$0xff] %v17008_v32 }
 0x81e   : > { %5084 = vmatmul.mubr.f32.gmra.mxu1 %v10790_v24 }
 0x81f   : > { %5088 = vmatprep.mubr.f32.mxu1 %v10793_v52 }
 0x822   : > { %v12717_v22 = vpop.f32.mrf.mxu1  ;;  %5089 = vmatmul.mubr.f32.gmra.mxu1 %v10792_v27  ;;  %v10798_v27 = vld [vmem:[%s19357_s1 + $0xf60] sm:$0xff] }
 0x823   : > { %v17014_v41 = vadd.f32 %v12717_v22, %v16526_v38  ;;  %5093 = vmatprep.mubr.f32.mxu1 %v10795_v20  ;;  %v10799_v38 = vld [vmem:[%s19357_s1 + $0xf68] sm:$0xff]  ;;  %v10801_v20 = vld [vmem:[%s19357_s1 + $0xf78] sm:$0xff]  ;;  %v10800_v22 = vld [vmem:[%s19357_s1 + $0xf70] sm:$0xff] }
 0x824   : > { %v17025_v2 = vpop.f32.mrf.mxu1 }
 0x825   : > { %19467 = vst [vmem:[#allocation95_spill] sm:$0xff] %v17025_v2 }
 0x826   : > { %5094 = vmatmul.mubr.f32.gmra.mxu1 %v10794_v26 }
 0x827   : > { %5098 = vmatprep.mubr.f32.mxu1 %v10797_v50 }
 0x82a   : > { %v12720_v24 = vpop.f32.mrf.mxu1  ;;  %5099 = vmatmul.mubr.f32.gmra.mxu1 %v10796_v9 }
 0x82b   : > { %v17031_v52 = vadd.f32 %v12720_v24, %v16543_v23  ;;  %5103 = vmatprep.mubr.f32.mxu1 %v10799_v38  ;;  %v10803_v23 = vld [vmem:[%s19357_s1 + $0xf88] sm:$0xff]  ;;  %v10802_v38 = vld [vmem:[%s19357_s1 + $0xf80] sm:$0xff]  ;;  %v10805_v24 = vld [vmem:[%s19357_s1 + $0xf98] sm:$0xff] }
 0x82c   : > { %v17042_v26 = vpop.f32.mrf.mxu1 }
 0x82d   : > { %19468 = vst [vmem:[#allocation96_spill] sm:$0xff] %v17042_v26 }
 0x82e   : > { %5104 = vmatmul.mubr.f32.gmra.mxu1 %v10798_v27  ;;  %v10804_v27 = vld [vmem:[%s19357_s1 + $0xf90] sm:$0xff] }
 0x82f   : > { %5108 = vmatprep.mubr.f32.mxu1 %v10801_v20 }
 0x832   : > { %v12723_v50 = vpop.f32.mrf.mxu1  ;;  %5109 = vmatmul.mubr.f32.gmra.mxu1 %v10800_v22 }
 0x833   : > { %v17048_v9 = vadd.f32 %v12723_v50, %v16560_v6  ;;  %5113 = vmatprep.mubr.f32.mxu1 %v10803_v23  ;;  %v10807_v6 = vld [vmem:[%s19357_s1 + $0xfa8] sm:$0xff]  ;;  %v10806_v50 = vld [vmem:[%s19357_s1 + $0xfa0] sm:$0xff] }
 0x834   : > { %v17059_v20 = vpop.f32.mrf.mxu1 }
 0x835   : > { %19469 = vst [vmem:[#allocation97_spill] sm:$0xff] %v17059_v20 }
 0x836   : > { %5114 = vmatmul.mubr.f32.gmra.mxu1 %v10802_v38  ;;  %v10809_v38 = vld [vmem:[%s19357_s1 + $0xfb8] sm:$0xff] }
 0x837   : > { %5118 = vmatprep.mubr.f32.mxu1 %v10805_v24  ;;  %v10808_v24 = vld [vmem:[%s19357_s1 + $0xfb0] sm:$0xff] }
 0x83a   : > { %v12726_v22 = vpop.f32.mrf.mxu1  ;;  %5119 = vmatmul.mubr.f32.gmra.mxu1 %v10804_v27 }
 0x83b   : > { %v17065_v23 = vadd.f32 %v12726_v22, %v16577_v55  ;;  %5123 = vmatprep.mubr.f32.mxu1 %v10807_v6  ;;  %v10811_v55 = vld [vmem:[%s19357_s1 + $0xfc8] sm:$0xff]  ;;  %v10810_v22 = vld [vmem:[%s19357_s1 + $0xfc0] sm:$0xff] }
 0x83c   : > { %v17076_v20 = vpop.f32.mrf.mxu1 }
 0x83d   : > { %19470 = vst [vmem:[#allocation98_spill] sm:$0xff] %v17076_v20 }
 0x83e   : > { %5124 = vmatmul.mubr.f32.gmra.mxu1 %v10806_v50  ;;  %v10813_v50 = vld [vmem:[%s19357_s1 + $0xfd8] sm:$0xff] }
 0x83f   : > { %5128 = vmatprep.mubr.f32.mxu1 %v10809_v38  ;;  %v10812_v38 = vld [vmem:[%s19357_s1 + $0xfd0] sm:$0xff] }
 0x842   : > { %v12729_v27 = vpop.f32.mrf.mxu1  ;;  %5129 = vmatmul.mubr.f32.gmra.mxu1 %v10808_v24 }
 0x843   : > { %v17082_v6 = vadd.f32 %v12729_v27, %v16594_v11  ;;  %5133 = vmatprep.mubr.f32.mxu1 %v10811_v55  ;;  %v10815_v11 = vld [vmem:[%s19357_s1 + $0xfe8] sm:$0xff]  ;;  %v10814_v27 = vld [vmem:[%s19357_s1 + $0xfe0] sm:$0xff] }
 0x844   : > { %v17093_v20 = vpop.f32.mrf.mxu1 }
 0x845   : > { %19471 = vst [vmem:[#allocation99_spill] sm:$0xff] %v17093_v20 }
 0x846   : > { %5134 = vmatmul.mubr.f32.gmra.mxu1 %v10810_v22  ;;  %v10817_v22 = vld [vmem:[%s19357_s1 + $0xff8] sm:$0xff] }
 0x847   : > { %5138 = vmatprep.mubr.f32.mxu1 %v10813_v50  ;;  %v10816_v50 = vld [vmem:[%s19357_s1 + $0xff0] sm:$0xff] }
 0x84a   : > { %v12732_v24 = vpop.f32.mrf.mxu1  ;;  %5139 = vmatmul.mubr.f32.gmra.mxu1 %v10812_v38 }
 0x84b   : > { %v17099_v55 = vadd.f32 %v12732_v24, %v16611_v3  ;;  %5143 = vmatprep.mubr.f32.mxu1 %v10815_v11 }
 0x84c   : > { %v17110_v20 = vpop.f32.mrf.mxu1 }
 0x84d   : > { %19472 = vst [vmem:[#allocation100_spill] sm:$0xff] %v17110_v20 }
 0x84e   : > { %5144 = vmatmul.mubr.f32.gmra.mxu1 %v10814_v27 }
 0x84f   : > { %5148 = vmatprep.mubr.f32.mxu1 %v10817_v22 }
 0x852   : > { %v12735_v38 = vpop.f32.mrf.mxu1  ;;  %5149 = vmatmul.mubr.f32.gmra.mxu1 %v10816_v50 }
 0x853   : > { %v17113_v3 = vadd.f32 %v12735_v38, %v16625_v0 }
 0x854   : > { %v17115_v11 = vpop.f32.mrf.mxu1 }
 0x855   : > { %19473 = vst [vmem:[#allocation101_spill] sm:$0xff] %v17115_v11 }
 0x85a   : > { %v12738_v24 = vpop.f32.mrf.mxu1 }
 0x85b   : > { %v17118_v26 = vadd.f32 %v12738_v24, %v16630_v25 }
 0x85c   : > { %v17120_v2 = vpop.f32.mrf.mxu1 }
 0x85d   : > { %19474 = vst [vmem:[#allocation102_spill] sm:$0xff] %v17120_v2 }
 0x862   : > { %v12741_v27 = vpop.f32.mrf.mxu1 }
 0x863   : > { %v17123_v22 = vadd.f32 %v12741_v27, %v16635_v63 }
 0x864   : > { %v17125_v32 = vpop.f32.mrf.mxu1 }
 0x865   : > { %19475 = vst [vmem:[#allocation103_spill] sm:$0xff] %v17125_v32 }
 0x86a   : > { %v12744_v20 = vpop.f32.mrf.mxu1 }
 0x86b   : > { %v17128_v50 = vadd.f32 %v12744_v20, %v16640_v47 }
 0x86c   : > { %v17130_v0 = vpop.f32.mrf.mxu1 }
 0x86d   : > { %19476 = vst [vmem:[#allocation104_spill] sm:$0xff] %v17130_v0 }
 0x872   : > { %v12747_v38 = vpop.f32.mrf.mxu1 }
 0x873   : > { %v17133_v11 = vadd.f32 %v12747_v38, %v16645_v53 }
 0x874   : > { %v17135_v25 = vpop.f32.mrf.mxu1 }
 0x875   : > { %19477 = vst [vmem:[#allocation105_spill] sm:$0xff] %v17135_v25 }
 0x87a   : > { %v12750_v24 = vpop.f32.mrf.mxu1 }
 0x87b   : > { %v17138_v2 = vadd.f32 %v12750_v24, %v16650_v56 }
 0x87c   : > { %v17140_v63 = vpop.f32.mrf.mxu1 }
 0x87d   : > { %19478 = vst [vmem:[#allocation106_spill] sm:$0xff] %v17140_v63 }
 0x882   : > { %v12753_v27 = vpop.f32.mrf.mxu1 }
 0x883   : > { %v17143_v32 = vadd.f32 %v12753_v27, %v16655_v40 }
 0x884   : > { %v17145_v47 = vpop.f32.mrf.mxu1 }
 0x88a   : > { %v12756_v20 = vpop.f32.mrf.mxu1 }
 0x88b   : > { %v17148_v0 = vadd.f32 %v12756_v20, %v16660_v16 }
 0x88c   : > { %v17150_v53 = vpop.f32.mrf.mxu1 }
 0x892   : > { %v12759_v38 = vpop.f32.mrf.mxu1 }
 0x893   : > { %v17153_v25 = vadd.f32 %v12759_v38, %v16665_v35 }
 0x894   : > { %v17155_v56 = vpop.f32.mrf.mxu1 }
 0x896   : > { %v4995_v24 = vpop.f32.mrf.mxu1 }
 0x897   : > { %12776 = vmatprep.mubr.msk.f32.mxu0 %vm961_vm0, %v4995_v24 }
 0x898   : > { %v4997_v63 = vpop.f32.mrf.mxu1 }
 0x89a   : > { %v5000_v40 = vpop.f32.mrf.mxu1 }
 0x89b   : > { %12777 = vmatmul.mubr.msk.f32.vlgmr.msra.gmra.mxu0 %vm961_vm0, %v5000_v40 }
 0x89c   : > { %v5002_v27 = vpop.f32.mrf.mxu1  ;;  %5582 = vmatpush1.msra.mxu0 %v16672_v43 }
 0x89d   : > { %5583 = vmatprep.subr.mxu0 %v19403_v34 }
 0x89e   : > { %v5005_v16 = vpop.f32.mrf.mxu1  ;;  %5584 = vmatpush1.msra.mxu0 %v16677_v61 }
 0x89f   : > { %12779 = vmatprep.mubr.msk.f32.mxu0 %vm961_vm0, %v5005_v16  ;;  %5585 = vmatprep.subr.mxu0 %v19403_v34 }
 0x8a0   : > { %v5007_v35 = vpop.f32.mrf.mxu1  ;;  %5586 = vmatpush1.msra.mxu0 %v16683_v17 }
 0x8a1   : > { %5587 = vmatprep.subr.mxu0 %v19403_v34 }
 0x8a2   : > { %v5010_v63 = vpop.f32.mrf.mxu1  ;;  %5588 = vmatpush1.msra.mxu0 %v16688_v39 }
 0x8a3   : > { %12780 = vmatmul.mubr.msk.f32.gmra.mxu0 %vm961_vm0, %v5010_v63  ;;  %5589 = vmatprep.subr.mxu0 %v19403_v34 }
 0x8a4   : > { %v5012_v43 = vpop.f32.mrf.mxu1  ;;  %5590 = vmatpush1.msra.mxu0 %v16694_v59 }
 0x8a5   : > { %5591 = vmatprep.subr.mxu0 %v19403_v34 }
 0x8a6   : > { %v5015_v61 = vpop.f32.mrf.mxu1  ;;  %5592 = vmatpush1.msra.mxu0 %v16699_v30 }
 0x8a7   : > { %12782 = vmatprep.mubr.msk.f32.mxu0 %vm961_vm0, %v5015_v61  ;;  %5593 = vmatprep.subr.mxu0 %v19403_v34 }
 0x8a8   : > { %v5017_v17 = vpop.f32.mrf.mxu1  ;;  %5594 = vmatpush1.msra.mxu0 %v16705_v21 }
 0x8a9   : > { %5595 = vmatprep.subr.mxu0 %v19403_v34 }
 0x8aa   : > { %v5020_v39 = vpop.f32.mrf.mxu1  ;;  %5596 = vmatpush1.msra.mxu0 %v16710_v7 }
 0x8ab   : > { %12783 = vmatmul.mubr.msk.f32.gmra.mxu0 %vm961_vm0, %v5020_v39  ;;  %5597 = vmatprep.subr.mxu0 %v19403_v34 }
 0x8ac   : > { %v5022_v59 = vpop.f32.mrf.mxu1  ;;  %5598 = vmatpush1.msra.mxu0 %v16716_v44 }
 0x8ad   : > { %5599 = vmatprep.subr.mxu0 %v19403_v34 }
 0x8ae   : > { %v5025_v30 = vpop.f32.mrf.mxu1  ;;  %5600 = vmatpush1.msra.mxu0 %v16721_v29 }
 0x8af   : > { %12785 = vmatprep.mubr.msk.f32.mxu0 %vm961_vm0, %v5025_v30  ;;  %5601 = vmatprep.subr.mxu0 %v19403_v34 }
 0x8b0   : > { %v5027_v21 = vpop.f32.mrf.mxu1  ;;  %5602 = vmatpush1.msra.mxu0 %v16727_v48 }
 0x8b1   : > { %5603 = vmatprep.subr.mxu0 %v19403_v34 }
 0x8b2   : > { %v5030_v7 = vpop.f32.mrf.mxu1  ;;  %5604 = vmatpush1.msra.mxu0 %v16732_v8 }
 0x8b3   : > { %12786 = vmatmul.mubr.msk.f32.gmra.mxu0 %vm961_vm0, %v5030_v7  ;;  %5605 = vmatprep.subr.mxu0 %v19403_v34 }
 0x8b4   : > { %v5032_v44 = vpop.f32.mrf.mxu1  ;;  %5606 = vmatpush1.msra.mxu0 %v16738_v58 }
 0x8b5   : > { %5607 = vmatprep.subr.mxu0 %v19403_v34 }
 0x8b6   : > { %v5035_v29 = vpop.f32.mrf.mxu1  ;;  %5608 = vmatpush1.msra.mxu0 %v16743_v42 }
 0x8b7   : > { %12788 = vmatprep.mubr.msk.f32.mxu0 %vm961_vm0, %v5035_v29  ;;  %5609 = vmatprep.subr.mxu0 %v19403_v34 }
 0x8b8   : > { %v5037_v48 = vpop.f32.mrf.mxu1  ;;  %5610 = vmatpush1.msra.mxu0 %v16749_v37 }
 0x8b9   : > { %5611 = vmatprep.subr.mxu0 %v19403_v34 }
 0x8ba   : > { %v5040_v8 = vpop.f32.mrf.mxu1  ;;  %5612 = vmatpush1.msra.mxu0 %v16754_v51 }
 0x8bb   : > { %12789 = vmatmul.mubr.msk.f32.gmra.mxu0 %vm961_vm0, %v5040_v8  ;;  %5613 = vmatprep.subr.mxu0 %v19403_v34 }
 0x8bc   : > { %v5042_v58 = vpop.f32.mrf.mxu1  ;;  %5614 = vmatpush2.msra.mxu0 %v16760_v13 }
 0x8bd   : > { %5615 = vmatprep.subr.mxu0 %v19403_v34 }
 0x8be   : > { %v5045_v42 = vpop.f32.mrf.mxu1  ;;  %5616 = vmatpush2.msra.mxu0 %v16765_v54 }
 0x8bf   : > { %12791 = vmatprep.mubr.msk.f32.mxu0 %vm961_vm0, %v5045_v42  ;;  %5617 = vmatprep.subr.mxu0 %v19403_v34 }
 0x8c0   : > { %v5047_v37 = vpop.f32.mrf.mxu1  ;;  %5618 = vmatpush2.msra.mxu0 %v16771_v28 }
 0x8c1   : > { %5619 = vmatprep.subr.mxu0 %v19403_v34  ;;  %v10859_v37 = vld [vmem:[%s19357_s1 + $0x1008] sm:$0xff] }
 0x8c2   : > { %v5050_v51 = vpop.f32.mrf.mxu1  ;;  %5620 = vmatpush2.msra.mxu0 %v16776_v10 }
 0x8c3   : > { %12792 = vmatmul.mubr.msk.f32.gmra.mxu0 %vm961_vm0, %v5050_v51  ;;  %5621 = vmatprep.subr.mxu0 %v19403_v34 }
 0x8c4   : > { %v5052_v13 = vpop.f32.mrf.mxu1  ;;  %5622 = vmatpush2.msra.mxu0 %v16782_v49 }
 0x8c5   : > { %5623 = vmatprep.subr.mxu0 %v19403_v34 }
 0x8c6   : > { %v5055_v54 = vpop.f32.mrf.mxu1  ;;  %5624 = vmatpush2.msra.mxu0 %v16787_v57 }
 0x8c7   : > { %12794 = vmatprep.mubr.msk.f32.mxu0 %vm961_vm0, %v5055_v54  ;;  %5625 = vmatprep.subr.mxu0 %v19403_v34  ;;  %v10858_v54 = vld [vmem:[%s19357_s1 + $0x1000] sm:$0xff] }
 0x8c8   : > { %v5057_v28 = vpop.f32.mrf.mxu1  ;;  %5626 = vmatpush2.msra.mxu0 %v16793_v36 }
 0x8c9   : > { %5627 = vmatprep.subr.mxu0 %v19403_v34  ;;  %v10861_v28 = vld [vmem:[%s19357_s1 + $0x1018] sm:$0xff] }
 0x8ca   : > { %v5060_v10 = vpop.f32.mrf.mxu1  ;;  %5628 = vmatpush2.msra.mxu0 %v16798_v46 }
 0x8cb   : > { %12795 = vmatmul.mubr.msk.f32.gmra.mxu0 %vm961_vm0, %v5060_v10  ;;  %5629 = vmatprep.subr.mxu0 %v19403_v34  ;;  %v10860_v10 = vld [vmem:[%s19357_s1 + $0x1010] sm:$0xff] }
 0x8cc   : > { %v5062_v49 = vpop.f32.mrf.mxu1  ;;  %5630 = vmatpush2.msra.mxu0 %v16804_v15 }
 0x8cd   : > { %5631 = vmatprep.subr.mxu0 %v19403_v34  ;;  %v10863_v49 = vld [vmem:[%s19357_s1 + $0x1028] sm:$0xff] }
 0x8ce   : > { %v5065_v57 = vpop.f32.mrf.mxu1  ;;  %5632 = vmatpush2.msra.mxu0 %v16809_v19 }
 0x8cf   : > { %12797 = vmatprep.mubr.msk.f32.mxu0 %vm961_vm0, %v5065_v57  ;;  %5633 = vmatprep.subr.mxu0 %v19403_v34  ;;  %v10862_v57 = vld [vmem:[%s19357_s1 + $0x1020] sm:$0xff] }
 0x8d0   : > { %v5067_v36 = vpop.f32.mrf.mxu1  ;;  %5634 = vmatpush2.msra.mxu0 %v16815_v12 }
 0x8d1   : > { %5635 = vmatprep.subr.mxu0 %v19403_v34  ;;  %v10865_v36 = vld [vmem:[%s19357_s1 + $0x1038] sm:$0xff] }
 0x8d2   : > { %v5070_v46 = vpop.f32.mrf.mxu1  ;;  %5636 = vmatpush2.msra.mxu0 %v16820_v33 }
 0x8d3   : > { %12798 = vmatmul.mubr.msk.f32.gmra.mxu0 %vm961_vm0, %v5070_v46  ;;  %5637 = vmatprep.subr.mxu0 %v19403_v34  ;;  %v10864_v46 = vld [vmem:[%s19357_s1 + $0x1030] sm:$0xff] }
 0x8d4   : > { %v5072_v15 = vpop.f32.mrf.mxu1  ;;  %5638 = vmatpush2.msra.mxu0 %v16826_v14 }
 0x8d5   : > { %5639 = vmatprep.subr.mxu0 %v19403_v34  ;;  %v10867_v15 = vld [vmem:[%s19357_s1 + $0x1048] sm:$0xff] }
 0x8d6   : > { %v5075_v19 = vpop.f32.mrf.mxu1  ;;  %5640 = vmatpush2.msra.mxu0 %v16831_v31 }
 0x8d7   : > { %12800 = vmatprep.mubr.msk.f32.mxu0 %vm961_vm0, %v5075_v19  ;;  %5641 = vmatprep.subr.mxu0 %v19403_v34  ;;  %v10866_v19 = vld [vmem:[%s19357_s1 + $0x1040] sm:$0xff] }
 0x8d8   : > { %v5077_v12 = vpop.f32.mrf.mxu1  ;;  %5642 = vmatpush2.msra.mxu0 %v16837_v4 }
 0x8d9   : > { %5643 = vmatprep.subr.mxu0 %v19403_v34  ;;  %v10869_v12 = vld [vmem:[%s19357_s1 + $0x1058] sm:$0xff] }
 0x8da   : > { %v5080_v33 = vpop.f32.mrf.mxu1  ;;  %5644 = vmatpush2.msra.mxu0 %v16842_v45 }
 0x8db   : > { %12801 = vmatmul.mubr.msk.f32.gmra.mxu0 %vm961_vm0, %v5080_v33  ;;  %v10868_v33 = vld [vmem:[%s19357_s1 + $0x1050] sm:$0xff] }
 0x8dc   : > { %v5082_v14 = vpop.f32.mrf.mxu1 }
 0x8dd   : > { %v10871_v14 = vld [vmem:[%s19357_s1 + $0x1068] sm:$0xff] }
 0x8de   : > { %v5085_v20 = vpop.f32.mrf.mxu1 }
 0x8df   : > { %12803 = vmatprep.mubr.msk.f32.mxu0 %vm961_vm0, %v5085_v20  ;;  %v10870_v20 = vld [vmem:[%s19357_s1 + $0x1060] sm:$0xff] }
 0x8e0   : > { %v5087_v38 = vpop.f32.mrf.mxu1 }
 0x8e1   : > { %v10873_v38 = vld [vmem:[%s19357_s1 + $0x1078] sm:$0xff] }
 0x8e2   : > { %v5090_v31 = vpop.f32.mrf.mxu1 }
 0x8e3   : > { %12804 = vmatmul.mubr.msk.f32.gmra.mxu0 %vm961_vm0, %v5090_v31  ;;  %v10872_v31 = vld [vmem:[%s19357_s1 + $0x1070] sm:$0xff] }
 0x8e4   : > { %v5092_v24 = vpop.f32.mrf.mxu1 }
 0x8e5   : > { %v10875_v24 = vld [vmem:[%s19357_s1 + $0x1088] sm:$0xff] }
 0x8e6   : > { %v5095_v40 = vpop.f32.mrf.mxu1 }
 0x8e7   : > { %12806 = vmatprep.mubr.msk.f32.mxu0 %vm961_vm0, %v5095_v40  ;;  %v10874_v40 = vld [vmem:[%s19357_s1 + $0x1080] sm:$0xff] }
 0x8e8   : > { %v5097_v4 = vpop.f32.mrf.mxu1 }
 0x8e9   : > { %v10877_v4 = vld [vmem:[%s19357_s1 + $0x1098] sm:$0xff] }
 0x8ea   : > { %v5100_v27 = vpop.f32.mrf.mxu1 }
 0x8eb   : > { %12807 = vmatmul.mubr.msk.f32.gmra.mxu0 %vm961_vm0, %v5100_v27  ;;  %v10929_v27 = vld [vmem:[%s19358_s2 + $0x238] sm:$0xff] }
 0x8ec   : > { %v5102_v34 = vpop.f32.mrf.mxu1  ;;  %12824 = vmatprep.subr.mxu1 %v10929_v27 }
 0x8ed   : > { %v10876_v34 = vld [vmem:[%s19357_s1 + $0x1090] sm:$0xff]  ;;  %12825 = vmatpush3.msra.mxu1 %v10929_v27  ;;  %v10905_v27 = vld [vmem:[%s19357_s1 + $0x1178] sm:$0xff] }
 0x8ee   : > { %v5105_v45 = vpop.f32.mrf.mxu1 }
 0x8ef   : > { %12809 = vmatprep.mubr.msk.f32.mxu0 %vm961_vm0, %v5105_v45  ;;  %v10879_v45 = vld [vmem:[%s19357_s1 + $0x10a8] sm:$0xff] }
 0x8f0   : > { %v5107_v16 = vpop.f32.mrf.mxu1 }
 0x8f1   : > { %v10878_v16 = vld [vmem:[%s19357_s1 + $0x10a0] sm:$0xff] }
 0x8f2   : > { %v5110_v35 = vpop.f32.mrf.mxu1 }
 0x8f3   : > { %12810 = vmatmul.mubr.msk.f32.gmra.mxu0 %vm961_vm0, %v5110_v35  ;;  %v10881_v35 = vld [vmem:[%s19357_s1 + $0x10b8] sm:$0xff] }
 0x8f4   : > { %v5112_v63 = vpop.f32.mrf.mxu1 }
 0x8f5   : > { %v10880_v63 = vld [vmem:[%s19357_s1 + $0x10b0] sm:$0xff] }
 0x8f6   : > { %v5115_v43 = vpop.f32.mrf.mxu1 }
 0x8f7   : > { %12812 = vmatprep.mubr.msk.f32.mxu0 %vm961_vm0, %v5115_v43  ;;  %v10883_v43 = vld [vmem:[%s19357_s1 + $0x10c8] sm:$0xff] }
 0x8f8   : > { %v5117_v61 = vpop.f32.mrf.mxu1 }
 0x8f9   : > { %v10882_v61 = vld [vmem:[%s19357_s1 + $0x10c0] sm:$0xff] }
 0x8fa   : > { %v5120_v17 = vpop.f32.mrf.mxu1 }
 0x8fb   : > { %12813 = vmatmul.mubr.msk.f32.gmra.mxu0 %vm961_vm0, %v5120_v17  ;;  %v10885_v17 = vld [vmem:[%s19357_s1 + $0x10d8] sm:$0xff] }
 0x8fc   : > { %v5122_v39 = vpop.f32.mrf.mxu1 }
 0x8fd   : > { %v10928_v39 = vld [vmem:[%s19358_s2 + $0x230] sm:$0xff] }
 0x8fe   : > { %v5125_v59 = vpop.f32.mrf.mxu1  ;;  %12826 = vmatprep.subr.mxu1 %v10928_v39 }
 0x8ff   : > { %12815 = vmatprep.mubr.msk.f32.mxu0 %vm961_vm0, %v5125_v59  ;;  %v10884_v59 = vld [vmem:[%s19357_s1 + $0x10d0] sm:$0xff]  ;;  %12827 = vmatpush3.msra.mxu1 %v10928_v39 }
 0x900   : > { %v5127_v30 = vpop.f32.mrf.mxu1 }
 0x901   : > { %v10887_v30 = vld [vmem:[%s19357_s1 + $0x10e8] sm:$0xff] }
 0x902   : > { %v5130_v21 = vpop.f32.mrf.mxu1 }
 0x903   : > { %12816 = vmatmul.mubr.msk.f32.gmra.mxu0 %vm961_vm0, %v5130_v21  ;;  %v10886_v21 = vld [vmem:[%s19357_s1 + $0x10e0] sm:$0xff] }
 0x904   : > { %v5132_v7 = vpop.f32.mrf.mxu1 }
 0x905   : > { %v10889_v7 = vld [vmem:[%s19357_s1 + $0x10f8] sm:$0xff] }
 0x906   : > { %v5135_v44 = vpop.f32.mrf.mxu1 }
 0x907   : > { %12818 = vmatprep.mubr.msk.f32.mxu0 %vm961_vm0, %v5135_v44  ;;  %v10927_v44 = vld [vmem:[%s19358_s2 + $0x228] sm:$0xff] }
 0x908   : > { %v5137_v29 = vpop.f32.mrf.mxu1  ;;  %12828 = vmatprep.subr.mxu1 %v10927_v44 }
 0x909   : > { %v10926_v29 = vld [vmem:[%s19358_s2 + $0x220] sm:$0xff]  ;;  %12829 = vmatpush3.msra.mxu1 %v10927_v44 }
 0x90a   : > { %v5140_v48 = vpop.f32.mrf.mxu1  ;;  %12830 = vmatprep.subr.mxu1 %v10926_v29 }
 0x90b   : > { %12819 = vmatmul.mubr.msk.f32.gmra.mxu0 %vm961_vm0, %v5140_v48  ;;  %v10888_v48 = vld [vmem:[%s19357_s1 + $0x10f0] sm:$0xff]  ;;  %12831 = vmatpush3.msra.mxu1 %v10926_v29 }
 0x90c   : > { %v5142_v8 = vpop.f32.mrf.mxu1 }
 0x90d   : > { %v10891_v8 = vld [vmem:[%s19357_s1 + $0x1108] sm:$0xff] }
 0x90e   : > { %v5145_v58 = vpop.f32.mrf.mxu1 }
 0x90f   : > { %12821 = vmatprep.mubr.msk.f32.mxu0 %vm961_vm0, %v5145_v58  ;;  %v10925_v58 = vld [vmem:[%s19358_s2 + $0x218] sm:$0xff] }
 0x910   : > { %v5147_v42 = vpop.f32.mrf.mxu1  ;;  %12832 = vmatprep.subr.mxu1 %v10925_v58 }
 0x911   : > { %v10890_v42 = vld [vmem:[%s19357_s1 + $0x1100] sm:$0xff]  ;;  %12833 = vmatpush3.msra.mxu1 %v10925_v58  ;;  %v10917_v58 = vld [vmem:[%s19357_s1 + $0x11d8] sm:$0xff] }
 0x912   : > { %v5150_v51 = vpop.f32.mrf.mxu1 }
 0x913   : > { %12822 = vmatmul.mubr.msk.f32.gmra.mxu0 %vm961_vm0, %v5150_v51  ;;  %v10924_v51 = vld [vmem:[%s19358_s2 + $0x210] sm:$0xff] }
 0x914   : > { %v5152_v13 = vpop.f32.mrf.mxu1  ;;  %5645 = vmatprep.mubr.f32.mxu0 %v10859_v37  ;;  %v10893_v37 = vld [vmem:[%s19357_s1 + $0x1118] sm:$0xff]  ;;  %12834 = vmatprep.subr.mxu1 %v10924_v51 }
 0x915   : > { %12835 = vmatpush3.msra.mxu1 %v10924_v51  ;;  %v10923_v13 = vld [vmem:[%s19358_s2 + $0x208] sm:$0xff] }
 0x916   : > { %12836 = vmatprep.subr.mxu1 %v10923_v13 }
 0x917   : > { %5646 = vmatmul.mubr.f32.vlgmr.msra.gmra.mxu0 %v10858_v54  ;;  %v10892_v54 = vld [vmem:[%s19357_s1 + $0x1110] sm:$0xff]  ;;  %12837 = vmatpush3.msra.mxu1 %v10923_v13 }
 0x918   : > { %5650 = vmatprep.mubr.f32.mxu0 %v10861_v28  ;;  %v10895_v28 = vld [vmem:[%s19357_s1 + $0x1128] sm:$0xff] }
 0x91b   : > { %5651 = vmatmul.mubr.f32.gmra.mxu0 %v10860_v10  ;;  %v10922_v10 = vld [vmem:[%s19358_s2 + $0x200] sm:$0xff] }
 0x91c   : > { %5655 = vmatprep.mubr.f32.mxu0 %v10863_v49  ;;  %12838 = vmatprep.subr.mxu1 %v10922_v10 }
 0x91d   : > { %12839 = vmatpush3.msra.mxu1 %v10922_v10  ;;  %v10920_v10 = vld [vmem:[%s19357_s1 + $0x11f0] sm:$0xff] }
 0x91f   : > { %5656 = vmatmul.mubr.f32.gmra.mxu0 %v10862_v57 }
 0x920   : > { %5660 = vmatprep.mubr.f32.mxu0 %v10865_v36  ;;  %v10894_v36 = vld [vmem:[%s19357_s1 + $0x1120] sm:$0xff] }
 0x923   : > { %5661 = vmatmul.mubr.f32.gmra.mxu0 %v10864_v46  ;;  %v10897_v46 = vld [vmem:[%s19357_s1 + $0x1138] sm:$0xff] }
 0x924   : > { %5665 = vmatprep.mubr.f32.mxu0 %v10867_v15  ;;  %v10896_v15 = vld [vmem:[%s19357_s1 + $0x1130] sm:$0xff] }
 0x927   : > { %5666 = vmatmul.mubr.f32.gmra.mxu0 %v10866_v19 }
 0x928   : > { %5670 = vmatprep.mubr.f32.mxu0 %v10869_v12 }
 0x92b   : > { %5671 = vmatmul.mubr.f32.gmra.mxu0 %v10868_v33 }
 0x92c   : > { %5675 = vmatprep.mubr.f32.mxu0 %v10871_v14  ;;  %v10898_v14 = vld [vmem:[%s19357_s1 + $0x1140] sm:$0xff] }
 0x92f   : > { %5676 = vmatmul.mubr.f32.gmra.mxu0 %v10870_v20  ;;  %v10901_v20 = vld [vmem:[%s19357_s1 + $0x1158] sm:$0xff] }
 0x930   : > { %5680 = vmatprep.mubr.f32.mxu0 %v10873_v38  ;;  %v10900_v38 = vld [vmem:[%s19357_s1 + $0x1150] sm:$0xff] }
 0x933   : > { %5681 = vmatmul.mubr.f32.gmra.mxu0 %v10872_v31 }
 0x934   : > { %5685 = vmatprep.mubr.f32.mxu0 %v10875_v24 }
 0x937   : > { %5686 = vmatmul.mubr.f32.gmra.mxu0 %v10874_v40 }
 0x938   : > { %5690 = vmatprep.mubr.f32.mxu0 %v10877_v4  ;;  %v10902_v4 = vld [vmem:[%s19357_s1 + $0x1160] sm:$0xff] }
 0x93b   : > { %5691 = vmatmul.mubr.f32.gmra.mxu0 %v10876_v34  ;;  %v10904_v34 = vld [vmem:[%s19357_s1 + $0x1170] sm:$0xff] }
 0x93c   : > { %5695 = vmatprep.mubr.f32.mxu0 %v10879_v45 }
 0x93f   : > { %5696 = vmatmul.mubr.f32.gmra.mxu0 %v10878_v16 }
 0x940   : > { %5700 = vmatprep.mubr.f32.mxu0 %v10881_v35 }
 0x943   : > { %5701 = vmatmul.mubr.f32.gmra.mxu0 %v10880_v63  ;;  %v10906_v63 = vld [vmem:[%s19357_s1 + $0x1180] sm:$0xff] }
 0x944   : > { %5705 = vmatprep.mubr.f32.mxu0 %v10883_v43  ;;  %v10909_v43 = vld [vmem:[%s19357_s1 + $0x1198] sm:$0xff] }
 0x947   : > { %5706 = vmatmul.mubr.f32.gmra.mxu0 %v10882_v61  ;;  %v10908_v61 = vld [vmem:[%s19357_s1 + $0x1190] sm:$0xff] }
 0x948   : > { %5710 = vmatprep.mubr.f32.mxu0 %v10885_v17 }
 0x94b   : > { %5711 = vmatmul.mubr.f32.gmra.mxu0 %v10884_v59 }
 0x94c   : > { %5715 = vmatprep.mubr.f32.mxu0 %v10887_v30  ;;  %v10910_v30 = vld [vmem:[%s19357_s1 + $0x11a0] sm:$0xff] }
 0x94f   : > { %5716 = vmatmul.mubr.f32.gmra.mxu0 %v10886_v21  ;;  %v10913_v21 = vld [vmem:[%s19357_s1 + $0x11b8] sm:$0xff] }
 0x950   : > { %5720 = vmatprep.mubr.f32.mxu0 %v10889_v7  ;;  %v10912_v7 = vld [vmem:[%s19357_s1 + $0x11b0] sm:$0xff] }
 0x953   : > { %5721 = vmatmul.mubr.f32.gmra.mxu0 %v10888_v48 }
 0x954   : > { %5725 = vmatprep.mubr.f32.mxu0 %v10891_v8  ;;  %v10914_v8 = vld [vmem:[%s19357_s1 + $0x11c0] sm:$0xff] }
 0x957   : > { %5726 = vmatmul.mubr.f32.gmra.mxu0 %v10890_v42  ;;  %v10916_v42 = vld [vmem:[%s19357_s1 + $0x11d0] sm:$0xff] }
 0x958   : > { %5730 = vmatprep.mubr.f32.mxu0 %v10893_v37 }
 0x95b   : > { %v12778_v49 = vpop.f32.mrf.mxu0  ;;  %5731 = vmatmul.mubr.f32.gmra.mxu0 %v10892_v54  ;;  %v10918_v54 = vld [vmem:[%s19357_s1 + $0x11e0] sm:$0xff] }
 0x95c   : > { %v17388_v57 = vadd.f32 %v12778_v49, %v16996_v5  ;;  %5735 = vmatprep.mubr.f32.mxu0 %v10895_v28  ;;  %v10899_v5 = vld [vmem:[%s19357_s1 + $0x1148] sm:$0xff]  ;;  %v10921_v28 = vld [vmem:[%s19357_s1 + $0x11f8] sm:$0xff] }
 0x95d   : > { %v17399_v19 = vpop.f32.mrf.mxu0 }
 0x95f   : > { %5736 = vmatmul.mubr.f32.gmra.mxu0 %v10894_v36 }
 0x960   : > { %5740 = vmatprep.mubr.f32.mxu0 %v10897_v46 }
 0x963   : > { %v12781_v12 = vpop.f32.mrf.mxu0  ;;  %5741 = vmatmul.mubr.f32.gmra.mxu0 %v10896_v15 }
 0x964   : > { %v17405_v33 = vadd.f32 %v12781_v12, %v17014_v41  ;;  %5745 = vmatprep.mubr.f32.mxu0 %v10899_v5  ;;  %v10903_v41 = vld [vmem:[%s19357_s1 + $0x1168] sm:$0xff] }
 0x965   : > { %v17416_v31 = vpop.f32.mrf.mxu0 }
 0x967   : > { %5746 = vmatmul.mubr.f32.gmra.mxu0 %v10898_v14 }
 0x968   : > { %5750 = vmatprep.mubr.f32.mxu0 %v10901_v20 }
 0x96b   : > { %v12784_v24 = vpop.f32.mrf.mxu0  ;;  %5751 = vmatmul.mubr.f32.gmra.mxu0 %v10900_v38 }
 0x96c   : > { %v17422_v40 = vadd.f32 %v12784_v24, %v17031_v52  ;;  %5755 = vmatprep.mubr.f32.mxu0 %v10903_v41  ;;  %v10907_v52 = vld [vmem:[%s19357_s1 + $0x1188] sm:$0xff] }
 0x96d   : > { %v17433_v45 = vpop.f32.mrf.mxu0 }
 0x96f   : > { %5756 = vmatmul.mubr.f32.gmra.mxu0 %v10902_v4 }
 0x970   : > { %5760 = vmatprep.mubr.f32.mxu0 %v10905_v27 }
 0x973   : > { %v12787_v16 = vpop.f32.mrf.mxu0  ;;  %5761 = vmatmul.mubr.f32.gmra.mxu0 %v10904_v34 }
 0x974   : > { %v17439_v35 = vadd.f32 %v12787_v16, %v17048_v9  ;;  %5765 = vmatprep.mubr.f32.mxu0 %v10907_v52  ;;  %v10911_v9 = vld [vmem:[%s19357_s1 + $0x11a8] sm:$0xff] }
 0x975   : > { %v17450_v17 = vpop.f32.mrf.mxu0 }
 0x977   : > { %5766 = vmatmul.mubr.f32.gmra.mxu0 %v10906_v63 }
 0x978   : > { %5770 = vmatprep.mubr.f32.mxu0 %v10909_v43 }
 0x97b   : > { %v12790_v39 = vpop.f32.mrf.mxu0  ;;  %5771 = vmatmul.mubr.f32.gmra.mxu0 %v10908_v61 }
 0x97c   : > { %v17456_v59 = vadd.f32 %v12790_v39, %v17065_v23  ;;  %5775 = vmatprep.mubr.f32.mxu0 %v10911_v9  ;;  %v10915_v23 = vld [vmem:[%s19357_s1 + $0x11c8] sm:$0xff] }
 0x97d   : > { %v17467_v44 = vpop.f32.mrf.mxu0 }
 0x97f   : > { %5776 = vmatmul.mubr.f32.gmra.mxu0 %v10910_v30  ;;  %v11010_v30 = vld [vmem:[%s19360_s4 + $0xf8] sm:$0xff] }
 0x980   : > { %5780 = vmatprep.mubr.f32.mxu0 %v10913_v21  ;;  %12968 = vmatprep.subr.mxu0 %v11010_v30 }
 0x981   : > { %12969 = vmatpush3.msra.mxu0 %v11010_v30 }
 0x983   : > { %v12793_v29 = vpop.f32.mrf.mxu0  ;;  %5781 = vmatmul.mubr.f32.gmra.mxu0 %v10912_v7 }
 0x984   : > { %v17473_v48 = vadd.f32 %v12793_v29, %v17082_v6  ;;  %5785 = vmatprep.mubr.f32.mxu0 %v10915_v23  ;;  %v10919_v6 = vld [vmem:[%s19357_s1 + $0x11e8] sm:$0xff]  ;;  %v6413_v23 = vld [vmem:[%s19360_s4 + $0x70] sm:$0xff] }
 0x985   : > { %v17484_v37 = vpop.f32.mrf.mxu0 }
 0x987   : > { %5786 = vmatmul.mubr.f32.gmra.mxu0 %v10914_v8 }
 0x988   : > { %5790 = vmatprep.mubr.f32.mxu0 %v10917_v58 }
 0x98b   : > { %v12796_v51 = vpop.f32.mrf.mxu0  ;;  %5791 = vmatmul.mubr.f32.gmra.mxu0 %v10916_v42 }
 0x98c   : > { %v17490_v13 = vadd.f32 %v12796_v51, %v17099_v55  ;;  %5795 = vmatprep.mubr.f32.mxu0 %v10919_v6 }
 0x98d   : > { %v17501_v49 = vpop.f32.mrf.mxu0 }
 0x98f   : > { %5796 = vmatmul.mubr.f32.gmra.mxu0 %v10918_v54 }
 0x990   : > { %5800 = vmatprep.mubr.f32.mxu0 %v10921_v28 }
 0x993   : > { %v12799_v36 = vpop.f32.mrf.mxu0  ;;  %5801 = vmatmul.mubr.f32.gmra.mxu0 %v10920_v10 }
 0x994   : > { %v17504_v55 = vadd.f32 %v12799_v36, %v17113_v3 }
 0x995   : > { %v17506_v46 = vpop.f32.mrf.mxu0 }
 0x99b   : > { %v12802_v15 = vpop.f32.mrf.mxu0 }
 0x99c   : > { %v17509_v5 = vadd.f32 %v12802_v15, %v17118_v26 }
 0x99d   : > { %v17511_v12 = vpop.f32.mrf.mxu0 }
 0x9a3   : > { %v12805_v14 = vpop.f32.mrf.mxu0 }
 0x9a4   : > { %v17514_v20 = vadd.f32 %v12805_v14, %v17123_v22 }
 0x9a5   : > { %v17516_v38 = vpop.f32.mrf.mxu0 }
 0x9ab   : > { %v12808_v41 = vpop.f32.mrf.mxu0 }
 0x9ac   : > { %v17519_v24 = vadd.f32 %v12808_v41, %v17128_v50 }
 0x9ad   : > { %v17521_v3 = vpop.f32.mrf.mxu0 }
 0x9b3   : > { %v12811_v4 = vpop.f32.mrf.mxu0 }
 0x9b4   : > { %v17524_v27 = vadd.f32 %v12811_v4, %v17133_v11 }
 0x9b5   : > { %v17526_v26 = vpop.f32.mrf.mxu0 }
 0x9bb   : > { %v12814_v34 = vpop.f32.mrf.mxu0 }
 0x9bc   : > { %v17529_v52 = vadd.f32 %v12814_v34, %v17138_v2 }
 0x9bd   : > { %v17531_v22 = vpop.f32.mrf.mxu0 }
 0x9c3   : > { %v12817_v16 = vpop.f32.mrf.mxu0 }
 0x9c4   : > { %v17534_v63 = vadd.f32 %v12817_v16, %v17143_v32  ;;  %v6414_v32 = vld [vmem:[%s19360_s4 + $0x78] sm:$0xff] }
 0x9c5   : > { %v17536_v50 = vpop.f32.mrf.mxu0  ;;  %12888 = vmatprep.subr.mxu1 %v6414_v32 }
 0x9cb   : > { %v12820_v43 = vpop.f32.mrf.mxu0 }
 0x9cc   : > { %v17539_v61 = vadd.f32 %v12820_v43, %v17148_v0  ;;  %v11009_v0 = vld [vmem:[%s19360_s4 + $0xf0] sm:$0xff] }
 0x9cd   : > { %v17541_v11 = vpop.f32.mrf.mxu0  ;;  %12970 = vmatprep.subr.mxu0 %v11009_v0 }
 0x9ce   : > { %12971 = vmatpush3.msra.mxu0 %v11009_v0 }
 0x9d3   : > { %v12823_v9 = vpop.f32.mrf.mxu0 }
 0x9d4   : > { %v17544_v39 = vadd.f32 %v12823_v9, %v17153_v25 }
 0x9d5   : > { %v17546_v2 = vpop.f32.mrf.mxu0 }
 0x9d7   : > { %v5647_v21 = vpop.f32.mrf.mxu0 }
 0x9d8   : > { %12840 = vmatprep.mubr.msk.f32.mxu1 %vm961_vm0, %v5647_v21 }
 0x9d9   : > { %v5649_v25 = vpop.f32.mrf.mxu0 }
 0x9db   : > { %v5652_v7 = vpop.f32.mrf.mxu0 }
 0x9dc   : > { %12841 = vmatmul.mubr.msk.f32.vlgmr.msra.gmra.mxu1 %vm961_vm0, %v5652_v7 }
 0x9dd   : > { %v5654_v29 = vpop.f32.mrf.mxu0  ;;  %12889 = vmatpush3.msra.mxu1 %v6414_v32 }
 0x9de   : > { %12890 = vmatprep.subr.mxu1 %v6413_v23 }
 0x9df   : > { %v5657_v8 = vpop.f32.mrf.mxu0  ;;  %12891 = vmatpush3.msra.mxu1 %v6413_v23 }
 0x9e0   : > { %12843 = vmatprep.mubr.msk.f32.mxu1 %vm961_vm0, %v5657_v8 }
 0x9e1   : > { %v5659_v58 = vpop.f32.mrf.mxu0 }
 0x9e3   : > { %v5662_v42 = vpop.f32.mrf.mxu0 }
 0x9e4   : > { %12844 = vmatmul.mubr.msk.f32.gmra.mxu1 %vm961_vm0, %v5662_v42 }
 0x9e5   : > { %v5664_v6 = vpop.f32.mrf.mxu0 }
 0x9e7   : > { %v5667_v51 = vpop.f32.mrf.mxu0 }
 0x9e8   : > { %12846 = vmatprep.mubr.msk.f32.mxu1 %vm961_vm0, %v5667_v51 }
 0x9e9   : > { %v5669_v54 = vpop.f32.mrf.mxu0 }
 0x9eb   : > { %v5672_v28 = vpop.f32.mrf.mxu0 }
 0x9ec   : > { %12847 = vmatmul.mubr.msk.f32.gmra.mxu1 %vm961_vm0, %v5672_v28  ;;  %v6412_v28 = vld [vmem:[%s19360_s4 + $0x68] sm:$0xff] }
 0x9ed   : > { %v5674_v10 = vpop.f32.mrf.mxu0  ;;  %12892 = vmatprep.subr.mxu1 %v6412_v28 }
 0x9ee   : > { %v11008_v10 = vld [vmem:[%s19360_s4 + $0xe8] sm:$0xff]  ;;  %12893 = vmatpush3.msra.mxu1 %v6412_v28 }
 0x9ef   : > { %v5677_v36 = vpop.f32.mrf.mxu0  ;;  %12972 = vmatprep.subr.mxu0 %v11008_v10  ;;  %v11000_v28 = vld [vmem:[%s19360_s4 + $0xa8] sm:$0xff] }
 0x9f0   : > { %12849 = vmatprep.mubr.msk.f32.mxu1 %vm961_vm0, %v5677_v36  ;;  %12973 = vmatpush3.msra.mxu0 %v11008_v10 }
 0x9f1   : > { %v5679_v15 = vpop.f32.mrf.mxu0 }
 0x9f2   : > { %v6411_v15 = vld [vmem:[%s19360_s4 + $0x60] sm:$0xff] }
 0x9f3   : > { %v5682_v14 = vpop.f32.mrf.mxu0  ;;  %12894 = vmatprep.subr.mxu1 %v6411_v15 }
 0x9f4   : > { %12850 = vmatmul.mubr.msk.f32.gmra.mxu1 %vm961_vm0, %v5682_v14  ;;  %v11007_v14 = vld [vmem:[%s19360_s4 + $0xe0] sm:$0xff] }
 0x9f5   : > { %v5684_v41 = vpop.f32.mrf.mxu0  ;;  %12974 = vmatprep.subr.mxu0 %v11007_v14  ;;  %12895 = vmatpush3.msra.mxu1 %v6411_v15 }
 0x9f6   : > { %12975 = vmatpush3.msra.mxu0 %v11007_v14  ;;  %v10999_v14 = vld [vmem:[%s19360_s4 + $0xa0] sm:$0xff] }
 0x9f7   : > { %v5687_v4 = vpop.f32.mrf.mxu0 }
 0x9f8   : > { %12852 = vmatprep.mubr.msk.f32.mxu1 %vm961_vm0, %v5687_v4  ;;  %v6410_v4 = vld [vmem:[%s19360_s4 + $0x58] sm:$0xff] }
 0x9f9   : > { %v5689_v34 = vpop.f32.mrf.mxu0  ;;  %12896 = vmatprep.subr.mxu1 %v6410_v4 }
 0x9fa   : > { %v11006_v34 = vld [vmem:[%s19360_s4 + $0xd8] sm:$0xff]  ;;  %12897 = vmatpush3.msra.mxu1 %v6410_v4 }
 0x9fb   : > { %v5692_v16 = vpop.f32.mrf.mxu0  ;;  %12976 = vmatprep.subr.mxu0 %v11006_v34 }
 0x9fc   : > { %12853 = vmatmul.mubr.msk.f32.gmra.mxu1 %vm961_vm0, %v5692_v16  ;;  %12977 = vmatpush3.msra.mxu0 %v11006_v34  ;;  %v10998_v34 = vld [vmem:[%s19360_s4 + $0x98] sm:$0xff] }
 0x9fd   : > { %v5694_v43 = vpop.f32.mrf.mxu0 }
 0x9fe   : > { %v6409_v43 = vld [vmem:[%s19360_s4 + $0x50] sm:$0xff] }
 0x9ff   : > { %v5697_v9 = vpop.f32.mrf.mxu0  ;;  %12898 = vmatprep.subr.mxu1 %v6409_v43 }
 0xa00   : > { %12855 = vmatprep.mubr.msk.f32.mxu1 %vm961_vm0, %v5697_v9  ;;  %v11005_v9 = vld [vmem:[%s19360_s4 + $0xd0] sm:$0xff]  ;;  %12899 = vmatpush3.msra.mxu1 %v6409_v43 }
 0xa01   : > { %v5699_v30 = vpop.f32.mrf.mxu0  ;;  %12978 = vmatprep.subr.mxu0 %v11005_v9  ;;  %v6401_v43 = vld [vmem:[%s19360_s4 + $0x10] sm:$0xff] }
 0xa02   : > { %12979 = vmatpush3.msra.mxu0 %v11005_v9  ;;  %v10997_v9 = vld [vmem:[%s19360_s4 + $0x90] sm:$0xff] }
 0xa03   : > { %v5702_v32 = vpop.f32.mrf.mxu0 }
 0xa04   : > { %12856 = vmatmul.mubr.msk.f32.gmra.mxu1 %vm961_vm0, %v5702_v32  ;;  %v6408_v32 = vld [vmem:[%s19360_s4 + $0x48] sm:$0xff] }
 0xa05   : > { %v5704_v0 = vpop.f32.mrf.mxu0  ;;  %12900 = vmatprep.subr.mxu1 %v6408_v32 }
 0xa06   : > { %v11004_v0 = vld [vmem:[%s19360_s4 + $0xc8] sm:$0xff]  ;;  %12901 = vmatpush3.msra.mxu1 %v6408_v32 }
 0xa07   : > { %v5707_v21 = vpop.f32.mrf.mxu0  ;;  %12980 = vmatprep.subr.mxu0 %v11004_v0  ;;  %v6400_v32 = vld [vmem:[%s19360_s4 + $0x8] sm:$0xff] }
 0xa08   : > { %12858 = vmatprep.mubr.msk.f32.mxu1 %vm961_vm0, %v5707_v21  ;;  %12981 = vmatpush3.msra.mxu0 %v11004_v0  ;;  %v10996_v0 = vld [vmem:[%s19360_s4 + $0x88] sm:$0xff] }
 0xa09   : > { %v5709_v25 = vpop.f32.mrf.mxu0 }
 0xa0a   : > { %v6407_v25 = vld [vmem:[%s19360_s4 + $0x40] sm:$0xff] }
 0xa0b   : > { %v5712_v7 = vpop.f32.mrf.mxu0  ;;  %12902 = vmatprep.subr.mxu1 %v6407_v25 }
 0xa0c   : > { %12859 = vmatmul.mubr.msk.f32.gmra.mxu1 %vm961_vm0, %v5712_v7  ;;  %v11003_v7 = vld [vmem:[%s19360_s4 + $0xc0] sm:$0xff] }
 0xa0d   : > { %v5714_v23 = vpop.f32.mrf.mxu0  ;;  %12982 = vmatprep.subr.mxu0 %v11003_v7  ;;  %12903 = vmatpush3.msra.mxu1 %v6407_v25  ;;  %v6399_v25 = vld [vmem:[%s19360_s4] sm:$0xff] }
 0xa0e   : > { %12983 = vmatpush3.msra.mxu0 %v11003_v7  ;;  %v10995_v7 = vld [vmem:[%s19360_s4 + $0x80] sm:$0xff] }
 0xa0f   : > { %v5717_v29 = vpop.f32.mrf.mxu0 }
 0xa10   : > { %12861 = vmatprep.mubr.msk.f32.mxu1 %vm961_vm0, %v5717_v29  ;;  %v6406_v29 = vld [vmem:[%s19360_s4 + $0x38] sm:$0xff] }
 0xa11   : > { %v5719_v8 = vpop.f32.mrf.mxu0  ;;  %12904 = vmatprep.subr.mxu1 %v6406_v29 }
 0xa12   : > { %v11002_v8 = vld [vmem:[%s19360_s4 + $0xb8] sm:$0xff]  ;;  %12905 = vmatpush3.msra.mxu1 %v6406_v29 }
 0xa13   : > { %v5722_v58 = vpop.f32.mrf.mxu0  ;;  %12984 = vmatprep.subr.mxu0 %v11002_v8 }
 0xa14   : > { %12862 = vmatmul.mubr.msk.f32.gmra.mxu1 %vm961_vm0, %v5722_v58  ;;  %12985 = vmatpush3.msra.mxu0 %v11002_v8 }
 0xa15   : > { %v5724_v42 = vpop.f32.mrf.mxu0 }
 0xa16   : > { %v6405_v42 = vld [vmem:[%s19360_s4 + $0x30] sm:$0xff] }
 0xa17   : > { %v5727_v6 = vpop.f32.mrf.mxu0  ;;  %12906 = vmatprep.subr.mxu1 %v6405_v42 }
 0xa18   : > { %12864 = vmatprep.mubr.msk.f32.mxu1 %vm961_vm0, %v5727_v6  ;;  %v11001_v6 = vld [vmem:[%s19360_s4 + $0xb0] sm:$0xff]  ;;  %12907 = vmatpush3.msra.mxu1 %v6405_v42 }
 0xa19   : > { %v5729_v51 = vpop.f32.mrf.mxu0  ;;  %12986 = vmatprep.subr.mxu0 %v11001_v6 }
 0xa1a   : > { %12987 = vmatpush3.msra.mxu0 %v11001_v6 }
 0xa1b   : > { %v5732_v54 = vpop.f32.mrf.mxu0  ;;  %12988 = vmatprep.subr.mxu0 %v11000_v28 }
 0xa1c   : > { %12865 = vmatmul.mubr.msk.f32.gmra.mxu1 %vm961_vm0, %v5732_v54  ;;  %v6404_v54 = vld [vmem:[%s19360_s4 + $0x28] sm:$0xff]  ;;  %12989 = vmatpush3.msra.mxu0 %v11000_v28 }
 0xa1d   : > { %v5734_v36 = vpop.f32.mrf.mxu0  ;;  %12908 = vmatprep.subr.mxu1 %v6404_v54  ;;  %12990 = vmatprep.subr.mxu0 %v10999_v14 }
 0xa1e   : > { %v6403_v36 = vld [vmem:[%s19360_s4 + $0x20] sm:$0xff]  ;;  %12909 = vmatpush3.msra.mxu1 %v6404_v54  ;;  %12991 = vmatpush3.msra.mxu0 %v10999_v14 }
 0xa1f   : > { %v5737_v41 = vpop.f32.mrf.mxu0  ;;  %12910 = vmatprep.subr.mxu1 %v6403_v36  ;;  %12992 = vmatprep.subr.mxu0 %v10998_v34 }
 0xa20   : > { %12867 = vmatprep.mubr.msk.f32.mxu1 %vm961_vm0, %v5737_v41  ;;  %v6402_v41 = vld [vmem:[%s19360_s4 + $0x18] sm:$0xff]  ;;  %12911 = vmatpush3.msra.mxu1 %v6403_v36 }
 0xa21   : > { %v5739_v16 = vpop.f32.mrf.mxu0  ;;  %12912 = vmatprep.subr.mxu1 %v6402_v41  ;;  %12993 = vmatpush3.msra.mxu0 %v10998_v34  ;;  %v1446_v34 = vadd.f32 %v14745_v18, %v14743_v60  ;;  %v17689_v60 = vld [vmem:[%s19359_s3] ss:$0 sm:$0xff]  ;;  %v19485_v18 = vld [vmem:[#allocation47_spill] sm:$0xff] }
 0xa22   : > { %12913 = vmatpush3.msra.mxu1 %v6402_v41  ;;  %12994 = vmatprep.subr.mxu0 %v10997_v9 }
 0xa23   : > { %v5742_v30 = vpop.f32.mrf.mxu0  ;;  %12914 = vmatprep.subr.mxu1 %v6401_v43  ;;  %12995 = vmatpush3.msra.mxu0 %v10997_v9  ;;  %v19479_v9 = vld [vmem:[#allocation62_spill] sm:$0xff] }
 0xa24   : > { %12868 = vmatmul.mubr.msk.f32.gmra.mxu1 %vm961_vm0, %v5742_v30  ;;  %12996 = vmatprep.subr.mxu0 %v10996_v0 }
 0xa25   : > { %v5744_v21 = vpop.f32.mrf.mxu0  ;;  %12915 = vmatpush3.msra.mxu1 %v6401_v43  ;;  %12997 = vmatpush3.msra.mxu0 %v10996_v0  ;;  %v19481_v0 = vld [vmem:[#allocation3_spill] sm:$0xff] }
 0xa26   : > { %12916 = vmatprep.subr.mxu1 %v6400_v32  ;;  %12998 = vmatprep.subr.mxu0 %v10995_v7 }
 0xa27   : > { %v5747_v23 = vpop.f32.mrf.mxu0  ;;  %12917 = vmatpush3.msra.mxu1 %v6400_v32  ;;  %12999 = vmatpush3.msra.mxu0 %v10995_v7  ;;  %v19480_v32 = vld [vmem:[#allocation2_spill] sm:$0xff] }
 0xa28   : > { %12870 = vmatprep.mubr.msk.f32.mxu1 %vm961_vm0, %v5747_v23  ;;  %12918 = vmatprep.subr.mxu1 %v6399_v25 }
 0xa29   : > { %v5749_v58 = vpop.f32.mrf.mxu0  ;;  %12919 = vmatpush3.msra.mxu1 %v6399_v25  ;;  %v19482_v25 = vld [vmem:[#allocation78_spill] sm:$0xff] }
 0xa2b   : > { %v5752_v51 = vpop.f32.mrf.mxu0 }
 0xa2c   : > { %12871 = vmatmul.mubr.msk.f32.gmra.mxu1 %vm961_vm0, %v5752_v51 }
 0xa2d   : > { %v5754_v10 = vpop.f32.mrf.mxu0 }
 0xa2f   : > { %v5757_v15 = vpop.f32.mrf.mxu0 }
 0xa30   : > { %12873 = vmatprep.mubr.msk.f32.mxu1 %vm961_vm0, %v5757_v15 }
 0xa31   : > { %v5759_v4 = vpop.f32.mrf.mxu0 }
 0xa33   : > { %v5762_v16 = vpop.f32.mrf.mxu0 }
 0xa34   : > { %12874 = vmatmul.mubr.msk.f32.gmra.mxu1 %vm961_vm0, %v5762_v16  ;;  %v2224_v16 = vadd.f32 %v15248_v1, %v1446_v34 }
 0xa35   : > { %v5764_v30 = vpop.f32.mrf.mxu0 }
 0xa36   : > { %v2876_v43 = vadd.f32 %v15640_v62, %v2224_v16 }
 0xa37   : > { %v5767_v21 = vpop.f32.mrf.mxu0 }
 0xa38   : > { %12876 = vmatprep.mubr.msk.f32.mxu1 %vm961_vm0, %v5767_v21  ;;  %v3528_v30 = vadd.f32 %v19479_v9, %v2876_v43  ;;  %v1456_v21 = vadd.f32 %v19481_v0, %v19480_v32 }
 0xa39   : > { %v5769_v23 = vpop.f32.mrf.mxu0 }
 0xa3a   : > { %v4180_v7 = vadd.f32 %v19482_v25, %v3528_v30  ;;  %v19483_v23 = vld [vmem:[#allocation32_spill] sm:$0xff] }
 0xa3b   : > { %v5772_v29 = vpop.f32.mrf.mxu0 }
 0xa3c   : > { %12877 = vmatmul.mubr.msk.f32.gmra.mxu1 %vm961_vm0, %v5772_v29  ;;  %v2226_v29 = vadd.f32 %v19483_v23, %v1456_v21  ;;  %v19492_v21 = vld [vmem:[#allocation48_spill] sm:$0xff] }
 0xa3d   : > { %v5774_v8 = vpop.f32.mrf.mxu0 }
 0xa3e   : > { %v19484_v8 = vld [vmem:[#allocation94_spill] sm:$0xff]  ;;  %v2878_v1 = vadd.f32 %v19485_v18, %v2226_v29 }
 0xa3f   : > { %v5777_v58 = vpop.f32.mrf.mxu0 }
 0xa40   : > { %12879 = vmatprep.mubr.msk.f32.mxu1 %vm961_vm0, %v5777_v58  ;;  %v4832_v58 = vadd.f32 %v19484_v8, %v4180_v7 }
 0xa41   : > { %v5779_v42 = vpop.f32.mrf.mxu0 }
 0xa42   : > { %v5484_v62 = vadd.f32 %v17399_v19, %v4832_v58  ;;  %v19490_v19 = vld [vmem:[#allocation33_spill] sm:$0xff] }
 0xa43   : > { %v5782_v6 = vpop.f32.mrf.mxu0 }
 0xa44   : > { %12880 = vmatmul.mubr.msk.f32.gmra.mxu1 %vm961_vm0, %v5782_v6 }
 0xa45   : > { %v5784_v51 = vpop.f32.mrf.mxu0 }
 0xa47   : > { %v5787_v54 = vpop.f32.mrf.mxu0 }
 0xa48   : > { %12882 = vmatprep.mubr.msk.f32.mxu1 %vm961_vm0, %v5787_v54  ;;  %v19486_v54 = vld [vmem:[#allocation63_spill] sm:$0xff] }
 0xa49   : > { %v5789_v28 = vpop.f32.mrf.mxu0 }
 0xa4a   : > { %v3530_v28 = vadd.f32 %v19486_v54, %v2878_v1 }
 0xa4b   : > { %v5792_v10 = vpop.f32.mrf.mxu0 }
 0xa4c   : > { %12883 = vmatmul.mubr.msk.f32.gmra.mxu1 %vm961_vm0, %v5792_v10 }
 0xa4d   : > { %v5794_v36 = vpop.f32.mrf.mxu0 }
 0xa4f   : > { %v5797_v15 = vpop.f32.mrf.mxu0 }
 0xa50   : > { %12885 = vmatprep.mubr.msk.f32.mxu1 %vm961_vm0, %v5797_v15  ;;  %v19487_v15 = vld [vmem:[#allocation4_spill] sm:$0xff] }
 0xa51   : > { %v5799_v14 = vpop.f32.mrf.mxu0 }
 0xa52   : > { %v19488_v14 = vld [vmem:[#allocation5_spill] sm:$0xff] }
 0xa53   : > { %v5802_v41 = vpop.f32.mrf.mxu0 }
 0xa54   : > { %12886 = vmatmul.mubr.msk.f32.gmra.mxu1 %vm961_vm0, %v5802_v41  ;;  %v1466_v41 = vadd.f32 %v19488_v14, %v19487_v15  ;;  %v19497_v14 = vld [vmem:[#allocation34_spill] sm:$0xff] }
 0xa55   : > { %v5804_v4 = vpop.f32.mrf.mxu0 }
 0xa56   : > { %v19489_v4 = vld [vmem:[#allocation79_spill] sm:$0xff]  ;;  %v2228_v9 = vadd.f32 %v19490_v19, %v1466_v41  ;;  %v19498_v41 = vld [vmem:[#allocation96_spill] sm:$0xff]  ;;  %v19499_v19 = vld [vmem:[#allocation49_spill] sm:$0xff] }
 0xa57   : > { %v4182_v34 = vadd.f32 %v19489_v4, %v3530_v28  ;;  %v19496_v28 = vld [vmem:[#allocation80_spill] sm:$0xff] }
 0xa58   : > { %v2880_v25 = vadd.f32 %v19492_v21, %v2228_v9  ;;  %v19500_v21 = vld [vmem:[#allocation65_spill] sm:$0xff] }
 0xa9c   : > { %v12842_v42 = vpop.f32.mrf.mxu1 }
 0xa9d   : > { %v6137_v6 = vadd.f32 %v12842_v42, %v17388_v57  ;;  %v19491_v57 = vld [vmem:[#allocation95_spill] sm:$0xff]  ;;  %v19493_v42 = vld [vmem:[#allocation64_spill] sm:$0xff] }
 0xa9e   : > { %v5977_v51 = vpop.f32.mrf.mxu1  ;;  %v4834_v30 = vadd.f32 %v19491_v57, %v4182_v34  ;;  %v3532_v18 = vadd.f32 %v19493_v42, %v2880_v25 }
 0xa9f   : > { %v17696_v10 = vadd.f32 %v17689_v60, %v6137_v6  ;;  %v6136_v36 = vadd.f32 %v5977_v51, %v5484_v62  ;;  %v19494_v6 = vld [vmem:[#allocation6_spill] sm:$0xff]  ;;  %v19495_v51 = vld [vmem:[#allocation7_spill] sm:$0xff] }
 0xaa0   : > { %v5486_v23 = vadd.f32 %v17416_v31, %v4834_v30  ;;  %v1476_v54 = vadd.f32 %v19495_v51, %v19494_v6 }
 0xaa1   : > { %v6240_v16 = vmin.f32 %v17696_v10, 0.0  ;;  %v17703_v43 = vadd.f32 %v17689_v60, %v6136_v36  ;;  %v4184_v36 = vadd.f32 %v19496_v28, %v3532_v18  ;;  %v19503_v18 = vld [vmem:[#allocation81_spill] sm:$0xff]  ;;  %vm6208_vm2 = vcmp.gt.f32.partialorder %v17696_v10, 0.0 }
 0xaa2   : > { %v19505_v28 = vld [vmem:[#allocation97_spill] sm:$0xff] }
 0xaa3   : > { %v6273_v32 = vmul.f32 1.442695, %v6240_v16  ;;  %v6239_v0 = vmin.f32 %v17703_v43, 0.0  ;;  %v4836_v4 = vadd.f32 %v19498_v41, %v4184_v36  ;;  %v19506_v41 = vld [vmem:[#allocation50_spill] sm:$0xff]  ;;  %vm6207_vm1 = vcmp.gt.f32.partialorder %v17703_v43, 0.0 }
 0xaa4   : > { %v12845_v7 = vpop.f32.mrf.mxu1 }
 0xaa5   : > { %13561 = vpow2.f32 %v6273_v32  ;;  %v6271_v29 = vmul.f32 1.442695, %v6239_v0  ;;  %v6139_v8 = vadd.f32 %v12845_v7, %v17405_v33  ;;  %v2230_v33 = vadd.f32 %v19497_v14, %v1476_v54 }
 0xaa6   : > { %v5987_v58 = vpop.f32.mrf.mxu1  ;;  %v5488_v30 = vadd.f32 %v17433_v45, %v4836_v4 }
 0xaa7   : > { %13563 = vpow2.f32 %v6271_v29  ;;  %v17713_v1 = vadd.f32 %v17689_v60, %v6139_v8  ;;  %v6138_v62 = vadd.f32 %v5987_v58, %v5486_v23  ;;  %v2882_v9 = vadd.f32 %v19499_v19, %v2230_v33  ;;  %v19501_v8 = vld [vmem:[#allocation8_spill] sm:$0xff]  ;;  %v19502_v58 = vld [vmem:[#allocation9_spill] sm:$0xff] }
 0xaa8   : > { %v1486_v42 = vadd.f32 %v19502_v58, %v19501_v8  ;;  %v19509_v8 = vld [vmem:[#allocation11_spill] sm:$0xff]  ;;  %v19510_v58 = vld [vmem:[#allocation82_spill] sm:$0xff] }
 0xaa9   : > { %v6242_v15 = vmin.f32 %v17713_v1, 0.0  ;;  %v17720_v31 = vadd.f32 %v17689_v60, %v6138_v62  ;;  %v3534_v25 = vadd.f32 %v19500_v21, %v2882_v9  ;;  %vm6210_vm4 = vcmp.gt.f32.partialorder %v17713_v1, 0.0 }
 0xaab   : > { %v6277_v34 = vmul.f32 1.442695, %v6242_v15  ;;  %v6241_v16 = vmin.f32 %v17720_v31, 0.0  ;;  %v4186_v62 = vadd.f32 %v19503_v18, %v3534_v25  ;;  %vm6209_vm3 = vcmp.gt.f32.partialorder %v17720_v31, 0.0 }
 0xaac   : > { %v12848_v57 = vpop.f32.mrf.mxu1 }
 0xaad   : > { %13565 = vpow2.f32 %v6277_v34  ;;  %v6275_v32 = vmul.f32 1.442695, %v6241_v16  ;;  %v6141_v0 = vadd.f32 %v12848_v57, %v17422_v40  ;;  %v19504_v40 = vld [vmem:[#allocation35_spill] sm:$0xff]  ;;  %v4838_v36 = vadd.f32 %v19505_v28, %v4186_v62  ;;  %v19512_v28 = vld [vmem:[#allocation98_spill] sm:$0xff] }
 0xaae   : > { %v5997_v7 = vpop.f32.mrf.mxu1  ;;  %v2232_v54 = vadd.f32 %v19504_v40, %v1486_v42  ;;  %v19511_v40 = vld [vmem:[#allocation36_spill] sm:$0xff] }
 0xaaf   : > { %13567 = vpow2.f32 %v6275_v32  ;;  %v17730_v23 = vadd.f32 %v17689_v60, %v6141_v0  ;;  %v6140_v29 = vadd.f32 %v5997_v7, %v5488_v30  ;;  %v5490_v34 = vadd.f32 %v17450_v17, %v4838_v36  ;;  %v19507_v30 = vld [vmem:[#allocation66_spill] sm:$0xff] }
 0xab0   : > { %v2884_v4 = vadd.f32 %v19506_v41, %v2232_v54 }
 0xab1   : > { %v6244_v6 = vmin.f32 %v17730_v23, 0.0  ;;  %v17737_v45 = vadd.f32 %v17689_v60, %v6140_v29  ;;  %v19508_v29 = vld [vmem:[#allocation10_spill] sm:$0xff]  ;;  %vm6212_vm6 = vcmp.gt.f32.partialorder %v17730_v23, 0.0 }
 0xab2   : > { %v13562_v51 = vpop.eup %13561  ;;  %v3536_v32 = vadd.f32 %v19507_v30, %v2884_v4  ;;  %v1496_v17 = vadd.f32 %v19509_v8, %v19508_v29  ;;  %v19516_v29 = vld [vmem:[#allocation13_spill] sm:$0xff] }
 0xab3   : > { %v6281_v15 = vmul.f32 1.442695, %v6244_v6  ;;  %v6243_v14 = vmin.f32 %v17737_v45, 0.0  ;;  %v10964_v19 = vadd.f32 -1.0, %v13562_v51  ;;  %vm6211_vm5 = vcmp.gt.f32.partialorder %v17737_v45, 0.0 }
 0xab4   : > { %v13564_v33 = vpop.eup %13563  ;;  %v12851_v16 = vpop.f32.mrf.mxu1  ;;  %v4188_v42 = vadd.f32 %v19510_v58, %v3536_v32  ;;  %v2234_v54 = vadd.f32 %v19511_v40, %v1496_v17  ;;  %v19517_v17 = vld [vmem:[#allocation83_spill] sm:$0xff] }
 0xab5   : > { %13569 = vpow2.f32 %v6281_v15  ;;  %v6279_v9 = vmul.f32 1.442695, %v6243_v14  ;;  %v6143_v57 = vadd.f32 %v12851_v16, %v17439_v35  ;;  %v10963_v21 = vadd.f32 -1.0, %v13564_v33  ;;  %v19513_v33 = vld [vmem:[#allocation51_spill] sm:$0xff] }
 0xab6   : > { %v6007_v0 = vpop.f32.mrf.mxu1  ;;  %v6368_v18 = vsel %vm6208_vm2, %v17696_v10, %v10964_v19  ;;  %v4840_v36 = vadd.f32 %v19512_v28, %v4188_v42  ;;  %v2886_v10 = vadd.f32 %v19513_v33, %v2234_v54 }
 0xab7   : > { %13571 = vpow2.f32 %v6279_v9  ;;  %v17747_v25 = vadd.f32 %v17689_v60, %v6143_v57  ;;  %v6142_v7 = vadd.f32 %v6007_v0, %v5490_v34  ;;  %v6367_v35 = vsel %vm6207_vm1, %v17703_v43, %v10963_v21  ;;  %v19514_v57 = vld [vmem:[#allocation67_spill] sm:$0xff] }
 0xab8   : > { %12920 = vmatprep.mubr.f32.mxu1 %v6367_v35  ;;  %13000 = vmatprep.mubr.f32.mxu0 %v6367_v35  ;;  %v5492_v41 = vadd.f32 %v17467_v44, %v4840_v36  ;;  %v3538_v30 = vadd.f32 %v19514_v57, %v2886_v10 }
 0xab9   : > { %v6246_v62 = vmin.f32 %v17747_v25, 0.0  ;;  %v17758_v6 = vadd.f32 %v17689_v60, %v6142_v7  ;;  %12921 = vmatmul.mubr.f32.vlgmr.msra.gmra.mxu1 %v6368_v18  ;;  %13001 = vmatmul.mubr.f32.vlgmr.msra.gmra.mxu0 %v6368_v18  ;;  %v19515_v7 = vld [vmem:[#allocation12_spill] sm:$0xff]  ;;  %vm6214_vm8 = vcmp.gt.f32.partialorder %v17747_v25, 0.0 }
 0xaba   : > { %v13566_v51 = vpop.eup %13565  ;;  %v1506_v8 = vadd.f32 %v19516_v29, %v19515_v7 }
 0xabb   : > { %v6285_v15 = vmul.f32 1.442695, %v6246_v62  ;;  %v6245_v14 = vmin.f32 %v17758_v6, 0.0  ;;  %v10966_v34 = vadd.f32 -1.0, %v13566_v51  ;;  %v19518_v62 = vld [vmem:[#allocation37_spill] sm:$0xff]  ;;  %vm6213_vm7 = vcmp.gt.f32.partialorder %v17758_v6, 0.0 }
 0xabc   : > { %v13568_v43 = vpop.eup %13567  ;;  %v12854_v4 = vpop.f32.mrf.mxu1  ;;  %v2236_v51 = vadd.f32 %v19518_v62, %v1506_v8 }
 0xabd   : > { %13573 = vpow2.f32 %v6285_v15  ;;  %v6283_v16 = vmul.f32 1.442695, %v6245_v14  ;;  %v6145_v19 = vadd.f32 %v12854_v4, %v17456_v59  ;;  %v10965_v9 = vadd.f32 -1.0, %v13568_v43  ;;  %v19520_v15 = vld [vmem:[#allocation52_spill] sm:$0xff] }
 0xabe   : > { %v6017_v32 = vpop.f32.mrf.mxu1  ;;  %v4190_v59 = vadd.f32 %v19517_v17, %v3538_v30  ;;  %v6370_v58 = vsel %vm6210_vm4, %v17713_v1, %v10966_v34  ;;  %v2888_v14 = vadd.f32 %v19520_v15, %v2236_v51  ;;  %v19521_v34 = vld [vmem:[#allocation68_spill] sm:$0xff]  ;;  %v19522_v30 = vld [vmem:[#allocation14_spill] sm:$0xff] }
 0xabf   : > { %13575 = vpow2.f32 %v6283_v16  ;;  %v17770_v0 = vadd.f32 %v17689_v60, %v6145_v19  ;;  %v6144_v21 = vadd.f32 %v6017_v32, %v5492_v41  ;;  %v6369_v44 = vsel %vm6209_vm3, %v17720_v31, %v10965_v9  ;;  %v19519_v31 = vld [vmem:[#allocation99_spill] sm:$0xff] }
 0xac0   : > { %12923 = vmatprep.mubr.f32.mxu1 %v6369_v44  ;;  %13003 = vmatprep.mubr.f32.mxu0 %v6369_v44  ;;  %v4842_v40 = vadd.f32 %v19519_v31, %v4190_v59  ;;  %v3540_v16 = vadd.f32 %v19521_v34, %v2888_v14  ;;  %v19523_v32 = vld [vmem:[#allocation15_spill] sm:$0xff]  ;;  %v19524_v44 = vld [vmem:[#allocation84_spill] sm:$0xff]  ;;  %v19525_v59 = vld [vmem:[#allocation38_spill] sm:$0xff] }
 0xac1   : > { %v6248_v42 = vmin.f32 %v17770_v0, 0.0  ;;  %v17779_v35 = vadd.f32 %v17689_v60, %v6144_v21  ;;  %12924 = vmatmul.mubr.f32.gmra.mxu1 %v6370_v58  ;;  %13004 = vmatmul.mubr.f32.gmra.mxu0 %v6370_v58  ;;  %v1516_v21 = vadd.f32 %v19523_v32, %v19522_v30  ;;  %v19527_v31 = vld [vmem:[#allocation53_spill] sm:$0xff]  ;;  %vm6216_vm10 = vcmp.gt.f32.partialorder %v17770_v0, 0.0 }
 0xac2   : > { %v13570_v18 = vpop.eup %13569  ;;  %v5494_v1 = vadd.f32 %v17484_v37, %v4842_v40  ;;  %v19530_v34 = vld [vmem:[#allocation17_spill] sm:$0xff] }
 0xac3   : > { %v6289_v54 = vmul.f32 1.442695, %v6248_v42  ;;  %v6247_v28 = vmin.f32 %v17779_v35, 0.0  ;;  %v10968_v33 = vadd.f32 -1.0, %v13570_v18  ;;  %v2238_v58 = vadd.f32 %v19525_v59, %v1516_v21  ;;  %v19532_v21 = vld [vmem:[#allocation39_spill] sm:$0xff]  ;;  %v19534_v59 = vld [vmem:[#allocation54_spill] sm:$0xff] }
 0xac4   : > { %v13572_v36 = vpop.eup %13571  ;;  %v12857_v43 = vpop.f32.mrf.mxu1  ;;  %vm6215_vm9 = vcmp.gt.f32.partialorder %v17779_v35, 0.0 }
 0xac5   : > { %13577 = vpow2.f32 %v6289_v54  ;;  %v6287_v10 = vmul.f32 1.442695, %v6247_v28  ;;  %v6147_v41 = vadd.f32 %v12857_v43, %v17473_v48  ;;  %v10967_v4 = vadd.f32 -1.0, %v13572_v36 }
 0xac6   : > { %v6027_v19 = vpop.f32.mrf.mxu1  ;;  %v4192_v48 = vadd.f32 %v19524_v44, %v3540_v16  ;;  %v6372_v7 = vsel %vm6212_vm6, %v17730_v23, %v10968_v33  ;;  %v2890_v40 = vadd.f32 %v19527_v31, %v2238_v58  ;;  %v19535_v31 = vld [vmem:[#allocation70_spill] sm:$0xff] }
 0xac7   : > { %13579 = vpow2.f32 %v6287_v10  ;;  %v17791_v9 = vadd.f32 %v17689_v60, %v6147_v41  ;;  %v6146_v57 = vadd.f32 %v6027_v19, %v5494_v1  ;;  %v6371_v37 = vsel %vm6211_vm5, %v17737_v45, %v10967_v4  ;;  %v19526_v45 = vld [vmem:[#allocation100_spill] sm:$0xff]  ;;  %v19528_v1 = vld [vmem:[#allocation69_spill] sm:$0xff] }
 0xac8   : > { %12926 = vmatprep.mubr.f32.mxu1 %v6371_v37  ;;  %13006 = vmatprep.mubr.f32.mxu0 %v6371_v37  ;;  %v4844_v42 = vadd.f32 %v19526_v45, %v4192_v48  ;;  %v3542_v43 = vadd.f32 %v19528_v1, %v2890_v40  ;;  %v19529_v4 = vld [vmem:[#allocation16_spill] sm:$0xff]  ;;  %v19531_v19 = vld [vmem:[#allocation85_spill] sm:$0xff]  ;;  %v19538_v1 = vld [vmem:[#allocation86_spill] sm:$0xff] }
 0xac9   : > { %v6250_v29 = vmin.f32 %v17791_v9, 0.0  ;;  %v17800_v8 = vadd.f32 %v17689_v60, %v6146_v57  ;;  %12927 = vmatmul.mubr.f32.gmra.mxu1 %v6372_v7  ;;  %13007 = vmatmul.mubr.f32.gmra.mxu0 %v6372_v7  ;;  %v1526_v16 = vadd.f32 %v19530_v34, %v19529_v4  ;;  %v19539_v4 = vld [vmem:[#allocation40_spill] sm:$0xff]  ;;  %vm6218_vm12 = vcmp.gt.f32.partialorder %v17791_v9, 0.0 }
 0xaca   : > { %v13574_v17 = vpop.eup %13573  ;;  %v5496_v23 = vadd.f32 %v17501_v49, %v4844_v42 }
 0xacb   : > { %v6293_v18 = vmul.f32 1.442695, %v6250_v29  ;;  %v6249_v62 = vmin.f32 %v17800_v8, 0.0  ;;  %v10970_v28 = vadd.f32 -1.0, %v13574_v17  ;;  %v2240_v44 = vadd.f32 %v19532_v21, %v1526_v16 }
 0xacc   : > { %v13576_v51 = vpop.eup %13575  ;;  %v12860_v54 = vpop.f32.mrf.mxu1  ;;  %vm6217_vm11 = vcmp.gt.f32.partialorder %v17800_v8, 0.0 }
 0xacd   : > { %13581 = vpow2.f32 %v6293_v18  ;;  %v6291_v36 = vmul.f32 1.442695, %v6249_v62  ;;  %v6149_v15 = vadd.f32 %v12860_v54, %v17490_v13  ;;  %v10969_v14 = vadd.f32 -1.0, %v13576_v51 }
 0xace   : > { %v6037_v33 = vpop.f32.mrf.mxu1  ;;  %v4194_v13 = vadd.f32 %v19531_v19, %v3542_v43  ;;  %v6374_v57 = vsel %vm6214_vm8, %v17747_v25, %v10970_v28  ;;  %v2892_v58 = vadd.f32 %v19534_v59, %v2240_v44 }
 0xacf   : > { %13583 = vpow2.f32 %v6291_v36  ;;  %v17812_v10 = vadd.f32 %v17689_v60, %v6149_v15  ;;  %v6148_v41 = vadd.f32 %v6037_v33, %v5496_v23  ;;  %v6373_v49 = vsel %vm6213_vm7, %v17758_v6, %v10969_v14  ;;  %v19533_v6 = vld [vmem:[#allocation101_spill] sm:$0xff]  ;;  %v19536_v36 = vld [vmem:[#allocation18_spill] sm:$0xff]  ;;  %v19537_v15 = vld [vmem:[#allocation19_spill] sm:$0xff] }
 0xad0   : > { %12929 = vmatprep.mubr.f32.mxu1 %v6373_v49  ;;  %13009 = vmatprep.mubr.f32.mxu0 %v6373_v49  ;;  %v4846_v48 = vadd.f32 %v19533_v6, %v4194_v13  ;;  %v3544_v40 = vadd.f32 %v19535_v31, %v2892_v58  ;;  %v1536_v14 = vadd.f32 %v19537_v15, %v19536_v36 }
 0xad1   : > { %v6252_v37 = vmin.f32 %v17812_v10, 0.0  ;;  %v17821_v30 = vadd.f32 %v17689_v60, %v6148_v41  ;;  %12930 = vmatmul.mubr.f32.gmra.mxu1 %v6374_v57  ;;  %13010 = vmatmul.mubr.f32.gmra.mxu0 %v6374_v57  ;;  %vm6220_vm14 = vcmp.gt.f32.partialorder %v17812_v10, 0.0 }
 0xad2   : > { %v13578_v32 = vpop.eup %13577  ;;  %v5498_v25 = vadd.f32 %v17506_v46, %v4846_v48  ;;  %v2242_v34 = vadd.f32 %v19539_v4, %v1536_v14 }
 0xad3   : > { %v6297_v7 = vmul.f32 1.442695, %v6252_v37  ;;  %v6251_v29 = vmin.f32 %v17821_v30, 0.0  ;;  %v10972_v42 = vadd.f32 -1.0, %v13578_v32  ;;  %v19541_v37 = vld [vmem:[#allocation55_spill] sm:$0xff]  ;;  %vm6219_vm13 = vcmp.gt.f32.partialorder %v17821_v30, 0.0 }
 0xad4   : > { %v13580_v17 = vpop.eup %13579  ;;  %v12863_v45 = vpop.f32.mrf.mxu1  ;;  %v2894_v32 = vadd.f32 %v19541_v37, %v2242_v34 }
 0xad5   : > { %13585 = vpow2.f32 %v6297_v7  ;;  %v6295_v18 = vmul.f32 1.442695, %v6251_v29  ;;  %v6151_v62 = vadd.f32 %v12863_v45, %v17504_v55  ;;  %v10971_v51 = vadd.f32 -1.0, %v13580_v17  ;;  %v19542_v29 = vld [vmem:[#allocation71_spill] sm:$0xff]  ;;  %v19543_v45 = vld [vmem:[#allocation20_spill] sm:$0xff] }
 0xad6   : > { %v6047_v23 = vpop.f32.mrf.mxu1  ;;  %v4196_v55 = vadd.f32 %v19538_v1, %v3544_v40  ;;  %v6376_v43 = vsel %vm6216_vm10, %v17770_v0, %v10972_v42  ;;  %v3546_v17 = vadd.f32 %v19542_v29, %v2894_v32  ;;  %v19544_v42 = vld [vmem:[#allocation21_spill] sm:$0xff]  ;;  %v19550_v32 = vld [vmem:[#allocation22_spill] sm:$0xff] }
 0xad7   : > { %13587 = vpow2.f32 %v6295_v18  ;;  %v17833_v54 = vadd.f32 %v17689_v60, %v6151_v62  ;;  %v6150_v28 = vadd.f32 %v6047_v23, %v5498_v25  ;;  %v6375_v46 = vsel %vm6215_vm9, %v17779_v35, %v10971_v51  ;;  %v19540_v35 = vld [vmem:[#allocation102_spill] sm:$0xff]  ;;  %v19545_v62 = vld [vmem:[#allocation87_spill] sm:$0xff] }
 0xad8   : > { %12932 = vmatprep.mubr.f32.mxu1 %v6375_v46  ;;  %13012 = vmatprep.mubr.f32.mxu0 %v6375_v46  ;;  %v4848_v16 = vadd.f32 %v19540_v35, %v4196_v55  ;;  %v1546_v18 = vadd.f32 %v19544_v42, %v19543_v45  ;;  %v19548_v55 = vld [vmem:[#allocation56_spill] sm:$0xff] }
 0xad9   : > { %v6254_v33 = vmin.f32 %v17833_v54, 0.0  ;;  %v17842_v41 = vadd.f32 %v17689_v60, %v6150_v28  ;;  %12933 = vmatmul.mubr.f32.gmra.mxu1 %v6376_v43  ;;  %13013 = vmatmul.mubr.f32.gmra.mxu0 %v6376_v43  ;;  %v19546_v28 = vld [vmem:[#allocation41_spill] sm:$0xff]  ;;  %vm6222_vm1 = vcmp.gt.f32.partialorder %v17833_v54, 0.0 }
 0xada   : > { %v13582_v49 = vpop.eup %13581  ;;  %v5500_v0 = vadd.f32 %v17511_v12, %v4848_v16  ;;  %v2244_v46 = vadd.f32 %v19546_v28, %v1546_v18  ;;  %v19549_v16 = vld [vmem:[#allocation72_spill] sm:$0xff]  ;;  %v19555_v18 = vld [vmem:[#allocation57_spill] sm:$0xff] }
 0xadb   : > { %v6301_v19 = vmul.f32 1.442695, %v6254_v33  ;;  %v6253_v13 = vmin.f32 %v17842_v41, 0.0  ;;  %v10974_v44 = vadd.f32 -1.0, %v13582_v49  ;;  %vm6221_vm15 = vcmp.gt.f32.partialorder %v17842_v41, 0.0 }
 0xadc   : > { %v13584_v57 = vpop.eup %13583  ;;  %v12866_v21 = vpop.f32.mrf.mxu1  ;;  %v2896_v43 = vadd.f32 %v19548_v55, %v2244_v46  ;;  %v19556_v46 = vld [vmem:[#allocation73_spill] sm:$0xff] }
 0xadd   : > { %13589 = vpow2.f32 %v6301_v19  ;;  %v6299_v6 = vmul.f32 1.442695, %v6253_v13  ;;  %v6153_v48 = vadd.f32 %v12866_v21, %v17509_v5  ;;  %v10973_v7 = vadd.f32 -1.0, %v13584_v57  ;;  %v19558_v55 = vld [vmem:[#allocation25_spill] sm:$0xff] }
 0xade   : > { %v6057_v59 = vpop.f32.mrf.mxu1  ;;  %v4198_v5 = vadd.f32 %v19545_v62, %v3546_v17  ;;  %v6378_v51 = vsel %vm6218_vm12, %v17791_v9, %v10974_v44  ;;  %v3548_v19 = vadd.f32 %v19549_v16, %v2896_v43  ;;  %v19552_v44 = vld [vmem:[#allocation88_spill] sm:$0xff]  ;;  %v19553_v17 = vld [vmem:[#allocation42_spill] sm:$0xff] }
 0xadf   : > { %13591 = vpow2.f32 %v6299_v6  ;;  %v17854_v58 = vadd.f32 %v17689_v60, %v6153_v48  ;;  %v6152_v25 = vadd.f32 %v6057_v59, %v5500_v0  ;;  %v6377_v12 = vsel %vm6217_vm11, %v17800_v8, %v10973_v7  ;;  %v19547_v8 = vld [vmem:[#allocation103_spill] sm:$0xff] }
 0xae0   : > { %12935 = vmatprep.mubr.f32.mxu1 %v6377_v12  ;;  %13015 = vmatprep.mubr.f32.mxu0 %v6377_v12  ;;  %v4850_v36 = vadd.f32 %v19547_v8, %v4198_v5  ;;  %v19551_v0 = vld [vmem:[#allocation23_spill] sm:$0xff] }
 0xae1   : > { %v6256_v31 = vmin.f32 %v17854_v58, 0.0  ;;  %v17863_v40 = vadd.f32 %v17689_v60, %v6152_v25  ;;  %12936 = vmatmul.mubr.f32.gmra.mxu1 %v6378_v51  ;;  %13016 = vmatmul.mubr.f32.gmra.mxu0 %v6378_v51  ;;  %v1556_v21 = vadd.f32 %v19551_v0, %v19550_v32  ;;  %v19562_v32 = vld [vmem:[#allocation58_spill] sm:$0xff]  ;;  %vm6224_vm3 = vcmp.gt.f32.partialorder %v17854_v58, 0.0 }
 0xae2   : > { %v13586_v23 = vpop.eup %13585  ;;  %v5502_v9 = vadd.f32 %v17516_v38, %v4850_v36 }
 0xae3   : > { %v6305_v15 = vmul.f32 1.442695, %v6256_v31  ;;  %v6255_v14 = vmin.f32 %v17863_v40, 0.0  ;;  %v10976_v49 = vadd.f32 -1.0, %v13586_v23  ;;  %v2246_v59 = vadd.f32 %v19553_v17, %v1556_v21 }
 0xae4   : > { %v13588_v1 = vpop.eup %13587  ;;  %v12869_v33 = vpop.f32.mrf.mxu1  ;;  %vm6223_vm2 = vcmp.gt.f32.partialorder %v17863_v40, 0.0 }
 0xae5   : > { %13593 = vpow2.f32 %v6305_v15  ;;  %v6303_v4 = vmul.f32 1.442695, %v6255_v14  ;;  %v6155_v34 = vadd.f32 %v12869_v33, %v17514_v20  ;;  %v10975_v35 = vadd.f32 -1.0, %v13588_v1  ;;  %v19557_v1 = vld [vmem:[#allocation24_spill] sm:$0xff] }
 0xae6   : > { %v6067_v13 = vpop.f32.mrf.mxu1  ;;  %v4200_v20 = vadd.f32 %v19552_v44, %v3548_v19  ;;  %v6380_v6 = vsel %vm6220_vm14, %v17812_v10, %v10976_v49  ;;  %v2898_v62 = vadd.f32 %v19555_v18, %v2246_v59  ;;  %v1566_v43 = vadd.f32 %v19558_v55, %v19557_v1  ;;  %v19566_v18 = vld [vmem:[#allocation90_spill] sm:$0xff] }
 0xae7   : > { %13595 = vpow2.f32 %v6303_v4  ;;  %v17875_v57 = vadd.f32 %v17689_v60, %v6155_v34  ;;  %v6154_v37 = vadd.f32 %v6067_v13, %v5502_v9  ;;  %v6379_v38 = vsel %vm6219_vm13, %v17821_v30, %v10975_v35  ;;  %v19554_v30 = vld [vmem:[#allocation104_spill] sm:$0xff]  ;;  %v19559_v9 = vld [vmem:[#allocation89_spill] sm:$0xff]  ;;  %v19560_v35 = vld [vmem:[#allocation43_spill] sm:$0xff] }
 0xae8   : > { %12938 = vmatprep.mubr.f32.mxu1 %v6379_v38  ;;  %13018 = vmatprep.mubr.f32.mxu0 %v6379_v38  ;;  %v4852_v25 = vadd.f32 %v19554_v30, %v4200_v20  ;;  %v3550_v8 = vadd.f32 %v19556_v46, %v2898_v62  ;;  %v2248_v16 = vadd.f32 %v19560_v35, %v1566_v43 }
 0xae9   : > { %v6258_v48 = vmin.f32 %v17875_v57, 0.0  ;;  %v17884_v7 = vadd.f32 %v17689_v60, %v6154_v37  ;;  %12939 = vmatmul.mubr.f32.gmra.mxu1 %v6380_v6  ;;  %13019 = vmatmul.mubr.f32.gmra.mxu0 %v6380_v6  ;;  %vm6226_vm5 = vcmp.gt.f32.partialorder %v17875_v57, 0.0 }
 0xaea   : > { %v13590_v29 = vpop.eup %13589  ;;  %v5504_v10 = vadd.f32 %v17521_v3, %v4852_v25  ;;  %v2900_v0 = vadd.f32 %v19562_v32, %v2248_v16 }
 0xaeb   : > { %v6309_v12 = vmul.f32 1.442695, %v6258_v48  ;;  %v6257_v45 = vmin.f32 %v17884_v7, 0.0  ;;  %v10978_v51 = vadd.f32 -1.0, %v13590_v29  ;;  %v19563_v29 = vld [vmem:[#allocation74_spill] sm:$0xff]  ;;  %vm6225_vm4 = vcmp.gt.f32.partialorder %v17884_v7, 0.0 }
 0xaec   : > { %v13592_v42 = vpop.eup %13591  ;;  %v12872_v5 = vpop.f32.mrf.mxu1  ;;  %v3552_v17 = vadd.f32 %v19563_v29, %v2900_v0  ;;  %v19575_v29 = vld [vmem:[#allocation60_spill] sm:$0xff] }
 0xaed   : > { %13597 = vpow2.f32 %v6309_v12  ;;  %v6307_v31 = vmul.f32 1.442695, %v6257_v45  ;;  %v6157_v23 = vadd.f32 %v12872_v5, %v17519_v24  ;;  %v10977_v28 = vadd.f32 -1.0, %v13592_v42  ;;  %v19564_v12 = vld [vmem:[#allocation26_spill] sm:$0xff]  ;;  %v19565_v45 = vld [vmem:[#allocation27_spill] sm:$0xff] }
 0xaee   : > { %v6077_v36 = vpop.f32.mrf.mxu1  ;;  %v4202_v24 = vadd.f32 %v19559_v9, %v3550_v8  ;;  %v6382_v33 = vsel %vm6222_vm1, %v17833_v54, %v10978_v51  ;;  %v1576_v42 = vadd.f32 %v19565_v45, %v19564_v12 }
 0xaef   : > { %13599 = vpow2.f32 %v6307_v31  ;;  %v17896_v15 = vadd.f32 %v17689_v60, %v6157_v23  ;;  %v6156_v14 = vadd.f32 %v6077_v36, %v5504_v10  ;;  %v6381_v3 = vsel %vm6221_vm15, %v17842_v41, %v10977_v28  ;;  %v19561_v41 = vld [vmem:[#allocation105_spill] sm:$0xff]  ;;  %v19567_v31 = vld [vmem:[#allocation44_spill] sm:$0xff] }
 0xaf0   : > { %12941 = vmatprep.mubr.f32.mxu1 %v6381_v3  ;;  %13021 = vmatprep.mubr.f32.mxu0 %v6381_v3  ;;  %v4854_v19 = vadd.f32 %v19561_v41, %v4202_v24  ;;  %v2250_v23 = vadd.f32 %v19567_v31, %v1576_v42  ;;  %v19571_v41 = vld [vmem:[#allocation28_spill] sm:$0xff] }
 0xaf1   : > { %v6260_v49 = vmin.f32 %v17896_v15, 0.0  ;;  %v17905_v4 = vadd.f32 %v17689_v60, %v6156_v14  ;;  %12942 = vmatmul.mubr.f32.gmra.mxu1 %v6382_v33  ;;  %13022 = vmatmul.mubr.f32.gmra.mxu0 %v6382_v33  ;;  %v19569_v14 = vld [vmem:[#allocation59_spill] sm:$0xff]  ;;  %v19576_v42 = vld [vmem:[#allocation76_spill] sm:$0xff]  ;;  %vm6228_vm7 = vcmp.gt.f32.partialorder %v17896_v15, 0.0 }
 0xaf2   : > { %v13594_v34 = vpop.eup %13593  ;;  %v5506_v54 = vadd.f32 %v17526_v26, %v4854_v19  ;;  %v2902_v3 = vadd.f32 %v19569_v14, %v2250_v23  ;;  %v19570_v33 = vld [vmem:[#allocation75_spill] sm:$0xff]  ;;  %v19572_v19 = vld [vmem:[#allocation29_spill] sm:$0xff]  ;;  %v19579_v23 = vld [vmem:[#allocation92_spill] sm:$0xff] }
 0xaf3   : > { %v6313_v13 = vmul.f32 1.442695, %v6260_v49  ;;  %v6259_v37 = vmin.f32 %v17905_v4, 0.0  ;;  %v10980_v44 = vadd.f32 -1.0, %v13594_v34  ;;  %vm6227_vm6 = vcmp.gt.f32.partialorder %v17905_v4, 0.0 }
 0xaf4   : > { %v13596_v38 = vpop.eup %13595  ;;  %v12875_v21 = vpop.f32.mrf.mxu1  ;;  %v3554_v49 = vadd.f32 %v19570_v33, %v2902_v3 }
 0xaf5   : > { %13601 = vpow2.f32 %v6313_v13  ;;  %v6311_v20 = vmul.f32 1.442695, %v6259_v37  ;;  %v6159_v6 = vadd.f32 %v12875_v21, %v17524_v27  ;;  %v10979_v48 = vadd.f32 -1.0, %v13596_v38  ;;  %v19573_v37 = vld [vmem:[#allocation91_spill] sm:$0xff]  ;;  %v19574_v21 = vld [vmem:[#allocation45_spill] sm:$0xff] }
 0xaf6   : > { %v6087_v59 = vpop.f32.mrf.mxu1  ;;  %v4204_v27 = vadd.f32 %v19566_v18, %v3552_v17  ;;  %v6384_v62 = vsel %vm6224_vm3, %v17854_v58, %v10980_v44  ;;  %v1586_v13 = vadd.f32 %v19572_v19, %v19571_v41 }
 0xaf7   : > { %13603 = vpow2.f32 %v6311_v20  ;;  %v17917_v30 = vadd.f32 %v17689_v60, %v6159_v6  ;;  %v6158_v25 = vadd.f32 %v6087_v59, %v5506_v54  ;;  %v6383_v26 = vsel %vm6223_vm2, %v17863_v40, %v10979_v48  ;;  %v19568_v40 = vld [vmem:[#allocation106_spill] sm:$0xff] }
 0xaf8   : > { %12944 = vmatprep.mubr.f32.mxu1 %v6383_v26  ;;  %13024 = vmatprep.mubr.f32.mxu0 %v6383_v26  ;;  %v4856_v28 = vadd.f32 %v19568_v40, %v4204_v27  ;;  %v2252_v44 = vadd.f32 %v19574_v21, %v1586_v13  ;;  %v19583_v13 = vld [vmem:[#allocation93_spill] sm:$0xff] }
 0xaf9   : > { %v6262_v10 = vmin.f32 %v17917_v30, 0.0  ;;  %v17926_v5 = vadd.f32 %v17689_v60, %v6158_v25  ;;  %12945 = vmatmul.mubr.f32.gmra.mxu1 %v6384_v62  ;;  %13025 = vmatmul.mubr.f32.gmra.mxu0 %v6384_v62  ;;  %vm6230_vm9 = vcmp.gt.f32.partialorder %v17917_v30, 0.0 }
 0xafa   : > { %v13598_v51 = vpop.eup %13597  ;;  %v5508_v58 = vadd.f32 %v17531_v22, %v4856_v28  ;;  %v2904_v17 = vadd.f32 %v19575_v29, %v2252_v44 }
 0xafb   : > { %v6317_v46 = vmul.f32 1.442695, %v6262_v10  ;;  %v6261_v8 = vmin.f32 %v17926_v5, 0.0  ;;  %v10982_v55 = vadd.f32 -1.0, %v13598_v51  ;;  %v19577_v10 = vld [vmem:[#allocation30_spill] sm:$0xff]  ;;  %v19578_v51 = vld [vmem:[#allocation31_spill] sm:$0xff] }
 0xafc   : > { %v13600_v36 = vpop.eup %13599  ;;  %v12878_v1 = vpop.f32.mrf.mxu1  ;;  %v3556_v18 = vadd.f32 %v19576_v42, %v2904_v17  ;;  %v1596_v31 = vadd.f32 %v19578_v51, %v19577_v10  ;;  %vm6229_vm8 = vcmp.gt.f32.partialorder %v17926_v5, 0.0 }
 0xafd   : > { %13605 = vpow2.f32 %v6317_v46  ;;  %v6315_v43 = vmul.f32 1.442695, %v6261_v8  ;;  %v6161_v9 = vadd.f32 %v12878_v1, %v17529_v52  ;;  %v10981_v24 = vadd.f32 -1.0, %v13600_v36  ;;  %v19580_v36 = vld [vmem:[#allocation46_spill] sm:$0xff] }
 0xafe   : > { %v6097_v34 = vpop.f32.mrf.mxu1  ;;  %v4206_v52 = vadd.f32 %v19573_v37, %v3554_v49  ;;  %v6386_v38 = vsel %vm6226_vm5, %v17875_v57, %v10982_v55  ;;  %v2254_v14 = vadd.f32 %v19580_v36, %v1596_v31  ;;  %v19581_v55 = vld [vmem:[#allocation61_spill] sm:$0xff] }
 0xaff   : > { %13607 = vpow2.f32 %v6315_v43  ;;  %v17938_v35 = vadd.f32 %v17689_v60, %v6161_v9  ;;  %v6160_v16 = vadd.f32 %v6097_v34, %v5508_v58  ;;  %v6385_v22 = vsel %vm6225_vm4, %v17884_v7, %v10981_v24 }
 0xb00   : > { %12947 = vmatprep.mubr.f32.mxu1 %v6385_v22  ;;  %13027 = vmatprep.mubr.f32.mxu0 %v6385_v22  ;;  %v4858_v7 = vadd.f32 %v17145_v47, %v4206_v52  ;;  %v2906_v43 = vadd.f32 %v19581_v55, %v2254_v14 }
 0xb01   : > { %v6264_v32 = vmin.f32 %v17938_v35, 0.0  ;;  %v17947_v0 = vadd.f32 %v17689_v60, %v6160_v16  ;;  %12948 = vmatmul.mubr.f32.gmra.mxu1 %v6386_v38  ;;  %13028 = vmatmul.mubr.f32.gmra.mxu0 %v6386_v38  ;;  %v19582_v16 = vld [vmem:[#allocation77_spill] sm:$0xff]  ;;  %vm6232_vm11 = vcmp.gt.f32.partialorder %v17938_v35, 0.0 }
 0xb02   : > { %v13602_v54 = vpop.eup %13601  ;;  %v5510_v57 = vadd.f32 %v17536_v50, %v4858_v7  ;;  %v3558_v22 = vadd.f32 %v19582_v16, %v2906_v43 }
 0xb03   : > { %v6321_v20 = vmul.f32 1.442695, %v6264_v32  ;;  %v6263_v6 = vmin.f32 %v17947_v0, 0.0  ;;  %v10984_v25 = vadd.f32 -1.0, %v13602_v54  ;;  %vm6231_vm10 = vcmp.gt.f32.partialorder %v17947_v0, 0.0 }
 0xb04   : > { %v13604_v48 = vpop.eup %13603  ;;  %v12881_v59 = vpop.f32.mrf.mxu1  ;;  %v4210_v37 = vadd.f32 %v19583_v13, %v3558_v22 }
 0xb05   : > { %13609 = vpow2.f32 %v6321_v20  ;;  %v6319_v26 = vmul.f32 1.442695, %v6263_v6  ;;  %v6163_v12 = vadd.f32 %v12881_v59, %v17534_v63  ;;  %v10983_v45 = vadd.f32 -1.0, %v13604_v48 }
 0xb06   : > { %v6107_v27 = vpop.f32.mrf.mxu1  ;;  %v4208_v63 = vadd.f32 %v19579_v23, %v3556_v18  ;;  %v6388_v40 = vsel %vm6228_vm7, %v17896_v15, %v10984_v25  ;;  %v4862_v54 = vadd.f32 %v17155_v56, %v4210_v37 }
 0xb07   : > { %13611 = vpow2.f32 %v6319_v26  ;;  %v17959_v47 = vadd.f32 %v17689_v60, %v6163_v12  ;;  %v6162_v62 = vadd.f32 %v6107_v27, %v5510_v57  ;;  %v6387_v50 = vsel %vm6227_vm6, %v17905_v4, %v10983_v45 }
 0xb08   : > { %12950 = vmatprep.mubr.f32.mxu1 %v6387_v50  ;;  %13030 = vmatprep.mubr.f32.mxu0 %v6387_v50  ;;  %v4860_v4 = vadd.f32 %v17150_v53, %v4208_v63 }
 0xb09   : > { %v6266_v28 = vmin.f32 %v17959_v47, 0.0  ;;  %v17968_v46 = vadd.f32 %v17689_v60, %v6162_v62  ;;  %12951 = vmatmul.mubr.f32.gmra.mxu1 %v6388_v40  ;;  %13031 = vmatmul.mubr.f32.gmra.mxu0 %v6388_v40  ;;  %vm6234_vm13 = vcmp.gt.f32.partialorder %v17959_v47, 0.0 }
 0xb0a   : > { %v13606_v8 = vpop.eup %13605  ;;  %v5512_v15 = vadd.f32 %v17541_v11, %v4860_v4 }
 0xb0b   : > { %v6325_v3 = vmul.f32 1.442695, %v6266_v28  ;;  %v6265_v58 = vmin.f32 %v17968_v46, 0.0  ;;  %v10986_v24 = vadd.f32 -1.0, %v13606_v8  ;;  %vm6233_vm12 = vcmp.gt.f32.partialorder %v17968_v46, 0.0 }
 0xb0c   : > { %v13608_v1 = vpop.eup %13607  ;;  %v12884_v9 = vpop.f32.mrf.mxu1 }
 0xb0d   : > { %13613 = vpow2.f32 %v6325_v3  ;;  %v6323_v33 = vmul.f32 1.442695, %v6265_v58  ;;  %v6165_v49 = vadd.f32 %v12884_v9, %v17539_v61  ;;  %v10985_v34 = vadd.f32 -1.0, %v13608_v1 }
 0xb0e   : > { %v6117_v41 = vpop.f32.mrf.mxu1  ;;  %v6390_v61 = vsel %vm6230_vm9, %v17917_v30, %v10986_v24 }
 0xb0f   : > { %13615 = vpow2.f32 %v6323_v33  ;;  %v17980_v53 = vadd.f32 %v17689_v60, %v6165_v49  ;;  %v6164_v19 = vadd.f32 %v6117_v41, %v5512_v15  ;;  %v6389_v11 = vsel %vm6229_vm8, %v17926_v5, %v10985_v34 }
 0xb10   : > { %12953 = vmatprep.mubr.f32.mxu1 %v6389_v11  ;;  %13033 = vmatprep.mubr.f32.mxu0 %v6389_v11  ;;  %v5514_v5 = vadd.f32 %v17546_v2, %v4862_v54 }
 0xb11   : > { %v6268_v52 = vmin.f32 %v17980_v53, 0.0  ;;  %v6203_v38 = vadd.f32 %v17689_v60, %v6164_v19  ;;  %12954 = vmatmul.mubr.f32.gmra.mxu1 %v6390_v61  ;;  %13034 = vmatmul.mubr.f32.gmra.mxu0 %v6390_v61  ;;  %vm6236_vm15 = vcmp.gt.f32.partialorder %v17980_v53, 0.0  ;;  %v6915_v19 = vld [vmem:[%s19361_s5 + $0x8] sm:$0xff] }
 0xb12   : > { %v13610_v32 = vpop.eup %13609 }
 0xb13   : > { %v6329_v21 = vmul.f32 1.442695, %v6268_v52  ;;  %v6267_v44 = vmin.f32 %v6203_v38, 0.0  ;;  %v10988_v6 = vadd.f32 -1.0, %v13610_v32  ;;  %vm6235_vm14 = vcmp.gt.f32.partialorder %v6203_v38, 0.0  ;;  %v11028_v32 = vld [vmem:[%s19361_s5 + $0x108] sm:$0xff] }
 0xb14   : > { %v13612_v7 = vpop.eup %13611  ;;  %v12887_v20 = vpop.f32.mrf.mxu1 }
 0xb15   : > { %13617 = vpow2.f32 %v6329_v21  ;;  %v6327_v48 = vmul.f32 1.442695, %v6267_v44  ;;  %v6167_v30 = vadd.f32 %v12887_v20, %v17544_v39  ;;  %v10987_v29 = vadd.f32 -1.0, %v13612_v7 }
 0xb16   : > { %v6127_v17 = vpop.f32.mrf.mxu1  ;;  %v6392_v2 = vsel %vm6232_vm11, %v17938_v35, %v10988_v6 }
 0xb17   : > { %13619 = vpow2.f32 %v6327_v48  ;;  %v6206_v56 = vadd.f32 %v17689_v60, %v6167_v30  ;;  %v6166_v57 = vadd.f32 %v6127_v17, %v5514_v5  ;;  %v6391_v59 = vsel %vm6231_vm10, %v17947_v0, %v10987_v29 }
 0xb18   : > { %12956 = vmatprep.mubr.f32.mxu1 %v6391_v59  ;;  %13036 = vmatprep.mubr.f32.mxu0 %v6391_v59 }
 0xb19   : > { %v6270_v25 = vmin.f32 %v6206_v56, 0.0  ;;  %v6205_v26 = vadd.f32 %v17689_v60, %v6166_v57  ;;  %12957 = vmatmul.mubr.f32.gmra.mxu1 %v6392_v2  ;;  %13037 = vmatmul.mubr.f32.gmra.mxu0 %v6392_v2  ;;  %vm6238_vm2 = vcmp.gt.f32.partialorder %v6206_v56, 0.0 }
 0xb1a   : > { %v13614_v39 = vpop.eup %13613 }
 0xb1b   : > { %v6333_v12 = vmul.f32 1.442695, %v6270_v25  ;;  %v6269_v45 = vmin.f32 %v6205_v26, 0.0  ;;  %v10990_v18 = vadd.f32 -1.0, %v13614_v39  ;;  %vm6237_vm1 = vcmp.gt.f32.partialorder %v6205_v26, 0.0 }
 0xb1c   : > { %v13616_v42 = vpop.eup %13615 }
 0xb1d   : > { %13621 = vpow2.f32 %v6333_v12  ;;  %v6331_v27 = vmul.f32 1.442695, %v6269_v45  ;;  %v10989_v62 = vadd.f32 -1.0, %v13616_v42  ;;  %v6394_v60 = vsel %vm6234_vm13, %v17959_v47, %v10990_v18 }
 0xb1f   : > { %13623 = vpow2.f32 %v6331_v27  ;;  %v6393_v0 = vsel %vm6233_vm12, %v17968_v46, %v10989_v62 }
 0xb20   : > { %12959 = vmatprep.mubr.f32.mxu1 %v6393_v0  ;;  %13039 = vmatprep.mubr.f32.mxu0 %v6393_v0 }
 0xb21   : > { %12960 = vmatmul.mubr.f32.gmra.mxu1 %v6394_v60  ;;  %13040 = vmatmul.mubr.f32.gmra.mxu0 %v6394_v60 }
 0xb22   : > { %v13618_v35 = vpop.eup %13617 }
 0xb23   : > { %v10992_v10 = vadd.f32 -1.0, %v13618_v35 }
 0xb24   : > { %v13620_v50 = vpop.eup %13619 }
 0xb25   : > { %v10991_v51 = vadd.f32 -1.0, %v13620_v50  ;;  %v6396_v23 = vsel %vm6236_vm15, %v17980_v53, %v10992_v10 }
 0xb27   : > { %v6395_v31 = vsel %vm6235_vm14, %v6203_v38, %v10991_v51 }
 0xb28   : > { %12962 = vmatprep.mubr.f32.mxu1 %v6395_v31  ;;  %13042 = vmatprep.mubr.f32.mxu0 %v6395_v31 }
 0xb29   : > { %12963 = vmatmul.mubr.f32.gmra.mxu1 %v6396_v23  ;;  %13043 = vmatmul.mubr.f32.gmra.mxu0 %v6396_v23 }
 0xb2a   : > { %v13622_v63 = vpop.eup %13621 }
 0xb2b   : > { %v10994_v28 = vadd.f32 -1.0, %v13622_v63 }
 0xb2c   : > { %v13624_v40 = vpop.eup %13623 }
 0xb2d   : > { %v10993_v47 = vadd.f32 -1.0, %v13624_v40  ;;  %v6398_v8 = vsel %vm6238_vm2, %v6206_v56, %v10994_v28 }
 0xb2f   : > { %v6397_v46 = vsel %vm6237_vm1, %v6205_v26, %v10993_v47 }
 0xb30   : > { %12965 = vmatprep.mubr.f32.mxu1 %v6397_v46  ;;  %13045 = vmatprep.mubr.f32.mxu0 %v6397_v46 }
 0xb31   : > { %12966 = vmatmul.mubr.f32.gmra.mxu1 %v6398_v8  ;;  %13046 = vmatmul.mubr.f32.gmra.mxu0 %v6398_v8 }
 0xb32   : > { %6994 = vmatprep.mubr.f32.mxu1 %v6915_v19  ;;  %7246 = vmatprep.mubr.f32.mxu0 %v11028_v32 }
 0xb79   : > { %v12922_v36 = vpop.f32.mrf.mxu1  ;;  %v13002_v14 = vpop.f32.mrf.mxu0 }
 0xb7a   : > { %v18002_v4 = vmax.f32 %v12922_v36, %v13002_v14 }
 0xb7b   : > { %v18004_v3 = vpop.f32.mrf.mxu1  ;;  %v18006_v58 = vpop.f32.mrf.mxu0 }
 0xb7c   : > { %19584 = vst [vmem:[#allocation62_spill] sm:$0xff] %v18002_v4 }
 0xb81   : > { %v12925_v1 = vpop.f32.mrf.mxu1  ;;  %v13005_v55 = vpop.f32.mrf.mxu0 }
 0xb82   : > { %v18008_v43 = vmax.f32 %v12925_v1, %v13005_v55 }
 0xb83   : > { %v18010_v15 = vpop.f32.mrf.mxu1  ;;  %v18012_v9 = vpop.f32.mrf.mxu0 }
 0xb89   : > { %v12928_v24 = vpop.f32.mrf.mxu1  ;;  %v13008_v33 = vpop.f32.mrf.mxu0 }
 0xb8a   : > { %v18014_v49 = vmax.f32 %v12928_v24, %v13008_v33 }
 0xb8b   : > { %v18016_v34 = vpop.f32.mrf.mxu1  ;;  %v18018_v16 = vpop.f32.mrf.mxu0 }
 0xb91   : > { %v12931_v22 = vpop.f32.mrf.mxu1  ;;  %v13011_v41 = vpop.f32.mrf.mxu0 }
 0xb92   : > { %v18020_v53 = vmax.f32 %v12931_v22, %v13011_v41 }
 0xb93   : > { %v18025_v11 = vpop.f32.mrf.mxu1  ;;  %v18027_v13 = vpop.f32.mrf.mxu0 }
 0xb99   : > { %v18029_v37 = vpop.f32.mrf.mxu1  ;;  %v18031_v61 = vpop.f32.mrf.mxu0 }
 0xb9b   : > { %v18033_v52 = vpop.f32.mrf.mxu1  ;;  %v18035_v38 = vpop.f32.mrf.mxu0 }
 0xba1   : > { %v18040_v54 = vpop.f32.mrf.mxu1  ;;  %v18042_v21 = vpop.f32.mrf.mxu0 }
 0xba3   : > { %v18044_v44 = vpop.f32.mrf.mxu1  ;;  %v18046_v7 = vpop.f32.mrf.mxu0 }
 0xba9   : > { %v12940_v5 = vpop.f32.mrf.mxu1  ;;  %v13020_v20 = vpop.f32.mrf.mxu0 }
 0xbab   : > { %v6541_v6 = vpop.f32.mrf.mxu1  ;;  %v6783_v48 = vpop.f32.mrf.mxu0 }
 0xbb1   : > { %v12943_v30 = vpop.f32.mrf.mxu1  ;;  %v13023_v29 = vpop.f32.mrf.mxu0 }
 0xbb2   : > { %v18082_v33 = vmax.f32 %v12943_v30, %v13023_v29  ;;  %v18096_v30 = vmax.f32 %v12940_v5, %v13020_v20  ;;  %v18114_v5 = vmax.f32 %v18040_v54, %v18042_v21  ;;  %v18134_v21 = vmax.f32 %v18029_v37, %v18031_v61 }
 0xbb3   : > { %v6551_v17 = vpop.f32.mrf.mxu1  ;;  %v6793_v56 = vpop.f32.mrf.mxu0 }
 0xbb4   : > { %v18088_v32 = vmax.f32 %v6551_v17, %v6793_v56  ;;  %v18104_v17 = vmax.f32 %v6541_v6, %v6783_v48  ;;  %v18124_v6 = vmax.f32 %v18044_v44, %v18046_v7  ;;  %v18144_v7 = vmax.f32 %v18033_v52, %v18035_v38 }
 0xbb5   : > { %v18164_v52 = vmax.f32 %v18025_v11, %v18027_v13  ;;  %v18184_v13 = vmax.f32 %v18016_v34, %v18018_v16  ;;  %v18204_v16 = vmax.f32 %v18010_v15, %v18012_v9  ;;  %v18224_v9 = vmax.f32 %v18004_v3, %v18006_v58  ;;  %v11027_v3 = vld [vmem:[%s19361_s5 + $0x100] sm:$0xff]  ;;  %v11030_v58 = vld [vmem:[%s19361_s5 + $0x118] sm:$0xff] }
 0xbb9   : > { %v18048_v57 = vpop.f32.mrf.mxu1  ;;  %v18050_v59 = vpop.f32.mrf.mxu0 }
 0xbbb   : > { %v18052_v2 = vpop.f32.mrf.mxu1  ;;  %v18054_v25 = vpop.f32.mrf.mxu0 }
 0xbbc   : > { %v18218_v15 = vmax.f32 %v18052_v2, %v18054_v25  ;;  %v6917_v2 = vld [vmem:[%s19361_s5 + $0x18] sm:$0xff]  ;;  %v6916_v25 = vld [vmem:[%s19361_s5 + $0x10] sm:$0xff] }
 0xbc1   : > { %v18056_v26 = vpop.f32.mrf.mxu1  ;;  %v18058_v39 = vpop.f32.mrf.mxu0 }
 0xbc2   : > { %v18190_v48 = vmax.f32 %v18056_v26, %v18058_v39  ;;  %v18210_v26 = vmax.f32 %v18048_v57, %v18050_v59  ;;  %v19585_v57 = vld [vmem:[#allocation62_spill] sm:$0xff]  ;;  %v6919_v39 = vld [vmem:[%s19361_s5 + $0x28] sm:$0xff] }
 0xbc3   : > { %v18060_v12 = vpop.f32.mrf.mxu1  ;;  %v18062_v45 = vpop.f32.mrf.mxu0  ;;  %v6914_v59 = vld [vmem:[%s19361_s5] sm:$0xff] }
 0xbc4   : > { %v18198_v34 = vmax.f32 %v18060_v12, %v18062_v45  ;;  %v11029_v12 = vld [vmem:[%s19361_s5 + $0x110] sm:$0xff]  ;;  %v11032_v45 = vld [vmem:[%s19361_s5 + $0x128] sm:$0xff] }
 0xbc9   : > { %v18064_v42 = vpop.f32.mrf.mxu1  ;;  %v18066_v18 = vpop.f32.mrf.mxu0 }
 0xbca   : > { %v18170_v38 = vmax.f32 %v18064_v42, %v18066_v18  ;;  %v6918_v42 = vld [vmem:[%s19361_s5 + $0x20] sm:$0xff]  ;;  %v6921_v18 = vld [vmem:[%s19361_s5 + $0x38] sm:$0xff] }
 0xbcb   : > { %v18068_v27 = vpop.f32.mrf.mxu1  ;;  %v18070_v62 = vpop.f32.mrf.mxu0 }
 0xbcc   : > { %v18178_v11 = vmax.f32 %v18068_v27, %v18070_v62  ;;  %v11031_v27 = vld [vmem:[%s19361_s5 + $0x120] sm:$0xff]  ;;  %v11034_v62 = vld [vmem:[%s19361_s5 + $0x138] sm:$0xff] }
 0xbd1   : > { %v18072_v0 = vpop.f32.mrf.mxu1  ;;  %v18074_v60 = vpop.f32.mrf.mxu0 }
 0xbd2   : > { %v18150_v37 = vmax.f32 %v18072_v0, %v18074_v60  ;;  %v6920_v0 = vld [vmem:[%s19361_s5 + $0x30] sm:$0xff]  ;;  %v6923_v60 = vld [vmem:[%s19361_s5 + $0x48] sm:$0xff] }
 0xbd3   : > { %v18076_v35 = vpop.f32.mrf.mxu1  ;;  %v18078_v50 = vpop.f32.mrf.mxu0 }
 0xbd4   : > { %v18158_v61 = vmax.f32 %v18076_v35, %v18078_v50  ;;  %v11033_v35 = vld [vmem:[%s19361_s5 + $0x130] sm:$0xff]  ;;  %v11036_v50 = vld [vmem:[%s19361_s5 + $0x148] sm:$0xff] }
 0xbd9   : > { %v12958_v10 = vpop.f32.mrf.mxu1  ;;  %v13038_v51 = vpop.f32.mrf.mxu0 }
 0xbda   : > { %v18128_v54 = vmax.f32 %v12958_v10, %v13038_v51  ;;  %v6922_v10 = vld [vmem:[%s19361_s5 + $0x40] sm:$0xff]  ;;  %v6925_v51 = vld [vmem:[%s19361_s5 + $0x58] sm:$0xff] }
 0xbdb   : > { %v6601_v31 = vpop.f32.mrf.mxu1  ;;  %v6843_v23 = vpop.f32.mrf.mxu0 }
 0xbdc   : > { %v18138_v44 = vmax.f32 %v6601_v31, %v6843_v23  ;;  %v11035_v31 = vld [vmem:[%s19361_s5 + $0x140] sm:$0xff]  ;;  %v11038_v23 = vld [vmem:[%s19361_s5 + $0x158] sm:$0xff] }
 0xbe1   : > { %v12961_v63 = vpop.f32.mrf.mxu1  ;;  %v13041_v40 = vpop.f32.mrf.mxu0 }
 0xbe2   : > { %v18108_v56 = vmax.f32 %v12961_v63, %v13041_v40  ;;  %v6924_v63 = vld [vmem:[%s19361_s5 + $0x50] sm:$0xff]  ;;  %v6927_v40 = vld [vmem:[%s19361_s5 + $0x68] sm:$0xff] }
 0xbe3   : > { %v6611_v28 = vpop.f32.mrf.mxu1  ;;  %v6853_v47 = vpop.f32.mrf.mxu0 }
 0xbe4   : > { %v18118_v20 = vmax.f32 %v6611_v28, %v6853_v47  ;;  %v11037_v28 = vld [vmem:[%s19361_s5 + $0x150] sm:$0xff]  ;;  %v11040_v47 = vld [vmem:[%s19361_s5 + $0x168] sm:$0xff] }
 0xbe9   : > { %v12964_v46 = vpop.f32.mrf.mxu1  ;;  %v13044_v8 = vpop.f32.mrf.mxu0 }
 0xbea   : > { %v18092_v4 = vmax.f32 %v12964_v46, %v13044_v8  ;;  %v6926_v46 = vld [vmem:[%s19361_s5 + $0x60] sm:$0xff]  ;;  %v6929_v8 = vld [vmem:[%s19361_s5 + $0x78] sm:$0xff] }
 0xbeb   : > { %v6621_v36 = vpop.f32.mrf.mxu1  ;;  %v6863_v14 = vpop.f32.mrf.mxu0 }
 0xbec   : > { %v18100_v29 = vmax.f32 %v6621_v36, %v6863_v14  ;;  %v11039_v36 = vld [vmem:[%s19361_s5 + $0x160] sm:$0xff]  ;;  %v11042_v14 = vld [vmem:[%s19361_s5 + $0x178] sm:$0xff] }
 0xbf1   : > { %v12967_v1 = vpop.f32.mrf.mxu1  ;;  %v13047_v55 = vpop.f32.mrf.mxu0 }
 0xbf2   : > { %v18080_v24 = vmax.f32 %v12967_v1, %v13047_v55  ;;  %v6928_v1 = vld [vmem:[%s19361_s5 + $0x70] sm:$0xff]  ;;  %v11012_v55 = vld [vmem:[%s19361_s5 + $0x88] sm:$0xff] }
 0xbf3   : > { %v6631_v22 = vpop.f32.mrf.mxu1  ;;  %v6873_v41 = vpop.f32.mrf.mxu0 }
 0xbf4   : > { %v18084_v19 = vmax.f32 %v6631_v22, %v6873_v41  ;;  %11800 = vmatprep.subr.mxu1 %v18080_v24  ;;  %11912 = vmatprep.subr.mxu0 %v18080_v24  ;;  %v11041_v22 = vld [vmem:[%s19361_s5 + $0x170] sm:$0xff]  ;;  %v11011_v41 = vld [vmem:[%s19361_s5 + $0x80] sm:$0xff] }
 0xbf5   : > { %11801 = vmatpush3.msra.mxu1 %v18082_v33  ;;  %11913 = vmatpush3.msra.mxu0 %v18082_v33 }
 0xbf6   : > { %11802 = vmatprep.subr.mxu1 %v18084_v19  ;;  %11914 = vmatprep.subr.mxu0 %v18084_v19 }
 0xbf7   : > { %11803 = vmatpush3.msra.mxu1 %v18088_v32  ;;  %11915 = vmatpush3.msra.mxu0 %v18088_v32 }
 0xbf8   : > { %11804 = vmatprep.subr.mxu1 %v18092_v4  ;;  %11916 = vmatprep.subr.mxu0 %v18092_v4 }
 0xbf9   : > { %11805 = vmatpush3.msra.mxu1 %v18096_v30  ;;  %11917 = vmatpush3.msra.mxu0 %v18096_v30 }
 0xbfa   : > { %11806 = vmatprep.subr.mxu1 %v18100_v29  ;;  %11918 = vmatprep.subr.mxu0 %v18100_v29 }
 0xbfb   : > { %11807 = vmatpush3.msra.mxu1 %v18104_v17  ;;  %11919 = vmatpush3.msra.mxu0 %v18104_v17 }
 0xbfc   : > { %11808 = vmatprep.subr.mxu1 %v18108_v56  ;;  %11920 = vmatprep.subr.mxu0 %v18108_v56 }
 0xbfd   : > { %11809 = vmatpush3.msra.mxu1 %v18114_v5  ;;  %11921 = vmatpush3.msra.mxu0 %v18114_v5 }
 0xbfe   : > { %11810 = vmatprep.subr.mxu1 %v18118_v20  ;;  %11922 = vmatprep.subr.mxu0 %v18118_v20 }
 0xbff   : > { %11811 = vmatpush3.msra.mxu1 %v18124_v6  ;;  %11923 = vmatpush3.msra.mxu0 %v18124_v6 }
 0xc00   : > { %11812 = vmatprep.subr.mxu1 %v18128_v54  ;;  %11924 = vmatprep.subr.mxu0 %v18128_v54 }
 0xc01   : > { %11813 = vmatpush3.msra.mxu1 %v18134_v21  ;;  %11925 = vmatpush3.msra.mxu0 %v18134_v21 }
 0xc02   : > { %11814 = vmatprep.subr.mxu1 %v18138_v44  ;;  %11926 = vmatprep.subr.mxu0 %v18138_v44 }
 0xc03   : > { %11815 = vmatpush3.msra.mxu1 %v18144_v7  ;;  %11927 = vmatpush3.msra.mxu0 %v18144_v7 }
 0xc04   : > { %11816 = vmatprep.subr.mxu1 %v18150_v37  ;;  %11928 = vmatprep.subr.mxu0 %v18150_v37 }
 0xc05   : > { %11817 = vmatpush3.msra.mxu1 %v18020_v53  ;;  %11929 = vmatpush3.msra.mxu0 %v18020_v53 }
 0xc06   : > { %11818 = vmatprep.subr.mxu1 %v18158_v61  ;;  %11930 = vmatprep.subr.mxu0 %v18158_v61 }
 0xc07   : > { %11819 = vmatpush3.msra.mxu1 %v18164_v52  ;;  %11931 = vmatpush3.msra.mxu0 %v18164_v52 }
 0xc08   : > { %11820 = vmatprep.subr.mxu1 %v18170_v38  ;;  %11932 = vmatprep.subr.mxu0 %v18170_v38 }
 0xc09   : > { %11821 = vmatpush3.msra.mxu1 %v18014_v49  ;;  %11933 = vmatpush3.msra.mxu0 %v18014_v49 }
 0xc0a   : > { %11822 = vmatprep.subr.mxu1 %v18178_v11  ;;  %11934 = vmatprep.subr.mxu0 %v18178_v11 }
 0xc0b   : > { %11823 = vmatpush3.msra.mxu1 %v18184_v13  ;;  %11935 = vmatpush3.msra.mxu0 %v18184_v13 }
 0xc0c   : > { %11824 = vmatprep.subr.mxu1 %v18190_v48  ;;  %11936 = vmatprep.subr.mxu0 %v18190_v48 }
 0xc0d   : > { %11825 = vmatpush3.msra.mxu1 %v18008_v43  ;;  %11937 = vmatpush3.msra.mxu0 %v18008_v43 }
 0xc0e   : > { %11826 = vmatprep.subr.mxu1 %v18198_v34  ;;  %11938 = vmatprep.subr.mxu0 %v18198_v34 }
 0xc0f   : > { %11827 = vmatpush3.msra.mxu1 %v18204_v16  ;;  %11939 = vmatpush3.msra.mxu0 %v18204_v16 }
 0xc10   : > { %11828 = vmatprep.subr.mxu1 %v18210_v26  ;;  %11940 = vmatprep.subr.mxu0 %v18210_v26 }
 0xc11   : > { %11829 = vmatpush3.msra.mxu1 %v19585_v57  ;;  %11941 = vmatpush3.msra.mxu0 %v19585_v57 }
 0xc12   : > { %11830 = vmatprep.subr.mxu1 %v18218_v15  ;;  %11942 = vmatprep.subr.mxu0 %v18218_v15 }
 0xc13   : > { %11831 = vmatpush3.msra.mxu1 %v18224_v9  ;;  %11943 = vmatpush3.msra.mxu0 %v18224_v9 }
 0xc14   : > { %6995 = vmatmul.mubr.f32.vlgmr.msra.gmra.mxu1 %v6914_v59  ;;  %11856 = vmatprep.subr.mxu1 %v18080_v24  ;;  %v11014_v59 = vld [vmem:[%s19361_s5 + $0x98] sm:$0xff] }
 0xc15   : > { %11857 = vmatpush3.msra.mxu1 %v18082_v33  ;;  %6999 = vmatprep.mubr.f32.mxu1 %v6917_v2  ;;  %v11013_v2 = vld [vmem:[%s19361_s5 + $0x90] sm:$0xff] }
 0xc16   : > { %11858 = vmatprep.subr.mxu1 %v18084_v19  ;;  %7247 = vmatmul.mubr.f32.vlgmr.msra.gmra.mxu0 %v11027_v3  ;;  %v11016_v3 = vld [vmem:[%s19361_s5 + $0xa8] sm:$0xff] }
 0xc17   : > { %11859 = vmatpush3.msra.mxu1 %v18088_v32  ;;  %7251 = vmatprep.mubr.f32.mxu0 %v11030_v58 }
 0xc18   : > { %7000 = vmatmul.mubr.f32.gmra.mxu1 %v6916_v25  ;;  %11860 = vmatprep.subr.mxu1 %v18092_v4 }
 0xc19   : > { %11861 = vmatpush3.msra.mxu1 %v18096_v30  ;;  %7004 = vmatprep.mubr.f32.mxu1 %v6919_v39 }
 0xc1a   : > { %11862 = vmatprep.subr.mxu1 %v18100_v29  ;;  %7252 = vmatmul.mubr.f32.gmra.mxu0 %v11029_v12 }
 0xc1b   : > { %11863 = vmatpush3.msra.mxu1 %v18104_v17  ;;  %7256 = vmatprep.mubr.f32.mxu0 %v11032_v45 }
 0xc1c   : > { %7005 = vmatmul.mubr.f32.gmra.mxu1 %v6918_v42  ;;  %11864 = vmatprep.subr.mxu1 %v18108_v56 }
 0xc1d   : > { %11865 = vmatpush3.msra.mxu1 %v18114_v5  ;;  %7009 = vmatprep.mubr.f32.mxu1 %v6921_v18 }
 0xc1e   : > { %11866 = vmatprep.subr.mxu1 %v18118_v20  ;;  %7257 = vmatmul.mubr.f32.gmra.mxu0 %v11031_v27 }
 0xc1f   : > { %11867 = vmatpush3.msra.mxu1 %v18124_v6  ;;  %7261 = vmatprep.mubr.f32.mxu0 %v11034_v62 }
 0xc20   : > { %7010 = vmatmul.mubr.f32.gmra.mxu1 %v6920_v0  ;;  %11868 = vmatprep.subr.mxu1 %v18128_v54 }
 0xc21   : > { %11869 = vmatpush3.msra.mxu1 %v18134_v21  ;;  %7014 = vmatprep.mubr.f32.mxu1 %v6923_v60 }
 0xc22   : > { %11870 = vmatprep.subr.mxu1 %v18138_v44  ;;  %7262 = vmatmul.mubr.f32.gmra.mxu0 %v11033_v35 }
 0xc23   : > { %11871 = vmatpush3.msra.mxu1 %v18144_v7  ;;  %7266 = vmatprep.mubr.f32.mxu0 %v11036_v50 }
 0xc24   : > { %7015 = vmatmul.mubr.f32.gmra.mxu1 %v6922_v10  ;;  %11872 = vmatprep.subr.mxu1 %v18150_v37 }
 0xc25   : > { %11873 = vmatpush3.msra.mxu1 %v18020_v53  ;;  %7019 = vmatprep.mubr.f32.mxu1 %v6925_v51 }
 0xc26   : > { %11874 = vmatprep.subr.mxu1 %v18158_v61  ;;  %7267 = vmatmul.mubr.f32.gmra.mxu0 %v11035_v31 }
 0xc27   : > { %11875 = vmatpush3.msra.mxu1 %v18164_v52  ;;  %7271 = vmatprep.mubr.f32.mxu0 %v11038_v23 }
 0xc28   : > { %7020 = vmatmul.mubr.f32.gmra.mxu1 %v6924_v63  ;;  %11876 = vmatprep.subr.mxu1 %v18170_v38 }
 0xc29   : > { %11877 = vmatpush3.msra.mxu1 %v18014_v49  ;;  %7024 = vmatprep.mubr.f32.mxu1 %v6927_v40 }
 0xc2a   : > { %11878 = vmatprep.subr.mxu1 %v18178_v11  ;;  %7272 = vmatmul.mubr.f32.gmra.mxu0 %v11037_v28 }
 0xc2b   : > { %11879 = vmatpush3.msra.mxu1 %v18184_v13  ;;  %7276 = vmatprep.mubr.f32.mxu0 %v11040_v47 }
 0xc2c   : > { %7025 = vmatmul.mubr.f32.gmra.mxu1 %v6926_v46  ;;  %11880 = vmatprep.subr.mxu1 %v18190_v48 }
 0xc2d   : > { %11881 = vmatpush3.msra.mxu1 %v18008_v43  ;;  %7029 = vmatprep.mubr.f32.mxu1 %v6929_v8 }
 0xc2e   : > { %11882 = vmatprep.subr.mxu1 %v18198_v34  ;;  %7277 = vmatmul.mubr.f32.gmra.mxu0 %v11039_v36 }
 0xc2f   : > { %11883 = vmatpush3.msra.mxu1 %v18204_v16  ;;  %7281 = vmatprep.mubr.f32.mxu0 %v11042_v14 }
 0xc30   : > { %7030 = vmatmul.mubr.f32.gmra.mxu1 %v6928_v1  ;;  %11884 = vmatprep.subr.mxu1 %v18210_v26 }
 0xc31   : > { %11885 = vmatpush3.msra.mxu1 %v19585_v57  ;;  %7116 = vmatprep.mubr.f32.mxu1 %v11012_v55 }
 0xc32   : > { %11886 = vmatprep.subr.mxu1 %v18218_v15  ;;  %7282 = vmatmul.mubr.f32.gmra.mxu0 %v11041_v22 }
 0xc33   : > { %11887 = vmatpush3.msra.mxu1 %v18224_v9 }
 0xc34   : > { %7117 = vmatmul.mubr.f32.vlgmr.msra.gmra.mxu1 %v11011_v41  ;;  %11968 = vmatprep.subr.mxu1 %v18080_v24  ;;  %v11015_v24 = vld [vmem:[%s19361_s5 + $0xa0] sm:$0xff] }
 0xc35   : > { %11969 = vmatpush3.msra.mxu1 %v18082_v33  ;;  %7121 = vmatprep.mubr.f32.mxu1 %v11014_v59  ;;  %v11018_v33 = vld [vmem:[%s19361_s5 + $0xb8] sm:$0xff] }
 0xc36   : > { %11970 = vmatprep.subr.mxu1 %v18084_v19  ;;  %v11020_v19 = vld [vmem:[%s19361_s5 + $0xc8] sm:$0xff] }
 0xc37   : > { %11971 = vmatpush3.msra.mxu1 %v18088_v32  ;;  %v11019_v32 = vld [vmem:[%s19361_s5 + $0xc0] sm:$0xff] }
 0xc38   : > { %7122 = vmatmul.mubr.f32.gmra.mxu1 %v11013_v2  ;;  %11972 = vmatprep.subr.mxu1 %v18092_v4  ;;  %v11017_v4 = vld [vmem:[%s19361_s5 + $0xb0] sm:$0xff] }
 0xc39   : > { %11973 = vmatpush3.msra.mxu1 %v18096_v30  ;;  %7126 = vmatprep.mubr.f32.mxu1 %v11016_v3  ;;  %v11022_v30 = vld [vmem:[%s19361_s5 + $0xd8] sm:$0xff] }
 0xc3a   : > { %11974 = vmatprep.subr.mxu1 %v18100_v29  ;;  %v11021_v29 = vld [vmem:[%s19361_s5 + $0xd0] sm:$0xff] }
 0xc3b   : > { %11975 = vmatpush3.msra.mxu1 %v18104_v17  ;;  %v11024_v17 = vld [vmem:[%s19361_s5 + $0xe8] sm:$0xff] }
 0xc3c   : > { %7127 = vmatmul.mubr.f32.gmra.mxu1 %v11015_v24  ;;  %11976 = vmatprep.subr.mxu1 %v18108_v56  ;;  %v11026_v56 = vld [vmem:[%s19361_s5 + $0xf8] sm:$0xff] }
 0xc3d   : > { %11977 = vmatpush3.msra.mxu1 %v18114_v5  ;;  %7131 = vmatprep.mubr.f32.mxu1 %v11018_v33  ;;  %v11044_v5 = vld [vmem:[%s19361_s5 + $0x188] sm:$0xff] }
 0xc3e   : > { %11978 = vmatprep.subr.mxu1 %v18118_v20  ;;  %v11046_v20 = vld [vmem:[%s19361_s5 + $0x198] sm:$0xff] }
 0xc3f   : > { %11979 = vmatpush3.msra.mxu1 %v18124_v6  ;;  %v11045_v6 = vld [vmem:[%s19361_s5 + $0x190] sm:$0xff] }
 0xc40   : > { %7132 = vmatmul.mubr.f32.gmra.mxu1 %v11017_v4  ;;  %11980 = vmatprep.subr.mxu1 %v18128_v54  ;;  %v11048_v54 = vld [vmem:[%s19361_s5 + $0x1a8] sm:$0xff] }
 0xc41   : > { %11981 = vmatpush3.msra.mxu1 %v18134_v21  ;;  %7136 = vmatprep.mubr.f32.mxu1 %v11020_v19  ;;  %v11047_v21 = vld [vmem:[%s19361_s5 + $0x1a0] sm:$0xff] }
 0xc42   : > { %11982 = vmatprep.subr.mxu1 %v18138_v44  ;;  %v11050_v44 = vld [vmem:[%s19361_s5 + $0x1b8] sm:$0xff] }
 0xc43   : > { %11983 = vmatpush3.msra.mxu1 %v18144_v7  ;;  %v11049_v7 = vld [vmem:[%s19361_s5 + $0x1b0] sm:$0xff] }
 0xc44   : > { %7137 = vmatmul.mubr.f32.gmra.mxu1 %v11019_v32  ;;  %11984 = vmatprep.subr.mxu1 %v18150_v37  ;;  %v11052_v37 = vld [vmem:[%s19361_s5 + $0x1c8] sm:$0xff] }
 0xc45   : > { %11985 = vmatpush3.msra.mxu1 %v18020_v53  ;;  %7141 = vmatprep.mubr.f32.mxu1 %v11022_v30  ;;  %v11023_v53 = vld [vmem:[%s19361_s5 + $0xe0] sm:$0xff] }
 0xc46   : > { %11986 = vmatprep.subr.mxu1 %v18158_v61  ;;  %v11051_v61 = vld [vmem:[%s19361_s5 + $0x1c0] sm:$0xff] }
 0xc47   : > { %11987 = vmatpush3.msra.mxu1 %v18164_v52  ;;  %v11054_v52 = vld [vmem:[%s19361_s5 + $0x1d8] sm:$0xff] }
 0xc48   : > { %7142 = vmatmul.mubr.f32.gmra.mxu1 %v11021_v29  ;;  %11988 = vmatprep.subr.mxu1 %v18170_v38  ;;  %v11053_v38 = vld [vmem:[%s19361_s5 + $0x1d0] sm:$0xff] }
 0xc49   : > { %11989 = vmatpush3.msra.mxu1 %v18014_v49  ;;  %7146 = vmatprep.mubr.f32.mxu1 %v11024_v17  ;;  %v11025_v49 = vld [vmem:[%s19361_s5 + $0xf0] sm:$0xff] }
 0xc4a   : > { %11990 = vmatprep.subr.mxu1 %v18178_v11  ;;  %v11056_v11 = vld [vmem:[%s19361_s5 + $0x1e8] sm:$0xff] }
 0xc4b   : > { %11991 = vmatpush3.msra.mxu1 %v18184_v13  ;;  %v11055_v13 = vld [vmem:[%s19361_s5 + $0x1e0] sm:$0xff] }
 0xc4c   : > { %7147 = vmatmul.mubr.f32.gmra.mxu1 %v11023_v53  ;;  %11992 = vmatprep.subr.mxu1 %v18190_v48  ;;  %v11058_v48 = vld [vmem:[%s19361_s5 + $0x1f8] sm:$0xff] }
 0xc4d   : > { %11993 = vmatpush3.msra.mxu1 %v18008_v43  ;;  %7151 = vmatprep.mubr.f32.mxu1 %v11026_v56  ;;  %v11043_v43 = vld [vmem:[%s19361_s5 + $0x180] sm:$0xff] }
 0xc4e   : > { %11994 = vmatprep.subr.mxu1 %v18198_v34  ;;  %v11057_v34 = vld [vmem:[%s19361_s5 + $0x1f0] sm:$0xff] }
 0xc4f   : > { %11995 = vmatpush3.msra.mxu1 %v18204_v16  ;;  %v11067_v16 = vld [vmem:[%s19362_s6 + $0x40] sm:$0xff] }
 0xc50   : > { %7152 = vmatmul.mubr.f32.gmra.mxu1 %v11025_v49  ;;  %11996 = vmatprep.subr.mxu1 %v18210_v26  ;;  %v7425_v26 = vld [vmem:[%s19362_s6] sm:$0xff] }
 0xc51   : > { %11997 = vmatpush3.msra.mxu1 %v19585_v57  ;;  %7376 = vmatprep.mubr.f32.mxu1 %v11044_v5 }
 0xc52   : > { %11998 = vmatprep.subr.mxu1 %v18218_v15  ;;  %13064 = vmatprep.mubr.msk.f32.mxu0 %vm961_vm0, %v7425_v26 }
 0xc53   : > { %11999 = vmatpush3.msra.mxu1 %v18224_v9 }
 0xc54   : > { %7377 = vmatmul.mubr.f32.vlgmr.msra.gmra.mxu1 %v11043_v43 }
 0xc55   : > { %7381 = vmatprep.mubr.f32.mxu1 %v11046_v20 }
 0xc58   : > { %7382 = vmatmul.mubr.f32.gmra.mxu1 %v11045_v6 }
 0xc59   : > { %7386 = vmatprep.mubr.f32.mxu1 %v11048_v54 }
 0xc5c   : > { %7387 = vmatmul.mubr.f32.gmra.mxu1 %v11047_v21 }
 0xc5d   : > { %7391 = vmatprep.mubr.f32.mxu1 %v11050_v44 }
 0xc60   : > { %7392 = vmatmul.mubr.f32.gmra.mxu1 %v11049_v7 }
 0xc61   : > { %7396 = vmatprep.mubr.f32.mxu1 %v11052_v37 }
 0xc64   : > { %7397 = vmatmul.mubr.f32.gmra.mxu1 %v11051_v61 }
 0xc65   : > { %7401 = vmatprep.mubr.f32.mxu1 %v11054_v52 }
 0xc68   : > { %7402 = vmatmul.mubr.f32.gmra.mxu1 %v11053_v38 }
 0xc69   : > { %7406 = vmatprep.mubr.f32.mxu1 %v11056_v11 }
 0xc6c   : > { %7407 = vmatmul.mubr.f32.gmra.mxu1 %v11055_v13 }
 0xc6d   : > { %7411 = vmatprep.mubr.f32.mxu1 %v11058_v48 }
 0xc70   : > { %7412 = vmatmul.mubr.f32.gmra.mxu1 %v11057_v34 }
 0xc71   : > { %13092 = vmatprep.mubr.msk.f32.mxu1 %vm961_vm0, %v11067_v16 }
 0xcd4   : > { %v11832_v15 = vpop.f32.mrf.mxu1 }
 0xcd6   : > { %v11833_v9 = vpop.f32.mrf.mxu1  ;;  %v18504_v31 = vpop.f32.mrf.mxu0 }
 0xcd7   : > { %v18508_v47 = vadd.f32 %v11833_v9, %v11832_v15 }
 0xcd8   : > { %v11835_v57 = vpop.f32.mrf.mxu1  ;;  %v18506_v40 = vpop.f32.mrf.mxu0 }
 0xcd9   : > { %19586 = vst [vmem:[#allocation2_spill] sm:$0xff] %v18508_v47 }
 0xcda   : > { %v11836_v58 = vpop.f32.mrf.mxu1  ;;  %v18512_v36 = vpop.f32.mrf.mxu0 }
 0xcdb   : > { %v18516_v55 = vadd.f32 %v11836_v58, %v11835_v57 }
 0xcdc   : > { %v18490_v25 = vpop.f32.mrf.mxu1  ;;  %v18520_v59 = vpop.f32.mrf.mxu0 }
 0xcdd   : > { %19588 = vst [vmem:[#allocation78_spill] sm:$0xff] %v18516_v55 }
 0xcde   : > { %v18492_v39 = vpop.f32.mrf.mxu1  ;;  %v18524_v24 = vpop.f32.mrf.mxu0 }
 0xce0   : > { %v18494_v12 = vpop.f32.mrf.mxu1  ;;  %v18526_v19 = vpop.f32.mrf.mxu0 }
 0xce2   : > { %v18496_v45 = vpop.f32.mrf.mxu1  ;;  %v11953_v29 = vpop.f32.mrf.mxu0 }
 0xce4   : > { %v11844_v42 = vpop.f32.mrf.mxu1  ;;  %v11954_v56 = vpop.f32.mrf.mxu0 }
 0xce6   : > { %v11845_v18 = vpop.f32.mrf.mxu1  ;;  %v11956_v43 = vpop.f32.mrf.mxu0 }
 0xce7   : > { %v18498_v27 = vadd.f32 %v11845_v18, %v11844_v42 }
 0xce8   : > { %v11847_v62 = vpop.f32.mrf.mxu1  ;;  %v11957_v54 = vpop.f32.mrf.mxu0 }
 0xcea   : > { %v11848_v0 = vpop.f32.mrf.mxu1  ;;  %v11959_v7 = vpop.f32.mrf.mxu0 }
 0xceb   : > { %v18500_v60 = vadd.f32 %v11848_v0, %v11847_v62 }
 0xcec   : > { %v11850_v35 = vpop.f32.mrf.mxu1  ;;  %v11960_v52 = vpop.f32.mrf.mxu0 }
 0xcee   : > { %v11851_v50 = vpop.f32.mrf.mxu1  ;;  %v11962_v13 = vpop.f32.mrf.mxu0 }
 0xcef   : > { %v18502_v10 = vadd.f32 %v11851_v50, %v11850_v35 }
 0xcf0   : > { %v11853_v51 = vpop.f32.mrf.mxu1  ;;  %v11963_v16 = vpop.f32.mrf.mxu0 }
 0xcf2   : > { %v11854_v23 = vpop.f32.mrf.mxu1  ;;  %v11965_v9 = vpop.f32.mrf.mxu0 }
 0xcf3   : > { %v11855_v0 = vadd.f32 %v11854_v23, %v11853_v51  ;;  %v11843_v51 = vadd.f32 %v18496_v45, %v18494_v12  ;;  %v11952_v45 = vadd.f32 %v18526_v19, %v18524_v24 }
 0xcf4   : > { %v11888_v63 = vpop.f32.mrf.mxu1  ;;  %v11966_v18 = vpop.f32.mrf.mxu0 }
 0xcf6   : > { %v11889_v28 = vpop.f32.mrf.mxu1 }
 0xcf7   : > { %v18510_v46 = vadd.f32 %v11889_v28, %v11888_v63 }
 0xcf8   : > { %v11891_v8 = vpop.f32.mrf.mxu1 }
 0xcf9   : > { %19587 = vst [vmem:[#allocation3_spill] sm:$0xff] %v18510_v46  ;;  %v11964_v46 = vadd.f32 %v11963_v16, %v11962_v13  ;;  %v11069_v13 = vld [vmem:[%s19362_s6 + $0x50] sm:$0xff]  ;;  %v11070_v16 = vld [vmem:[%s19362_s6 + $0x58] sm:$0xff] }
 0xcfa   : > { %v11892_v1 = vpop.f32.mrf.mxu1 }
 0xcfb   : > { %v18518_v22 = vadd.f32 %v11892_v1, %v11891_v8  ;;  %v11967_v8 = vadd.f32 %v11966_v18, %v11965_v9  ;;  %v11087_v9 = vld [vmem:[%s19363_s7 + $0x60] sm:$0xff]  ;;  %v11073_v18 = vld [vmem:[%s19362_s6 + $0x70] sm:$0xff] }
 0xcfc   : > { %v11894_v41 = vpop.f32.mrf.mxu1 }
 0xcfd   : > { %19589 = vst [vmem:[#allocation32_spill] sm:$0xff] %v18518_v22 }
 0xcfe   : > { %v11895_v3 = vpop.f32.mrf.mxu1 }
 0xcff   : > { %v11896_v23 = vadd.f32 %v11895_v3, %v11894_v41 }
 0xd00   : > { %v11897_v33 = vpop.f32.mrf.mxu1 }
 0xd02   : > { %v11898_v4 = vpop.f32.mrf.mxu1 }
 0xd03   : > { %v11899_v47 = vadd.f32 %v11898_v4, %v11897_v33  ;;  %v11955_v4 = vadd.f32 %v11954_v56, %v11953_v29 }
 0xd04   : > { %v11900_v32 = vpop.f32.mrf.mxu1 }
 0xd05   : > { %v7160_v33 = vmax.f32 %v11843_v51, %v11899_v47  ;;  %v11949_v47 = vadd.f32 %v18520_v59, %v18512_v36  ;;  %v7567_v51 = vld [vmem:[%s19363_s7 + $0x28] sm:$0xff] }
 0xd06   : > { %v11901_v30 = vpop.f32.mrf.mxu1 }
 0xd07   : > { %v11902_v14 = vadd.f32 %v11901_v30, %v11900_v32 }
 0xd08   : > { %v11903_v17 = vpop.f32.mrf.mxu1 }
 0xd0a   : > { %v11904_v53 = vpop.f32.mrf.mxu1 }
 0xd0b   : > { %v11905_v63 = vadd.f32 %v11904_v53, %v11903_v17  ;;  %v11958_v17 = vadd.f32 %v11957_v54, %v11956_v43  ;;  %v7161_v53 = vmax.f32 %v18498_v27, %v11902_v14  ;;  %v19597_v43 = vld [vmem:[#allocation2_spill] sm:$0xff]  ;;  %v19598_v54 = vld [vmem:[#allocation3_spill] sm:$0xff] }
 0xd0c   : > { %v11906_v49 = vpop.f32.mrf.mxu1 }
 0xd0d   : > { %v7162_v22 = vmax.f32 %v18500_v60, %v11905_v63  ;;  %v7291_v27 = vmax.f32 %v7161_v53, %v11958_v17  ;;  %v11084_v63 = vld [vmem:[%s19363_s7 + $0x48] sm:$0xff]  ;;  %v7565_v17 = vld [vmem:[%s19363_s7 + $0x18] sm:$0xff]  ;;  %v7564_v53 = vld [vmem:[%s19363_s7 + $0x10] sm:$0xff] }
 0xd0e   : > { %v11907_v5 = vpop.f32.mrf.mxu1 }
 0xd0f   : > { %v11908_v35 = vadd.f32 %v11907_v5, %v11906_v49 }
 0xd10   : > { %v11909_v20 = vpop.f32.mrf.mxu1 }
 0xd11   : > { %v7163_v2 = vmax.f32 %v18502_v10, %v11908_v35  ;;  %v11840_v10 = vadd.f32 %v18492_v39, %v18490_v25  ;;  %v7430_v35 = vld [vmem:[%s19362_s6 + $0x28] sm:$0xff] }
 0xd12   : > { %v11910_v6 = vpop.f32.mrf.mxu1 }
 0xd13   : > { %v11911_v42 = vadd.f32 %v11910_v6, %v11909_v20  ;;  %v7293_v49 = vmax.f32 %v7163_v2, %v11964_v46  ;;  %v7159_v12 = vmax.f32 %v11840_v10, %v11896_v23  ;;  %v7290_v46 = vmax.f32 %v7160_v33, %v11955_v4  ;;  %v19592_v2 = vld [vmem:[#allocation78_spill] sm:$0xff] }
 0xd14   : > { %v18528_v21 = vpop.f32.mrf.mxu1  ;;  %v7566_v23 = vld [vmem:[%s19363_s7 + $0x20] sm:$0xff] }
 0xd15   : > { %19590 = vst [vmem:[#allocation94_spill] sm:$0xff] %v18528_v21  ;;  %v7164_v28 = vmax.f32 %v11855_v0, %v11911_v42  ;;  %v7289_v36 = vmax.f32 %v7159_v12, %v11952_v45  ;;  %v11086_v42 = vld [vmem:[%s19363_s7 + $0x58] sm:$0xff]  ;;  %v11085_v0 = vld [vmem:[%s19363_s7 + $0x50] sm:$0xff] }
 0xd16   : > { %v18530_v44 = vpop.f32.mrf.mxu1 }
 0xd17   : > { %19591 = vst [vmem:[#allocation47_spill] sm:$0xff] %v18530_v44  ;;  %v11961_v44 = vadd.f32 %v11960_v52, %v11959_v7  ;;  %v7294_v55 = vmax.f32 %v7164_v28, %v11967_v8  ;;  %v11068_v52 = vld [vmem:[%s19362_s6 + $0x48] sm:$0xff]  ;;  %v7431_v28 = vld [vmem:[%s19362_s6 + $0x30] sm:$0xff]  ;;  %v11083_v8 = vld [vmem:[%s19363_s7 + $0x40] sm:$0xff] }
 0xd18   : > { %v18532_v37 = vpop.f32.mrf.mxu1 }
 0xd19   : > { %v7292_v60 = vmax.f32 %v7162_v22, %v11961_v44  ;;  %v11946_v22 = vadd.f32 %v18506_v40, %v18504_v31  ;;  %v19593_v31 = vld [vmem:[#allocation32_spill] sm:$0xff] }
 0xd1a   : > { %v18534_v61 = vpop.f32.mrf.mxu1  ;;  %v19594_v40 = vmax.f32 %v19592_v2, %v19593_v31  ;;  %v11108_v31 = vld [vmem:[%s19362_s6 + $0x88] sm:$0xff] }
 0xd1b   : > { %v12005_v41 = vadd.f32 %v18534_v61, %v18532_v37 }
 0xd1c   : > { %v12006_v38 = vpop.f32.mrf.mxu1  ;;  %v7288_v3 = vmax.f32 %v19594_v40, %v11949_v47  ;;  %v19595_v24 = vld [vmem:[#allocation94_spill] sm:$0xff] }
 0xd1e   : > { %v12007_v11 = vpop.f32.mrf.mxu1  ;;  %v19596_v19 = vld [vmem:[#allocation47_spill] sm:$0xff]  ;;  %v18591_v37 = vmax.f32 %v7288_v3, %v12005_v41  ;;  %v11107_v41 = vld [vmem:[%s19362_s6 + $0x80] sm:$0xff]  ;;  %v11109_v3 = vld [vmem:[%s19362_s6 + $0x90] sm:$0xff] }
 0xd1f   : > { %v12008_v14 = vadd.f32 %v12007_v11, %v12006_v38  ;;  %v12002_v29 = vadd.f32 %v19596_v19, %v19595_v24  ;;  %v11090_v38 = vld [vmem:[%s19363_s7 + $0x78] sm:$0xff]  ;;  %v7426_v11 = vld [vmem:[%s19362_s6 + $0x8] sm:$0xff]  ;;  %v11111_v19 = vld [vmem:[%s19362_s6 + $0xa0] sm:$0xff] }
 0xd20   : > { %v12009_v48 = vpop.f32.mrf.mxu1  ;;  %v11110_v24 = vld [vmem:[%s19362_s6 + $0x98] sm:$0xff] }
 0xd21   : > { %v18582_v56 = vmax.f32 %v7289_v36, %v12008_v14 }
 0xd22   : > { %v12010_v34 = vpop.f32.mrf.mxu1 }
 0xd23   : > { %v12011_v25 = vadd.f32 %v12010_v34, %v12009_v48  ;;  %v7427_v48 = vld [vmem:[%s19362_s6 + $0x10] sm:$0xff] }
 0xd24   : > { %v12012_v26 = vpop.f32.mrf.mxu1  ;;  %v11089_v34 = vld [vmem:[%s19363_s7 + $0x70] sm:$0xff] }
 0xd25   : > { %v18571_v59 = vmax.f32 %v7290_v46, %v12011_v25 }
 0xd26   : > { %v12013_v15 = vpop.f32.mrf.mxu1 }
 0xd27   : > { %v12014_v5 = vadd.f32 %v12013_v15, %v12012_v26  ;;  %v11088_v26 = vld [vmem:[%s19363_s7 + $0x68] sm:$0xff]  ;;  %v11071_v15 = vld [vmem:[%s19362_s6 + $0x60] sm:$0xff] }
 0xd28   : > { %v12015_v57 = vpop.f32.mrf.mxu1 }
 0xd2a   : > { %v12016_v58 = vpop.f32.mrf.mxu1 }
 0xd2b   : > { %v12017_v32 = vadd.f32 %v12016_v58, %v12015_v57  ;;  %v7428_v57 = vld [vmem:[%s19362_s6 + $0x18] sm:$0xff]  ;;  %v11072_v58 = vld [vmem:[%s19362_s6 + $0x68] sm:$0xff] }
 0xd2c   : > { %v12018_v62 = vpop.f32.mrf.mxu1 }
 0xd2d   : > { %v18553_v39 = vmax.f32 %v7292_v60, %v12017_v32  ;;  %v7562_v32 = vld [vmem:[%s19363_s7] sm:$0xff] }
 0xd2e   : > { %v12019_v50 = vpop.f32.mrf.mxu1 }
 0xd2f   : > { %v12020_v20 = vadd.f32 %v12019_v50, %v12018_v62  ;;  %v7429_v62 = vld [vmem:[%s19362_s6 + $0x20] sm:$0xff]  ;;  %v11074_v50 = vld [vmem:[%s19362_s6 + $0x78] sm:$0xff] }
 0xd30   : > { %v12021_v1 = vpop.f32.mrf.mxu1 }
 0xd31   : > { %v18545_v7 = vmax.f32 %v7293_v49, %v12020_v20  ;;  %v7569_v20 = vld [vmem:[%s19363_s7 + $0x38] sm:$0xff]  ;;  %v7563_v49 = vld [vmem:[%s19363_s7 + $0x8] sm:$0xff] }
 0xd32   : > { %v12022_v21 = vpop.f32.mrf.mxu1 }
 0xd33   : > { %v12023_v6 = vadd.f32 %v12022_v21, %v12021_v1  ;;  %v19599_v21 = vmax.f32 %v19597_v43, %v19598_v54  ;;  %v7432_v1 = vld [vmem:[%s19362_s6 + $0x38] sm:$0xff]  ;;  %v11113_v43 = vld [vmem:[%s19362_s6 + $0xb0] sm:$0xff] }
 0xd34   : > { %v11114_v54 = vld [vmem:[%s19362_s6 + $0xb8] sm:$0xff] }
 0xd35   : > { %v18541_v30 = vmax.f32 %v7294_v55, %v12023_v6  ;;  %v18561_v55 = vmax.f32 %v7291_v27, %v12014_v5  ;;  %v7287_v44 = vmax.f32 %v19599_v21, %v11946_v22  ;;  %v7568_v6 = vld [vmem:[%s19363_s7 + $0x30] sm:$0xff]  ;;  %v11139_v21 = vld [vmem:[%s19362_s6 + $0xc0] sm:$0xff] }
 0xd37   : > { %13048 = vmatprep.subr.mxu0 %v18541_v30  ;;  %13076 = vmatprep.subr.mxu1 %v18541_v30  ;;  %v18597_v61 = vmax.f32 %v7287_v44, %v12002_v29  ;;  %v11112_v29 = vld [vmem:[%s19362_s6 + $0xa8] sm:$0xff] }
 0xd38   : > { %13049 = vmatpush3.msra.mxu0 %v18541_v30  ;;  %13077 = vmatpush3.msra.mxu1 %v18541_v30  ;;  %v11140_v44 = vld [vmem:[%s19362_s6 + $0xc8] sm:$0xff] }
 0xd39   : > { %13050 = vmatprep.subr.mxu0 %v18545_v7  ;;  %13078 = vmatprep.subr.mxu1 %v18545_v7 }
 0xd3a   : > { %13051 = vmatpush3.msra.mxu0 %v18545_v7  ;;  %13079 = vmatpush3.msra.mxu1 %v18545_v7 }
 0xd3b   : > { %13052 = vmatprep.subr.mxu0 %v18553_v39  ;;  %13080 = vmatprep.subr.mxu1 %v18553_v39 }
 0xd3c   : > { %13053 = vmatpush3.msra.mxu0 %v18553_v39  ;;  %13081 = vmatpush3.msra.mxu1 %v18553_v39 }
 0xd3d   : > { %13054 = vmatprep.subr.mxu0 %v18561_v55  ;;  %13082 = vmatprep.subr.mxu1 %v18561_v55 }
 0xd3e   : > { %13055 = vmatpush3.msra.mxu0 %v18561_v55  ;;  %13083 = vmatpush3.msra.mxu1 %v18561_v55 }
 0xd3f   : > { %13056 = vmatprep.subr.mxu0 %v18571_v59  ;;  %13084 = vmatprep.subr.mxu1 %v18571_v59 }
 0xd40   : > { %13057 = vmatpush3.msra.mxu0 %v18571_v59  ;;  %13085 = vmatpush3.msra.mxu1 %v18571_v59 }
 0xd41   : > { %13058 = vmatprep.subr.mxu0 %v18582_v56  ;;  %13086 = vmatprep.subr.mxu1 %v18582_v56 }
 0xd42   : > { %13059 = vmatpush3.msra.mxu0 %v18582_v56  ;;  %13087 = vmatpush3.msra.mxu1 %v18582_v56 }
 0xd43   : > { %13060 = vmatprep.subr.mxu0 %v18591_v37  ;;  %13088 = vmatprep.subr.mxu1 %v18591_v37 }
 0xd44   : > { %13061 = vmatpush3.msra.mxu0 %v18591_v37  ;;  %13089 = vmatpush3.msra.mxu1 %v18591_v37 }
 0xd45   : > { %13062 = vmatprep.subr.mxu0 %v18597_v61  ;;  %13090 = vmatprep.subr.mxu1 %v18597_v61 }
 0xd46   : > { %13063 = vmatpush3.msra.mxu0 %v18597_v61  ;;  %13091 = vmatpush3.msra.mxu1 %v18597_v61 }
 0xd47   : > { %13093 = vmatmul.mubr.msk.f32.vlgmr.msra.gmra.mxu1 %vm961_vm0, %v11068_v52  ;;  %13104 = vmatprep.subr.mxu0 %v11090_v38  ;;  %v11141_v52 = vld [vmem:[%s19362_s6 + $0xd0] sm:$0xff] }
 0xd48   : > { %13065 = vmatmul.mubr.msk.f32.vlgmr.msra.gmra.mxu0 %vm961_vm0, %v7426_v11  ;;  %13095 = vmatprep.mubr.msk.f32.mxu1 %vm961_vm0, %v11069_v13  ;;  %v11143_v11 = vld [vmem:[%s19362_s6 + $0xe0] sm:$0xff]  ;;  %v11144_v13 = vld [vmem:[%s19362_s6 + $0xe8] sm:$0xff] }
 0xd49   : > { %13105 = vmatpush3.msra.mxu0 %v11090_v38  ;;  %13067 = vmatprep.mubr.msk.f32.mxu0 %vm961_vm0, %v7427_v48  ;;  %v11142_v38 = vld [vmem:[%s19362_s6 + $0xd8] sm:$0xff]  ;;  %v11145_v48 = vld [vmem:[%s19362_s6 + $0xf0] sm:$0xff] }
 0xd4a   : > { %13106 = vmatprep.subr.mxu0 %v11089_v34  ;;  %13132 = vmatprep.subr.mxu1 %v7569_v20 }
 0xd4b   : > { %13107 = vmatpush3.msra.mxu0 %v11089_v34  ;;  %13096 = vmatmul.mubr.msk.f32.gmra.mxu1 %vm961_vm0, %v11070_v16  ;;  %v11146_v34 = vld [vmem:[%s19362_s6 + $0xf8] sm:$0xff]  ;;  %v11171_v16 = vld [vmem:[%s19362_s6 + $0x100] sm:$0xff] }
 0xd4c   : > { %13108 = vmatprep.subr.mxu0 %v11088_v26  ;;  %13098 = vmatprep.mubr.msk.f32.mxu1 %vm961_vm0, %v11071_v15  ;;  %v11173_v15 = vld [vmem:[%s19362_s6 + $0x110] sm:$0xff] }
 0xd4d   : > { %13109 = vmatpush3.msra.mxu0 %v11088_v26  ;;  %13133 = vmatpush3.msra.mxu1 %v7569_v20  ;;  %v11172_v26 = vld [vmem:[%s19362_s6 + $0x108] sm:$0xff]  ;;  %v11129_v20 = vld [vmem:[%s19363_s7 + $0xb0] sm:$0xff] }
 0xd4e   : > { %13110 = vmatprep.subr.mxu0 %v11087_v9  ;;  %13068 = vmatmul.mubr.msk.f32.gmra.mxu0 %vm961_vm0, %v7428_v57  ;;  %v11175_v57 = vld [vmem:[%s19362_s6 + $0x120] sm:$0xff] }
 0xd4f   : > { %13111 = vmatpush3.msra.mxu0 %v11087_v9  ;;  %13099 = vmatmul.mubr.msk.f32.gmra.mxu1 %vm961_vm0, %v11072_v58  ;;  %v11174_v9 = vld [vmem:[%s19362_s6 + $0x118] sm:$0xff]  ;;  %v11176_v58 = vld [vmem:[%s19362_s6 + $0x128] sm:$0xff] }
 0xd50   : > { %13112 = vmatprep.subr.mxu0 %v11086_v42  ;;  %13101 = vmatprep.mubr.msk.f32.mxu1 %vm961_vm0, %v11073_v18  ;;  %v11178_v18 = vld [vmem:[%s19362_s6 + $0x138] sm:$0xff] }
 0xd51   : > { %13113 = vmatpush3.msra.mxu0 %v11086_v42  ;;  %13070 = vmatprep.mubr.msk.f32.mxu0 %vm961_vm0, %v7429_v62  ;;  %v11177_v42 = vld [vmem:[%s19362_s6 + $0x130] sm:$0xff]  ;;  %v11203_v62 = vld [vmem:[%s19362_s6 + $0x140] sm:$0xff] }
 0xd52   : > { %13114 = vmatprep.subr.mxu0 %v11085_v0  ;;  %13071 = vmatmul.mubr.msk.f32.gmra.mxu0 %vm961_vm0, %v7430_v35  ;;  %v11205_v35 = vld [vmem:[%s19362_s6 + $0x150] sm:$0xff] }
 0xd53   : > { %13115 = vmatpush3.msra.mxu0 %v11085_v0  ;;  %13102 = vmatmul.mubr.msk.f32.gmra.mxu1 %vm961_vm0, %v11074_v50  ;;  %v11204_v0 = vld [vmem:[%s19362_s6 + $0x148] sm:$0xff]  ;;  %v11206_v50 = vld [vmem:[%s19362_s6 + $0x158] sm:$0xff] }
 0xd54   : > { %13116 = vmatprep.subr.mxu0 %v11084_v63  ;;  %13073 = vmatprep.mubr.msk.f32.mxu0 %vm961_vm0, %v7431_v28  ;;  %v11130_v28 = vld [vmem:[%s19363_s7 + $0xb8] sm:$0xff] }
 0xd55   : > { %13117 = vmatpush3.msra.mxu0 %v11084_v63  ;;  %13134 = vmatprep.subr.mxu1 %v7568_v6  ;;  %v11207_v63 = vld [vmem:[%s19362_s6 + $0x160] sm:$0xff] }
 0xd56   : > { %13118 = vmatprep.subr.mxu0 %v11083_v8  ;;  %13074 = vmatmul.mubr.msk.f32.gmra.mxu0 %vm961_vm0, %v7432_v1  ;;  %v11209_v1 = vld [vmem:[%s19362_s6 + $0x170] sm:$0xff] }
 0xd57   : > { %13119 = vmatpush3.msra.mxu0 %v11083_v8  ;;  %13135 = vmatpush3.msra.mxu1 %v7568_v6  ;;  %v11208_v8 = vld [vmem:[%s19362_s6 + $0x168] sm:$0xff]  ;;  %v11210_v6 = vld [vmem:[%s19362_s6 + $0x178] sm:$0xff] }
 0xd58   : > { %13160 = vmatprep.subr.mxu0 %v18541_v30  ;;  %13136 = vmatprep.subr.mxu1 %v7567_v51 }
 0xd59   : > { %13137 = vmatpush3.msra.mxu1 %v7567_v51  ;;  %v11235_v51 = vld [vmem:[%s19362_s6 + $0x180] sm:$0xff] }
 0xd5a   : > { %13138 = vmatprep.subr.mxu1 %v7566_v23 }
 0xd5b   : > { %13139 = vmatpush3.msra.mxu1 %v7566_v23  ;;  %v11128_v23 = vld [vmem:[%s19363_s7 + $0xa8] sm:$0xff] }
 0xd5c   : > { %13140 = vmatprep.subr.mxu1 %v7565_v17 }
 0xd5d   : > { %13141 = vmatpush3.msra.mxu1 %v7565_v17  ;;  %v11236_v17 = vld [vmem:[%s19362_s6 + $0x188] sm:$0xff] }
 0xd5e   : > { %13142 = vmatprep.subr.mxu1 %v7564_v53 }
 0xd5f   : > { %13143 = vmatpush3.msra.mxu1 %v7564_v53  ;;  %v11237_v53 = vld [vmem:[%s19362_s6 + $0x190] sm:$0xff] }
 0xd60   : > { %13144 = vmatprep.subr.mxu1 %v7563_v49 }
 0xd61   : > { %13145 = vmatpush3.msra.mxu1 %v7563_v49  ;;  %v11127_v49 = vld [vmem:[%s19363_s7 + $0xa0] sm:$0xff] }
 0xd62   : > { %13146 = vmatprep.subr.mxu1 %v7562_v32 }
 0xd63   : > { %13147 = vmatpush3.msra.mxu1 %v7562_v32  ;;  %v11238_v32 = vld [vmem:[%s19362_s6 + $0x198] sm:$0xff] }
 0xd64   : > { %13188 = vmatprep.subr.mxu1 %v11130_v28 }
 0xe07   : > { %v13094_v10 = vpop.f32.mrf.mxu1 }
 0xe08   : > { %v13066_v33 = vpop.f32.mrf.mxu0 }
 0xe09   : > { %v7669_v4 = vpop.f32.mrf.mxu1 }
 0xe0a   : > { %13120 = vmatprep.mubr.msk.f32.mxu0 %vm961_vm0, %v7669_v4  ;;  %v7523_v60 = vpop.f32.mrf.mxu0  ;;  %v11240_v4 = vld [vmem:[%s19362_s6 + $0x1a8] sm:$0xff] }
 0xe0b   : > { %v13097_v5 = vpop.f32.mrf.mxu1  ;;  %13121 = vmatmul.mubr.msk.f32.vlgmr.msra.gmra.mxu0 %vm961_vm0, %v13094_v10  ;;  %13148 = vmatprep.mubr.msk.f32.mxu1 %vm961_vm0, %v7523_v60  ;;  %v11239_v10 = vld [vmem:[%s19362_s6 + $0x1a0] sm:$0xff]  ;;  %v11241_v60 = vld [vmem:[%s19362_s6 + $0x1b0] sm:$0xff] }
 0xe0c   : > { %13161 = vmatpush3.msra.mxu0 %v18541_v30  ;;  %13149 = vmatmul.mubr.msk.f32.vlgmr.msra.gmra.mxu1 %vm961_vm0, %v13066_v33  ;;  %v11126_v33 = vld [vmem:[%s19363_s7 + $0x98] sm:$0xff] }
 0xe0d   : > { %13162 = vmatprep.subr.mxu0 %v18545_v7  ;;  %v7679_v12 = vpop.f32.mrf.mxu1  ;;  %13189 = vmatpush3.msra.mxu1 %v11130_v28  ;;  %v11159_v28 = vld [vmem:[%s19363_s7 + $0xe0] sm:$0xff] }
 0xe0e   : > { %13163 = vmatpush3.msra.mxu0 %v18545_v7  ;;  %13123 = vmatprep.mubr.msk.f32.mxu0 %vm961_vm0, %v7679_v12  ;;  %v13069_v45 = vpop.f32.mrf.mxu0  ;;  %v11242_v12 = vld [vmem:[%s19362_s6 + $0x1b8] sm:$0xff] }
 0xe0f   : > { %13164 = vmatprep.subr.mxu0 %v18553_v39  ;;  %v13100_v27 = vpop.f32.mrf.mxu1  ;;  %13124 = vmatmul.mubr.msk.f32.gmra.mxu0 %vm961_vm0, %v13097_v5  ;;  %v11125_v5 = vld [vmem:[%s19363_s7 + $0x90] sm:$0xff] }
 0xe10   : > { %13165 = vmatpush3.msra.mxu0 %v18553_v39  ;;  %v7533_v25 = vpop.f32.mrf.mxu0  ;;  %13190 = vmatprep.subr.mxu1 %v11129_v20 }
 0xe11   : > { %13166 = vmatprep.subr.mxu0 %v18561_v55  ;;  %v7689_v47 = vpop.f32.mrf.mxu1  ;;  %13151 = vmatprep.mubr.msk.f32.mxu1 %vm961_vm0, %v7533_v25  ;;  %v11268_v25 = vld [vmem:[%s19362_s6 + $0x1c8] sm:$0xff] }
 0xe12   : > { %13167 = vmatpush3.msra.mxu0 %v18561_v55  ;;  %13126 = vmatprep.mubr.msk.f32.mxu0 %vm961_vm0, %v7689_v47  ;;  %v13072_v46 = vpop.f32.mrf.mxu0  ;;  %v11269_v47 = vld [vmem:[%s19362_s6 + $0x1d0] sm:$0xff] }
 0xe13   : > { %13168 = vmatprep.subr.mxu0 %v18571_v59  ;;  %v13103_v14 = vpop.f32.mrf.mxu1  ;;  %13127 = vmatmul.mubr.msk.f32.gmra.mxu0 %vm961_vm0, %v13100_v27  ;;  %v11124_v27 = vld [vmem:[%s19363_s7 + $0x88] sm:$0xff] }
 0xe14   : > { %13169 = vmatpush3.msra.mxu0 %v18571_v59  ;;  %13152 = vmatmul.mubr.msk.f32.gmra.mxu1 %vm961_vm0, %v13069_v45  ;;  %v7543_v22 = vpop.f32.mrf.mxu0  ;;  %v11267_v45 = vld [vmem:[%s19362_s6 + $0x1c0] sm:$0xff] }
 0xe15   : > { %13170 = vmatprep.subr.mxu0 %v18582_v56  ;;  %v7699_v36 = vpop.f32.mrf.mxu1  ;;  %13154 = vmatprep.mubr.msk.f32.mxu1 %vm961_vm0, %v7543_v22  ;;  %v11271_v22 = vld [vmem:[%s19362_s6 + $0x1e0] sm:$0xff] }
 0xe16   : > { %13171 = vmatpush3.msra.mxu0 %v18582_v56  ;;  %13129 = vmatprep.mubr.msk.f32.mxu0 %vm961_vm0, %v7699_v36  ;;  %v13075_v2 = vpop.f32.mrf.mxu0  ;;  %v11272_v36 = vld [vmem:[%s19362_s6 + $0x1e8] sm:$0xff] }
 0xe17   : > { %13172 = vmatprep.subr.mxu0 %v18591_v37  ;;  %13130 = vmatmul.mubr.msk.f32.gmra.mxu0 %vm961_vm0, %v13103_v14  ;;  %v11270_v14 = vld [vmem:[%s19362_s6 + $0x1d8] sm:$0xff] }
 0xe18   : > { %13173 = vmatpush3.msra.mxu0 %v18591_v37  ;;  %13176 = vmatprep.mubr.msk.f32.mxu0 %vm961_vm0, %v11107_v41  ;;  %v7553_v40 = vpop.f32.mrf.mxu0  ;;  %v11299_v41 = vld [vmem:[%s19362_s6 + $0x200] sm:$0xff] }
 0xe19   : > { %13174 = vmatprep.subr.mxu0 %v18597_v61  ;;  %13155 = vmatmul.mubr.msk.f32.gmra.mxu1 %vm961_vm0, %v13072_v46  ;;  %v11123_v46 = vld [vmem:[%s19363_s7 + $0x80] sm:$0xff] }
 0xe1a   : > { %13175 = vmatpush3.msra.mxu0 %v18597_v61  ;;  %13157 = vmatprep.mubr.msk.f32.mxu1 %vm961_vm0, %v7553_v40 }
 0xe1b   : > { %13216 = vmatprep.subr.mxu0 %v18541_v30  ;;  %13177 = vmatmul.mubr.msk.f32.vlgmr.msra.gmra.mxu0 %vm961_vm0, %v11108_v31  ;;  %v11306_v31 = vld [vmem:[%s19362_s6 + $0x238] sm:$0xff] }
 0xe1c   : > { %13217 = vmatpush3.msra.mxu0 %v18541_v30  ;;  %13179 = vmatprep.mubr.msk.f32.mxu0 %vm961_vm0, %v11109_v3 }
 0xe1d   : > { %13218 = vmatprep.subr.mxu0 %v18545_v7  ;;  %13158 = vmatmul.mubr.msk.f32.gmra.mxu1 %vm961_vm0, %v13075_v2  ;;  %v11305_v2 = vld [vmem:[%s19362_s6 + $0x230] sm:$0xff] }
 0xe1e   : > { %13219 = vmatpush3.msra.mxu0 %v18545_v7  ;;  %13191 = vmatpush3.msra.mxu1 %v11129_v20 }
 0xe1f   : > { %13220 = vmatprep.subr.mxu0 %v18553_v39  ;;  %13180 = vmatmul.mubr.msk.f32.gmra.mxu0 %vm961_vm0, %v11110_v24 }
 0xe20   : > { %13221 = vmatpush3.msra.mxu0 %v18553_v39  ;;  %13182 = vmatprep.mubr.msk.f32.mxu0 %vm961_vm0, %v11111_v19 }
 0xe21   : > { %13222 = vmatprep.subr.mxu0 %v18561_v55  ;;  %13192 = vmatprep.subr.mxu1 %v11128_v23 }
 0xe22   : > { %13223 = vmatpush3.msra.mxu0 %v18561_v55  ;;  %13193 = vmatpush3.msra.mxu1 %v11128_v23  ;;  %v11156_v23 = vld [vmem:[%s19363_s7 + $0xc8] sm:$0xff] }
 0xe23   : > { %13224 = vmatprep.subr.mxu0 %v18571_v59  ;;  %13183 = vmatmul.mubr.msk.f32.gmra.mxu0 %vm961_vm0, %v11112_v29 }
 0xe24   : > { %13225 = vmatpush3.msra.mxu0 %v18571_v59  ;;  %13185 = vmatprep.mubr.msk.f32.mxu0 %vm961_vm0, %v11113_v43 }
 0xe25   : > { %13226 = vmatprep.subr.mxu0 %v18582_v56  ;;  %13194 = vmatprep.subr.mxu1 %v11127_v49 }
 0xe26   : > { %13227 = vmatpush3.msra.mxu0 %v18582_v56  ;;  %13195 = vmatpush3.msra.mxu1 %v11127_v49 }
 0xe27   : > { %13228 = vmatprep.subr.mxu0 %v18591_v37  ;;  %13186 = vmatmul.mubr.msk.f32.gmra.mxu0 %vm961_vm0, %v11114_v54 }
 0xe28   : > { %13229 = vmatpush3.msra.mxu0 %v18591_v37  ;;  %13232 = vmatprep.mubr.msk.f32.mxu0 %vm961_vm0, %v11139_v21 }
 0xe29   : > { %13230 = vmatprep.subr.mxu0 %v18597_v61  ;;  %13196 = vmatprep.subr.mxu1 %v11126_v33 }
 0xe2a   : > { %13231 = vmatpush3.msra.mxu0 %v18597_v61  ;;  %13197 = vmatpush3.msra.mxu1 %v11126_v33  ;;  %v11193_v33 = vld [vmem:[%s19363_s7 + $0x130] sm:$0xff] }
 0xe2b   : > { %13272 = vmatprep.subr.mxu0 %v18541_v30  ;;  %13233 = vmatmul.mubr.msk.f32.vlgmr.msra.gmra.mxu0 %vm961_vm0, %v11140_v44 }
 0xe2c   : > { %13273 = vmatpush3.msra.mxu0 %v18541_v30  ;;  %13235 = vmatprep.mubr.msk.f32.mxu0 %vm961_vm0, %v11141_v52 }
 0xe2d   : > { %13274 = vmatprep.subr.mxu0 %v18545_v7  ;;  %13198 = vmatprep.subr.mxu1 %v11125_v5 }
 0xe2e   : > { %13275 = vmatpush3.msra.mxu0 %v18545_v7  ;;  %13199 = vmatpush3.msra.mxu1 %v11125_v5 }
 0xe2f   : > { %13276 = vmatprep.subr.mxu0 %v18553_v39  ;;  %13236 = vmatmul.mubr.msk.f32.gmra.mxu0 %vm961_vm0, %v11142_v38 }
 0xe30   : > { %13277 = vmatpush3.msra.mxu0 %v18553_v39  ;;  %13238 = vmatprep.mubr.msk.f32.mxu0 %vm961_vm0, %v11143_v11 }
 0xe31   : > { %13278 = vmatprep.subr.mxu0 %v18561_v55  ;;  %13200 = vmatprep.subr.mxu1 %v11124_v27 }
 0xe32   : > { %13279 = vmatpush3.msra.mxu0 %v18561_v55  ;;  %13201 = vmatpush3.msra.mxu1 %v11124_v27  ;;  %v11190_v27 = vld [vmem:[%s19363_s7 + $0x118] sm:$0xff] }
 0xe33   : > { %13280 = vmatprep.subr.mxu0 %v18571_v59  ;;  %13239 = vmatmul.mubr.msk.f32.gmra.mxu0 %vm961_vm0, %v11144_v13 }
 0xe34   : > { %13281 = vmatpush3.msra.mxu0 %v18571_v59  ;;  %13241 = vmatprep.mubr.msk.f32.mxu0 %vm961_vm0, %v11145_v48 }
 0xe35   : > { %13282 = vmatprep.subr.mxu0 %v18582_v56  ;;  %13202 = vmatprep.subr.mxu1 %v11123_v46 }
 0xe36   : > { %13283 = vmatpush3.msra.mxu0 %v18582_v56  ;;  %13203 = vmatpush3.msra.mxu1 %v11123_v46 }
 0xe37   : > { %13284 = vmatprep.subr.mxu0 %v18591_v37  ;;  %13242 = vmatmul.mubr.msk.f32.gmra.mxu0 %vm961_vm0, %v11146_v34 }
 0xe38   : > { %13285 = vmatpush3.msra.mxu0 %v18591_v37  ;;  %13288 = vmatprep.mubr.msk.f32.mxu0 %vm961_vm0, %v11171_v16 }
 0xe39   : > { %13286 = vmatprep.subr.mxu0 %v18597_v61 }
 0xe3a   : > { %13287 = vmatpush3.msra.mxu0 %v18597_v61 }
 0xe3b   : > { %13328 = vmatprep.subr.mxu0 %v18541_v30  ;;  %13289 = vmatmul.mubr.msk.f32.vlgmr.msra.gmra.mxu0 %vm961_vm0, %v11172_v26 }
 0xe3c   : > { %13329 = vmatpush3.msra.mxu0 %v18541_v30  ;;  %13291 = vmatprep.mubr.msk.f32.mxu0 %vm961_vm0, %v11173_v15 }
 0xe3d   : > { %13330 = vmatprep.subr.mxu0 %v18545_v7 }
 0xe3e   : > { %13331 = vmatpush3.msra.mxu0 %v18545_v7 }
 0xe3f   : > { %13332 = vmatprep.subr.mxu0 %v18553_v39  ;;  %13292 = vmatmul.mubr.msk.f32.gmra.mxu0 %vm961_vm0, %v11174_v9 }
 0xe40   : > { %13333 = vmatpush3.msra.mxu0 %v18553_v39  ;;  %13294 = vmatprep.mubr.msk.f32.mxu0 %vm961_vm0, %v11175_v57 }
 0xe41   : > { %13334 = vmatprep.subr.mxu0 %v18561_v55 }
 0xe42   : > { %13335 = vmatpush3.msra.mxu0 %v18561_v55 }
 0xe43   : > { %13336 = vmatprep.subr.mxu0 %v18571_v59  ;;  %13295 = vmatmul.mubr.msk.f32.gmra.mxu0 %vm961_vm0, %v11176_v58 }
 0xe44   : > { %13337 = vmatpush3.msra.mxu0 %v18571_v59  ;;  %13297 = vmatprep.mubr.msk.f32.mxu0 %vm961_vm0, %v11177_v42 }
 0xe45   : > { %13338 = vmatprep.subr.mxu0 %v18582_v56 }
 0xe46   : > { %13339 = vmatpush3.msra.mxu0 %v18582_v56 }
 0xe47   : > { %13340 = vmatprep.subr.mxu0 %v18591_v37  ;;  %13298 = vmatmul.mubr.msk.f32.gmra.mxu0 %vm961_vm0, %v11178_v18 }
 0xe48   : > { %13341 = vmatpush3.msra.mxu0 %v18591_v37  ;;  %13344 = vmatprep.mubr.msk.f32.mxu0 %vm961_vm0, %v11203_v62  ;;  %v11161_v62 = vld [vmem:[%s19363_s7 + $0xf0] sm:$0xff] }
 0xe49   : > { %13342 = vmatprep.subr.mxu0 %v18597_v61 }
 0xe4a   : > { %13343 = vmatpush3.msra.mxu0 %v18597_v61 }
 0xe4b   : > { %13384 = vmatprep.subr.mxu0 %v18541_v30  ;;  %13345 = vmatmul.mubr.msk.f32.vlgmr.msra.gmra.mxu0 %vm961_vm0, %v11204_v0 }
 0xe4c   : > { %13385 = vmatpush3.msra.mxu0 %v18541_v30  ;;  %13347 = vmatprep.mubr.msk.f32.mxu0 %vm961_vm0, %v11205_v35 }
 0xe4d   : > { %13386 = vmatprep.subr.mxu0 %v18545_v7 }
 0xe4e   : > { %13387 = vmatpush3.msra.mxu0 %v18545_v7 }
 0xe4f   : > { %13388 = vmatprep.subr.mxu0 %v18553_v39  ;;  %13348 = vmatmul.mubr.msk.f32.gmra.mxu0 %vm961_vm0, %v11206_v50  ;;  %v11160_v50 = vld [vmem:[%s19363_s7 + $0xe8] sm:$0xff] }
 0xe50   : > { %13389 = vmatpush3.msra.mxu0 %v18553_v39  ;;  %13350 = vmatprep.mubr.msk.f32.mxu0 %vm961_vm0, %v11207_v63 }
 0xe51   : > { %13390 = vmatprep.subr.mxu0 %v18561_v55 }
 0xe52   : > { %13391 = vmatpush3.msra.mxu0 %v18561_v55 }
 0xe53   : > { %13392 = vmatprep.subr.mxu0 %v18571_v59  ;;  %13351 = vmatmul.mubr.msk.f32.gmra.mxu0 %vm961_vm0, %v11208_v8 }
 0xe54   : > { %13393 = vmatpush3.msra.mxu0 %v18571_v59  ;;  %13353 = vmatprep.mubr.msk.f32.mxu0 %vm961_vm0, %v11209_v1  ;;  %v11158_v1 = vld [vmem:[%s19363_s7 + $0xd8] sm:$0xff] }
 0xe55   : > { %13394 = vmatprep.subr.mxu0 %v18582_v56 }
 0xe56   : > { %13395 = vmatpush3.msra.mxu0 %v18582_v56 }
 0xe57   : > { %13396 = vmatprep.subr.mxu0 %v18591_v37  ;;  %13354 = vmatmul.mubr.msk.f32.gmra.mxu0 %vm961_vm0, %v11210_v6  ;;  %v11157_v6 = vld [vmem:[%s19363_s7 + $0xd0] sm:$0xff] }
 0xe58   : > { %13397 = vmatpush3.msra.mxu0 %v18591_v37  ;;  %13400 = vmatprep.mubr.msk.f32.mxu0 %vm961_vm0, %v11235_v51 }
 0xe59   : > { %13398 = vmatprep.subr.mxu0 %v18597_v61 }
 0xe5a   : > { %13399 = vmatpush3.msra.mxu0 %v18597_v61 }
 0xe5b   : > { %13440 = vmatprep.subr.mxu0 %v18541_v30  ;;  %13401 = vmatmul.mubr.msk.f32.vlgmr.msra.gmra.mxu0 %vm961_vm0, %v11236_v17 }
 0xe5c   : > { %13441 = vmatpush3.msra.mxu0 %v18541_v30  ;;  %13403 = vmatprep.mubr.msk.f32.mxu0 %vm961_vm0, %v11237_v53  ;;  %v11155_v53 = vld [vmem:[%s19363_s7 + $0xc0] sm:$0xff] }
 0xe5d   : > { %13442 = vmatprep.subr.mxu0 %v18545_v7 }
 0xe5e   : > { %13443 = vmatpush3.msra.mxu0 %v18545_v7 }
 0xe5f   : > { %13444 = vmatprep.subr.mxu0 %v18553_v39  ;;  %13404 = vmatmul.mubr.msk.f32.gmra.mxu0 %vm961_vm0, %v11238_v32  ;;  %v11194_v32 = vld [vmem:[%s19363_s7 + $0x138] sm:$0xff] }
 0xe60   : > { %13445 = vmatpush3.msra.mxu0 %v18553_v39  ;;  %13406 = vmatprep.mubr.msk.f32.mxu0 %vm961_vm0, %v11239_v10 }
 0xe61   : > { %13446 = vmatprep.subr.mxu0 %v18561_v55 }
 0xe62   : > { %13447 = vmatpush3.msra.mxu0 %v18561_v55 }
 0xe63   : > { %13448 = vmatprep.subr.mxu0 %v18571_v59  ;;  %13407 = vmatmul.mubr.msk.f32.gmra.mxu0 %vm961_vm0, %v11240_v4 }
 0xe64   : > { %13449 = vmatpush3.msra.mxu0 %v18571_v59  ;;  %13409 = vmatprep.mubr.msk.f32.mxu0 %vm961_vm0, %v11241_v60  ;;  %v11192_v60 = vld [vmem:[%s19363_s7 + $0x128] sm:$0xff] }
 0xe65   : > { %13450 = vmatprep.subr.mxu0 %v18582_v56 }
 0xe66   : > { %13451 = vmatpush3.msra.mxu0 %v18582_v56 }
 0xe67   : > { %13452 = vmatprep.subr.mxu0 %v18591_v37  ;;  %13410 = vmatmul.mubr.msk.f32.gmra.mxu0 %vm961_vm0, %v11242_v12  ;;  %v11191_v12 = vld [vmem:[%s19363_s7 + $0x120] sm:$0xff] }
 0xe68   : > { %13453 = vmatpush3.msra.mxu0 %v18591_v37  ;;  %13456 = vmatprep.mubr.msk.f32.mxu0 %vm961_vm0, %v11267_v45 }
 0xe69   : > { %13454 = vmatprep.subr.mxu0 %v18597_v61 }
 0xe6a   : > { %13455 = vmatpush3.msra.mxu0 %v18597_v61 }
 0xe6b   : > { %13496 = vmatprep.subr.mxu0 %v18541_v30  ;;  %13457 = vmatmul.mubr.msk.f32.vlgmr.msra.gmra.mxu0 %vm961_vm0, %v11268_v25 }
 0xe6c   : > { %13497 = vmatpush3.msra.mxu0 %v18541_v30  ;;  %13459 = vmatprep.mubr.msk.f32.mxu0 %vm961_vm0, %v11269_v47  ;;  %v19032_v30 = vld [vmem:[%s19363_s7 + $0xf8] sm:$0xff]  ;;  %v11189_v47 = vld [vmem:[%s19363_s7 + $0x110] sm:$0xff] }
 0xe6d   : > { %13498 = vmatprep.subr.mxu0 %v18545_v7  ;;  %13244 = vmatprep.subr.mxu1 %v19032_v30 }
 0xe6e   : > { %13499 = vmatpush3.msra.mxu0 %v18545_v7  ;;  %v11273_v7 = vld [vmem:[%s19362_s6 + $0x1f0] sm:$0xff] }
 0xe6f   : > { %13500 = vmatprep.subr.mxu0 %v18553_v39  ;;  %13460 = vmatmul.mubr.msk.f32.gmra.mxu0 %vm961_vm0, %v11270_v14  ;;  %v11188_v14 = vld [vmem:[%s19363_s7 + $0x108] sm:$0xff] }
 0xe70   : > { %13501 = vmatpush3.msra.mxu0 %v18553_v39  ;;  %13462 = vmatprep.mubr.msk.f32.mxu0 %vm961_vm0, %v11271_v22  ;;  %v11274_v39 = vld [vmem:[%s19362_s6 + $0x1f8] sm:$0xff] }
 0xe71   : > { %13502 = vmatprep.subr.mxu0 %v18561_v55 }
 0xe72   : > { %13503 = vmatpush3.msra.mxu0 %v18561_v55  ;;  %v11300_v55 = vld [vmem:[%s19362_s6 + $0x208] sm:$0xff] }
 0xe73   : > { %13504 = vmatprep.subr.mxu0 %v18571_v59  ;;  %13463 = vmatmul.mubr.msk.f32.gmra.mxu0 %vm961_vm0, %v11272_v36 }
 0xe74   : > { %13505 = vmatpush3.msra.mxu0 %v18571_v59  ;;  %13465 = vmatprep.mubr.msk.f32.mxu0 %vm961_vm0, %v11273_v7  ;;  %v11301_v59 = vld [vmem:[%s19362_s6 + $0x210] sm:$0xff]  ;;  %v11226_v7 = vld [vmem:[%s19363_s7 + $0x178] sm:$0xff] }
 0xe75   : > { %13506 = vmatprep.subr.mxu0 %v18582_v56 }
 0xe76   : > { %13507 = vmatpush3.msra.mxu0 %v18582_v56  ;;  %v11302_v56 = vld [vmem:[%s19362_s6 + $0x218] sm:$0xff] }
 0xe77   : > { %13508 = vmatprep.subr.mxu0 %v18591_v37  ;;  %13466 = vmatmul.mubr.msk.f32.gmra.mxu0 %vm961_vm0, %v11274_v39 }
 0xe78   : > { %13509 = vmatpush3.msra.mxu0 %v18591_v37  ;;  %13512 = vmatprep.mubr.msk.f32.mxu0 %vm961_vm0, %v11299_v41  ;;  %v11303_v37 = vld [vmem:[%s19362_s6 + $0x220] sm:$0xff]  ;;  %v11225_v41 = vld [vmem:[%s19363_s7 + $0x170] sm:$0xff] }
 0xe79   : > { %13510 = vmatprep.subr.mxu0 %v18597_v61 }
 0xe7a   : > { %13511 = vmatpush3.msra.mxu0 %v18597_v61  ;;  %v11304_v61 = vld [vmem:[%s19362_s6 + $0x228] sm:$0xff] }
 0xe7b   : > { %13513 = vmatmul.mubr.msk.f32.vlgmr.msra.gmra.mxu0 %vm961_vm0, %v11300_v55 }
 0xe7c   : > { %13515 = vmatprep.mubr.msk.f32.mxu0 %vm961_vm0, %v11301_v59  ;;  %v11224_v59 = vld [vmem:[%s19363_s7 + $0x168] sm:$0xff] }
 0xe7f   : > { %13516 = vmatmul.mubr.msk.f32.gmra.mxu0 %vm961_vm0, %v11302_v56 }
 0xe80   : > { %13518 = vmatprep.mubr.msk.f32.mxu0 %vm961_vm0, %v11303_v37  ;;  %v11223_v37 = vld [vmem:[%s19363_s7 + $0x160] sm:$0xff] }
 0xe83   : > { %13519 = vmatmul.mubr.msk.f32.gmra.mxu0 %vm961_vm0, %v11304_v61 }
 0xe84   : > { %13521 = vmatprep.mubr.msk.f32.mxu0 %vm961_vm0, %v11305_v2  ;;  %v11222_v2 = vld [vmem:[%s19363_s7 + $0x158] sm:$0xff] }
 0xe87   : > { %13522 = vmatmul.mubr.msk.f32.gmra.mxu0 %vm961_vm0, %v11306_v31 }
 0xecb   : > { %v13122_v40 = vpop.f32.mrf.mxu0 }
 0xecc   : > { %v13150_v3 = vpop.f32.mrf.mxu1 }
 0xecd   : > { %v7807_v24 = vpop.f32.mrf.mxu0  ;;  %v19093_v19 = vadd.f32 %v13150_v3, %v13122_v40  ;;  %v11221_v40 = vld [vmem:[%s19363_s7 + $0x150] sm:$0xff] }
 0xece   : > { %v7936_v29 = vpop.f32.mrf.mxu1 }
 0xecf   : > { %v13125_v43 = vpop.f32.mrf.mxu0  ;;  %v19095_v54 = vadd.f32 %v7936_v29, %v7807_v24  ;;  %v11220_v24 = vld [vmem:[%s19363_s7 + $0x148] sm:$0xff] }
 0xed1   : > { %v7817_v21 = vpop.f32.mrf.mxu0 }
 0xed3   : > { %v13128_v44 = vpop.f32.mrf.mxu0 }
 0xed4   : > { %v13153_v52 = vpop.f32.mrf.mxu1 }
 0xed5   : > { %v7827_v38 = vpop.f32.mrf.mxu0  ;;  %v19097_v11 = vadd.f32 %v13153_v52, %v13125_v43  ;;  %v11219_v43 = vld [vmem:[%s19363_s7 + $0x140] sm:$0xff] }
 0xed6   : > { %v7946_v13 = vpop.f32.mrf.mxu1 }
 0xed7   : > { %v13131_v48 = vpop.f32.mrf.mxu0  ;;  %v19099_v34 = vadd.f32 %v7946_v13, %v7817_v21 }
 0xed9   : > { %v19101_v16 = vpop.f32.mrf.mxu0  ;;  %v13156_v26 = vpop.f32.mrf.mxu1 }
 0xeda   : > { %v19103_v15 = vadd.f32 %v13156_v26, %v13128_v44  ;;  %v11258_v44 = vld [vmem:[%s19363_s7 + $0x1b8] sm:$0xff] }
 0xedb   : > { %v13178_v9 = vpop.f32.mrf.mxu0  ;;  %v7956_v57 = vpop.f32.mrf.mxu1 }
 0xedc   : > { %v19105_v58 = vadd.f32 %v7956_v57, %v7827_v38  ;;  %v11257_v38 = vld [vmem:[%s19363_s7 + $0x1b0] sm:$0xff] }
 0xedd   : > { %v8074_v42 = vpop.f32.mrf.mxu0  ;;  %v13159_v18 = vpop.f32.mrf.mxu1 }
 0xede   : > { %13204 = vmatprep.mubr.msk.f32.mxu1 %vm961_vm0, %v8074_v42  ;;  %v19111_v0 = vadd.f32 %v13159_v18, %v13131_v48  ;;  %v11256_v48 = vld [vmem:[%s19363_s7 + $0x1a8] sm:$0xff]  ;;  %v11254_v42 = vld [vmem:[%s19363_s7 + $0x198] sm:$0xff] }
 0xedf   : > { %v13181_v35 = vpop.f32.mrf.mxu0  ;;  %13205 = vmatmul.mubr.msk.f32.vlgmr.msra.gmra.mxu1 %vm961_vm0, %v13178_v9  ;;  %v11255_v9 = vld [vmem:[%s19363_s7 + $0x1a0] sm:$0xff] }
 0xee0   : > { %13245 = vmatpush3.msra.mxu1 %v19032_v30  ;;  %v11187_v30 = vld [vmem:[%s19363_s7 + $0x100] sm:$0xff] }
 0xee1   : > { %v8084_v63 = vpop.f32.mrf.mxu0  ;;  %13246 = vmatprep.subr.mxu1 %v11161_v62 }
 0xee2   : > { %13207 = vmatprep.mubr.msk.f32.mxu1 %vm961_vm0, %v8084_v63  ;;  %13247 = vmatpush3.msra.mxu1 %v11161_v62  ;;  %v11253_v62 = vld [vmem:[%s19363_s7 + $0x190] sm:$0xff] }
 0xee3   : > { %v13184_v8 = vpop.f32.mrf.mxu0  ;;  %13208 = vmatmul.mubr.msk.f32.gmra.mxu1 %vm961_vm0, %v13181_v35  ;;  %13248 = vmatprep.subr.mxu1 %v11160_v50 }
 0xee4   : > { %13249 = vmatpush3.msra.mxu1 %v11160_v50  ;;  %v11252_v50 = vld [vmem:[%s19363_s7 + $0x188] sm:$0xff] }
 0xee5   : > { %v8094_v20 = vpop.f32.mrf.mxu0  ;;  %13250 = vmatprep.subr.mxu1 %v11159_v28 }
 0xee6   : > { %13210 = vmatprep.mubr.msk.f32.mxu1 %vm961_vm0, %v8094_v20  ;;  %13251 = vmatpush3.msra.mxu1 %v11159_v28  ;;  %v11251_v28 = vld [vmem:[%s19363_s7 + $0x180] sm:$0xff] }
 0xee7   : > { %v13187_v51 = vpop.f32.mrf.mxu0  ;;  %13211 = vmatmul.mubr.msk.f32.gmra.mxu1 %vm961_vm0, %v13184_v8  ;;  %13252 = vmatprep.subr.mxu1 %v11158_v1 }
 0xee8   : > { %13253 = vmatpush3.msra.mxu1 %v11158_v1  ;;  %v11290_v1 = vld [vmem:[%s19363_s7 + $0x1f8] sm:$0xff] }
 0xee9   : > { %v8104_v17 = vpop.f32.mrf.mxu0  ;;  %13254 = vmatprep.subr.mxu1 %v11157_v6 }
 0xeea   : > { %13213 = vmatprep.mubr.msk.f32.mxu1 %vm961_vm0, %v8104_v17  ;;  %13255 = vmatpush3.msra.mxu1 %v11157_v6  ;;  %v11289_v6 = vld [vmem:[%s19363_s7 + $0x1f0] sm:$0xff] }
 0xeeb   : > { %13214 = vmatmul.mubr.msk.f32.gmra.mxu1 %vm961_vm0, %v13187_v51  ;;  %v13234_v49 = vpop.f32.mrf.mxu0  ;;  %13256 = vmatprep.subr.mxu1 %v11156_v23 }
 0xeec   : > { %13257 = vmatpush3.msra.mxu1 %v11156_v23  ;;  %v11288_v23 = vld [vmem:[%s19363_s7 + $0x1e8] sm:$0xff] }
 0xeed   : > { %v8358_v10 = vpop.f32.mrf.mxu0  ;;  %13258 = vmatprep.subr.mxu1 %v11155_v53 }
 0xeee   : > { %13259 = vmatpush3.msra.mxu1 %v11155_v53  ;;  %13260 = vmatprep.mubr.msk.f32.mxu1 %vm961_vm0, %v8358_v10  ;;  %v11287_v53 = vld [vmem:[%s19363_s7 + $0x1e0] sm:$0xff] }
 0xeef   : > { %v13237_v4 = vpop.f32.mrf.mxu0  ;;  %13261 = vmatmul.mubr.msk.f32.vlgmr.msra.gmra.mxu1 %vm961_vm0, %v13234_v49  ;;  %13300 = vmatprep.subr.mxu1 %v11194_v32 }
 0xef0   : > { %13301 = vmatpush3.msra.mxu1 %v11194_v32  ;;  %v11286_v32 = vld [vmem:[%s19363_s7 + $0x1d8] sm:$0xff] }
 0xef1   : > { %v8368_v5 = vpop.f32.mrf.mxu0  ;;  %13302 = vmatprep.subr.mxu1 %v11193_v33 }
 0xef2   : > { %13263 = vmatprep.mubr.msk.f32.mxu1 %vm961_vm0, %v8368_v5  ;;  %13303 = vmatpush3.msra.mxu1 %v11193_v33  ;;  %v11285_v33 = vld [vmem:[%s19363_s7 + $0x1d0] sm:$0xff] }
 0xef3   : > { %v13240_v45 = vpop.f32.mrf.mxu0  ;;  %13264 = vmatmul.mubr.msk.f32.gmra.mxu1 %vm961_vm0, %v13237_v4  ;;  %13304 = vmatprep.subr.mxu1 %v11192_v60 }
 0xef4   : > { %13305 = vmatpush3.msra.mxu1 %v11192_v60  ;;  %v11284_v60 = vld [vmem:[%s19363_s7 + $0x1c8] sm:$0xff] }
 0xef5   : > { %v8378_v25 = vpop.f32.mrf.mxu0  ;;  %13306 = vmatprep.subr.mxu1 %v11191_v12 }
 0xef6   : > { %13266 = vmatprep.mubr.msk.f32.mxu1 %vm961_vm0, %v8378_v25  ;;  %13307 = vmatpush3.msra.mxu1 %v11191_v12  ;;  %v11283_v12 = vld [vmem:[%s19363_s7 + $0x1c0] sm:$0xff] }
 0xef7   : > { %v13243_v46 = vpop.f32.mrf.mxu0  ;;  %13267 = vmatmul.mubr.msk.f32.gmra.mxu1 %vm961_vm0, %v13240_v45  ;;  %13308 = vmatprep.subr.mxu1 %v11190_v27 }
 0xef8   : > { %13309 = vmatpush3.msra.mxu1 %v11190_v27  ;;  %v11322_v27 = vld [vmem:[%s19363_s7 + $0x238] sm:$0xff] }
 0xef9   : > { %v8388_v22 = vpop.f32.mrf.mxu0  ;;  %13310 = vmatprep.subr.mxu1 %v11189_v47 }
 0xefa   : > { %13269 = vmatprep.mubr.msk.f32.mxu1 %vm961_vm0, %v8388_v22  ;;  %13311 = vmatpush3.msra.mxu1 %v11189_v47  ;;  %v11321_v47 = vld [vmem:[%s19363_s7 + $0x230] sm:$0xff] }
 0xefb   : > { %13270 = vmatmul.mubr.msk.f32.gmra.mxu1 %vm961_vm0, %v13243_v46  ;;  %v13290_v36 = vpop.f32.mrf.mxu0  ;;  %13312 = vmatprep.subr.mxu1 %v11188_v14 }
 0xefc   : > { %13313 = vmatpush3.msra.mxu1 %v11188_v14  ;;  %v11320_v14 = vld [vmem:[%s19363_s7 + $0x228] sm:$0xff] }
 0xefd   : > { %v8642_v39 = vpop.f32.mrf.mxu0  ;;  %13314 = vmatprep.subr.mxu1 %v11187_v30 }
 0xefe   : > { %13315 = vmatpush3.msra.mxu1 %v11187_v30  ;;  %13316 = vmatprep.mubr.msk.f32.mxu1 %vm961_vm0, %v8642_v39  ;;  %v11319_v30 = vld [vmem:[%s19363_s7 + $0x220] sm:$0xff] }
 0xeff   : > { %v13293_v55 = vpop.f32.mrf.mxu0  ;;  %13317 = vmatmul.mubr.msk.f32.vlgmr.msra.gmra.mxu1 %vm961_vm0, %v13290_v36  ;;  %13356 = vmatprep.subr.mxu1 %v11226_v7 }
 0xf00   : > { %13357 = vmatpush3.msra.mxu1 %v11226_v7  ;;  %v11318_v7 = vld [vmem:[%s19363_s7 + $0x218] sm:$0xff] }
 0xf01   : > { %v8652_v56 = vpop.f32.mrf.mxu0  ;;  %13358 = vmatprep.subr.mxu1 %v11225_v41 }
 0xf02   : > { %13319 = vmatprep.mubr.msk.f32.mxu1 %vm961_vm0, %v8652_v56  ;;  %13359 = vmatpush3.msra.mxu1 %v11225_v41  ;;  %v11317_v41 = vld [vmem:[%s19363_s7 + $0x210] sm:$0xff] }
 0xf03   : > { %v13296_v61 = vpop.f32.mrf.mxu0  ;;  %13320 = vmatmul.mubr.msk.f32.gmra.mxu1 %vm961_vm0, %v13293_v55  ;;  %13360 = vmatprep.subr.mxu1 %v11224_v59 }
 0xf04   : > { %13361 = vmatpush3.msra.mxu1 %v11224_v59  ;;  %v11316_v59 = vld [vmem:[%s19363_s7 + $0x208] sm:$0xff] }
 0xf05   : > { %v8662_v31 = vpop.f32.mrf.mxu0  ;;  %13362 = vmatprep.subr.mxu1 %v11223_v37 }
 0xf06   : > { %13322 = vmatprep.mubr.msk.f32.mxu1 %vm961_vm0, %v8662_v31  ;;  %13363 = vmatpush3.msra.mxu1 %v11223_v37  ;;  %v11315_v37 = vld [vmem:[%s19363_s7 + $0x200] sm:$0xff] }
 0xf07   : > { %v13299_v3 = vpop.f32.mrf.mxu0  ;;  %13323 = vmatmul.mubr.msk.f32.gmra.mxu1 %vm961_vm0, %v13296_v61  ;;  %13364 = vmatprep.subr.mxu1 %v11222_v2 }
 0xf08   : > { %13365 = vmatpush3.msra.mxu1 %v11222_v2 }
 0xf09   : > { %v8672_v29 = vpop.f32.mrf.mxu0  ;;  %13366 = vmatprep.subr.mxu1 %v11221_v40 }
 0xf0a   : > { %13325 = vmatprep.mubr.msk.f32.mxu1 %vm961_vm0, %v8672_v29  ;;  %13367 = vmatpush3.msra.mxu1 %v11221_v40 }
 0xf0b   : > { %13326 = vmatmul.mubr.msk.f32.gmra.mxu1 %vm961_vm0, %v13299_v3  ;;  %v13346_v21 = vpop.f32.mrf.mxu0  ;;  %13368 = vmatprep.subr.mxu1 %v11220_v24 }
 0xf0c   : > { %13369 = vmatpush3.msra.mxu1 %v11220_v24 }
 0xf0d   : > { %v8926_v52 = vpop.f32.mrf.mxu0  ;;  %13370 = vmatprep.subr.mxu1 %v11219_v43 }
 0xf0e   : > { %13371 = vmatpush3.msra.mxu1 %v11219_v43  ;;  %13372 = vmatprep.mubr.msk.f32.mxu1 %vm961_vm0, %v8926_v52 }
 0xf0f   : > { %v13349_v13 = vpop.f32.mrf.mxu0  ;;  %13373 = vmatmul.mubr.msk.f32.vlgmr.msra.gmra.mxu1 %vm961_vm0, %v13346_v21  ;;  %13412 = vmatprep.subr.mxu1 %v11258_v44  ;;  %v7966_v21 = vpop.f32.mrf.mxu1 }
 0xf10   : > { %13413 = vmatpush3.msra.mxu1 %v11258_v44 }
 0xf11   : > { %v8936_v26 = vpop.f32.mrf.mxu0  ;;  %13414 = vmatprep.subr.mxu1 %v11257_v38 }
 0xf12   : > { %13375 = vmatprep.mubr.msk.f32.mxu1 %vm961_vm0, %v8936_v26  ;;  %13415 = vmatpush3.msra.mxu1 %v11257_v38 }
 0xf13   : > { %v13352_v57 = vpop.f32.mrf.mxu0  ;;  %13376 = vmatmul.mubr.msk.f32.gmra.mxu1 %vm961_vm0, %v13349_v13  ;;  %13416 = vmatprep.subr.mxu1 %v11256_v48 }
 0xf14   : > { %13417 = vmatpush3.msra.mxu1 %v11256_v48 }
 0xf15   : > { %v8946_v18 = vpop.f32.mrf.mxu0  ;;  %13418 = vmatprep.subr.mxu1 %v11255_v9 }
 0xf16   : > { %13378 = vmatprep.mubr.msk.f32.mxu1 %vm961_vm0, %v8946_v18  ;;  %13419 = vmatpush3.msra.mxu1 %v11255_v9 }
 0xf17   : > { %v13355_v35 = vpop.f32.mrf.mxu0  ;;  %13379 = vmatmul.mubr.msk.f32.gmra.mxu1 %vm961_vm0, %v13352_v57  ;;  %13420 = vmatprep.subr.mxu1 %v11254_v42 }
 0xf18   : > { %13421 = vmatpush3.msra.mxu1 %v11254_v42 }
 0xf19   : > { %v8956_v63 = vpop.f32.mrf.mxu0  ;;  %13422 = vmatprep.subr.mxu1 %v11253_v62 }
 0xf1a   : > { %13381 = vmatprep.mubr.msk.f32.mxu1 %vm961_vm0, %v8956_v63  ;;  %13423 = vmatpush3.msra.mxu1 %v11253_v62  ;;  %v7967_v63 = vadd.f32 %v7966_v21, %v19101_v16 }
 0xf1b   : > { %13382 = vmatmul.mubr.msk.f32.gmra.mxu1 %vm961_vm0, %v13355_v35  ;;  %v13402_v8 = vpop.f32.mrf.mxu0  ;;  %13424 = vmatprep.subr.mxu1 %v11252_v50 }
 0xf1c   : > { %13425 = vmatpush3.msra.mxu1 %v11252_v50 }
 0xf1d   : > { %v9210_v20 = vpop.f32.mrf.mxu0  ;;  %13426 = vmatprep.subr.mxu1 %v11251_v28 }
 0xf1e   : > { %13427 = vmatpush3.msra.mxu1 %v11251_v28  ;;  %13428 = vmatprep.mubr.msk.f32.mxu1 %vm961_vm0, %v9210_v20 }
 0xf1f   : > { %v13405_v51 = vpop.f32.mrf.mxu0  ;;  %13429 = vmatmul.mubr.msk.f32.vlgmr.msra.gmra.mxu1 %vm961_vm0, %v13402_v8  ;;  %13468 = vmatprep.subr.mxu1 %v11290_v1 }
 0xf20   : > { %13469 = vmatpush3.msra.mxu1 %v11290_v1 }
 0xf21   : > { %v9220_v17 = vpop.f32.mrf.mxu0  ;;  %13470 = vmatprep.subr.mxu1 %v11289_v6 }
 0xf22   : > { %13431 = vmatprep.mubr.msk.f32.mxu1 %vm961_vm0, %v9220_v17  ;;  %13471 = vmatpush3.msra.mxu1 %v11289_v6 }
 0xf23   : > { %v13408_v49 = vpop.f32.mrf.mxu0  ;;  %13432 = vmatmul.mubr.msk.f32.gmra.mxu1 %vm961_vm0, %v13405_v51  ;;  %13472 = vmatprep.subr.mxu1 %v11288_v23 }
 0xf24   : > { %13473 = vmatpush3.msra.mxu1 %v11288_v23 }
 0xf25   : > { %v9230_v10 = vpop.f32.mrf.mxu0  ;;  %13474 = vmatprep.subr.mxu1 %v11287_v53 }
 0xf26   : > { %13434 = vmatprep.mubr.msk.f32.mxu1 %vm961_vm0, %v9230_v10  ;;  %13475 = vmatpush3.msra.mxu1 %v11287_v53 }
 0xf27   : > { %v13411_v4 = vpop.f32.mrf.mxu0  ;;  %13435 = vmatmul.mubr.msk.f32.gmra.mxu1 %vm961_vm0, %v13408_v49  ;;  %13476 = vmatprep.subr.mxu1 %v11286_v32 }
 0xf28   : > { %13477 = vmatpush3.msra.mxu1 %v11286_v32 }
 0xf29   : > { %v9240_v5 = vpop.f32.mrf.mxu0  ;;  %13478 = vmatprep.subr.mxu1 %v11285_v33 }
 0xf2a   : > { %13437 = vmatprep.mubr.msk.f32.mxu1 %vm961_vm0, %v9240_v5  ;;  %13479 = vmatpush3.msra.mxu1 %v11285_v33 }
 0xf2b   : > { %13438 = vmatmul.mubr.msk.f32.gmra.mxu1 %vm961_vm0, %v13411_v4  ;;  %v13458_v45 = vpop.f32.mrf.mxu0  ;;  %13480 = vmatprep.subr.mxu1 %v11284_v60 }
 0xf2c   : > { %13481 = vmatpush3.msra.mxu1 %v11284_v60 }
 0xf2d   : > { %v9494_v25 = vpop.f32.mrf.mxu0  ;;  %13482 = vmatprep.subr.mxu1 %v11283_v12 }
 0xf2e   : > { %13483 = vmatpush3.msra.mxu1 %v11283_v12  ;;  %13484 = vmatprep.mubr.msk.f32.mxu1 %vm961_vm0, %v9494_v25 }
 0xf2f   : > { %v13461_v46 = vpop.f32.mrf.mxu0  ;;  %13485 = vmatmul.mubr.msk.f32.vlgmr.msra.gmra.mxu1 %vm961_vm0, %v13458_v45  ;;  %13524 = vmatprep.subr.mxu1 %v11322_v27 }
 0xf30   : > { %13525 = vmatpush3.msra.mxu1 %v11322_v27 }
 0xf31   : > { %v9504_v22 = vpop.f32.mrf.mxu0  ;;  %13526 = vmatprep.subr.mxu1 %v11321_v47 }
 0xf32   : > { %13487 = vmatprep.mubr.msk.f32.mxu1 %vm961_vm0, %v9504_v22  ;;  %13527 = vmatpush3.msra.mxu1 %v11321_v47 }
 0xf33   : > { %v13464_v36 = vpop.f32.mrf.mxu0  ;;  %13488 = vmatmul.mubr.msk.f32.gmra.mxu1 %vm961_vm0, %v13461_v46  ;;  %13528 = vmatprep.subr.mxu1 %v11320_v14 }
 0xf34   : > { %13529 = vmatpush3.msra.mxu1 %v11320_v14 }
 0xf35   : > { %v9514_v39 = vpop.f32.mrf.mxu0  ;;  %13530 = vmatprep.subr.mxu1 %v11319_v30 }
 0xf36   : > { %13490 = vmatprep.mubr.msk.f32.mxu1 %vm961_vm0, %v9514_v39  ;;  %13531 = vmatpush3.msra.mxu1 %v11319_v30 }
 0xf37   : > { %v13467_v55 = vpop.f32.mrf.mxu0  ;;  %13491 = vmatmul.mubr.msk.f32.gmra.mxu1 %vm961_vm0, %v13464_v36  ;;  %13532 = vmatprep.subr.mxu1 %v11318_v7 }
 0xf38   : > { %13533 = vmatpush3.msra.mxu1 %v11318_v7 }
 0xf39   : > { %v9524_v56 = vpop.f32.mrf.mxu0  ;;  %13534 = vmatprep.subr.mxu1 %v11317_v41 }
 0xf3a   : > { %13493 = vmatprep.mubr.msk.f32.mxu1 %vm961_vm0, %v9524_v56  ;;  %13535 = vmatpush3.msra.mxu1 %v11317_v41 }
 0xf3b   : > { %13494 = vmatmul.mubr.msk.f32.gmra.mxu1 %vm961_vm0, %v13467_v55  ;;  %v13514_v61 = vpop.f32.mrf.mxu0  ;;  %13536 = vmatprep.subr.mxu1 %v11316_v59 }
 0xf3c   : > { %13537 = vmatpush3.msra.mxu1 %v11316_v59 }
 0xf3d   : > { %v9778_v2 = vpop.f32.mrf.mxu0  ;;  %13538 = vmatprep.subr.mxu1 %v11315_v37 }
 0xf3e   : > { %13539 = vmatpush3.msra.mxu1 %v11315_v37  ;;  %13540 = vmatprep.mubr.msk.f32.mxu1 %vm961_vm0, %v9778_v2 }
 0xf3f   : > { %v13517_v31 = vpop.f32.mrf.mxu0  ;;  %13541 = vmatmul.mubr.msk.f32.vlgmr.msra.gmra.mxu1 %vm961_vm0, %v13514_v61 }
 0xf41   : > { %v9788_v40 = vpop.f32.mrf.mxu0 }
 0xf42   : > { %13543 = vmatprep.mubr.msk.f32.mxu1 %vm961_vm0, %v9788_v40 }
 0xf43   : > { %v13520_v3 = vpop.f32.mrf.mxu0  ;;  %13544 = vmatmul.mubr.msk.f32.gmra.mxu1 %vm961_vm0, %v13517_v31 }
 0xf45   : > { %v9798_v24 = vpop.f32.mrf.mxu0 }
 0xf46   : > { %13546 = vmatprep.mubr.msk.f32.mxu1 %vm961_vm0, %v9798_v24 }
 0xf47   : > { %v13523_v29 = vpop.f32.mrf.mxu0  ;;  %13547 = vmatmul.mubr.msk.f32.gmra.mxu1 %vm961_vm0, %v13520_v3 }
 0xf49   : > { %v9808_v43 = vpop.f32.mrf.mxu0 }
 0xf4a   : > { %13549 = vmatprep.mubr.msk.f32.mxu1 %vm961_vm0, %v9808_v43 }
 0xf4b   : > { %13550 = vmatmul.mubr.msk.f32.gmra.mxu1 %vm961_vm0, %v13523_v29 }
 0xf9f   : > { %v13206_v44 = vpop.f32.mrf.mxu1 }
 0xfa0   : > { %v8252_v52 = vadd.f32 %v13206_v44, %v19093_v19 }
 0xfa1   : > { %v8212_v38 = vpop.f32.mrf.mxu1 }
 0xfa2   : > { %v8251_v13 = vadd.f32 %v8212_v38, %v19095_v54 }
 0xfa3   : > { %v13209_v48 = vpop.f32.mrf.mxu1 }
 0xfa4   : > { %v8254_v26 = vadd.f32 %v13209_v48, %v19097_v11 }
 0xfa5   : > { %v8222_v9 = vpop.f32.mrf.mxu1 }
 0xfa6   : > { %v8253_v57 = vadd.f32 %v8222_v9, %v19099_v34 }
 0xfa7   : > { %v13212_v42 = vpop.f32.mrf.mxu1 }
 0xfa8   : > { %v8256_v18 = vadd.f32 %v13212_v42, %v19103_v15 }
 0xfa9   : > { %v8232_v62 = vpop.f32.mrf.mxu1 }
 0xfaa   : > { %v8255_v35 = vadd.f32 %v8232_v62, %v19105_v58 }
 0xfab   : > { %v13215_v50 = vpop.f32.mrf.mxu1 }
 0xfac   : > { %v8258_v19 = vadd.f32 %v13215_v50, %v19111_v0  ;;  %v11331_v50 = vld [vmem:[%s19364_s8] ss:$0 sm:$0xff] }
 0xfad   : > { %v8242_v28 = vpop.f32.mrf.mxu1 }
 0xfae   : > { %v8257_v8 = vadd.f32 %v8242_v28, %v7967_v63 }
 0xfaf   : > { %v13262_v54 = vpop.f32.mrf.mxu1 }
 0xfb0   : > { %v8536_v1 = vadd.f32 %v13262_v54, %v8252_v52 }
 0xfb1   : > { %v8496_v20 = vpop.f32.mrf.mxu1 }
 0xfb2   : > { %v8535_v11 = vadd.f32 %v8496_v20, %v8251_v13 }
 0xfb3   : > { %v13265_v6 = vpop.f32.mrf.mxu1 }
 0xfb4   : > { %v8538_v51 = vadd.f32 %v13265_v6, %v8254_v26 }
 0xfb5   : > { %v8506_v34 = vpop.f32.mrf.mxu1 }
 0xfb6   : > { %v8537_v23 = vadd.f32 %v8506_v34, %v8253_v57 }
 0xfb7   : > { %v13268_v17 = vpop.f32.mrf.mxu1 }
 0xfb8   : > { %v8540_v15 = vadd.f32 %v13268_v17, %v8256_v18 }
 0xfb9   : > { %v8516_v53 = vpop.f32.mrf.mxu1 }
 0xfba   : > { %v8539_v49 = vadd.f32 %v8516_v53, %v8255_v35 }
 0xfbb   : > { %v13271_v58 = vpop.f32.mrf.mxu1 }
 0xfbc   : > { %v8542_v32 = vadd.f32 %v13271_v58, %v8258_v19 }
 0xfbd   : > { %v8526_v10 = vpop.f32.mrf.mxu1 }
 0xfbe   : > { %v19315_v16 = vadd.f32 %v8526_v10, %v8257_v8 }
 0xfbf   : > { %v13318_v0 = vpop.f32.mrf.mxu1 }
 0xfc0   : > { %v8820_v43 = vadd.f32 %v13318_v0, %v8536_v1 }
 0xfc1   : > { %v8780_v33 = vpop.f32.mrf.mxu1 }
 0xfc2   : > { %v8819_v44 = vadd.f32 %v8780_v33, %v8535_v11 }
 0xfc3   : > { %v13321_v4 = vpop.f32.mrf.mxu1 }
 0xfc4   : > { %v8822_v13 = vadd.f32 %v13321_v4, %v8538_v51 }
 0xfc5   : > { %v8790_v60 = vpop.f32.mrf.mxu1 }
 0xfc6   : > { %v8821_v62 = vadd.f32 %v8790_v60, %v8537_v23 }
 0xfc7   : > { %v13324_v5 = vpop.f32.mrf.mxu1 }
 0xfc8   : > { %v8824_v8 = vadd.f32 %v13324_v5, %v8540_v15 }
 0xfc9   : > { %v8800_v12 = vpop.f32.mrf.mxu1 }
 0xfca   : > { %v8823_v20 = vadd.f32 %v8800_v12, %v8539_v49 }
 0xfcb   : > { %v13327_v45 = vpop.f32.mrf.mxu1 }
 0xfcc   : > { %v8826_v34 = vadd.f32 %v13327_v45, %v8542_v32 }
 0xfcd   : > { %v8810_v27 = vpop.f32.mrf.mxu1 }
 0xfce   : > { %v8825_v4 = vadd.f32 %v8810_v27, %v19315_v16 }
 0xfcf   : > { %v13374_v25 = vpop.f32.mrf.mxu1 }
 0xfd0   : > { %v9104_v52 = vadd.f32 %v13374_v25, %v8820_v43 }
 0xfd1   : > { %v9064_v47 = vpop.f32.mrf.mxu1 }
 0xfd2   : > { %v9103_v48 = vadd.f32 %v9064_v47, %v8819_v44 }
 0xfd3   : > { %v13377_v46 = vpop.f32.mrf.mxu1 }
 0xfd4   : > { %v9106_v57 = vadd.f32 %v13377_v46, %v8822_v13 }
 0xfd5   : > { %v9074_v14 = vpop.f32.mrf.mxu1 }
 0xfd6   : > { %v9105_v54 = vadd.f32 %v9074_v14, %v8821_v62 }
 0xfd7   : > { %v13380_v22 = vpop.f32.mrf.mxu1 }
 0xfd8   : > { %v9108_v17 = vadd.f32 %v13380_v22, %v8824_v8 }
 0xfd9   : > { %v9084_v30 = vpop.f32.mrf.mxu1 }
 0xfda   : > { %v9107_v58 = vadd.f32 %v9084_v30, %v8823_v20 }
 0xfdb   : > { %v13383_v36 = vpop.f32.mrf.mxu1 }
 0xfdc   : > { %v9110_v15 = vadd.f32 %v13383_v36, %v8826_v34 }
 0xfdd   : > { %v9094_v7 = vpop.f32.mrf.mxu1 }
 0xfde   : > { %v9109_v45 = vadd.f32 %v9094_v7, %v8825_v4 }
 0xfdf   : > { %v13430_v39 = vpop.f32.mrf.mxu1 }
 0xfe0   : > { %v9388_v26 = vadd.f32 %v13430_v39, %v9104_v52 }
 0xfe1   : > { %v9348_v41 = vpop.f32.mrf.mxu1 }
 0xfe2   : > { %v9387_v42 = vadd.f32 %v9348_v41, %v9103_v48 }
 0xfe3   : > { %v13433_v55 = vpop.f32.mrf.mxu1 }
 0xfe4   : > { %v9390_v63 = vadd.f32 %v13433_v55, %v9106_v57 }
 0xfe5   : > { %v9358_v59 = vpop.f32.mrf.mxu1 }
 0xfe6   : > { %v9389_v53 = vadd.f32 %v9358_v59, %v9105_v54 }
 0xfe7   : > { %v13436_v56 = vpop.f32.mrf.mxu1 }
 0xfe8   : > { %v9392_v60 = vadd.f32 %v13436_v56, %v9108_v17 }
 0xfe9   : > { %v9368_v37 = vpop.f32.mrf.mxu1 }
 0xfea   : > { %v9391_v12 = vadd.f32 %v9368_v37, %v9107_v58 }
 0xfeb   : > { %v13439_v61 = vpop.f32.mrf.mxu1 }
 0xfec   : > { %v9394_v46 = vadd.f32 %v13439_v61, %v9110_v15 }
 0xfed   : > { %v9378_v2 = vpop.f32.mrf.mxu1 }
 0xfee   : > { %v9393_v59 = vadd.f32 %v9378_v2, %v9109_v45 }
 0xfef   : > { %v13486_v31 = vpop.f32.mrf.mxu1 }
 0xff0   : > { %v9672_v18 = vadd.f32 %v13486_v31, %v9388_v26 }
 0xff1   : > { %v9632_v40 = vpop.f32.mrf.mxu1 }
 0xff2   : > { %v9671_v19 = vadd.f32 %v9632_v40, %v9387_v42 }
 0xff3   : > { %v13489_v3 = vpop.f32.mrf.mxu1 }
 0xff4   : > { %v9674_v11 = vadd.f32 %v13489_v3, %v9390_v63 }
 0xff5   : > { %v9642_v24 = vpop.f32.mrf.mxu1 }
 0xff6   : > { %v9673_v5 = vadd.f32 %v9642_v24, %v9389_v53 }
 0xff7   : > { %v13492_v29 = vpop.f32.mrf.mxu1 }
 0xff8   : > { %v9676_v14 = vadd.f32 %v13492_v29, %v9392_v60 }
 0xff9   : > { %v9652_v21 = vpop.f32.mrf.mxu1 }
 0xffa   : > { %v9675_v39 = vadd.f32 %v9652_v21, %v9391_v12 }
 0xffb   : > { %v13495_v38 = vpop.f32.mrf.mxu1 }
 0xffc   : > { %v9678_v56 = vadd.f32 %v13495_v38, %v9394_v46 }
 0xffd   : > { %v9662_v9 = vpop.f32.mrf.mxu1 }
 0xffe   : > { %v9677_v7 = vadd.f32 %v9662_v9, %v9393_v59 }
 0xfff   : > { %v13542_v35 = vpop.f32.mrf.mxu1 }
0x1000   : > { %v9956_v28 = vadd.f32 %v13542_v35, %v9672_v18 }
0x1001   : > { %v9916_v1 = vpop.f32.mrf.mxu1 }
0x1002   : > { %v19320_v6 = vadd.f32 %v11331_v50, %v9956_v28  ;;  %v9955_v51 = vadd.f32 %v9916_v1, %v9671_v19 }
0x1003   : > { %v13545_v23 = vpop.f32.mrf.mxu1 }
0x1004   : > { %v9987_v10 = vmin.f32 %v19320_v6, 0.0  ;;  %v19323_v0 = vadd.f32 %v11331_v50, %v9955_v51  ;;  %v9958_v33 = vadd.f32 %v13545_v23, %v9674_v11  ;;  %vm9979_vm3 = vcmp.gt.f32.partialorder %v19320_v6, 0.0 }
0x1005   : > { %v9926_v49 = vpop.f32.mrf.mxu1 }
0x1006   : > { %v9996_v25 = vmul.f32 1.442695, %v9987_v10  ;;  %v9986_v47 = vmin.f32 %v19323_v0, 0.0  ;;  %v9973_v32 = vadd.f32 %v11331_v50, %v9958_v33  ;;  %v9957_v22 = vadd.f32 %v9926_v49, %v9673_v5 }
0x1007   : > { %v13548_v30 = vpop.f32.mrf.mxu1  ;;  %vm9978_vm4 = vcmp.gt.f32.partialorder %v19323_v0, 0.0 }
0x1008   : > { %13625 = vpow2.f32 %v9996_v25  ;;  %v9994_v41 = vmul.f32 1.442695, %v9986_v47  ;;  %v9989_v55 = vmin.f32 %v9973_v32, 0.0  ;;  %v9972_v16 = vadd.f32 %v11331_v50, %v9957_v22 }
0x1009   : > { %v9960_v27 = vadd.f32 %v13548_v30, %v9676_v14  ;;  %v9936_v36 = vpop.f32.mrf.mxu1  ;;  %vm9981_vm5 = vcmp.gt.f32.partialorder %v9973_v32, 0.0 }
0x100a   : > { %13627 = vpow2.f32 %v9994_v41  ;;  %v10000_v37 = vmul.f32 1.442695, %v9989_v55  ;;  %v9959_v31 = vadd.f32 %v9936_v36, %v9675_v39  ;;  %v9988_v40 = vmin.f32 %v9972_v16, 0.0 }
0x100b   : > { %v9975_v3 = vadd.f32 %v11331_v50, %v9960_v27  ;;  %v13551_v24 = vpop.f32.mrf.mxu1  ;;  %vm9980_vm6 = vcmp.gt.f32.partialorder %v9972_v16, 0.0 }
0x100c   : > { %13629 = vpow2.f32 %v10000_v37  ;;  %v9974_v61 = vadd.f32 %v11331_v50, %v9959_v31  ;;  %v9962_v29 = vadd.f32 %v13551_v24, %v9678_v56  ;;  %v9998_v43 = vmul.f32 1.442695, %v9988_v40 }
0x100d   : > { %v9991_v21 = vmin.f32 %v9975_v3, 0.0  ;;  %v9946_v44 = vpop.f32.mrf.mxu1  ;;  %vm9983_vm7 = vcmp.gt.f32.partialorder %v9975_v3, 0.0 }
0x100e   : > { %v9990_v52 = vmin.f32 %v9974_v61, 0.0  ;;  %v9977_v2 = vadd.f32 %v11331_v50, %v9962_v29  ;;  %v9961_v13 = vadd.f32 %v9946_v44, %v9677_v7  ;;  %13631 = vpow2.f32 %v9998_v43 }
0x100f   : > { %v10004_v48 = vmul.f32 1.442695, %v9991_v21  ;;  %vm9982_vm8 = vcmp.gt.f32.partialorder %v9974_v61, 0.0 }
0x1010   : > { %v10002_v38 = vmul.f32 1.442695, %v9990_v52  ;;  %v9993_v26 = vmin.f32 %v9977_v2, 0.0  ;;  %v9976_v57 = vadd.f32 %v11331_v50, %v9961_v13  ;;  %vm9985_vm9 = vcmp.gt.f32.partialorder %v9977_v2, 0.0 }
0x1011   : > { %13633 = vpow2.f32 %v10004_v48 }
0x1012   : > { %13635 = vpow2.f32 %v10002_v38  ;;  %v10008_v42 = vmul.f32 1.442695, %v9993_v26  ;;  %v9992_v18 = vmin.f32 %v9976_v57, 0.0  ;;  %vm9984_vm10 = vcmp.gt.f32.partialorder %v9976_v57, 0.0 }
0x1014   : > { %13637 = vpow2.f32 %v10008_v42  ;;  %v10006_v9 = vmul.f32 1.442695, %v9992_v18 }
0x1015   : > { %v13626_v62 = vpop.eup %13625 }
0x1016   : > { %v11333_v35 = vadd.f32 -1.0, %v13626_v62  ;;  %13639 = vpow2.f32 %v10006_v9 }
0x1017   : > { %v13628_v63 = vpop.eup %13627 }
0x1018   : > { %v10019_v50 = vsel %vm9979_vm3, %v19320_v6, %v11333_v35  ;;  %v11332_v19 = vadd.f32 -1.0, %v13628_v63 }
0x1019   : > { %v13630_v28 = vpop.eup %13629  ;;  %10027 = vst.msk [vmem:[%s19331_s29 + $0x8] sm:$0xff] %vm961_vm0, %v10019_v50 }
0x101a   : > { %v10018_v8 = vsel %vm9978_vm4, %v19323_v0, %v11332_v19  ;;  %v11335_v54 = vadd.f32 -1.0, %v13630_v28 }
0x101b   : > { %10026 = vst.msk [vmem:[%s19331_s29] sm:$0xff] %vm961_vm0, %v10018_v8  ;;  %v13632_v1 = vpop.eup %13631 }
0x101c   : > { %v10021_v20 = vsel %vm9981_vm5, %v9973_v32, %v11335_v54  ;;  %v11334_v11 = vadd.f32 -1.0, %v13632_v1 }
0x101d   : > { %10029 = vst.msk [vmem:[%s19331_s29 + $0x18] sm:$0xff] %vm961_vm0, %v10021_v20 }
0x101e   : > { %v13634_v6 = vpop.eup %13633  ;;  %v10020_v34 = vsel %vm9980_vm6, %v9972_v16, %v11334_v11 }
0x101f   : > { %v13636_v51 = vpop.eup %13635  ;;  %v11337_v17 = vadd.f32 -1.0, %v13634_v6  ;;  %10028 = vst.msk [vmem:[%s19331_s29 + $0x10] sm:$0xff] %vm961_vm0, %v10020_v34 }
0x1020   : > { %v11336_v53 = vadd.f32 -1.0, %v13636_v51 }
0x1021   : > { %v13638_v23 = vpop.eup %13637  ;;  %v10023_v58 = vsel %vm9983_vm7, %v9975_v3, %v11337_v17 }
0x1022   : > { %10031 = vst.msk [vmem:[%s19331_s29 + $0x28] sm:$0xff] %vm961_vm0, %v10023_v58  ;;  %v10022_v10 = vsel %vm9982_vm8, %v9974_v61, %v11336_v53  ;;  %v11339_v0 = vadd.f32 -1.0, %v13638_v23 }
0x1023   : > { %v13640_v33 = vpop.eup %13639  ;;  %10030 = vst.msk [vmem:[%s19331_s29 + $0x20] sm:$0xff] %vm961_vm0, %v10022_v10 }
0x1024   : > { %v10025_v4 = vsel %vm9985_vm9, %v9977_v2, %v11339_v0  ;;  %v11338_v15 = vadd.f32 -1.0, %v13640_v33 }
0x1025   : > { %10033 = vst.msk [vmem:[%s19331_s29 + $0x38] sm:$0xff] %vm961_vm0, %v10025_v4 }
0x1026   : > { %v10024_v60 = vsel %vm9984_vm10, %v9976_v57, %v11338_v15 }
0x1027   : > { %10032 = vst.msk [vmem:[%s19331_s29 + $0x30] sm:$0xff] %vm961_vm0, %v10024_v60 }
0x1028 PF: > { %s19_s30 = sadd.s32 1, %s13743_s30  }
0x1029   : > { %p16_p4 = scmp.ge.s32.totalorder %s19_s30, 4  }
0x102b   :  { %18 = sbr.rel (!%p16_p4) target bundleno = 1 (0x1), region = 122 }

</bundles_post_ra>
